<compile_context>
chip_gen: v7x
topology: tpu7x:2x2x1
jax: 0.10.0
libtpu: 0.0.40
codegen_flags: <defaults>
</compile_context>

<pallas_src>
import jax
import jax.numpy as jnp
from jax import lax
from jax.experimental import pallas as pl
from jax.experimental.pallas import tpu as pltpu


def make_dphysics(cfg, robot_points, mask_left, mask_right, robot_I_inv,
                  *, t_chunk=8, mxu_dtype=jnp.bfloat16):
    D_MAX = float(cfg["d_max"])
    GRID_RES = float(cfg["grid_res"])
    DT = float(cfg["dt"])
    T_SIM = float(cfg["traj_sim_time"])
    MASS = float(cfg["robot_mass"])
    K_STIFF = float(cfg["k_stiffness"])
    K_DAMP = float(cfg["k_damping"])
    K_FRIC = float(cfg["k_friction"])
    GRAV = float(cfg["gravity"])
    EPS = 1e-6
    INV_RES = 1.0 / GRID_RES
    INV_MASS = 1.0 / MASS

    f32 = jnp.float32

    # Inertia inverse baked in as compile-time scalars (off the per-step path).
    _iinv = jnp.asarray(robot_I_inv, f32).reshape(-1)
    I00, I01, I02, I10, I11, I12, I20, I21, I22 = [float(v) for v in _iinv]

    Np_real = int(robot_points.shape[0])
    NP_PAD = max(128, ((Np_real + 127) // 128) * 128)   # lane-dense point dimension

    def kernel(ctrl_ref, z_ref, wred_ref, valid_ref, xp0_ref,
               small_out, xp_out, fs_out, ff_out,
               rb_sc, pts_sc):
        z_grid = z_ref[...]                       # (B, Hg, Wg) torch-style transposed
        Wred = wred_ref[...]                      # (Np, 4) reduction weights
        valid = valid_ref[...]                    # (1, Np) real-point mask
        B, Hg, Wg = z_grid.shape
        Np = valid.shape[1]
        steps_per_chunk = ctrl_ref.shape[0]

        # hoisted: MXU operand for the gather einsum (once per chunk, not per step)
        z_mxu = z_grid.astype(mxu_dtype)

        # loop-invariant iotas for the one-hot bilinear gather
        iota_h = lax.broadcasted_iota(jnp.int32, (B, Np, Hg), 2)
        iota_w = lax.broadcasted_iota(jnp.int32, (B, Np, Wg), 2)

        # ---- chunk-0 initialization of the persistent state scratch --------------
        @pl.when(pl.program_id(0) == 0)
        def _init():
            zb = jnp.zeros((B, 1), f32)
            ob = jnp.ones((B, 1), f32)
            rb_sc[...] = jnp.concatenate(
                [zb, zb, jnp.full((B, 1), 0.2, f32),        # x
                 zb, zb, zb,                                # xd
                 zb, zb, zb,                                # omega
                 ob, zb, zb, zb, ob, zb, zb, zb, ob],       # R (row-major)
                axis=1)
            pts_sc[...] = jnp.concatenate(
                [xp0_ref[...], jnp.zeros((3 * B, Np), f32)], axis=0)   # pos | vel

        # ---- load carried state (scratch -> vregs) --------------------------------
        rb = rb_sc[...]
        pts = pts_sc[...]
        carry0 = tuple(rb[:, c:c + 1] for c in range(18)) + tuple(
            pts[k * B:(k + 1) * B, :] for k in range(6))

        def step(t, carry):
            (x_x, x_y, x_z, xd_x, xd_y, xd_z, om_x, om_y, om_z,
             r00, r01, r02, r10, r11, r12, r20, r21, r22,
             px, py, pz, vx, vy, vz) = carry

            u = ctrl_ref[t]                        # (B, 2)
            u_l = u[:, 0:1]
            u_r = u[:, 1:2]

            # ---- bilinear height interpolation (folded one-hot weights -> MXU) ----
            gx = (px + D_MAX) * INV_RES
            gy = (py + D_MAX) * INV_RES
            xi = jnp.clip(gx.astype(jnp.int32), 0, Wg - 2)
            yi = jnp.clip(gy.astype(jnp.int32), 0, Hg - 2)
            xf = gx - xi.astype(f32)
            yf = gy - yi.astype(f32)

            # row (y) weights, consumed by the einsum before the column weights exist
            yi3 = yi[:, :, None]
            yf3 = yf[:, :, None]
            oy0 = (iota_h == yi3).astype(f32)
            oy1 = (iota_h == yi3 + 1).astype(f32)
            Wyd = oy1 - oy0                                  # d/dy row selector
            Wy = oy0 + yf3 * Wyd                             # (1-yf)*oy0 + yf*oy1
            Wcat = jnp.concatenate([Wy, Wyd], axis=1).astype(mxu_dtype)   # (B,2Np,Hg)
            zr = jnp.einsum('bph,bhw->bpw', Wcat, z_mxu,
                            preferred_element_type=f32)
            zry = zr[:, :Np]                                 # sum_h Wy  * z
            zryd = zr[:, Np:]                                # sum_h Wyd * z

            # column (x) weights, built after the einsum (shorter live ranges)
            xi3 = xi[:, :, None]
            xf3 = xf[:, :, None]
            ox0 = (iota_w == xi3).astype(f32)
            ox1 = (iota_w == xi3 + 1).astype(f32)
            Wxd = ox1 - ox0
            Wx = ox0 + xf3 * Wxd

            z_pts = jnp.sum(zry * Wx, axis=-1)
            dz_dx = jnp.sum(zry * Wxd, axis=-1)
            dz_dy = jnp.sum(zryd * Wx, axis=-1)

            inv_nn = lax.rsqrt(dz_dx * dz_dx + dz_dy * dz_dy + 1.0)   # arg >= 1
            nx = -dz_dx * inv_nn
            ny = -dz_dy * inv_nn
            nz = inv_nn

            # ---- contact + friction forces ----------------------------------------
            dh = pz - z_pts
            on_grid = ((px >= -D_MAX) & (px <= D_MAX)
                       & (py >= -D_MAX) & (py <= D_MAX))
            in_contact = ((dh <= 0.0) & on_grid).astype(f32) * valid

            vdot_n = vx * nx + vy * ny + vz * nz
            smag = -(K_STIFF * dh + K_DAMP * vdot_n) * in_contact
            Fsx = smag * nx
            Fsy = smag * ny
            Fsz = smag * nz
            Nrm = jnp.sqrt(Fsx * Fsx + Fsy * Fsy + Fsz * Fsz)

            tx = vx - vdot_n * nx
            ty = vy - vdot_n * ny
            tz = vz - vdot_n * nz
            inv_tau = pl.reciprocal(jnp.sqrt(tx * tx + ty * ty + tz * tz) + EPS,
                                    approx=True)
            Ffx = -K_FRIC * Nrm * tx * inv_tau
            Ffy = -K_FRIC * Nrm * ty * inv_tau
            Ffz = -K_FRIC * Nrm * tz * inv_tau

            Fx = Fsx + Ffx
            Fy = Fsy + Ffy
            Fz = Fsz + Ffz

            rx = px - x_x
            ry = py - x_y
            rz = pz - x_z
            tcx = ry * Fz - rz * Fy
            tcy = rz * Fx - rx * Fz
            tcz = rx * Fy - ry * Fx

            # ---- ALL point reductions fused into one MXU matmul --------------------
            # rows: [px,py,pz,vx,vy,vz,in_contact,Nrm,Fx,Fy,Fz,tcx,tcy,tcz] x (B each)
            Pcat = jnp.concatenate(
                [px, py, pz, vx, vy, vz, in_contact, Nrm,
                 Fx, Fy, Fz, tcx, tcy, tcz], axis=0)                  # (14B, Np)
            red = jnp.dot(Pcat, Wred, preferred_element_type=f32)     # (14B, 4)

            def rc(q, c):                                             # (B,1) slice
                return red[q * B:(q + 1) * B, c:c + 1]

            xl_x, xl_y, xl_z = rc(0, 0), rc(1, 0), rc(2, 0)
            xr_x, xr_y, xr_z = rc(0, 1), rc(1, 1), rc(2, 1)
            vl_x, vl_y, vl_z = rc(3, 0), rc(4, 0), rc(5, 0)
            vr_x, vr_y, vr_z = rc(3, 1), rc(4, 1), rc(5, 1)
            contact_l = rc(6, 0)
            contact_r = rc(6, 1)
            N_mean = rc(7, 2)
            Fm_x, Fm_y, Fm_z = rc(8, 2), rc(9, 2), rc(10, 2)
            tqs_x, tqs_y, tqs_z = rc(11, 3), rc(12, 3), rc(13, 3)

            # ---- thrust -------------------------------------------------------------
            inv_td = pl.reciprocal(
                jnp.sqrt(r00 * r00 + r10 * r10 + r20 * r20) + EPS, approx=True)
            tdx = r00 * inv_td
            tdy = r10 * inv_td
            tdz = r20 * inv_td

            v_l = vl_x * tdx + vl_y * tdy + vl_z * tdz
            v_r = vr_x * tdx + vr_y * tdy + vr_z * tdz
            s_l = N_mean * (u_l - v_l) * contact_l
            s_r = N_mean * (u_r - v_r) * contact_r
            Ftl_x, Ftl_y, Ftl_z = s_l * tdx, s_l * tdy, s_l * tdz
            Ftr_x, Ftr_y, Ftr_z = s_r * tdx, s_r * tdy, s_r * tdz

            # ---- torques, angular / linear acceleration -----------------------------
            al_x, al_y, al_z = xl_x - x_x, xl_y - x_y, xl_z - x_z
            ar_x, ar_y, ar_z = xr_x - x_x, xr_y - x_y, xr_z - x_z
            tq_x = tqs_x + (al_y * Ftl_z - al_z * Ftl_y) + (ar_y * Ftr_z - ar_z * Ftr_y)
            tq_y = tqs_y + (al_z * Ftl_x - al_x * Ftl_z) + (ar_z * Ftr_x - ar_x * Ftr_z)
            tq_z = tqs_z + (al_x * Ftl_y - al_y * Ftl_x) + (ar_x * Ftr_y - ar_y * Ftr_x)

            omd_x = tq_x * I00 + tq_y * I01 + tq_z * I02
            omd_y = tq_x * I10 + tq_y * I11 + tq_z * I12
            omd_z = tq_x * I20 + tq_y * I21 + tq_z * I22

            xdd_x = (Fm_x + Ftl_x + Ftr_x) * INV_MASS
            xdd_y = (Fm_y + Ftl_y + Ftr_y) * INV_MASS
            xdd_z = (-MASS * GRAV + Fm_z + Ftl_z + Ftr_z) * INV_MASS

            # new point velocities from the OLD rigid-body state (pad points pinned)
            vpx = (xd_x + (om_y * rz - om_z * ry)) * valid
            vpy = (xd_y + (om_z * rx - om_x * rz)) * valid
            vpz = (xd_z + (om_x * ry - om_y * rx)) * valid

            # ---- RK4 integration (constant derivative, as in the reference) ---------
            def integ(a, v):
                k1 = DT * v
                k2 = DT * (v + 0.5 * k1)
                k3 = DT * (v + 0.5 * k2)
                k4 = DT * (v + k3)
                return a + (k1 + 2.0 * k2 + 2.0 * k3 + k4) / 6.0

            xd_nx, xd_ny, xd_nz = integ(xd_x, xdd_x), integ(xd_y, xdd_y), integ(xd_z, xdd_z)
            x_nx, x_ny, x_nz = integ(x_x, xd_nx), integ(x_y, xd_ny), integ(x_z, xd_nz)
            px_n, py_n, pz_n = integ(px, vpx), integ(py, vpy), integ(pz, vpz)
            om_nx, om_ny, om_nz = integ(om_x, omd_x), integ(om_y, omd_y), integ(om_z, omd_z)

            # ---- Rodrigues rotation update (explicit 3x3 FMAs) -----------------------
            om_norm = jnp.sqrt(om_nx * om_nx + om_ny * om_ny + om_nz * om_nz)
            theta = om_norm * DT
            inv_o = pl.reciprocal(om_norm + EPS, approx=True)
            kx, ky, kz = om_nx * inv_o, om_ny * inv_o, om_nz * inv_o
            s = jnp.sin(theta)
            c1 = 1.0 - jnp.cos(theta)
            A00 = 1.0 - (ky * ky + kz * kz) * c1
            A01 = -kz * s + kx * ky * c1
            A02 = ky * s + kx * kz * c1
            A10 = kz * s + kx * ky * c1
            A11 = 1.0 - (kx * kx + kz * kz) * c1
            A12 = -kx * s + ky * kz * c1
            A20 = -ky * s + kx * kz * c1
            A21 = kx * s + ky * kz * c1
            A22 = 1.0 - (kx * kx + ky * ky) * c1

            n00 = r00 * A00 + r01 * A10 + r02 * A20
            n01 = r00 * A01 + r01 * A11 + r02 * A21
            n02 = r00 * A02 + r01 * A12 + r02 * A22
            n10 = r10 * A00 + r11 * A10 + r12 * A20
            n11 = r10 * A01 + r11 * A11 + r12 * A21
            n12 = r10 * A02 + r11 * A12 + r12 * A22
            n20 = r20 * A00 + r21 * A10 + r22 * A20
            n21 = r20 * A01 + r21 * A11 + r22 * A21
            n22 = r20 * A02 + r21 * A12 + r22 * A22

            # ---- per-step outputs (coalesced, sublane-dense stores) -------------------
            small = jnp.concatenate(
                [x_nx, x_ny, x_nz, xd_nx, xd_ny, xd_nz,
                 n00, n01, n02, n10, n11, n12, n20, n21, n22,
                 om_nx, om_ny, om_nz,
                 Ftl_x, Ftl_y, Ftl_z, Ftr_x, Ftr_y, Ftr_z], axis=1)      # (B, 24)
            small_out[t] = small
            xp_out[t] = jnp.concatenate([px_n, py_n, pz_n], axis=0)      # (3B, Np)
            fs_out[t] = jnp.concatenate([Fsx, Fsy, Fsz], axis=0)
            ff_out[t] = jnp.concatenate([Ffx, Ffy, Ffz], axis=0)

            return (x_nx, x_ny, x_nz, xd_nx, xd_ny, xd_nz, om_nx, om_ny, om_nz,
                    n00, n01, n02, n10, n11, n12, n20, n21, n22,
                    px_n, py_n, pz_n, vpx, vpy, vpz)

        carry = lax.fori_loop(0, steps_per_chunk, step, carry0)

        # ---- write carried state back for the next chunk ---------------------------
        rb_sc[...] = jnp.concatenate(carry[:18], axis=1)
        pts_sc[...] = jnp.concatenate(carry[18:], axis=0)

    def forward(z_grid, controls):
        B, H, W = z_grid.shape
        N_ts = min(int(T_SIM / DT), int(controls.shape[1]))
        n_chunks = max(1, -(-N_ts // t_chunk))
        N_ts_pad = n_chunks * t_chunk
        pad_n = NP_PAD - Np_real

        # glue matching the torch wrapper: z_grid.transpose(1,2); time-major controls
        z_t = jnp.transpose(z_grid, (0, 2, 1)).astype(f32)                 # (B, Hg, Wg)
        Hg, Wg = z_t.shape[1], z_t.shape[2]
        ctrl_t = jnp.transpose(controls[:, :N_ts].astype(f32), (1, 0, 2))  # (N_ts, B, 2)
        if N_ts_pad > N_ts:
            ctrl_t = jnp.concatenate(
                [ctrl_t, jnp.zeros((N_ts_pad - N_ts, B, 2), f32)], axis=0)

        # pad the point cloud to a lane-dense multiple of 128; pads parked off-grid
        rp = jnp.asarray(robot_points, f32)
        ml = jnp.asarray(mask_left, f32)
        mr = jnp.asarray(mask_right, f32)
        valid = jnp.ones((Np_real,), f32)
        if pad_n > 0:
            pad_pts = jnp.concatenate(
                [jnp.full((pad_n, 2), 3.0 * D_MAX, f32), jnp.zeros((pad_n, 1), f32)],
                axis=1)
            rp = jnp.concatenate([rp, pad_pts], axis=0)
            ml = jnp.concatenate([ml, jnp.zeros((pad_n,), f32)])
            mr = jnp.concatenate([mr, jnp.zeros((pad_n,), f32)])
            valid = jnp.concatenate([valid, jnp.zeros((pad_n,), f32)])

        cnt_l = jnp.maximum(jnp.sum(ml), 1.0)
        cnt_r = jnp.maximum(jnp.sum(mr), 1.0)
        # reduction columns: [left mean, right mean, all-real mean, all-real sum]
        Wred = jnp.stack([ml / cnt_l, mr / cnt_r, valid / float(Np_real), valid], axis=1)
        valid_2d = valid[None, :]                                          # (1, NP_PAD)

        # initial points (R0 = I, x0 = [0, 0, 0.2]) packed SoA as (3B, NP_PAD)
        xp0 = jnp.broadcast_to(
            (rp + jnp.array([0.0, 0.0, 0.2], f32)).T[:, None, :],
            (3, B, NP_PAD)).reshape(3 * B, NP_PAD)

        out_shape = (
            jax.ShapeDtypeStruct((N_ts_pad, B, 24), f32),           # x|xd|R|omega|Ftl|Ftr
            jax.ShapeDtypeStruct((N_ts_pad, 3 * B, NP_PAD), f32),   # X_points
            jax.ShapeDtypeStruct((N_ts_pad, 3 * B, NP_PAD), f32),   # F_springs
            jax.ShapeDtypeStruct((N_ts_pad, 3 * B, NP_PAD), f32),   # F_frictions
        )

        grid_spec = pltpu.PrefetchScalarGridSpec(
            num_scalar_prefetch=0,
            grid=(n_chunks,),
            in_specs=[
                pl.BlockSpec((t_chunk, B, 2), lambda c: (c, 0, 0)),        # controls chunk
                pl.BlockSpec((B, Hg, Wg), lambda c: (0, 0, 0)),            # z_grid (resident)
                pl.BlockSpec((NP_PAD, 4), lambda c: (0, 0)),               # reduction weights
                pl.BlockSpec((1, NP_PAD), lambda c: (0, 0)),               # real-point mask
                pl.BlockSpec((3 * B, NP_PAD), lambda c: (0, 0)),           # x_points0 (SoA)
            ],
            out_specs=[
                pl.BlockSpec((t_chunk, B, 24), lambda c: (c, 0, 0)),
                pl.BlockSpec((t_chunk, 3 * B, NP_PAD), lambda c: (c, 0, 0)),
                pl.BlockSpec((t_chunk, 3 * B, NP_PAD), lambda c: (c, 0, 0)),
                pl.BlockSpec((t_chunk, 3 * B, NP_PAD), lambda c: (c, 0, 0)),
            ],
            scratch_shapes=[
                pltpu.VMEM((B, 18), f32),               # rigid-body state carry
                pltpu.VMEM((6 * B, NP_PAD), f32),       # point positions + velocities carry
            ],
        )

        small, xp, fs, ff = pl.pallas_call(
            kernel,
            out_shape=out_shape,
            grid_spec=grid_spec,
            compiler_params=pltpu.CompilerParams(
                dimension_semantics=("arbitrary",),
                vmem_limit_bytes=48 * 1024 * 1024),
        )(ctrl_t, z_t, Wred, valid_2d, xp0)

        sb = jnp.transpose(small[:N_ts], (1, 0, 2))            # (B, N_ts, 24)
        Xs = sb[..., 0:3]
        Xds = sb[..., 3:6]
        Rs = sb[..., 6:15].reshape(B, N_ts, 3, 3)
        Omegas = sb[..., 15:18]
        F_thrusts_left = sb[..., 18:21]
        F_thrusts_right = sb[..., 21:24]

        def unpack_points(a):                                   # (N_ts_pad, 3B, NP_PAD)
            a = a[:N_ts].reshape(N_ts, 3, B, NP_PAD)
            return jnp.transpose(a, (2, 0, 3, 1))[:, :, :Np_real, :]   # (B, N_ts, Np, 3)

        X_points = unpack_points(xp)
        F_springs = unpack_points(fs)
        F_frictions = unpack_points(ff)

        States = (Xs, Xds, Rs, Omegas, X_points)
        Forces = (F_springs, F_frictions, F_thrusts_left, F_thrusts_right)
        return States, Forces

    return forward


if __name__ == "__main__":
    key = jax.random.PRNGKey(0)
    B, H, W = 2, 16, 16
    N_ctrl = 20

    # deterministic synthetic DPhysConfig
    cfg = dict(grid_res=0.1, d_max=0.8, dt=0.01, traj_sim_time=1.0,
               robot_mass=10.0, k_stiffness=100.0, k_damping=20.0,
               k_friction=0.5, gravity=9.81)

    # robot contact points: 4 (y) x 8 (x) grid, z = 0 -> 32 points
    xs_ = jnp.linspace(-0.25, 0.25, 8, dtype=jnp.float32)
    ys_ = jnp.array([-0.15, -0.05, 0.05, 0.15], jnp.float32)
    gx_, gy_ = jnp.meshgrid(xs_, ys_, indexing="xy")
    robot_points = jnp.stack(
        [gx_.ravel(), gy_.ravel(), jnp.zeros(gx_.size, jnp.float32)], axis=-1)  # (32, 3)
    mask_left = robot_points[:, 1] > 0.0     # left track
    mask_right = robot_points[:, 1] < 0.0    # right track

    robot_I = jnp.diag(jnp.array([0.5, 1.0, 1.5], jnp.float32))
    robot_I_inv = jnp.linalg.inv(robot_I)

    k1, k2 = jax.random.split(key)
    z_grid = 0.05 * jax.random.normal(k1, (B, H, W), jnp.float32)
    controls = jax.random.uniform(k2, (B, N_ctrl, 2), jnp.float32, minval=0.0, maxval=1.0)

    forward = make_dphysics(cfg, robot_points, mask_left, mask_right, robot_I_inv)
    States, Forces = forward(z_grid, controls)
    jax.block_until_ready(States)
    jax.block_until_ready(Forces)

    Xs, Xds, Rs, Omegas, X_points = States
    F_springs, F_frictions, F_tl, F_tr = Forces
    N_ts = min(int(cfg["traj_sim_time"] / cfg["dt"]), N_ctrl)
    Np = robot_points.shape[0]
    assert Xs.shape == (B, N_ts, 3)
    assert Xds.shape == (B, N_ts, 3)
    assert Rs.shape == (B, N_ts, 3, 3)
    assert Omegas.shape == (B, N_ts, 3)
    assert X_points.shape == (B, N_ts, Np, 3)
    assert F_springs.shape == (B, N_ts, Np, 3)
    assert F_frictions.shape == (B, N_ts, Np, 3)
    assert F_tl.shape == (B, N_ts, 3)
    assert F_tr.shape == (B, N_ts, 3)
    assert bool(jnp.all(jnp.isfinite(Xs))) and bool(jnp.all(jnp.isfinite(F_springs)))
    assert bool(jnp.all(jnp.isfinite(Rs))) and bool(jnp.all(jnp.isfinite(F_frictions)))
    print("KERNEL_OK")
</pallas_src>

<mosaic_0001>
module attributes {stable_mosaic.version = 11 : i64} {
  func.func @kernel(%arg0: i32, %arg1: memref<8x2x2xf32, #tpu.memory_space<vmem>>, %arg2: memref<2x16x16xf32, #tpu.memory_space<vmem>>, %arg3: memref<128x4xf32, #tpu.memory_space<vmem>>, %arg4: memref<1x128xf32, #tpu.memory_space<vmem>>, %arg5: memref<6x128xf32, #tpu.memory_space<vmem>>, %arg6: memref<8x2x24xf32, #tpu.memory_space<vmem>>, %arg7: memref<8x6x128xf32, #tpu.memory_space<vmem>>, %arg8: memref<8x6x128xf32, #tpu.memory_space<vmem>>, %arg9: memref<8x6x128xf32, #tpu.memory_space<vmem>>, %arg10: memref<2x18xf32, #tpu.memory_space<vmem>>, %arg11: memref<12x128xf32, #tpu.memory_space<vmem>>) attributes {dimension_semantics = [#tpu.dimension_semantics<arbitrary>], iteration_bounds = array<i64: 3>, scalar_prefetch = 0 : i64, scratch_operands = 2 : i64, tpu.core_type = #tpu.core_type<tc>, window_params = [{transform_indices = @transform_0, window_bounds = array<i64: 8, 2, 2>}, {pipeline_mode = #tpu.pipeline_mode<synchronous>, transform_indices = @transform_1, window_bounds = array<i64: 2, 16, 16>}, {pipeline_mode = #tpu.pipeline_mode<synchronous>, transform_indices = @transform_2, window_bounds = array<i64: 128, 4>}, {pipeline_mode = #tpu.pipeline_mode<synchronous>, transform_indices = @transform_3, window_bounds = array<i64: 1, 128>}, {pipeline_mode = #tpu.pipeline_mode<synchronous>, transform_indices = @transform_4, window_bounds = array<i64: 6, 128>}, {transform_indices = @transform_5, window_bounds = array<i64: 8, 2, 24>}, {transform_indices = @transform_6, window_bounds = array<i64: 8, 6, 128>}, {transform_indices = @transform_7, window_bounds = array<i64: 8, 6, 128>}, {transform_indices = @transform_8, window_bounds = array<i64: 8, 6, 128>}]} {
    %c0 = arith.constant 0 : index
    %c0_0 = arith.constant 0 : index
    %c0_1 = arith.constant 0 : index
    %0 = vector.load %arg2[%c0, %c0_0, %c0_1] : memref<2x16x16xf32, #tpu.memory_space<vmem>>, vector<2x16x16xf32>
    %c0_2 = arith.constant 0 : index
    %c0_3 = arith.constant 0 : index
    %1 = vector.load %arg3[%c0_2, %c0_3] : memref<128x4xf32, #tpu.memory_space<vmem>>, vector<128x4xf32>
    %c0_4 = arith.constant 0 : index
    %c0_5 = arith.constant 0 : index
    %2 = vector.load %arg4[%c0_4, %c0_5] : memref<1x128xf32, #tpu.memory_space<vmem>>, vector<1x128xf32>
    %3 = arith.truncf %0 : vector<2x16x16xf32> to vector<2x16x16xbf16>
    %4 = tpu.iota {dimensions = array<i32: 2>} : vector<2x128x16xi32>
    %5 = tpu.iota {dimensions = array<i32: 2>} : vector<2x128x16xi32>
    %c0_i32 = arith.constant 0 : i32
    %6 = arith.cmpi eq, %arg0, %c0_i32 : i32
    %7 = arith.extui %6 : i1 to i32
    %c0_i32_6 = arith.constant 0 : i32
    %8 = arith.cmpi ne, %7, %c0_i32_6 : i32
    scf.if %8 {
      %cst = arith.constant 0.000000e+00 : f32
      %43 = vector.broadcast %cst : f32 to vector<2x1xf32>
      %cst_17 = arith.constant 1.000000e+00 : f32
      %44 = vector.broadcast %cst_17 : f32 to vector<2x1xf32>
      %cst_18 = arith.constant 2.000000e-01 : f32
      %45 = vector.broadcast %cst_18 : f32 to vector<2x1xf32>
      %46 = tpu.concatenate %43, %43, %45, %43, %43, %43, %43, %43, %43, %44, %43, %43, %43, %44, %43, %43 in 1 : vector<2x1xf32>, vector<2x1xf32>, vector<2x1xf32>, vector<2x1xf32>, vector<2x1xf32>, vector<2x1xf32>, vector<2x1xf32>, vector<2x1xf32>, vector<2x1xf32>, vector<2x1xf32>, vector<2x1xf32>, vector<2x1xf32>, vector<2x1xf32>, vector<2x1xf32>, vector<2x1xf32>, vector<2x1xf32> -> vector<2x16xf32>
      %47 = tpu.concatenate %43, %44 in 1 : vector<2x1xf32>, vector<2x1xf32> -> vector<2x2xf32>
      %48 = tpu.concatenate %46, %47 in 1 : vector<2x16xf32>, vector<2x2xf32> -> vector<2x18xf32>
      %c0_19 = arith.constant 0 : index
      %c0_20 = arith.constant 0 : index
      %49 = vector.load %arg10[%c0_19, %c0_20] : memref<2x18xf32, #tpu.memory_space<vmem>>, vector<2x18xf32>
      tpu.vector_store %arg10[%c0_19, %c0_20], %48 {strides = array<i32>} : memref<2x18xf32, #tpu.memory_space<vmem>>, vector<2x18xf32>,
      %c0_21 = arith.constant 0 : index
      %c0_22 = arith.constant 0 : index
      %50 = vector.load %arg5[%c0_21, %c0_22] : memref<6x128xf32, #tpu.memory_space<vmem>>, vector<6x128xf32>
      %cst_23 = arith.constant 0.000000e+00 : f32
      %51 = vector.broadcast %cst_23 : f32 to vector<6x128xf32>
      %52 = tpu.concatenate %50, %51 in 0 : vector<6x128xf32>, vector<6x128xf32> -> vector<12x128xf32>
      %c0_24 = arith.constant 0 : index
      %c0_25 = arith.constant 0 : index
      %53 = vector.load %arg11[%c0_24, %c0_25] : memref<12x128xf32, #tpu.memory_space<vmem>>, vector<12x128xf32>
      tpu.vector_store %arg11[%c0_24, %c0_25], %52 {strides = array<i32>} : memref<12x128xf32, #tpu.memory_space<vmem>>, vector<12x128xf32>,
    } else {
    }
    %c0_7 = arith.constant 0 : index
    %c0_8 = arith.constant 0 : index
    %9 = vector.load %arg10[%c0_7, %c0_8] : memref<2x18xf32, #tpu.memory_space<vmem>>, vector<2x18xf32>
    %c0_9 = arith.constant 0 : index
    %c0_10 = arith.constant 0 : index
    %10 = vector.load %arg11[%c0_9, %c0_10] : memref<12x128xf32, #tpu.memory_space<vmem>>, vector<12x128xf32>
    %11 = vector.extract_strided_slice %9 {offsets = [0, 0], sizes = [2, 1], strides = [1, 1]} : vector<2x18xf32> to vector<2x1xf32>
    %12 = vector.extract_strided_slice %9 {offsets = [0, 1], sizes = [2, 1], strides = [1, 1]} : vector<2x18xf32> to vector<2x1xf32>
    %13 = vector.extract_strided_slice %9 {offsets = [0, 2], sizes = [2, 1], strides = [1, 1]} : vector<2x18xf32> to vector<2x1xf32>
    %14 = vector.extract_strided_slice %9 {offsets = [0, 3], sizes = [2, 1], strides = [1, 1]} : vector<2x18xf32> to vector<2x1xf32>
    %15 = vector.extract_strided_slice %9 {offsets = [0, 4], sizes = [2, 1], strides = [1, 1]} : vector<2x18xf32> to vector<2x1xf32>
    %16 = vector.extract_strided_slice %9 {offsets = [0, 5], sizes = [2, 1], strides = [1, 1]} : vector<2x18xf32> to vector<2x1xf32>
    %17 = vector.extract_strided_slice %9 {offsets = [0, 6], sizes = [2, 1], strides = [1, 1]} : vector<2x18xf32> to vector<2x1xf32>
    %18 = vector.extract_strided_slice %9 {offsets = [0, 7], sizes = [2, 1], strides = [1, 1]} : vector<2x18xf32> to vector<2x1xf32>
    %19 = vector.extract_strided_slice %9 {offsets = [0, 8], sizes = [2, 1], strides = [1, 1]} : vector<2x18xf32> to vector<2x1xf32>
    %20 = vector.extract_strided_slice %9 {offsets = [0, 9], sizes = [2, 1], strides = [1, 1]} : vector<2x18xf32> to vector<2x1xf32>
    %21 = vector.extract_strided_slice %9 {offsets = [0, 10], sizes = [2, 1], strides = [1, 1]} : vector<2x18xf32> to vector<2x1xf32>
    %22 = vector.extract_strided_slice %9 {offsets = [0, 11], sizes = [2, 1], strides = [1, 1]} : vector<2x18xf32> to vector<2x1xf32>
    %23 = vector.extract_strided_slice %9 {offsets = [0, 12], sizes = [2, 1], strides = [1, 1]} : vector<2x18xf32> to vector<2x1xf32>
    %24 = vector.extract_strided_slice %9 {offsets = [0, 13], sizes = [2, 1], strides = [1, 1]} : vector<2x18xf32> to vector<2x1xf32>
    %25 = vector.extract_strided_slice %9 {offsets = [0, 14], sizes = [2, 1], strides = [1, 1]} : vector<2x18xf32> to vector<2x1xf32>
    %26 = vector.extract_strided_slice %9 {offsets = [0, 15], sizes = [2, 1], strides = [1, 1]} : vector<2x18xf32> to vector<2x1xf32>
    %27 = vector.extract_strided_slice %9 {offsets = [0, 16], sizes = [2, 1], strides = [1, 1]} : vector<2x18xf32> to vector<2x1xf32>
    %28 = vector.extract_strided_slice %9 {offsets = [0, 17], sizes = [2, 1], strides = [1, 1]} : vector<2x18xf32> to vector<2x1xf32>
    %29 = vector.extract_strided_slice %10 {offsets = [0, 0], sizes = [2, 128], strides = [1, 1]} : vector<12x128xf32> to vector<2x128xf32>
    %30 = vector.extract_strided_slice %10 {offsets = [2, 0], sizes = [2, 128], strides = [1, 1]} : vector<12x128xf32> to vector<2x128xf32>
    %31 = vector.extract_strided_slice %10 {offsets = [4, 0], sizes = [2, 128], strides = [1, 1]} : vector<12x128xf32> to vector<2x128xf32>
    %32 = vector.extract_strided_slice %10 {offsets = [6, 0], sizes = [2, 128], strides = [1, 1]} : vector<12x128xf32> to vector<2x128xf32>
    %33 = vector.extract_strided_slice %10 {offsets = [8, 0], sizes = [2, 128], strides = [1, 1]} : vector<12x128xf32> to vector<2x128xf32>
    %34 = vector.extract_strided_slice %10 {offsets = [10, 0], sizes = [2, 128], strides = [1, 1]} : vector<12x128xf32> to vector<2x128xf32>
    %c0_i32_11 = arith.constant 0 : i32
    %c8_i32 = arith.constant 8 : i32
    %35 = arith.addi %c0_i32_11, %c8_i32 : i32
    %c1_i32 = arith.constant 1 : i32
    %36:24 = scf.for %arg12 = %c0_i32_11 to %35 step %c1_i32 iter_args(%arg13 = %11, %arg14 = %12, %arg15 = %13, %arg16 = %14, %arg17 = %15, %arg18 = %16, %arg19 = %17, %arg20 = %18, %arg21 = %19, %arg22 = %20, %arg23 = %21, %arg24 = %22, %arg25 = %23, %arg26 = %24, %arg27 = %25, %arg28 = %26, %arg29 = %27, %arg30 = %28, %arg31 = %29, %arg32 = %30, %arg33 = %31, %arg34 = %32, %arg35 = %33, %arg36 = %34) -> (vector<2x1xf32>, vector<2x1xf32>, vector<2x1xf32>, vector<2x1xf32>, vector<2x1xf32>, vector<2x1xf32>, vector<2x1xf32>, vector<2x1xf32>, vector<2x1xf32>, vector<2x1xf32>, vector<2x1xf32>, vector<2x1xf32>, vector<2x1xf32>, vector<2x1xf32>, vector<2x1xf32>, vector<2x1xf32>, vector<2x1xf32>, vector<2x1xf32>, vector<2x128xf32>, vector<2x128xf32>, vector<2x128xf32>, vector<2x128xf32>, vector<2x128xf32>, vector<2x128xf32>)  : i32 {
      %43 = arith.index_cast %arg12 : i32 to index
      %c0_17 = arith.constant 0 : index
      %c0_18 = arith.constant 0 : index
      %44 = vector.load %arg1[%43, %c0_17, %c0_18] : memref<8x2x2xf32, #tpu.memory_space<vmem>>, vector<1x2x2xf32>
      %45 = vector.shape_cast %44 : vector<1x2x2xf32> to vector<2x2xf32>
      %46 = vector.extract_strided_slice %45 {offsets = [0, 0], sizes = [2, 1], strides = [1, 1]} : vector<2x2xf32> to vector<2x1xf32>
      %47 = vector.extract_strided_slice %45 {offsets = [0, 1], sizes = [2, 1], strides = [1, 1]} : vector<2x2xf32> to vector<2x1xf32>
      %cst = arith.constant 8.000000e-01 : f32
      %48 = vector.broadcast %cst : f32 to vector<2x128xf32>
      %49 = arith.addf %arg31, %48 : vector<2x128xf32>
      %cst_19 = arith.constant 1.000000e+01 : f32
      %50 = vector.broadcast %cst_19 : f32 to vector<2x128xf32>
      %51 = arith.mulf %49, %50 : vector<2x128xf32>
      %cst_20 = arith.constant 8.000000e-01 : f32
      %52 = vector.broadcast %cst_20 : f32 to vector<2x128xf32>
      %53 = arith.addf %arg32, %52 : vector<2x128xf32>
      %cst_21 = arith.constant 1.000000e+01 : f32
      %54 = vector.broadcast %cst_21 : f32 to vector<2x128xf32>
      %55 = arith.mulf %53, %54 : vector<2x128xf32>
      %56 = arith.fptosi %51 : vector<2x128xf32> to vector<2x128xi32>
      %c0_i32_22 = arith.constant 0 : i32
      %c14_i32 = arith.constant 14 : i32
      %57 = vector.broadcast %c0_i32_22 : i32 to vector<2x128xi32>
      %58 = arith.maxsi %57, %56 : vector<2x128xi32>
      %59 = vector.broadcast %c14_i32 : i32 to vector<2x128xi32>
      %60 = arith.minsi %59, %58 : vector<2x128xi32>
      %61 = arith.fptosi %55 : vector<2x128xf32> to vector<2x128xi32>
      %c0_i32_23 = arith.constant 0 : i32
      %c14_i32_24 = arith.constant 14 : i32
      %62 = vector.broadcast %c0_i32_23 : i32 to vector<2x128xi32>
      %63 = arith.maxsi %62, %61 : vector<2x128xi32>
      %64 = vector.broadcast %c14_i32_24 : i32 to vector<2x128xi32>
      %65 = arith.minsi %64, %63 : vector<2x128xi32>
      %66 = arith.sitofp %60 : vector<2x128xi32> to vector<2x128xf32>
      %67 = arith.subf %51, %66 : vector<2x128xf32>
      %68 = arith.sitofp %65 : vector<2x128xi32> to vector<2x128xf32>
      %69 = arith.subf %55, %68 : vector<2x128xf32>
      %70 = vector.shape_cast %65 : vector<2x128xi32> to vector<2x128x1xi32>
      %71 = vector.shape_cast %69 : vector<2x128xf32> to vector<2x128x1xf32>
      %72 = vector.broadcast %70 : vector<2x128x1xi32> to vector<2x128x16xi32>
      %73 = arith.cmpi eq, %4, %72 : vector<2x128x16xi32>
      %74 = arith.extui %73 : vector<2x128x16xi1> to vector<2x128x16xi32>
      %75 = arith.sitofp %74 : vector<2x128x16xi32> to vector<2x128x16xf32>
      %c1_i32_25 = arith.constant 1 : i32
      %76 = vector.broadcast %c1_i32_25 : i32 to vector<2x128x1xi32>
      %77 = arith.addi %70, %76 : vector<2x128x1xi32>
      %78 = vector.broadcast %77 : vector<2x128x1xi32> to vector<2x128x16xi32>
      %79 = arith.cmpi eq, %4, %78 : vector<2x128x16xi32>
      %80 = arith.extui %79 : vector<2x128x16xi1> to vector<2x128x16xi32>
      %81 = arith.sitofp %80 : vector<2x128x16xi32> to vector<2x128x16xf32>
      %82 = arith.subf %81, %75 : vector<2x128x16xf32>
      %83 = vector.broadcast %71 : vector<2x128x1xf32> to vector<2x128x16xf32>
      %84 = arith.mulf %83, %82 : vector<2x128x16xf32>
      %85 = arith.addf %75, %84 : vector<2x128x16xf32>
      %86 = tpu.concatenate %85, %82 in 1 : vector<2x128x16xf32>, vector<2x128x16xf32> -> vector<2x256x16xf32>
      %87 = arith.truncf %86 : vector<2x256x16xf32> to vector<2x256x16xbf16>
      "tpu.trace_start"() <{level = 10 : i32, message = "bph,bhw->bpw"}> : () -> ()
      %cst_26 = arith.constant dense<0.000000e+00> : vector<2x256x16xf32>
      %88 = tpu.matmul %87, %3, %cst_26 {dimension_numbers = #tpu.dot_dimension_numbers<[2], [1], [1], [2], [0, 0, 0, 1, 1, 2], [0], [0]>} : vector<2x256x16xbf16>, vector<2x16x16xbf16>, vector<2x256x16xf32> -> vector<2x256x16xf32>
      "tpu.trace_stop"() : () -> ()
      %89 = vector.extract_strided_slice %88 {offsets = [0, 0, 0], sizes = [2, 128, 16], strides = [1, 1, 1]} : vector<2x256x16xf32> to vector<2x128x16xf32>
      %90 = vector.extract_strided_slice %88 {offsets = [0, 128, 0], sizes = [2, 128, 16], strides = [1, 1, 1]} : vector<2x256x16xf32> to vector<2x128x16xf32>
      %91 = vector.shape_cast %60 : vector<2x128xi32> to vector<2x128x1xi32>
      %92 = vector.shape_cast %67 : vector<2x128xf32> to vector<2x128x1xf32>
      %93 = vector.broadcast %91 : vector<2x128x1xi32> to vector<2x128x16xi32>
      %94 = arith.cmpi eq, %5, %93 : vector<2x128x16xi32>
      %95 = arith.extui %94 : vector<2x128x16xi1> to vector<2x128x16xi32>
      %96 = arith.sitofp %95 : vector<2x128x16xi32> to vector<2x128x16xf32>
      %c1_i32_27 = arith.constant 1 : i32
      %97 = vector.broadcast %c1_i32_27 : i32 to vector<2x128x1xi32>
      %98 = arith.addi %91, %97 : vector<2x128x1xi32>
      %99 = vector.broadcast %98 : vector<2x128x1xi32> to vector<2x128x16xi32>
      %100 = arith.cmpi eq, %5, %99 : vector<2x128x16xi32>
      %101 = arith.extui %100 : vector<2x128x16xi1> to vector<2x128x16xi32>
      %102 = arith.sitofp %101 : vector<2x128x16xi32> to vector<2x128x16xf32>
      %103 = arith.subf %102, %96 : vector<2x128x16xf32>
      %104 = vector.broadcast %92 : vector<2x128x1xf32> to vector<2x128x16xf32>
      %105 = arith.mulf %104, %103 : vector<2x128x16xf32>
      %106 = arith.addf %96, %105 : vector<2x128x16xf32>
      %107 = arith.mulf %89, %106 : vector<2x128x16xf32>
      %cst_28 = arith.constant dense<0.000000e+00> : vector<2x128xf32>
      %108 = vector.multi_reduction <add>, %107, %cst_28 [2] : vector<2x128x16xf32> to vector<2x128xf32>
      %109 = arith.mulf %89, %103 : vector<2x128x16xf32>
      %cst_29 = arith.constant dense<0.000000e+00> : vector<2x128xf32>
      %110 = vector.multi_reduction <add>, %109, %cst_29 [2] : vector<2x128x16xf32> to vector<2x128xf32>
      %111 = arith.mulf %90, %106 : vector<2x128x16xf32>
      %cst_30 = arith.constant dense<0.000000e+00> : vector<2x128xf32>
      %112 = vector.multi_reduction <add>, %111, %cst_30 [2] : vector<2x128x16xf32> to vector<2x128xf32>
      %113 = arith.mulf %110, %110 : vector<2x128xf32>
      %114 = arith.mulf %112, %112 : vector<2x128xf32>
      %115 = arith.addf %113, %114 : vector<2x128xf32>
      %cst_31 = arith.constant 1.000000e+00 : f32
      %116 = vector.broadcast %cst_31 : f32 to vector<2x128xf32>
      %117 = arith.addf %115, %116 : vector<2x128xf32>
      %118 = math.rsqrt %117 : vector<2x128xf32>
      %cst_32 = arith.constant 0.000000e+00 : f32
      %119 = vector.broadcast %cst_32 : f32 to vector<2x128xf32>
      %120 = arith.subf %119, %110 : vector<2x128xf32>
      %121 = arith.mulf %120, %118 : vector<2x128xf32>
      %cst_33 = arith.constant 0.000000e+00 : f32
      %122 = vector.broadcast %cst_33 : f32 to vector<2x128xf32>
      %123 = arith.subf %122, %112 : vector<2x128xf32>
      %124 = arith.mulf %123, %118 : vector<2x128xf32>
      %125 = arith.subf %arg33, %108 : vector<2x128xf32>
      %cst_34 = arith.constant -8.000000e-01 : f32
      %126 = vector.broadcast %cst_34 : f32 to vector<2x128xf32>
      %127 = arith.cmpf oge, %arg31, %126 : vector<2x128xf32>
      %cst_35 = arith.constant 8.000000e-01 : f32
      %128 = vector.broadcast %cst_35 : f32 to vector<2x128xf32>
      %129 = arith.cmpf ole, %arg31, %128 : vector<2x128xf32>
      %130 = arith.andi %127, %129 : vector<2x128xi1>
      %cst_36 = arith.constant -8.000000e-01 : f32
      %131 = vector.broadcast %cst_36 : f32 to vector<2x128xf32>
      %132 = arith.cmpf oge, %arg32, %131 : vector<2x128xf32>
      %133 = arith.andi %130, %132 : vector<2x128xi1>
      %cst_37 = arith.constant 8.000000e-01 : f32
      %134 = vector.broadcast %cst_37 : f32 to vector<2x128xf32>
      %135 = arith.cmpf ole, %arg32, %134 : vector<2x128xf32>
      %136 = arith.andi %133, %135 : vector<2x128xi1>
      %cst_38 = arith.constant 0.000000e+00 : f32
      %137 = vector.broadcast %cst_38 : f32 to vector<2x128xf32>
      %138 = arith.cmpf ole, %125, %137 : vector<2x128xf32>
      %139 = arith.andi %138, %136 : vector<2x128xi1>
      %140 = arith.extui %139 : vector<2x128xi1> to vector<2x128xi32>
      %141 = arith.sitofp %140 : vector<2x128xi32> to vector<2x128xf32>
      %142 = vector.broadcast %2 : vector<1x128xf32> to vector<2x128xf32>
      %143 = arith.mulf %141, %142 : vector<2x128xf32>
      %144 = arith.mulf %arg34, %121 : vector<2x128xf32>
      %145 = arith.mulf %arg35, %124 : vector<2x128xf32>
      %146 = arith.addf %144, %145 : vector<2x128xf32>
      %147 = arith.mulf %arg36, %118 : vector<2x128xf32>
      %148 = arith.addf %146, %147 : vector<2x128xf32>
      %cst_39 = arith.constant 1.000000e+02 : f32
      %149 = vector.broadcast %cst_39 : f32 to vector<2x128xf32>
      %150 = arith.mulf %149, %125 : vector<2x128xf32>
      %cst_40 = arith.constant 2.000000e+01 : f32
      %151 = vector.broadcast %cst_40 : f32 to vector<2x128xf32>
      %152 = arith.mulf %151, %148 : vector<2x128xf32>
      %153 = arith.addf %150, %152 : vector<2x128xf32>
      %cst_41 = arith.constant 0.000000e+00 : f32
      %154 = vector.broadcast %cst_41 : f32 to vector<2x128xf32>
      %155 = arith.subf %154, %153 : vector<2x128xf32>
      %156 = arith.mulf %155, %143 : vector<2x128xf32>
      %157 = arith.mulf %156, %121 : vector<2x128xf32>
      %158 = arith.mulf %156, %124 : vector<2x128xf32>
      %159 = arith.mulf %156, %118 : vector<2x128xf32>
      %160 = arith.mulf %157, %157 : vector<2x128xf32>
      %161 = arith.mulf %158, %158 : vector<2x128xf32>
      %162 = arith.addf %160, %161 : vector<2x128xf32>
      %163 = arith.mulf %159, %159 : vector<2x128xf32>
      %164 = arith.addf %162, %163 : vector<2x128xf32>
      %165 = math.sqrt %164 : vector<2x128xf32>
      %166 = arith.mulf %148, %121 : vector<2x128xf32>
      %167 = arith.subf %arg34, %166 : vector<2x128xf32>
      %168 = arith.mulf %148, %124 : vector<2x128xf32>
      %169 = arith.subf %arg35, %168 : vector<2x128xf32>
      %170 = arith.mulf %148, %118 : vector<2x128xf32>
      %171 = arith.subf %arg36, %170 : vector<2x128xf32>
      %172 = arith.mulf %167, %167 : vector<2x128xf32>
      %173 = arith.mulf %169, %169 : vector<2x128xf32>
      %174 = arith.addf %172, %173 : vector<2x128xf32>
      %175 = arith.mulf %171, %171 : vector<2x128xf32>
      %176 = arith.addf %174, %175 : vector<2x128xf32>
      %177 = math.sqrt %176 : vector<2x128xf32>
      %cst_42 = arith.constant 9.99999997E-7 : f32
      %178 = vector.broadcast %cst_42 : f32 to vector<2x128xf32>
      %179 = arith.addf %177, %178 : vector<2x128xf32>
      %180 = tpu.reciprocal %179 {approx = true} : vector<2x128xf32> -> vector<2x128xf32>
      %cst_43 = arith.constant -5.000000e-01 : f32
      %181 = vector.broadcast %cst_43 : f32 to vector<2x128xf32>
      %182 = arith.mulf %181, %165 : vector<2x128xf32>
      %183 = arith.mulf %182, %167 : vector<2x128xf32>
      %184 = arith.mulf %183, %180 : vector<2x128xf32>
      %cst_44 = arith.constant -5.000000e-01 : f32
      %185 = vector.broadcast %cst_44 : f32 to vector<2x128xf32>
      %186 = arith.mulf %185, %165 : vector<2x128xf32>
      %187 = arith.mulf %186, %169 : vector<2x128xf32>
      %188 = arith.mulf %187, %180 : vector<2x128xf32>
      %cst_45 = arith.constant -5.000000e-01 : f32
      %189 = vector.broadcast %cst_45 : f32 to vector<2x128xf32>
      %190 = arith.mulf %189, %165 : vector<2x128xf32>
      %191 = arith.mulf %190, %171 : vector<2x128xf32>
      %192 = arith.mulf %191, %180 : vector<2x128xf32>
      %193 = arith.addf %157, %184 : vector<2x128xf32>
      %194 = arith.addf %158, %188 : vector<2x128xf32>
      %195 = arith.addf %159, %192 : vector<2x128xf32>
      %196 = vector.broadcast %arg13 : vector<2x1xf32> to vector<2x128xf32>
      %197 = arith.subf %arg31, %196 : vector<2x128xf32>
      %198 = vector.broadcast %arg14 : vector<2x1xf32> to vector<2x128xf32>
      %199 = arith.subf %arg32, %198 : vector<2x128xf32>
      %200 = vector.broadcast %arg15 : vector<2x1xf32> to vector<2x128xf32>
      %201 = arith.subf %arg33, %200 : vector<2x128xf32>
      %202 = arith.mulf %199, %195 : vector<2x128xf32>
      %203 = arith.mulf %201, %194 : vector<2x128xf32>
      %204 = arith.subf %202, %203 : vector<2x128xf32>
      %205 = arith.mulf %201, %193 : vector<2x128xf32>
      %206 = arith.mulf %197, %195 : vector<2x128xf32>
      %207 = arith.subf %205, %206 : vector<2x128xf32>
      %208 = arith.mulf %197, %194 : vector<2x128xf32>
      %209 = arith.mulf %199, %193 : vector<2x128xf32>
      %210 = arith.subf %208, %209 : vector<2x128xf32>
      %211 = tpu.concatenate %arg31, %arg32, %arg33, %arg34, %arg35, %arg36, %143, %165, %193, %194, %195, %204, %207, %210 in 0 : vector<2x128xf32>, vector<2x128xf32>, vector<2x128xf32>, vector<2x128xf32>, vector<2x128xf32>, vector<2x128xf32>, vector<2x128xf32>, vector<2x128xf32>, vector<2x128xf32>, vector<2x128xf32>, vector<2x128xf32>, vector<2x128xf32>, vector<2x128xf32>, vector<2x128xf32> -> vector<28x128xf32>
      %cst_46 = arith.constant dense<0.000000e+00> : vector<28x4xf32>
      %212 = tpu.matmul %211, %1, %cst_46 {dimension_numbers = #tpu.dot_dimension_numbers<[1], [0], [0], [1], [0, 0, 1, 1], [], []>} : vector<28x128xf32>, vector<128x4xf32>, vector<28x4xf32> -> vector<28x4xf32>
      %213 = vector.extract_strided_slice %212 {offsets = [0, 0], sizes = [2, 1], strides = [1, 1]} : vector<28x4xf32> to vector<2x1xf32>
      %214 = vector.extract_strided_slice %212 {offsets = [2, 0], sizes = [2, 1], strides = [1, 1]} : vector<28x4xf32> to vector<2x1xf32>
      %215 = vector.extract_strided_slice %212 {offsets = [4, 0], sizes = [2, 1], strides = [1, 1]} : vector<28x4xf32> to vector<2x1xf32>
      %216 = vector.extract_strided_slice %212 {offsets = [0, 1], sizes = [2, 1], strides = [1, 1]} : vector<28x4xf32> to vector<2x1xf32>
      %217 = vector.extract_strided_slice %212 {offsets = [2, 1], sizes = [2, 1], strides = [1, 1]} : vector<28x4xf32> to vector<2x1xf32>
      %218 = vector.extract_strided_slice %212 {offsets = [4, 1], sizes = [2, 1], strides = [1, 1]} : vector<28x4xf32> to vector<2x1xf32>
      %219 = vector.extract_strided_slice %212 {offsets = [6, 0], sizes = [2, 1], strides = [1, 1]} : vector<28x4xf32> to vector<2x1xf32>
      %220 = vector.extract_strided_slice %212 {offsets = [8, 0], sizes = [2, 1], strides = [1, 1]} : vector<28x4xf32> to vector<2x1xf32>
      %221 = vector.extract_strided_slice %212 {offsets = [10, 0], sizes = [2, 1], strides = [1, 1]} : vector<28x4xf32> to vector<2x1xf32>
      %222 = vector.extract_strided_slice %212 {offsets = [6, 1], sizes = [2, 1], strides = [1, 1]} : vector<28x4xf32> to vector<2x1xf32>
      %223 = vector.extract_strided_slice %212 {offsets = [8, 1], sizes = [2, 1], strides = [1, 1]} : vector<28x4xf32> to vector<2x1xf32>
      %224 = vector.extract_strided_slice %212 {offsets = [10, 1], sizes = [2, 1], strides = [1, 1]} : vector<28x4xf32> to vector<2x1xf32>
      %225 = vector.extract_strided_slice %212 {offsets = [12, 0], sizes = [2, 1], strides = [1, 1]} : vector<28x4xf32> to vector<2x1xf32>
      %226 = vector.extract_strided_slice %212 {offsets = [12, 1], sizes = [2, 1], strides = [1, 1]} : vector<28x4xf32> to vector<2x1xf32>
      %227 = vector.extract_strided_slice %212 {offsets = [14, 2], sizes = [2, 1], strides = [1, 1]} : vector<28x4xf32> to vector<2x1xf32>
      %228 = vector.extract_strided_slice %212 {offsets = [16, 2], sizes = [2, 1], strides = [1, 1]} : vector<28x4xf32> to vector<2x1xf32>
      %229 = vector.extract_strided_slice %212 {offsets = [18, 2], sizes = [2, 1], strides = [1, 1]} : vector<28x4xf32> to vector<2x1xf32>
      %230 = vector.extract_strided_slice %212 {offsets = [20, 2], sizes = [2, 1], strides = [1, 1]} : vector<28x4xf32> to vector<2x1xf32>
      %231 = vector.extract_strided_slice %212 {offsets = [22, 3], sizes = [2, 1], strides = [1, 1]} : vector<28x4xf32> to vector<2x1xf32>
      %232 = vector.extract_strided_slice %212 {offsets = [24, 3], sizes = [2, 1], strides = [1, 1]} : vector<28x4xf32> to vector<2x1xf32>
      %233 = vector.extract_strided_slice %212 {offsets = [26, 3], sizes = [2, 1], strides = [1, 1]} : vector<28x4xf32> to vector<2x1xf32>
      %234 = arith.mulf %arg22, %arg22 : vector<2x1xf32>
      %235 = arith.mulf %arg25, %arg25 : vector<2x1xf32>
      %236 = arith.addf %234, %235 : vector<2x1xf32>
      %237 = arith.mulf %arg28, %arg28 : vector<2x1xf32>
      %238 = arith.addf %236, %237 : vector<2x1xf32>
      %239 = math.sqrt %238 : vector<2x1xf32>
      %cst_47 = arith.constant 9.99999997E-7 : f32
      %240 = vector.broadcast %cst_47 : f32 to vector<2x1xf32>
      %241 = arith.addf %239, %240 : vector<2x1xf32>
      %242 = tpu.reciprocal %241 {approx = true} : vector<2x1xf32> -> vector<2x1xf32>
      %243 = arith.mulf %arg22, %242 : vector<2x1xf32>
      %244 = arith.mulf %arg25, %242 : vector<2x1xf32>
      %245 = arith.mulf %arg28, %242 : vector<2x1xf32>
      %246 = arith.mulf %219, %243 : vector<2x1xf32>
      %247 = arith.mulf %220, %244 : vector<2x1xf32>
      %248 = arith.addf %246, %247 : vector<2x1xf32>
      %249 = arith.mulf %221, %245 : vector<2x1xf32>
      %250 = arith.addf %248, %249 : vector<2x1xf32>
      %251 = arith.mulf %222, %243 : vector<2x1xf32>
      %252 = arith.mulf %223, %244 : vector<2x1xf32>
      %253 = arith.addf %251, %252 : vector<2x1xf32>
      %254 = arith.mulf %224, %245 : vector<2x1xf32>
      %255 = arith.addf %253, %254 : vector<2x1xf32>
      %256 = arith.subf %46, %250 : vector<2x1xf32>
      %257 = arith.mulf %227, %256 : vector<2x1xf32>
      %258 = arith.mulf %257, %225 : vector<2x1xf32>
      %259 = arith.subf %47, %255 : vector<2x1xf32>
      %260 = arith.mulf %227, %259 : vector<2x1xf32>
      %261 = arith.mulf %260, %226 : vector<2x1xf32>
      %262 = arith.mulf %258, %243 : vector<2x1xf32>
      %263 = arith.mulf %258, %244 : vector<2x1xf32>
      %264 = arith.mulf %258, %245 : vector<2x1xf32>
      %265 = arith.mulf %261, %243 : vector<2x1xf32>
      %266 = arith.mulf %261, %244 : vector<2x1xf32>
      %267 = arith.mulf %261, %245 : vector<2x1xf32>
      %268 = arith.subf %213, %arg13 : vector<2x1xf32>
      %269 = arith.subf %214, %arg14 : vector<2x1xf32>
      %270 = arith.subf %215, %arg15 : vector<2x1xf32>
      %271 = arith.subf %216, %arg13 : vector<2x1xf32>
      %272 = arith.subf %217, %arg14 : vector<2x1xf32>
      %273 = arith.subf %218, %arg15 : vector<2x1xf32>
      %274 = arith.mulf %269, %264 : vector<2x1xf32>
      %275 = arith.mulf %270, %263 : vector<2x1xf32>
      %276 = arith.subf %274, %275 : vector<2x1xf32>
      %277 = arith.addf %231, %276 : vector<2x1xf32>
      %278 = arith.mulf %272, %267 : vector<2x1xf32>
      %279 = arith.mulf %273, %266 : vector<2x1xf32>
      %280 = arith.subf %278, %279 : vector<2x1xf32>
      %281 = arith.addf %277, %280 : vector<2x1xf32>
      %282 = arith.mulf %270, %262 : vector<2x1xf32>
      %283 = arith.mulf %268, %264 : vector<2x1xf32>
      %284 = arith.subf %282, %283 : vector<2x1xf32>
      %285 = arith.addf %232, %284 : vector<2x1xf32>
      %286 = arith.mulf %273, %265 : vector<2x1xf32>
      %287 = arith.mulf %271, %267 : vector<2x1xf32>
      %288 = arith.subf %286, %287 : vector<2x1xf32>
      %289 = arith.addf %285, %288 : vector<2x1xf32>
      %290 = arith.mulf %268, %263 : vector<2x1xf32>
      %291 = arith.mulf %269, %262 : vector<2x1xf32>
      %292 = arith.subf %290, %291 : vector<2x1xf32>
      %293 = arith.addf %233, %292 : vector<2x1xf32>
      %294 = arith.mulf %271, %266 : vector<2x1xf32>
      %295 = arith.mulf %272, %265 : vector<2x1xf32>
      %296 = arith.subf %294, %295 : vector<2x1xf32>
      %297 = arith.addf %293, %296 : vector<2x1xf32>
      %cst_48 = arith.constant 2.000000e+00 : f32
      %298 = vector.broadcast %cst_48 : f32 to vector<2x1xf32>
      %299 = arith.mulf %281, %298 : vector<2x1xf32>
      %cst_49 = arith.constant 0.000000e+00 : f32
      %300 = vector.broadcast %cst_49 : f32 to vector<2x1xf32>
      %301 = arith.mulf %289, %300 : vector<2x1xf32>
      %302 = arith.addf %299, %301 : vector<2x1xf32>
      %cst_50 = arith.constant 0.000000e+00 : f32
      %303 = vector.broadcast %cst_50 : f32 to vector<2x1xf32>
      %304 = arith.mulf %297, %303 : vector<2x1xf32>
      %305 = arith.addf %302, %304 : vector<2x1xf32>
      %cst_51 = arith.constant 0.000000e+00 : f32
      %306 = vector.broadcast %cst_51 : f32 to vector<2x1xf32>
      %307 = arith.mulf %281, %306 : vector<2x1xf32>
      %cst_52 = arith.constant 1.000000e+00 : f32
      %308 = vector.broadcast %cst_52 : f32 to vector<2x1xf32>
      %309 = arith.mulf %289, %308 : vector<2x1xf32>
      %310 = arith.addf %307, %309 : vector<2x1xf32>
      %cst_53 = arith.constant 0.000000e+00 : f32
      %311 = vector.broadcast %cst_53 : f32 to vector<2x1xf32>
      %312 = arith.mulf %297, %311 : vector<2x1xf32>
      %313 = arith.addf %310, %312 : vector<2x1xf32>
      %cst_54 = arith.constant 0.000000e+00 : f32
      %314 = vector.broadcast %cst_54 : f32 to vector<2x1xf32>
      %315 = arith.mulf %281, %314 : vector<2x1xf32>
      %cst_55 = arith.constant 0.000000e+00 : f32
      %316 = vector.broadcast %cst_55 : f32 to vector<2x1xf32>
      %317 = arith.mulf %289, %316 : vector<2x1xf32>
      %318 = arith.addf %315, %317 : vector<2x1xf32>
      %cst_56 = arith.constant 0.666666686 : f32
      %319 = vector.broadcast %cst_56 : f32 to vector<2x1xf32>
      %320 = arith.mulf %297, %319 : vector<2x1xf32>
      %321 = arith.addf %318, %320 : vector<2x1xf32>
      %322 = arith.addf %228, %262 : vector<2x1xf32>
      %323 = arith.addf %322, %265 : vector<2x1xf32>
      %cst_57 = arith.constant 1.000000e-01 : f32
      %324 = vector.broadcast %cst_57 : f32 to vector<2x1xf32>
      %325 = arith.mulf %323, %324 : vector<2x1xf32>
      %326 = arith.addf %229, %263 : vector<2x1xf32>
      %327 = arith.addf %326, %266 : vector<2x1xf32>
      %cst_58 = arith.constant 1.000000e-01 : f32
      %328 = vector.broadcast %cst_58 : f32 to vector<2x1xf32>
      %329 = arith.mulf %327, %328 : vector<2x1xf32>
      %cst_59 = arith.constant -98.0999984 : f32
      %330 = vector.broadcast %cst_59 : f32 to vector<2x1xf32>
      %331 = arith.addf %330, %230 : vector<2x1xf32>
      %332 = arith.addf %331, %264 : vector<2x1xf32>
      %333 = arith.addf %332, %267 : vector<2x1xf32>
      %cst_60 = arith.constant 1.000000e-01 : f32
      %334 = vector.broadcast %cst_60 : f32 to vector<2x1xf32>
      %335 = arith.mulf %333, %334 : vector<2x1xf32>
      %336 = vector.broadcast %arg20 : vector<2x1xf32> to vector<2x128xf32>
      %337 = arith.mulf %336, %201 : vector<2x128xf32>
      %338 = vector.broadcast %arg21 : vector<2x1xf32> to vector<2x128xf32>
      %339 = arith.mulf %338, %199 : vector<2x128xf32>
      %340 = arith.subf %337, %339 : vector<2x128xf32>
      %341 = vector.broadcast %arg16 : vector<2x1xf32> to vector<2x128xf32>
      %342 = arith.addf %341, %340 : vector<2x128xf32>
      %343 = vector.broadcast %2 : vector<1x128xf32> to vector<2x128xf32>
      %344 = arith.mulf %342, %343 : vector<2x128xf32>
      %345 = vector.broadcast %arg21 : vector<2x1xf32> to vector<2x128xf32>
      %346 = arith.mulf %345, %197 : vector<2x128xf32>
      %347 = vector.broadcast %arg19 : vector<2x1xf32> to vector<2x128xf32>
      %348 = arith.mulf %347, %201 : vector<2x128xf32>
      %349 = arith.subf %346, %348 : vector<2x128xf32>
      %350 = vector.broadcast %arg17 : vector<2x1xf32> to vector<2x128xf32>
      %351 = arith.addf %350, %349 : vector<2x128xf32>
      %352 = vector.broadcast %2 : vector<1x128xf32> to vector<2x128xf32>
      %353 = arith.mulf %351, %352 : vector<2x128xf32>
      %354 = vector.broadcast %arg19 : vector<2x1xf32> to vector<2x128xf32>
      %355 = arith.mulf %354, %199 : vector<2x128xf32>
      %356 = vector.broadcast %arg20 : vector<2x1xf32> to vector<2x128xf32>
      %357 = arith.mulf %356, %197 : vector<2x128xf32>
      %358 = arith.subf %355, %357 : vector<2x128xf32>
      %359 = vector.broadcast %arg18 : vector<2x1xf32> to vector<2x128xf32>
      %360 = arith.addf %359, %358 : vector<2x128xf32>
      %361 = vector.broadcast %2 : vector<1x128xf32> to vector<2x128xf32>
      %362 = arith.mulf %360, %361 : vector<2x128xf32>
      %cst_61 = arith.constant 0.00999999977 : f32
      %363 = vector.broadcast %cst_61 : f32 to vector<2x1xf32>
      %364 = arith.mulf %363, %325 : vector<2x1xf32>
      %cst_62 = arith.constant 5.000000e-01 : f32
      %365 = vector.broadcast %cst_62 : f32 to vector<2x1xf32>
      %366 = arith.mulf %365, %364 : vector<2x1xf32>
      %367 = arith.addf %325, %366 : vector<2x1xf32>
      %cst_63 = arith.constant 0.00999999977 : f32
      %368 = vector.broadcast %cst_63 : f32 to vector<2x1xf32>
      %369 = arith.mulf %368, %367 : vector<2x1xf32>
      %cst_64 = arith.constant 5.000000e-01 : f32
      %370 = vector.broadcast %cst_64 : f32 to vector<2x1xf32>
      %371 = arith.mulf %370, %369 : vector<2x1xf32>
      %372 = arith.addf %325, %371 : vector<2x1xf32>
      %cst_65 = arith.constant 0.00999999977 : f32
      %373 = vector.broadcast %cst_65 : f32 to vector<2x1xf32>
      %374 = arith.mulf %373, %372 : vector<2x1xf32>
      %375 = arith.addf %325, %374 : vector<2x1xf32>
      %cst_66 = arith.constant 0.00999999977 : f32
      %376 = vector.broadcast %cst_66 : f32 to vector<2x1xf32>
      %377 = arith.mulf %376, %375 : vector<2x1xf32>
      %cst_67 = arith.constant 2.000000e+00 : f32
      %378 = vector.broadcast %cst_67 : f32 to vector<2x1xf32>
      %379 = arith.mulf %378, %369 : vector<2x1xf32>
      %380 = arith.addf %364, %379 : vector<2x1xf32>
      %cst_68 = arith.constant 2.000000e+00 : f32
      %381 = vector.broadcast %cst_68 : f32 to vector<2x1xf32>
      %382 = arith.mulf %381, %374 : vector<2x1xf32>
      %383 = arith.addf %380, %382 : vector<2x1xf32>
      %384 = arith.addf %383, %377 : vector<2x1xf32>
      %cst_69 = arith.constant 6.000000e+00 : f32
      %385 = vector.broadcast %cst_69 : f32 to vector<2x1xf32>
      %386 = arith.divf %384, %385 : vector<2x1xf32>
      %387 = arith.addf %arg16, %386 : vector<2x1xf32>
      %cst_70 = arith.constant 0.00999999977 : f32
      %388 = vector.broadcast %cst_70 : f32 to vector<2x1xf32>
      %389 = arith.mulf %388, %329 : vector<2x1xf32>
      %cst_71 = arith.constant 5.000000e-01 : f32
      %390 = vector.broadcast %cst_71 : f32 to vector<2x1xf32>
      %391 = arith.mulf %390, %389 : vector<2x1xf32>
      %392 = arith.addf %329, %391 : vector<2x1xf32>
      %cst_72 = arith.constant 0.00999999977 : f32
      %393 = vector.broadcast %cst_72 : f32 to vector<2x1xf32>
      %394 = arith.mulf %393, %392 : vector<2x1xf32>
      %cst_73 = arith.constant 5.000000e-01 : f32
      %395 = vector.broadcast %cst_73 : f32 to vector<2x1xf32>
      %396 = arith.mulf %395, %394 : vector<2x1xf32>
      %397 = arith.addf %329, %396 : vector<2x1xf32>
      %cst_74 = arith.constant 0.00999999977 : f32
      %398 = vector.broadcast %cst_74 : f32 to vector<2x1xf32>
      %399 = arith.mulf %398, %397 : vector<2x1xf32>
      %400 = arith.addf %329, %399 : vector<2x1xf32>
      %cst_75 = arith.constant 0.00999999977 : f32
      %401 = vector.broadcast %cst_75 : f32 to vector<2x1xf32>
      %402 = arith.mulf %401, %400 : vector<2x1xf32>
      %cst_76 = arith.constant 2.000000e+00 : f32
      %403 = vector.broadcast %cst_76 : f32 to vector<2x1xf32>
      %404 = arith.mulf %403, %394 : vector<2x1xf32>
      %405 = arith.addf %389, %404 : vector<2x1xf32>
      %cst_77 = arith.constant 2.000000e+00 : f32
      %406 = vector.broadcast %cst_77 : f32 to vector<2x1xf32>
      %407 = arith.mulf %406, %399 : vector<2x1xf32>
      %408 = arith.addf %405, %407 : vector<2x1xf32>
      %409 = arith.addf %408, %402 : vector<2x1xf32>
      %cst_78 = arith.constant 6.000000e+00 : f32
      %410 = vector.broadcast %cst_78 : f32 to vector<2x1xf32>
      %411 = arith.divf %409, %410 : vector<2x1xf32>
      %412 = arith.addf %arg17, %411 : vector<2x1xf32>
      %cst_79 = arith.constant 0.00999999977 : f32
      %413 = vector.broadcast %cst_79 : f32 to vector<2x1xf32>
      %414 = arith.mulf %413, %335 : vector<2x1xf32>
      %cst_80 = arith.constant 5.000000e-01 : f32
      %415 = vector.broadcast %cst_80 : f32 to vector<2x1xf32>
      %416 = arith.mulf %415, %414 : vector<2x1xf32>
      %417 = arith.addf %335, %416 : vector<2x1xf32>
      %cst_81 = arith.constant 0.00999999977 : f32
      %418 = vector.broadcast %cst_81 : f32 to vector<2x1xf32>
      %419 = arith.mulf %418, %417 : vector<2x1xf32>
      %cst_82 = arith.constant 5.000000e-01 : f32
      %420 = vector.broadcast %cst_82 : f32 to vector<2x1xf32>
      %421 = arith.mulf %420, %419 : vector<2x1xf32>
      %422 = arith.addf %335, %421 : vector<2x1xf32>
      %cst_83 = arith.constant 0.00999999977 : f32
      %423 = vector.broadcast %cst_83 : f32 to vector<2x1xf32>
      %424 = arith.mulf %423, %422 : vector<2x1xf32>
      %425 = arith.addf %335, %424 : vector<2x1xf32>
      %cst_84 = arith.constant 0.00999999977 : f32
      %426 = vector.broadcast %cst_84 : f32 to vector<2x1xf32>
      %427 = arith.mulf %426, %425 : vector<2x1xf32>
      %cst_85 = arith.constant 2.000000e+00 : f32
      %428 = vector.broadcast %cst_85 : f32 to vector<2x1xf32>
      %429 = arith.mulf %428, %419 : vector<2x1xf32>
      %430 = arith.addf %414, %429 : vector<2x1xf32>
      %cst_86 = arith.constant 2.000000e+00 : f32
      %431 = vector.broadcast %cst_86 : f32 to vector<2x1xf32>
      %432 = arith.mulf %431, %424 : vector<2x1xf32>
      %433 = arith.addf %430, %432 : vector<2x1xf32>
      %434 = arith.addf %433, %427 : vector<2x1xf32>
      %cst_87 = arith.constant 6.000000e+00 : f32
      %435 = vector.broadcast %cst_87 : f32 to vector<2x1xf32>
      %436 = arith.divf %434, %435 : vector<2x1xf32>
      %437 = arith.addf %arg18, %436 : vector<2x1xf32>
      %cst_88 = arith.constant 0.00999999977 : f32
      %438 = vector.broadcast %cst_88 : f32 to vector<2x1xf32>
      %439 = arith.mulf %438, %387 : vector<2x1xf32>
      %cst_89 = arith.constant 5.000000e-01 : f32
      %440 = vector.broadcast %cst_89 : f32 to vector<2x1xf32>
      %441 = arith.mulf %440, %439 : vector<2x1xf32>
      %442 = arith.addf %387, %441 : vector<2x1xf32>
      %cst_90 = arith.constant 0.00999999977 : f32
      %443 = vector.broadcast %cst_90 : f32 to vector<2x1xf32>
      %444 = arith.mulf %443, %442 : vector<2x1xf32>
      %cst_91 = arith.constant 5.000000e-01 : f32
      %445 = vector.broadcast %cst_91 : f32 to vector<2x1xf32>
      %446 = arith.mulf %445, %444 : vector<2x1xf32>
      %447 = arith.addf %387, %446 : vector<2x1xf32>
      %cst_92 = arith.constant 0.00999999977 : f32
      %448 = vector.broadcast %cst_92 : f32 to vector<2x1xf32>
      %449 = arith.mulf %448, %447 : vector<2x1xf32>
      %450 = arith.addf %387, %449 : vector<2x1xf32>
      %cst_93 = arith.constant 0.00999999977 : f32
      %451 = vector.broadcast %cst_93 : f32 to vector<2x1xf32>
      %452 = arith.mulf %451, %450 : vector<2x1xf32>
      %cst_94 = arith.constant 2.000000e+00 : f32
      %453 = vector.broadcast %cst_94 : f32 to vector<2x1xf32>
      %454 = arith.mulf %453, %444 : vector<2x1xf32>
      %455 = arith.addf %439, %454 : vector<2x1xf32>
      %cst_95 = arith.constant 2.000000e+00 : f32
      %456 = vector.broadcast %cst_95 : f32 to vector<2x1xf32>
      %457 = arith.mulf %456, %449 : vector<2x1xf32>
      %458 = arith.addf %455, %457 : vector<2x1xf32>
      %459 = arith.addf %458, %452 : vector<2x1xf32>
      %cst_96 = arith.constant 6.000000e+00 : f32
      %460 = vector.broadcast %cst_96 : f32 to vector<2x1xf32>
      %461 = arith.divf %459, %460 : vector<2x1xf32>
      %462 = arith.addf %arg13, %461 : vector<2x1xf32>
      %cst_97 = arith.constant 0.00999999977 : f32
      %463 = vector.broadcast %cst_97 : f32 to vector<2x1xf32>
      %464 = arith.mulf %463, %412 : vector<2x1xf32>
      %cst_98 = arith.constant 5.000000e-01 : f32
      %465 = vector.broadcast %cst_98 : f32 to vector<2x1xf32>
      %466 = arith.mulf %465, %464 : vector<2x1xf32>
      %467 = arith.addf %412, %466 : vector<2x1xf32>
      %cst_99 = arith.constant 0.00999999977 : f32
      %468 = vector.broadcast %cst_99 : f32 to vector<2x1xf32>
      %469 = arith.mulf %468, %467 : vector<2x1xf32>
      %cst_100 = arith.constant 5.000000e-01 : f32
      %470 = vector.broadcast %cst_100 : f32 to vector<2x1xf32>
      %471 = arith.mulf %470, %469 : vector<2x1xf32>
      %472 = arith.addf %412, %471 : vector<2x1xf32>
      %cst_101 = arith.constant 0.00999999977 : f32
      %473 = vector.broadcast %cst_101 : f32 to vector<2x1xf32>
      %474 = arith.mulf %473, %472 : vector<2x1xf32>
      %475 = arith.addf %412, %474 : vector<2x1xf32>
      %cst_102 = arith.constant 0.00999999977 : f32
      %476 = vector.broadcast %cst_102 : f32 to vector<2x1xf32>
      %477 = arith.mulf %476, %475 : vector<2x1xf32>
      %cst_103 = arith.constant 2.000000e+00 : f32
      %478 = vector.broadcast %cst_103 : f32 to vector<2x1xf32>
      %479 = arith.mulf %478, %469 : vector<2x1xf32>
      %480 = arith.addf %464, %479 : vector<2x1xf32>
      %cst_104 = arith.constant 2.000000e+00 : f32
      %481 = vector.broadcast %cst_104 : f32 to vector<2x1xf32>
      %482 = arith.mulf %481, %474 : vector<2x1xf32>
      %483 = arith.addf %480, %482 : vector<2x1xf32>
      %484 = arith.addf %483, %477 : vector<2x1xf32>
      %cst_105 = arith.constant 6.000000e+00 : f32
      %485 = vector.broadcast %cst_105 : f32 to vector<2x1xf32>
      %486 = arith.divf %484, %485 : vector<2x1xf32>
      %487 = arith.addf %arg14, %486 : vector<2x1xf32>
      %cst_106 = arith.constant 0.00999999977 : f32
      %488 = vector.broadcast %cst_106 : f32 to vector<2x1xf32>
      %489 = arith.mulf %488, %437 : vector<2x1xf32>
      %cst_107 = arith.constant 5.000000e-01 : f32
      %490 = vector.broadcast %cst_107 : f32 to vector<2x1xf32>
      %491 = arith.mulf %490, %489 : vector<2x1xf32>
      %492 = arith.addf %437, %491 : vector<2x1xf32>
      %cst_108 = arith.constant 0.00999999977 : f32
      %493 = vector.broadcast %cst_108 : f32 to vector<2x1xf32>
      %494 = arith.mulf %493, %492 : vector<2x1xf32>
      %cst_109 = arith.constant 5.000000e-01 : f32
      %495 = vector.broadcast %cst_109 : f32 to vector<2x1xf32>
      %496 = arith.mulf %495, %494 : vector<2x1xf32>
      %497 = arith.addf %437, %496 : vector<2x1xf32>
      %cst_110 = arith.constant 0.00999999977 : f32
      %498 = vector.broadcast %cst_110 : f32 to vector<2x1xf32>
      %499 = arith.mulf %498, %497 : vector<2x1xf32>
      %500 = arith.addf %437, %499 : vector<2x1xf32>
      %cst_111 = arith.constant 0.00999999977 : f32
      %501 = vector.broadcast %cst_111 : f32 to vector<2x1xf32>
      %502 = arith.mulf %501, %500 : vector<2x1xf32>
      %cst_112 = arith.constant 2.000000e+00 : f32
      %503 = vector.broadcast %cst_112 : f32 to vector<2x1xf32>
      %504 = arith.mulf %503, %494 : vector<2x1xf32>
      %505 = arith.addf %489, %504 : vector<2x1xf32>
      %cst_113 = arith.constant 2.000000e+00 : f32
      %506 = vector.broadcast %cst_113 : f32 to vector<2x1xf32>
      %507 = arith.mulf %506, %499 : vector<2x1xf32>
      %508 = arith.addf %505, %507 : vector<2x1xf32>
      %509 = arith.addf %508, %502 : vector<2x1xf32>
      %cst_114 = arith.constant 6.000000e+00 : f32
      %510 = vector.broadcast %cst_114 : f32 to vector<2x1xf32>
      %511 = arith.divf %509, %510 : vector<2x1xf32>
      %512 = arith.addf %arg15, %511 : vector<2x1xf32>
      %cst_115 = arith.constant 0.00999999977 : f32
      %513 = vector.broadcast %cst_115 : f32 to vector<2x128xf32>
      %514 = arith.mulf %513, %344 : vector<2x128xf32>
      %cst_116 = arith.constant 5.000000e-01 : f32
      %515 = vector.broadcast %cst_116 : f32 to vector<2x128xf32>
      %516 = arith.mulf %515, %514 : vector<2x128xf32>
      %517 = arith.addf %344, %516 : vector<2x128xf32>
      %cst_117 = arith.constant 0.00999999977 : f32
      %518 = vector.broadcast %cst_117 : f32 to vector<2x128xf32>
      %519 = arith.mulf %518, %517 : vector<2x128xf32>
      %cst_118 = arith.constant 5.000000e-01 : f32
      %520 = vector.broadcast %cst_118 : f32 to vector<2x128xf32>
      %521 = arith.mulf %520, %519 : vector<2x128xf32>
      %522 = arith.addf %344, %521 : vector<2x128xf32>
      %cst_119 = arith.constant 0.00999999977 : f32
      %523 = vector.broadcast %cst_119 : f32 to vector<2x128xf32>
      %524 = arith.mulf %523, %522 : vector<2x128xf32>
      %525 = arith.addf %344, %524 : vector<2x128xf32>
      %cst_120 = arith.constant 0.00999999977 : f32
      %526 = vector.broadcast %cst_120 : f32 to vector<2x128xf32>
      %527 = arith.mulf %526, %525 : vector<2x128xf32>
      %cst_121 = arith.constant 2.000000e+00 : f32
      %528 = vector.broadcast %cst_121 : f32 to vector<2x128xf32>
      %529 = arith.mulf %528, %519 : vector<2x128xf32>
      %530 = arith.addf %514, %529 : vector<2x128xf32>
      %cst_122 = arith.constant 2.000000e+00 : f32
      %531 = vector.broadcast %cst_122 : f32 to vector<2x128xf32>
      %532 = arith.mulf %531, %524 : vector<2x128xf32>
      %533 = arith.addf %530, %532 : vector<2x128xf32>
      %534 = arith.addf %533, %527 : vector<2x128xf32>
      %cst_123 = arith.constant 6.000000e+00 : f32
      %535 = vector.broadcast %cst_123 : f32 to vector<2x128xf32>
      %536 = arith.divf %534, %535 : vector<2x128xf32>
      %537 = arith.addf %arg31, %536 : vector<2x128xf32>
      %cst_124 = arith.constant 0.00999999977 : f32
      %538 = vector.broadcast %cst_124 : f32 to vector<2x128xf32>
      %539 = arith.mulf %538, %353 : vector<2x128xf32>
      %cst_125 = arith.constant 5.000000e-01 : f32
      %540 = vector.broadcast %cst_125 : f32 to vector<2x128xf32>
      %541 = arith.mulf %540, %539 : vector<2x128xf32>
      %542 = arith.addf %353, %541 : vector<2x128xf32>
      %cst_126 = arith.constant 0.00999999977 : f32
      %543 = vector.broadcast %cst_126 : f32 to vector<2x128xf32>
      %544 = arith.mulf %543, %542 : vector<2x128xf32>
      %cst_127 = arith.constant 5.000000e-01 : f32
      %545 = vector.broadcast %cst_127 : f32 to vector<2x128xf32>
      %546 = arith.mulf %545, %544 : vector<2x128xf32>
      %547 = arith.addf %353, %546 : vector<2x128xf32>
      %cst_128 = arith.constant 0.00999999977 : f32
      %548 = vector.broadcast %cst_128 : f32 to vector<2x128xf32>
      %549 = arith.mulf %548, %547 : vector<2x128xf32>
      %550 = arith.addf %353, %549 : vector<2x128xf32>
      %cst_129 = arith.constant 0.00999999977 : f32
      %551 = vector.broadcast %cst_129 : f32 to vector<2x128xf32>
      %552 = arith.mulf %551, %550 : vector<2x128xf32>
      %cst_130 = arith.constant 2.000000e+00 : f32
      %553 = vector.broadcast %cst_130 : f32 to vector<2x128xf32>
      %554 = arith.mulf %553, %544 : vector<2x128xf32>
      %555 = arith.addf %539, %554 : vector<2x128xf32>
      %cst_131 = arith.constant 2.000000e+00 : f32
      %556 = vector.broadcast %cst_131 : f32 to vector<2x128xf32>
      %557 = arith.mulf %556, %549 : vector<2x128xf32>
      %558 = arith.addf %555, %557 : vector<2x128xf32>
      %559 = arith.addf %558, %552 : vector<2x128xf32>
      %cst_132 = arith.constant 6.000000e+00 : f32
      %560 = vector.broadcast %cst_132 : f32 to vector<2x128xf32>
      %561 = arith.divf %559, %560 : vector<2x128xf32>
      %562 = arith.addf %arg32, %561 : vector<2x128xf32>
      %cst_133 = arith.constant 0.00999999977 : f32
      %563 = vector.broadcast %cst_133 : f32 to vector<2x128xf32>
      %564 = arith.mulf %563, %362 : vector<2x128xf32>
      %cst_134 = arith.constant 5.000000e-01 : f32
      %565 = vector.broadcast %cst_134 : f32 to vector<2x128xf32>
      %566 = arith.mulf %565, %564 : vector<2x128xf32>
      %567 = arith.addf %362, %566 : vector<2x128xf32>
      %cst_135 = arith.constant 0.00999999977 : f32
      %568 = vector.broadcast %cst_135 : f32 to vector<2x128xf32>
      %569 = arith.mulf %568, %567 : vector<2x128xf32>
      %cst_136 = arith.constant 5.000000e-01 : f32
      %570 = vector.broadcast %cst_136 : f32 to vector<2x128xf32>
      %571 = arith.mulf %570, %569 : vector<2x128xf32>
      %572 = arith.addf %362, %571 : vector<2x128xf32>
      %cst_137 = arith.constant 0.00999999977 : f32
      %573 = vector.broadcast %cst_137 : f32 to vector<2x128xf32>
      %574 = arith.mulf %573, %572 : vector<2x128xf32>
      %575 = arith.addf %362, %574 : vector<2x128xf32>
      %cst_138 = arith.constant 0.00999999977 : f32
      %576 = vector.broadcast %cst_138 : f32 to vector<2x128xf32>
      %577 = arith.mulf %576, %575 : vector<2x128xf32>
      %cst_139 = arith.constant 2.000000e+00 : f32
      %578 = vector.broadcast %cst_139 : f32 to vector<2x128xf32>
      %579 = arith.mulf %578, %569 : vector<2x128xf32>
      %580 = arith.addf %564, %579 : vector<2x128xf32>
      %cst_140 = arith.constant 2.000000e+00 : f32
      %581 = vector.broadcast %cst_140 : f32 to vector<2x128xf32>
      %582 = arith.mulf %581, %574 : vector<2x128xf32>
      %583 = arith.addf %580, %582 : vector<2x128xf32>
      %584 = arith.addf %583, %577 : vector<2x128xf32>
      %cst_141 = arith.constant 6.000000e+00 : f32
      %585 = vector.broadcast %cst_141 : f32 to vector<2x128xf32>
      %586 = arith.divf %584, %585 : vector<2x128xf32>
      %587 = arith.addf %arg33, %586 : vector<2x128xf32>
      %cst_142 = arith.constant 0.00999999977 : f32
      %588 = vector.broadcast %cst_142 : f32 to vector<2x1xf32>
      %589 = arith.mulf %588, %305 : vector<2x1xf32>
      %cst_143 = arith.constant 5.000000e-01 : f32
      %590 = vector.broadcast %cst_143 : f32 to vector<2x1xf32>
      %591 = arith.mulf %590, %589 : vector<2x1xf32>
      %592 = arith.addf %305, %591 : vector<2x1xf32>
      %cst_144 = arith.constant 0.00999999977 : f32
      %593 = vector.broadcast %cst_144 : f32 to vector<2x1xf32>
      %594 = arith.mulf %593, %592 : vector<2x1xf32>
      %cst_145 = arith.constant 5.000000e-01 : f32
      %595 = vector.broadcast %cst_145 : f32 to vector<2x1xf32>
      %596 = arith.mulf %595, %594 : vector<2x1xf32>
      %597 = arith.addf %305, %596 : vector<2x1xf32>
      %cst_146 = arith.constant 0.00999999977 : f32
      %598 = vector.broadcast %cst_146 : f32 to vector<2x1xf32>
      %599 = arith.mulf %598, %597 : vector<2x1xf32>
      %600 = arith.addf %305, %599 : vector<2x1xf32>
      %cst_147 = arith.constant 0.00999999977 : f32
      %601 = vector.broadcast %cst_147 : f32 to vector<2x1xf32>
      %602 = arith.mulf %601, %600 : vector<2x1xf32>
      %cst_148 = arith.constant 2.000000e+00 : f32
      %603 = vector.broadcast %cst_148 : f32 to vector<2x1xf32>
      %604 = arith.mulf %603, %594 : vector<2x1xf32>
      %605 = arith.addf %589, %604 : vector<2x1xf32>
      %cst_149 = arith.constant 2.000000e+00 : f32
      %606 = vector.broadcast %cst_149 : f32 to vector<2x1xf32>
      %607 = arith.mulf %606, %599 : vector<2x1xf32>
      %608 = arith.addf %605, %607 : vector<2x1xf32>
      %609 = arith.addf %608, %602 : vector<2x1xf32>
      %cst_150 = arith.constant 6.000000e+00 : f32
      %610 = vector.broadcast %cst_150 : f32 to vector<2x1xf32>
      %611 = arith.divf %609, %610 : vector<2x1xf32>
      %612 = arith.addf %arg19, %611 : vector<2x1xf32>
      %cst_151 = arith.constant 0.00999999977 : f32
      %613 = vector.broadcast %cst_151 : f32 to vector<2x1xf32>
      %614 = arith.mulf %613, %313 : vector<2x1xf32>
      %cst_152 = arith.constant 5.000000e-01 : f32
      %615 = vector.broadcast %cst_152 : f32 to vector<2x1xf32>
      %616 = arith.mulf %615, %614 : vector<2x1xf32>
      %617 = arith.addf %313, %616 : vector<2x1xf32>
      %cst_153 = arith.constant 0.00999999977 : f32
      %618 = vector.broadcast %cst_153 : f32 to vector<2x1xf32>
      %619 = arith.mulf %618, %617 : vector<2x1xf32>
      %cst_154 = arith.constant 5.000000e-01 : f32
      %620 = vector.broadcast %cst_154 : f32 to vector<2x1xf32>
      %621 = arith.mulf %620, %619 : vector<2x1xf32>
      %622 = arith.addf %313, %621 : vector<2x1xf32>
      %cst_155 = arith.constant 0.00999999977 : f32
      %623 = vector.broadcast %cst_155 : f32 to vector<2x1xf32>
      %624 = arith.mulf %623, %622 : vector<2x1xf32>
      %625 = arith.addf %313, %624 : vector<2x1xf32>
      %cst_156 = arith.constant 0.00999999977 : f32
      %626 = vector.broadcast %cst_156 : f32 to vector<2x1xf32>
      %627 = arith.mulf %626, %625 : vector<2x1xf32>
      %cst_157 = arith.constant 2.000000e+00 : f32
      %628 = vector.broadcast %cst_157 : f32 to vector<2x1xf32>
      %629 = arith.mulf %628, %619 : vector<2x1xf32>
      %630 = arith.addf %614, %629 : vector<2x1xf32>
      %cst_158 = arith.constant 2.000000e+00 : f32
      %631 = vector.broadcast %cst_158 : f32 to vector<2x1xf32>
      %632 = arith.mulf %631, %624 : vector<2x1xf32>
      %633 = arith.addf %630, %632 : vector<2x1xf32>
      %634 = arith.addf %633, %627 : vector<2x1xf32>
      %cst_159 = arith.constant 6.000000e+00 : f32
      %635 = vector.broadcast %cst_159 : f32 to vector<2x1xf32>
      %636 = arith.divf %634, %635 : vector<2x1xf32>
      %637 = arith.addf %arg20, %636 : vector<2x1xf32>
      %cst_160 = arith.constant 0.00999999977 : f32
      %638 = vector.broadcast %cst_160 : f32 to vector<2x1xf32>
      %639 = arith.mulf %638, %321 : vector<2x1xf32>
      %cst_161 = arith.constant 5.000000e-01 : f32
      %640 = vector.broadcast %cst_161 : f32 to vector<2x1xf32>
      %641 = arith.mulf %640, %639 : vector<2x1xf32>
      %642 = arith.addf %321, %641 : vector<2x1xf32>
      %cst_162 = arith.constant 0.00999999977 : f32
      %643 = vector.broadcast %cst_162 : f32 to vector<2x1xf32>
      %644 = arith.mulf %643, %642 : vector<2x1xf32>
      %cst_163 = arith.constant 5.000000e-01 : f32
      %645 = vector.broadcast %cst_163 : f32 to vector<2x1xf32>
      %646 = arith.mulf %645, %644 : vector<2x1xf32>
      %647 = arith.addf %321, %646 : vector<2x1xf32>
      %cst_164 = arith.constant 0.00999999977 : f32
      %648 = vector.broadcast %cst_164 : f32 to vector<2x1xf32>
      %649 = arith.mulf %648, %647 : vector<2x1xf32>
      %650 = arith.addf %321, %649 : vector<2x1xf32>
      %cst_165 = arith.constant 0.00999999977 : f32
      %651 = vector.broadcast %cst_165 : f32 to vector<2x1xf32>
      %652 = arith.mulf %651, %650 : vector<2x1xf32>
      %cst_166 = arith.constant 2.000000e+00 : f32
      %653 = vector.broadcast %cst_166 : f32 to vector<2x1xf32>
      %654 = arith.mulf %653, %644 : vector<2x1xf32>
      %655 = arith.addf %639, %654 : vector<2x1xf32>
      %cst_167 = arith.constant 2.000000e+00 : f32
      %656 = vector.broadcast %cst_167 : f32 to vector<2x1xf32>
      %657 = arith.mulf %656, %649 : vector<2x1xf32>
      %658 = arith.addf %655, %657 : vector<2x1xf32>
      %659 = arith.addf %658, %652 : vector<2x1xf32>
      %cst_168 = arith.constant 6.000000e+00 : f32
      %660 = vector.broadcast %cst_168 : f32 to vector<2x1xf32>
      %661 = arith.divf %659, %660 : vector<2x1xf32>
      %662 = arith.addf %arg21, %661 : vector<2x1xf32>
      %663 = arith.mulf %612, %612 : vector<2x1xf32>
      %664 = arith.mulf %637, %637 : vector<2x1xf32>
      %665 = arith.addf %663, %664 : vector<2x1xf32>
      %666 = arith.mulf %662, %662 : vector<2x1xf32>
      %667 = arith.addf %665, %666 : vector<2x1xf32>
      %668 = math.sqrt %667 : vector<2x1xf32>
      %cst_169 = arith.constant 0.00999999977 : f32
      %669 = vector.broadcast %cst_169 : f32 to vector<2x1xf32>
      %670 = arith.mulf %668, %669 : vector<2x1xf32>
      %cst_170 = arith.constant 9.99999997E-7 : f32
      %671 = vector.broadcast %cst_170 : f32 to vector<2x1xf32>
      %672 = arith.addf %668, %671 : vector<2x1xf32>
      %673 = tpu.reciprocal %672 {approx = true} : vector<2x1xf32> -> vector<2x1xf32>
      %674 = arith.mulf %612, %673 : vector<2x1xf32>
      %675 = arith.mulf %637, %673 : vector<2x1xf32>
      %676 = arith.mulf %662, %673 : vector<2x1xf32>
      %677 = math.sin %670 : vector<2x1xf32>
      %678 = math.cos %670 : vector<2x1xf32>
      %cst_171 = arith.constant 1.000000e+00 : f32
      %679 = vector.broadcast %cst_171 : f32 to vector<2x1xf32>
      %680 = arith.subf %679, %678 : vector<2x1xf32>
      %681 = arith.mulf %675, %675 : vector<2x1xf32>
      %682 = arith.mulf %676, %676 : vector<2x1xf32>
      %683 = arith.addf %681, %682 : vector<2x1xf32>
      %684 = arith.mulf %683, %680 : vector<2x1xf32>
      %cst_172 = arith.constant 1.000000e+00 : f32
      %685 = vector.broadcast %cst_172 : f32 to vector<2x1xf32>
      %686 = arith.subf %685, %684 : vector<2x1xf32>
      %cst_173 = arith.constant 0.000000e+00 : f32
      %687 = vector.broadcast %cst_173 : f32 to vector<2x1xf32>
      %688 = arith.subf %687, %676 : vector<2x1xf32>
      %689 = arith.mulf %688, %677 : vector<2x1xf32>
      %690 = arith.mulf %674, %675 : vector<2x1xf32>
      %691 = arith.mulf %690, %680 : vector<2x1xf32>
      %692 = arith.addf %689, %691 : vector<2x1xf32>
      %693 = arith.mulf %675, %677 : vector<2x1xf32>
      %694 = arith.mulf %674, %676 : vector<2x1xf32>
      %695 = arith.mulf %694, %680 : vector<2x1xf32>
      %696 = arith.addf %693, %695 : vector<2x1xf32>
      %697 = arith.mulf %676, %677 : vector<2x1xf32>
      %698 = arith.mulf %674, %675 : vector<2x1xf32>
      %699 = arith.mulf %698, %680 : vector<2x1xf32>
      %700 = arith.addf %697, %699 : vector<2x1xf32>
      %701 = arith.mulf %674, %674 : vector<2x1xf32>
      %702 = arith.mulf %676, %676 : vector<2x1xf32>
      %703 = arith.addf %701, %702 : vector<2x1xf32>
      %704 = arith.mulf %703, %680 : vector<2x1xf32>
      %cst_174 = arith.constant 1.000000e+00 : f32
      %705 = vector.broadcast %cst_174 : f32 to vector<2x1xf32>
      %706 = arith.subf %705, %704 : vector<2x1xf32>
      %cst_175 = arith.constant 0.000000e+00 : f32
      %707 = vector.broadcast %cst_175 : f32 to vector<2x1xf32>
      %708 = arith.subf %707, %674 : vector<2x1xf32>
      %709 = arith.mulf %708, %677 : vector<2x1xf32>
      %710 = arith.mulf %675, %676 : vector<2x1xf32>
      %711 = arith.mulf %710, %680 : vector<2x1xf32>
      %712 = arith.addf %709, %711 : vector<2x1xf32>
      %cst_176 = arith.constant 0.000000e+00 : f32
      %713 = vector.broadcast %cst_176 : f32 to vector<2x1xf32>
      %714 = arith.subf %713, %675 : vector<2x1xf32>
      %715 = arith.mulf %714, %677 : vector<2x1xf32>
      %716 = arith.mulf %674, %676 : vector<2x1xf32>
      %717 = arith.mulf %716, %680 : vector<2x1xf32>
      %718 = arith.addf %715, %717 : vector<2x1xf32>
      %719 = arith.mulf %674, %677 : vector<2x1xf32>
      %720 = arith.mulf %675, %676 : vector<2x1xf32>
      %721 = arith.mulf %720, %680 : vector<2x1xf32>
      %722 = arith.addf %719, %721 : vector<2x1xf32>
      %723 = arith.mulf %674, %674 : vector<2x1xf32>
      %724 = arith.mulf %675, %675 : vector<2x1xf32>
      %725 = arith.addf %723, %724 : vector<2x1xf32>
      %726 = arith.mulf %725, %680 : vector<2x1xf32>
      %cst_177 = arith.constant 1.000000e+00 : f32
      %727 = vector.broadcast %cst_177 : f32 to vector<2x1xf32>
      %728 = arith.subf %727, %726 : vector<2x1xf32>
      %729 = arith.mulf %arg22, %686 : vector<2x1xf32>
      %730 = arith.mulf %arg23, %700 : vector<2x1xf32>
      %731 = arith.addf %729, %730 : vector<2x1xf32>
      %732 = arith.mulf %arg24, %718 : vector<2x1xf32>
      %733 = arith.addf %731, %732 : vector<2x1xf32>
      %734 = arith.mulf %arg22, %692 : vector<2x1xf32>
      %735 = arith.mulf %arg23, %706 : vector<2x1xf32>
      %736 = arith.addf %734, %735 : vector<2x1xf32>
      %737 = arith.mulf %arg24, %722 : vector<2x1xf32>
      %738 = arith.addf %736, %737 : vector<2x1xf32>
      %739 = arith.mulf %arg22, %696 : vector<2x1xf32>
      %740 = arith.mulf %arg23, %712 : vector<2x1xf32>
      %741 = arith.addf %739, %740 : vector<2x1xf32>
      %742 = arith.mulf %arg24, %728 : vector<2x1xf32>
      %743 = arith.addf %741, %742 : vector<2x1xf32>
      %744 = arith.mulf %arg25, %686 : vector<2x1xf32>
      %745 = arith.mulf %arg26, %700 : vector<2x1xf32>
      %746 = arith.addf %744, %745 : vector<2x1xf32>
      %747 = arith.mulf %arg27, %718 : vector<2x1xf32>
      %748 = arith.addf %746, %747 : vector<2x1xf32>
      %749 = arith.mulf %arg25, %692 : vector<2x1xf32>
      %750 = arith.mulf %arg26, %706 : vector<2x1xf32>
      %751 = arith.addf %749, %750 : vector<2x1xf32>
      %752 = arith.mulf %arg27, %722 : vector<2x1xf32>
      %753 = arith.addf %751, %752 : vector<2x1xf32>
      %754 = arith.mulf %arg25, %696 : vector<2x1xf32>
      %755 = arith.mulf %arg26, %712 : vector<2x1xf32>
      %756 = arith.addf %754, %755 : vector<2x1xf32>
      %757 = arith.mulf %arg27, %728 : vector<2x1xf32>
      %758 = arith.addf %756, %757 : vector<2x1xf32>
      %759 = arith.mulf %arg28, %686 : vector<2x1xf32>
      %760 = arith.mulf %arg29, %700 : vector<2x1xf32>
      %761 = arith.addf %759, %760 : vector<2x1xf32>
      %762 = arith.mulf %arg30, %718 : vector<2x1xf32>
      %763 = arith.addf %761, %762 : vector<2x1xf32>
      %764 = arith.mulf %arg28, %692 : vector<2x1xf32>
      %765 = arith.mulf %arg29, %706 : vector<2x1xf32>
      %766 = arith.addf %764, %765 : vector<2x1xf32>
      %767 = arith.mulf %arg30, %722 : vector<2x1xf32>
      %768 = arith.addf %766, %767 : vector<2x1xf32>
      %769 = arith.mulf %arg28, %696 : vector<2x1xf32>
      %770 = arith.mulf %arg29, %712 : vector<2x1xf32>
      %771 = arith.addf %769, %770 : vector<2x1xf32>
      %772 = arith.mulf %arg30, %728 : vector<2x1xf32>
      %773 = arith.addf %771, %772 : vector<2x1xf32>
      %774 = tpu.concatenate %462, %487, %512, %387, %412, %437, %733, %738, %743, %748, %753, %758, %763, %768, %773, %612 in 1 : vector<2x1xf32>, vector<2x1xf32>, vector<2x1xf32>, vector<2x1xf32>, vector<2x1xf32>, vector<2x1xf32>, vector<2x1xf32>, vector<2x1xf32>, vector<2x1xf32>, vector<2x1xf32>, vector<2x1xf32>, vector<2x1xf32>, vector<2x1xf32>, vector<2x1xf32>, vector<2x1xf32>, vector<2x1xf32> -> vector<2x16xf32>
      %775 = tpu.concatenate %637, %662, %262, %263, %264, %265, %266, %267 in 1 : vector<2x1xf32>, vector<2x1xf32>, vector<2x1xf32>, vector<2x1xf32>, vector<2x1xf32>, vector<2x1xf32>, vector<2x1xf32>, vector<2x1xf32> -> vector<2x8xf32>
      %776 = tpu.concatenate %774, %775 in 1 : vector<2x16xf32>, vector<2x8xf32> -> vector<2x24xf32>
      %777 = arith.index_cast %arg12 : i32 to index
      %c0_178 = arith.constant 0 : index
      %c0_179 = arith.constant 0 : index
      %778 = vector.load %arg6[%777, %c0_178, %c0_179] : memref<8x2x24xf32, #tpu.memory_space<vmem>>, vector<1x2x24xf32>
      %779 = vector.shape_cast %778 : vector<1x2x24xf32> to vector<2x24xf32>
      %780 = vector.shape_cast %776 : vector<2x24xf32> to vector<1x2x24xf32>
      tpu.vector_store %arg6[%777, %c0_178, %c0_179], %780 {strides = array<i32>} : memref<8x2x24xf32, #tpu.memory_space<vmem>>, vector<1x2x24xf32>,
      %781 = tpu.concatenate %537, %562, %587 in 0 : vector<2x128xf32>, vector<2x128xf32>, vector<2x128xf32> -> vector<6x128xf32>
      %782 = arith.index_cast %arg12 : i32 to index
      %c0_180 = arith.constant 0 : index
      %c0_181 = arith.constant 0 : index
      %783 = vector.load %arg7[%782, %c0_180, %c0_181] : memref<8x6x128xf32, #tpu.memory_space<vmem>>, vector<1x6x128xf32>
      %784 = vector.shape_cast %783 : vector<1x6x128xf32> to vector<6x128xf32>
      %785 = vector.shape_cast %781 : vector<6x128xf32> to vector<1x6x128xf32>
      tpu.vector_store %arg7[%782, %c0_180, %c0_181], %785 {strides = array<i32>} : memref<8x6x128xf32, #tpu.memory_space<vmem>>, vector<1x6x128xf32>,
      %786 = tpu.concatenate %157, %158, %159 in 0 : vector<2x128xf32>, vector<2x128xf32>, vector<2x128xf32> -> vector<6x128xf32>
      %787 = arith.index_cast %arg12 : i32 to index
      %c0_182 = arith.constant 0 : index
      %c0_183 = arith.constant 0 : index
      %788 = vector.load %arg8[%787, %c0_182, %c0_183] : memref<8x6x128xf32, #tpu.memory_space<vmem>>, vector<1x6x128xf32>
      %789 = vector.shape_cast %788 : vector<1x6x128xf32> to vector<6x128xf32>
      %790 = vector.shape_cast %786 : vector<6x128xf32> to vector<1x6x128xf32>
      tpu.vector_store %arg8[%787, %c0_182, %c0_183], %790 {strides = array<i32>} : memref<8x6x128xf32, #tpu.memory_space<vmem>>, vector<1x6x128xf32>,
      %791 = tpu.concatenate %184, %188, %192 in 0 : vector<2x128xf32>, vector<2x128xf32>, vector<2x128xf32> -> vector<6x128xf32>
      %792 = arith.index_cast %arg12 : i32 to index
      %c0_184 = arith.constant 0 : index
      %c0_185 = arith.constant 0 : index
      %793 = vector.load %arg9[%792, %c0_184, %c0_185] : memref<8x6x128xf32, #tpu.memory_space<vmem>>, vector<1x6x128xf32>
      %794 = vector.shape_cast %793 : vector<1x6x128xf32> to vector<6x128xf32>
      %795 = vector.shape_cast %791 : vector<6x128xf32> to vector<1x6x128xf32>
      tpu.vector_store %arg9[%792, %c0_184, %c0_185], %795 {strides = array<i32>} : memref<8x6x128xf32, #tpu.memory_space<vmem>>, vector<1x6x128xf32>,
      scf.yield %462, %487, %512, %387, %412, %437, %612, %637, %662, %733, %738, %743, %748, %753, %758, %763, %768, %773, %537, %562, %587, %344, %353, %362 : vector<2x1xf32>, vector<2x1xf32>, vector<2x1xf32>, vector<2x1xf32>, vector<2x1xf32>, vector<2x1xf32>, vector<2x1xf32>, vector<2x1xf32>, vector<2x1xf32>, vector<2x1xf32>, vector<2x1xf32>, vector<2x1xf32>, vector<2x1xf32>, vector<2x1xf32>, vector<2x1xf32>, vector<2x1xf32>, vector<2x1xf32>, vector<2x1xf32>, vector<2x128xf32>, vector<2x128xf32>, vector<2x128xf32>, vector<2x128xf32>, vector<2x128xf32>, vector<2x128xf32>
    }
    %c8_i32_12 = arith.constant 8 : i32
    %37 = tpu.concatenate %36#0, %36#1, %36#2, %36#3, %36#4, %36#5, %36#6, %36#7, %36#8, %36#9, %36#10, %36#11, %36#12, %36#13, %36#14, %36#15 in 1 : vector<2x1xf32>, vector<2x1xf32>, vector<2x1xf32>, vector<2x1xf32>, vector<2x1xf32>, vector<2x1xf32>, vector<2x1xf32>, vector<2x1xf32>, vector<2x1xf32>, vector<2x1xf32>, vector<2x1xf32>, vector<2x1xf32>, vector<2x1xf32>, vector<2x1xf32>, vector<2x1xf32>, vector<2x1xf32> -> vector<2x16xf32>
    %38 = tpu.concatenate %36#16, %36#17 in 1 : vector<2x1xf32>, vector<2x1xf32> -> vector<2x2xf32>
    %39 = tpu.concatenate %37, %38 in 1 : vector<2x16xf32>, vector<2x2xf32> -> vector<2x18xf32>
    %c0_13 = arith.constant 0 : index
    %c0_14 = arith.constant 0 : index
    %40 = vector.load %arg10[%c0_13, %c0_14] : memref<2x18xf32, #tpu.memory_space<vmem>>, vector<2x18xf32>
    tpu.vector_store %arg10[%c0_13, %c0_14], %39 {strides = array<i32>} : memref<2x18xf32, #tpu.memory_space<vmem>>, vector<2x18xf32>,
    %41 = tpu.concatenate %36#18, %36#19, %36#20, %36#21, %36#22, %36#23 in 0 : vector<2x128xf32>, vector<2x128xf32>, vector<2x128xf32>, vector<2x128xf32>, vector<2x128xf32>, vector<2x128xf32> -> vector<12x128xf32>
    %c0_15 = arith.constant 0 : index
    %c0_16 = arith.constant 0 : index
    %42 = vector.load %arg11[%c0_15, %c0_16] : memref<12x128xf32, #tpu.memory_space<vmem>>, vector<12x128xf32>
    tpu.vector_store %arg11[%c0_15, %c0_16], %41 {strides = array<i32>} : memref<12x128xf32, #tpu.memory_space<vmem>>, vector<12x128xf32>,
    return
  }
  func.func @transform_0(%arg0: i32) -> (i32, i32, i32) {
    %c0_i32 = arith.constant 0 : i32
    %c0_i32_0 = arith.constant 0 : i32
    %c0_i32_1 = arith.constant 0 : i32
    return %arg0, %c0_i32, %c0_i32_0 : i32, i32, i32
  }
  func.func @transform_1(%arg0: i32) -> (i32, i32, i32) {
    %c0_i32 = arith.constant 0 : i32
    %c0_i32_0 = arith.constant 0 : i32
    %c0_i32_1 = arith.constant 0 : i32
    %c0_i32_2 = arith.constant 0 : i32
    return %c0_i32, %c0_i32_0, %c0_i32_1 : i32, i32, i32
  }
  func.func @transform_2(%arg0: i32) -> (i32, i32) {
    %c0_i32 = arith.constant 0 : i32
    %c0_i32_0 = arith.constant 0 : i32
    %c0_i32_1 = arith.constant 0 : i32
    return %c0_i32, %c0_i32_0 : i32, i32
  }
  func.func @transform_3(%arg0: i32) -> (i32, i32) {
    %c0_i32 = arith.constant 0 : i32
    %c0_i32_0 = arith.constant 0 : i32
    %c0_i32_1 = arith.constant 0 : i32
    return %c0_i32, %c0_i32_0 : i32, i32
  }
  func.func @transform_4(%arg0: i32) -> (i32, i32) {
    %c0_i32 = arith.constant 0 : i32
    %c0_i32_0 = arith.constant 0 : i32
    %c0_i32_1 = arith.constant 0 : i32
    return %c0_i32, %c0_i32_0 : i32, i32
  }
  func.func @transform_5(%arg0: i32) -> (i32, i32, i32) {
    %c0_i32 = arith.constant 0 : i32
    %c0_i32_0 = arith.constant 0 : i32
    %c0_i32_1 = arith.constant 0 : i32
    return %arg0, %c0_i32, %c0_i32_0 : i32, i32, i32
  }
  func.func @transform_6(%arg0: i32) -> (i32, i32, i32) {
    %c0_i32 = arith.constant 0 : i32
    %c0_i32_0 = arith.constant 0 : i32
    %c0_i32_1 = arith.constant 0 : i32
    return %arg0, %c0_i32, %c0_i32_0 : i32, i32, i32
  }
  func.func @transform_7(%arg0: i32) -> (i32, i32, i32) {
    %c0_i32 = arith.constant 0 : i32
    %c0_i32_0 = arith.constant 0 : i32
    %c0_i32_1 = arith.constant 0 : i32
    return %arg0, %c0_i32, %c0_i32_0 : i32, i32, i32
  }
  func.func @transform_8(%arg0: i32) -> (i32, i32, i32) {
    %c0_i32 = arith.constant 0 : i32
    %c0_i32_0 = arith.constant 0 : i32
    %c0_i32_1 = arith.constant 0 : i32
    return %arg0, %c0_i32, %c0_i32_0 : i32, i32, i32
  }
}

</mosaic_0001>

<bundles_post_ra>
// kernel: tpu_custom_call.1
= control target key start
LH: loop header
LB: loop body
LE: loop exit
PB: predicated region body
PF: predicated region fallthrough
CT: control target
= control target key end

     0   :  { %s10278_s0 = inlined_call_operand.vmem [shape: f32[24,2,2], index: 0, kind: input, shape index: {}]   ;;  %s10279_s1 = inlined_call_operand.vmem [shape: f32[2,16,16], index: 1, kind: input, shape index: {}]   ;;  %s10280_s2 = inlined_call_operand.vmem [shape: f32[128,4], index: 2, kind: input, shape index: {}]   ;;  %s10281_s3 = inlined_call_operand.vmem [shape: f32[1,128], index: 3, kind: input, shape index: {}]   ;;  %s10282_s4 = inlined_call_operand.vmem [shape: f32[6,128], index: 4, kind: input, shape index: {}]   ;;  %s10283_s5 = inlined_call_operand.hbm [shape: f32[24,2,24], index: 5, kind: output, shape index: {0}]   ;;  %s10284_s6 = inlined_call_operand.vmem [shape: f32[24,6,128], index: 6, kind: output, shape index: {1}]   ;;  %s10285_s7 = inlined_call_operand.vmem [shape: f32[24,6,128], index: 7, kind: output, shape index: {2}]   ;;  %s10286_s8 = inlined_call_operand.vmem [shape: f32[24,6,128], index: 8, kind: output, shape index: {3}]  }
   0x1   :  { %10387 = sst [smem:[#allocation102_spill]] %s10279_s1 }
   0x2   :  { %14 = vsyncpa [#allocation5], 0 }
   0x3   :  { %16 = vsyncpa [#allocation5 + $0x1], 0  ;;  %s6625_s27 = smov 0   ;;  %s6627_s28 = smov 0  }
   0x4   :  { %s6629_s29 = smov 0   ;;  %s6631_s30 = smov 0  }
   0x5 LB: > { %s6646_s9 = sadd.s32 4294967295, %s6418_s30   ;;  %s5458_s10 = sadd.s32 4294967294, %s6418_s30   ;;  %s6418_s30 = sphi %s6631_s30, %s10816_s30   ;;  %s6414_s29 = sphi %s6629_s29, %s10815_s29   ;;  %s6410_s28 = sphi %s6627_s28, %s10814_s28   ;;  %s6406_s27 = sphi %s6625_s27, %s10813_s27  }
   0x6   : > { %s6650_s11 = sadd.s32 1, %s6418_s30   ;;  %s139_s12 = sadd.s32 1, %s6414_s29 }
   0x7   : > { %s136_s13 = ssub.s32 %s6418_s30, %s6650_s11  ;;  %p149_p0 = scmp.ne.s32.totalorder %s6414_s29, %s6410_s28 }
   0x8   : > { %p137_p1 = scmp.eq.s32.totalorder %s136_s13, 0  ;;  %p150_p2 = scmp.eq.s32.totalorder %s6646_s9, 2 }
   0x9   : > { %p155_p3 = scmp.ne.s32.totalorder %s6410_s28, %s6406_s27  ;;  %p156_p4 = scmp.eq.s32.totalorder %s5458_s10, 2 }
   0xa   : > { %s6661_s14 = scalar_select %p137_p1, %s6414_s29, %s139_s12  }
   0xb   : > { %p6663_p5 = por %p150_p2, %p149_p0  ;;  %p6667_p6 = por %p156_p4, %p155_p3 }
   0xc   : > { %10388 = sst [smem:[#allocation7_spill]] %s6661_s14  ;;  %p5461_p7 = scmp.ge.s32.totalorder %s6418_s30, 1 }
   0xd   : > { %p273_p8 = scmp.lt.s32.totalorder %s6418_s30, 4 }
   0xf   : > { %p274_p9 = pnand %p5461_p7, %p273_p8 }
  0x11   : > { %277 = sbr.rel (%p274_p9) target bundleno = 2996 (0xbb4), region = 40 }
  0x18   : > { %s10287_s17 = sand.u32 1, %s6410_s28   ;;  %s5463_s18 = sshll.u32 %s6646_s9, 3  ;;  %v10288_v3 = vlaneseq  ;;  %v6694_v5 = vld [vmem:[%s10280_s2] sm:$0xff]  ;;  %v6699_v6 = vld [vmem:[%s10280_s2 + $0x8] sm:$0xff]  ;;  %v6706_v8 = vld [vmem:[%s10280_s2 + $0x10] sm:$0xff] }
  0x19   : > { %s10391_s1 = sld [smem:[#allocation102_spill]]  ;;  %s6686_s25 = sshll.u32 %s10287_s17, 4  ;;  %10392 = vst [vmem:[#allocation8_spill] sm:$0xff] %v6694_v5  ;;  %10393 = vst [vmem:[#allocation9_spill] sm:$0xff] %v6699_v6  ;;  %v6711_v9 = vld [vmem:[%s10280_s2 + $0x18] sm:$0xff]  ;;  %v6716_v10 = vld [vmem:[%s10280_s2 + $0x20] sm:$0xff] }
  0x1a   : > { %p323_p10 = scmp.lt.s32.totalorder %s5463_s18, 23  ;;  %10395 = vst [vmem:[#allocation11_spill] sm:$0xff] %v6706_v8  ;;  %10396 = vst [vmem:[#allocation12_spill] sm:$0xff] %v6711_v9  ;;  %v6721_v12 = vand.u32 127, %v10288_v3  ;;  %v6726_v13 = vld [vmem:[%s10280_s2 + $0x28] sm:$0xff]  ;;  %v6731_v14 = vld [vmem:[%s10280_s2 + $0x30] sm:$0xff] }
  0x1b   : > { %10397 = vst [vmem:[#allocation13_spill] sm:$0xff] %v6716_v10  ;;  %10400 = vst [vmem:[#allocation16_spill] sm:$0xff] %v6726_v13  ;;  %v6736_v15 = vld [vmem:[%s10280_s2 + $0x38] sm:$0xff]  ;;  %v6741_v16 = vld [vmem:[%s10280_s2 + $0x40] sm:$0xff]  ;;  %p5471_p11 = scmp.ne.s32.totalorder %s6646_s9, 0 }
  0x1c   : > { %10399 = vst [vmem:[#allocation15_spill] sm:$0xff] %v6721_v12  ;;  %s10818_s18 = smov (!%p323_p10, %s5463_s18), 23  ;;  %10401 = vst [vmem:[#allocation17_spill] sm:$0xff] %v6731_v14  ;;  %v6746_v17 = vld [vmem:[%s10280_s2 + $0x48] sm:$0xff]  ;;  %v6751_v18 = vld [vmem:[%s10280_s2 + $0x50] sm:$0xff]  ;;  %vm405_vm0 = vcmask (!%p5471_p11), 7168  }
  0x1d   : > { %10402 = vst [vmem:[#allocation18_spill] sm:$0xff] %v6736_v15  ;;  %10403 = vst [vmem:[#allocation19_spill] sm:$0xff] %v6741_v16  ;;  %s5464_s19 = sshll.u32 %s10818_s18, 1  ;;  %s6753_s20 = sshll.u32 %s10818_s18, 3  ;;  %v6758_v19 = vld [vmem:[%s10280_s2 + $0x58] sm:$0xff]  ;;  %v6763_v20 = vld [vmem:[%s10280_s2 + $0x60] sm:$0xff] }
  0x1e   : > { %10404 = vst [vmem:[#allocation20_spill] sm:$0xff] %v6746_v17  ;;  %10405 = vst [vmem:[#allocation21_spill] sm:$0xff] %v6751_v18  ;;  %v6768_v21 = vld [vmem:[%s10280_s2 + $0x68] sm:$0xff]  ;;  %s6773_s13 = scalar_lea.vmem %s10278_s0, %s5464_s19  ;;  %v6782_v22 = vld [vmem:[%s10280_s2 + $0x70] sm:$0xff]  ;;  %376 = sbr.rel (%p5471_p11) target bundleno = 149 (0x95), region = 44  ;;  %v6520_v25 = vmov (!%p5471_p11), 1.0  }
  0x1f   : > { %v348_v0 = vld [vmem:[%s10391_s1] sm:$0xff]  ;;  %v349_v1 = vld [vmem:[%s10391_s1 + $0x8] sm:$0xff]  ;;  %v350_v2 = vld [vmem:[%s10391_s1 + $0x10] sm:$0xff]  ;;  %10406 = vst [vmem:[#allocation22_spill] sm:$0xff] %v6758_v19  ;;  %v406_v26 = vsel (!%p5471_p11), %vm405_vm0, 0.0, %v6520_v25  ;;  %s6521_s23 = smov (!%p5471_p11), 16  }
  0x20   : > { %v351_v4 = vld [vmem:[%s10391_s1 + $0x18] sm:$0xff]  ;;  %v6701_v7 = vpack.c.bf16 %v349_v1, %v348_v0  ;;  %10407 = vst [vmem:[#allocation23_spill] sm:$0xff] %v6763_v20  ;;  %10408 = vst [vmem:[#allocation24_spill] sm:$0xff] %v6768_v21  ;;  %v6792_v24 = vld [vmem:[%s10281_s3] ss:$0 sm:$0xff]  ;;  %408 = vrot.lane.b32.xlu0 (!%p5471_p11), %v406_v26, %s6521_s23  ;;  %vm416_vm1 = vcmask (!%p5471_p11), 1045504  }
  0x21   : > { %v6718_v11 = vpack.c.bf16 %v351_v4, %v350_v2  ;;  %10409 = vst [vmem:[#allocation25_spill] sm:$0xff] %v6782_v22  ;;  %v6787_v23 = vld [vmem:[%s10280_s2 + $0x78] sm:$0xff]  ;;  %10411 = vst [vmem:[#allocation27_spill] sm:$0xff] %v6792_v24  ;;  %v415_v27 = vld [vmem:[%s10282_s4] sm:$0x3f] (!%p5471_p11)  ;;  %v6522_v29 = vmov (!%p5471_p11), 0.0  }
  0x22   : > { %10394 = vst [vmem:[#allocation10_spill] sm:$0xff] %v6701_v7  ;;  %10410 = vst [vmem:[#allocation26_spill] sm:$0xff] %v6787_v23  ;;  %v417_v28 = vsel (!%p5471_p11), %vm416_vm1, %v415_v27, 0.0  ;;  %vm377_vm2 = vcmask (!%p5471_p11), 15360   ;;  %v6523_v30 = vmov (!%p5471_p11), 0.2  }
  0x23   : > { %10398 = vst [vmem:[#allocation14_spill] sm:$0xff] %v6718_v11  ;;  %419 = vst [vmem:[#allocation3 + $0x8] sm:$0xf] (!%p5471_p11), %v6522_v29  ;;  %v378_v31 = vsel (!%p5471_p11), %vm377_vm2, 0.0, %v6523_v30  ;;  %vm379_vm3 = vcmask (!%p5471_p11), 23552   ;;  %vm381_vm4 = vcmask (!%p5471_p11), 31744  }
  0x24   : > { %418 = vst [vmem:[#allocation3] sm:$0xff] (!%p5471_p11), %v417_v28  ;;  %v380_v32 = vsel (!%p5471_p11), %vm379_vm3, %v378_v31, 0.0  ;;  %vm383_vm5 = vcmask (!%p5471_p11), 39936   ;;  %vm385_vm6 = vcmask (!%p5471_p11), 48128   ;;  %vm387_vm7 = vcmask (!%p5471_p11), 56320  }
  0x25   : > { %v382_v33 = vsel %vm381_vm4, %v380_v32, 0.0  ;;  %vm389_vm8 = vcmask 64512   ;;  %vm391_vm9 = vcmask 72704   ;;  %vm393_vm10 = vcmask 80896  }
  0x26   : > { %v384_v34 = vsel %vm383_vm5, %v382_v33, 0.0  ;;  %vm395_vm11 = vcmask 89088   ;;  %vm397_vm12 = vcmask 97280   ;;  %vm399_vm13 = vcmask 105472  }
  0x27   : > { %v386_v35 = vsel %vm385_vm6, %v384_v34, 0.0  ;;  %vm401_vm14 = vcmask 113664   ;;  %vm403_vm15 = vcmask 121856   ;;  %vm411_vm0 = vcmask 130048  }
  0x28   : > { %v388_v36 = vsel %vm387_vm7, %v386_v35, 0.0  ;;  %vm413_vm1 = vcmask 140288  }
  0x29   : > { %v390_v37 = vsel %vm389_vm8, %v388_v36, 0.0 }
  0x2a   : > { %v392_v38 = vsel %vm391_vm9, %v390_v37, 1.0 }
  0x2b   : > { %v394_v39 = vsel %vm393_vm10, %v392_v38, 0.0 }
  0x2c   : > { %v396_v40 = vsel %vm395_vm11, %v394_v39, 0.0 }
  0x2d   : > { %v398_v41 = vsel %vm397_vm12, %v396_v40, 0.0 }
  0x2e   : > { %v400_v42 = vsel %vm399_vm13, %v398_v41, 1.0 }
  0x2f   : > { %v402_v43 = vsel %vm401_vm14, %v400_v42, 0.0 }
  0x30   : > { %v404_v44 = vsel %vm403_vm15, %v402_v43, 0.0 }
  0x92   : > { %v409_v45 = vpop.permute.xlu0 %408 }
  0x93   : > { %v412_v46 = vsel %vm411_vm0, %v404_v44, %v409_v45 }
  0x94   : > { %414 = vst.msk [vmem:[#allocation2] sm:$0x3] %vm413_vm1, %v412_v46 }
  0x95 PF: > { %s6524_s10 = smov 115   ;;  %s6525_s19 = smov 118  }
  0x96   : > { %s6526_s18 = smov 114   ;;  %s6527_s21 = smov 117  }
  0x97   : > { %s6528_s22 = smov 111   ;;  %s6529_s23 = smov 112  }
  0x98   : > { %s6855_s24 = smov 0  }
  0x9a   : > { %v422_v49 = vld [vmem:[#allocation3 + $0x8] sm:$0xf]  }
  0x9b   : > { %v420_v47 = vld [vmem:[#allocation2] sm:$0x3]   ;;  %v421_v48 = vld [vmem:[#allocation3] sm:$0xff]   ;;  %v446_v51 = vrot.slane %v422_v49, 2  }
  0x9c   : > { %430 = vrot.lane.b32.xlu1 %v420_v47, %s6524_s10  ;;  %424 = vrot.lane.b32.xlu0 %v420_v47, %s6525_s19  ;;  %v443_v50 = vrot.slane %v421_v48, 6   ;;  %v10412_v58 = vmov %v421_v48  ;;  %v10413_v59 = vmov %v421_v48  ;;  %v10414_v60 = vmov %v420_v47 }
  0x9d   : > { %v10415_v61 = vmov %v420_v47  ;;  %v10416_v62 = vmov %v420_v47  ;;  %v10417_v63 = vmov %v420_v47  ;;  %v10418_v0 = vmov %v420_v47 }
  0x9e   : > { %v10419_v1 = vmov %v420_v47  ;;  %v10420_v2 = vmov %v420_v47  ;;  %v10421_v4 = vmov %v420_v47  ;;  %v10422_v25 = vmov %v420_v47 }
  0x9f   : > { %v10423_v26 = vmov %v420_v47  ;;  %v10424_v27 = vmov %v420_v47 }
  0xa0   : > { %433 = vrot.lane.b32.xlu1 %v420_v47, %s6526_s18  ;;  %427 = vrot.lane.b32.xlu0 %v420_v47, %s6527_s21 }
  0xa4   : > { %439 = vrot.lane.b32.xlu1 %v420_v47, %s6528_s22  ;;  %436 = vrot.lane.b32.xlu0 %v420_v47, %s6529_s23 }
 0x10e   : > { %v431_v52 = vpop.permute.xlu1 %430   ;;  %v425_v53 = vpop.permute.xlu0 %424  }
 0x112   : > { %v434_v54 = vpop.permute.xlu1 %433   ;;  %v428_v55 = vpop.permute.xlu0 %427  }
 0x116   : > { %v440_v56 = vpop.permute.xlu1 %439   ;;  %v437_v57 = vpop.permute.xlu0 %436  }
 0x117 LB: >> { %v10425_v12 = vld [vmem:[#allocation15_spill] sm:$0xff]  ;;  %v10426_v11 = vld [vmem:[#allocation14_spill] sm:$0xff]  ;;  %10428 = vst [vmem:[#allocation28_spill] sm:$0xff] %v6422_v51  ;;  %10429 = vst [vmem:[#allocation29_spill] sm:$0xff] %v6426_v49  ;;  %v483_v28 = vadd.f32 0.8, %v6438_v59  ;;  %v10452_v3 = vlaneseq  ;;  %s10749_s12 = scalar_lea.vmem %s10285_s7, %s6753_s20  ;;  %s10753_s1 = scalar_lea.vmem %s10286_s8, %s6753_s20  ;;  %v6430_v50 = vphi %v443_v50, %v10794_v50   ;;  %v6426_v49 = vphi %v422_v49, %v10793_v49   ;;  %v6422_v51 = vphi %v446_v51, %v10792_v51   ;;  %s6518_s24 = sphi %s6855_s24, %s453_s24   ;;  %v6514_v47 = vphi %v420_v47, %v10084_v47   ;;  %v6510_v27 = vphi %v10424_v27, %v10081_v27   ;;  %v6506_v26 = vphi %v10423_v26, %v10090_v26   ;;  %v6502_v25 = vphi %v10422_v25, %v10808_v25   ;;  %v6498_v4 = vphi %v10421_v4, %v10807_v4   ;;  %v6494_v2 = vphi %v10420_v2, %v9891_v2   ;;  %v6490_v1 = vphi %v10419_v1, %v10806_v1   ;;  %v6486_v0 = vphi %v10418_v0, %v10805_v0   ;;  %v6482_v63 = vphi %v10417_v63, %v10804_v63   ;;  %v6478_v62 = vphi %v10416_v62, %v10803_v62   ;;  %v6474_v53 = vphi %v425_v53, %v10802_v53   ;;  %v6470_v55 = vphi %v428_v55, %v10801_v55   ;;  %v6466_v61 = vphi %v10415_v61, %v10800_v61   ;;  %v6462_v52 = vphi %v431_v52, %v10799_v52   ;;  %v6458_v54 = vphi %v434_v54, %v10798_v54   ;;  %v6454_v60 = vphi %v10414_v60, %v10797_v60   ;;  %v6450_v57 = vphi %v437_v57, %v10796_v57   ;;  %v6446_v56 = vphi %v440_v56, %v10795_v56   ;;  %v6442_v48 = vphi %v421_v48, %v10061_v48   ;;  %v6438_v59 = vphi %v10413_v59, %v10064_v59   ;;  %v6434_v58 = vphi %v10412_v58, %v4414_v58  }
 0x118   : >> { %v10427_v7 = vld [vmem:[#allocation10_spill] sm:$0xff]  ;;  %10430 = vst [vmem:[#allocation30_spill] sm:$0xff] %v6430_v50  ;;  %10431 = vst [vmem:[#allocation31_spill] sm:$0xff] %v6434_v58  ;;  %5738 = vmatprep.subr.bf16.mxu1 %v10426_v11  ;;  %v481_v43 = vadd.f32 0.8, %v6442_v48  ;;  %s10381_s26 = smov 125  }
 0x119   : >> { %10432 = vst [vmem:[#allocation32_spill] sm:$0xff] %v6438_v59  ;;  %10433 = vst [vmem:[#allocation33_spill] sm:$0xff] %v6442_v48  ;;  %5704 = vmatprep.subr.bf16.mxu0 %v10427_v7  ;;  %5739 = vmatpush3.bf16.msra.mxu1 %v10426_v11  ;;  %v484_v29 = vmul.f32 10.0, %v483_v28  ;;  %v6938_v31 = vshrl.u32 %v10452_v3, 7  ;;  %v10454_v11 = vmov 0.0   ;;  %s6533_s10 = smov 122  }
 0x11a   : >> { %10434 = vst [vmem:[#allocation34_spill] sm:$0xff] %v6446_v56  ;;  %10435 = vst [vmem:[#allocation35_spill] sm:$0xff] %v6450_v57  ;;  %5705 = vmatpush3.bf16.msra.mxu0 %v10427_v7  ;;  %v6985_v44 = vmul.f32 10.0, %v481_v43  ;;  %s9557_s19 = sshll.u32 %s6518_s24, 3  ;;  %s6536_s18 = smov 3  }
 0x11b   : >> { %10436 = vst [vmem:[#allocation36_spill] sm:$0xff] %v6454_v60  ;;  %10437 = vst [vmem:[#allocation37_spill] sm:$0xff] %v6458_v54  ;;  %v5860_v30 = vtrunc.f32 %v484_v29  ;;  %v568_v33 = vsub.s32 3, %v6938_v31  ;;  %v501_v34 = vsub.s32 2, %v6938_v31  ;;  %s5089_s23 = scalar_lea.vmem %s10749_s12, %s9557_s19  ;;  %s6537_s14 = smov 6  }
 0x11c   : >> { %10438 = vst [vmem:[#allocation38_spill] sm:$0xff] %v6462_v52  ;;  %10439 = vst [vmem:[#allocation39_spill] sm:$0xff] %v6466_v61  ;;  %v5858_v45 = vtrunc.f32 %v6985_v44  ;;  %s10377_s12 = smov 116   ;;  %s6540_s21 = smov 117  }
 0x11d   : >> { %10440 = vst [vmem:[#allocation40_spill] sm:$0xff] %v6470_v55  ;;  %10441 = vst [vmem:[#allocation41_spill] sm:$0xff] %v6474_v53  ;;  %v5861_v32 = vcvt.f32.s32 %v5860_v30  ;;  %s10375_s22 = smov 113   ;;  %s6544_s17 = smov 121  }
 0x11e   : >> { %10442 = vst [vmem:[#allocation42_spill] sm:$0xff] %v6478_v62  ;;  %10443 = vst [vmem:[#allocation43_spill] sm:$0xff] %v6482_v63  ;;  %v5859_v46 = vcvt.f32.s32 %v5858_v45 }
 0x11f   : >> { %10444 = vst [vmem:[#allocation44_spill] sm:$0xff] %v6486_v0  ;;  %10445 = vst [vmem:[#allocation45_spill] sm:$0xff] %v6490_v1  ;;  %vm491_vm2 = vcmp.gt.s32.totalorder %v5861_v32, 0 }
 0x120   : >> { %10446 = vst [vmem:[#allocation46_spill] sm:$0xff] %v6494_v2  ;;  %10447 = vst [vmem:[#allocation47_spill] sm:$0xff] %v6498_v4  ;;  %v492_v35 = vsel %vm491_vm2, %v5861_v32, 0  ;;  %vm486_vm4 = vcmp.gt.s32.totalorder %v5859_v46, 0 }
 0x121   : >> { %10448 = vst [vmem:[#allocation48_spill] sm:$0xff] %v6502_v25  ;;  %10449 = vst [vmem:[#allocation49_spill] sm:$0xff] %v6506_v26  ;;  %vm493_vm3 = vcmp.lt.s32.totalorder %v492_v35, 14  ;;  %v487_v28 = vsel %vm486_vm4, %v5859_v46, 0 }
 0x122   : >> { %10450 = vst [vmem:[#allocation50_spill] sm:$0xff] %v6510_v27  ;;  %10451 = vst [vmem:[#allocation51_spill] sm:$0xff] %v6514_v47  ;;  %v494_v36 = vsel %vm493_vm3, %v492_v35, 14  ;;  %vm488_vm5 = vcmp.lt.s32.totalorder %v487_v28, 14 }
 0x123   : >> { %10453 = vst [vmem:[#allocation52_spill] sm:$0xff] %v6938_v31  ;;  %v6942_v37 = vrot.slane %v494_v36, %v568_v33  ;;  %v502_v38 = vrot.slane %v494_v36, %v501_v34  ;;  %v497_v39 = vcvt.s32.f32 %v494_v36  ;;  %v7000_v35 = vsel %vm488_vm5, %v487_v28, 14 }
 0x125   : >> { %571 = vbcast.lane.b32.xlu1 %v6942_v37, 256  ;;  %504 = vbcast.lane.b32.xlu0 %v502_v38, 256  ;;  %v498_v40 = vsub.f32 %v484_v29, %v497_v39 }
 0x127   : >> { %v6948_v41 = vrot.slane %v498_v40, %v501_v34  ;;  %v6952_v42 = vrot.slane %v498_v40, %v568_v33  ;;  %v10289_v34 = vsub.s32 0, %v6938_v31 }
 0x129   : >> { %575 = vbcast.lane.b32.xlu1 %v6942_v37, 264  ;;  %508 = vbcast.lane.b32.xlu0 %v502_v38, 264  ;;  %v7015_v28 = vrot.slane %v7000_v35, %v10289_v34 }
 0x12d   : >> { %516 = vbcast.lane.b32.xlu1 %v502_v38, 280  ;;  %512 = vbcast.lane.b32.xlu0 %v502_v38, 272 }
 0x131   : >> { %583 = vbcast.lane.b32.xlu1 %v6942_v37, 280  ;;  %579 = vbcast.lane.b32.xlu0 %v6942_v37, 272 }
 0x135   : >> { %642 = vbcast.lane.b32.xlu1 %v6948_v41, 264  ;;  %638 = vbcast.lane.b32.xlu0 %v6948_v41, 256 }
 0x139   : >> { %709 = vbcast.lane.b32.xlu1 %v6952_v42, 264  ;;  %705 = vbcast.lane.b32.xlu0 %v6952_v42, 256 }
 0x13d   : >> { %650 = vbcast.lane.b32.xlu1 %v6948_v41, 280  ;;  %646 = vbcast.lane.b32.xlu0 %v6948_v41, 272 }
 0x141   : >> { %717 = vbcast.lane.b32.xlu1 %v6952_v42, 280  ;;  %713 = vbcast.lane.b32.xlu0 %v6952_v42, 272 }
 0x145   : >> { %524 = vbcast.lane.b32.xlu1 %v502_v38, 296  ;;  %520 = vbcast.lane.b32.xlu0 %v502_v38, 288 }
 0x149   : >> { %591 = vbcast.lane.b32.xlu1 %v6942_v37, 296  ;;  %587 = vbcast.lane.b32.xlu0 %v6942_v37, 288 }
 0x14d   : >> { %532 = vbcast.lane.b32.xlu1 %v502_v38, 312  ;;  %528 = vbcast.lane.b32.xlu0 %v502_v38, 304 }
 0x151   : >> { %599 = vbcast.lane.b32.xlu1 %v6942_v37, 312  ;;  %595 = vbcast.lane.b32.xlu0 %v6942_v37, 304 }
 0x155   : >> { %658 = vbcast.lane.b32.xlu1 %v6948_v41, 296  ;;  %654 = vbcast.lane.b32.xlu0 %v6948_v41, 288 }
 0x159   : >> { %725 = vbcast.lane.b32.xlu1 %v6952_v42, 296  ;;  %721 = vbcast.lane.b32.xlu0 %v6952_v42, 288 }
 0x15d   : >> { %666 = vbcast.lane.b32.xlu1 %v6948_v41, 312  ;;  %662 = vbcast.lane.b32.xlu0 %v6948_v41, 304 }
 0x161   : >> { %733 = vbcast.lane.b32.xlu1 %v6952_v42, 312  ;;  %729 = vbcast.lane.b32.xlu0 %v6952_v42, 304 }
 0x165   : >> { %540 = vbcast.lane.b32.xlu1 %v502_v38, 328  ;;  %536 = vbcast.lane.b32.xlu0 %v502_v38, 320 }
 0x169   : >> { %607 = vbcast.lane.b32.xlu1 %v6942_v37, 328  ;;  %603 = vbcast.lane.b32.xlu0 %v6942_v37, 320 }
 0x16d   : >> { %548 = vbcast.lane.b32.xlu1 %v502_v38, 344  ;;  %544 = vbcast.lane.b32.xlu0 %v502_v38, 336 }
 0x171   : >> { %615 = vbcast.lane.b32.xlu1 %v6942_v37, 344  ;;  %611 = vbcast.lane.b32.xlu0 %v6942_v37, 336 }
 0x175   : >> { %674 = vbcast.lane.b32.xlu1 %v6948_v41, 328  ;;  %670 = vbcast.lane.b32.xlu0 %v6948_v41, 320 }
 0x179   : >> { %741 = vbcast.lane.b32.xlu1 %v6952_v42, 328  ;;  %737 = vbcast.lane.b32.xlu0 %v6952_v42, 320 }
 0x17d   : >> { %682 = vbcast.lane.b32.xlu1 %v6948_v41, 344  ;;  %678 = vbcast.lane.b32.xlu0 %v6948_v41, 336 }
 0x181   : >> { %749 = vbcast.lane.b32.xlu1 %v6952_v42, 344  ;;  %745 = vbcast.lane.b32.xlu0 %v6952_v42, 336 }
 0x185   : >> { %556 = vbcast.lane.b32.xlu1 %v502_v38, 360  ;;  %552 = vbcast.lane.b32.xlu0 %v502_v38, 352 }
 0x189   : >> { %623 = vbcast.lane.b32.xlu1 %v6942_v37, 360  ;;  %619 = vbcast.lane.b32.xlu0 %v6942_v37, 352 }
 0x18d   : >> { %564 = vbcast.lane.b32.xlu1 %v502_v38, 376  ;;  %560 = vbcast.lane.b32.xlu0 %v502_v38, 368  ;;  %v10291_v38 = vmov 0.0  }
 0x191   : >> { %631 = vbcast.lane.b32.xlu1 %v6942_v37, 376  ;;  %627 = vbcast.lane.b32.xlu0 %v6942_v37, 368 }
 0x195   : >> { %690 = vbcast.lane.b32.xlu1 %v6948_v41, 360  ;;  %686 = vbcast.lane.b32.xlu0 %v6948_v41, 352 }
 0x197   : >> { %v572_v29 = vpop.permute.xlu1 %571  ;;  %v505_v30 = vpop.permute.xlu0 %504 }
 0x198   : >> { %v879_v32 = vadd.s32 1, %v572_v29  ;;  %v863_v33 = vadd.s32 1, %v505_v30  ;;  %vm783_vm6 = vcmp.eq.s32.totalorder %v10425_v12, %v572_v29  ;;  %vm767_vm7 = vcmp.eq.s32.totalorder %v10425_v12, %v505_v30 }
 0x199   : >> { %757 = vbcast.lane.b32.xlu1 %v6952_v42, 360  ;;  %753 = vbcast.lane.b32.xlu0 %v6952_v42, 352  ;;  %v7007_v45 = vsel %vm783_vm6, 1.0, %v10291_v38  ;;  %v5473_v46 = vsel %vm767_vm7, 1.0, %v10291_v38  ;;  %vm10374_vm6 = vcmask 130048  }
 0x19a   : >> { %vm895_vm8 = vcmp.eq.s32.totalorder %v10425_v12, %v863_v33  ;;  %vm911_vm9 = vcmp.eq.s32.totalorder %v10425_v12, %v879_v32 }
 0x19b   : >> { %v576_v36 = vpop.permute.xlu1 %575  ;;  %v509_v37 = vpop.permute.xlu0 %508  ;;  %v5505_v39 = vsel %vm895_vm8, 1.0, %v10291_v38  ;;  %v5521_v30 = vsel %vm911_vm9, 1.0, %v10291_v38 }
 0x19c   : >> { %vm784_vm10 = vcmp.eq.s32.totalorder %v10425_v12, %v576_v36  ;;  %v880_v40 = vadd.s32 1, %v576_v36  ;;  %vm768_vm11 = vcmp.eq.s32.totalorder %v10425_v12, %v509_v37  ;;  %v864_v43 = vadd.s32 1, %v509_v37 }
 0x19d   : >> { %698 = vbcast.lane.b32.xlu1 %v6948_v41, 376  ;;  %694 = vbcast.lane.b32.xlu0 %v6948_v41, 368  ;;  %v7018_v29 = vsel %vm784_vm10, 1.0, %v10291_v38  ;;  %v5474_v33 = vsel %vm768_vm11, 1.0, %v10291_v38  ;;  %v7027_v3 = vsub.f32 %v5505_v39, %v5473_v46  ;;  %v7040_v39 = vsub.f32 %v5521_v30, %v7007_v45 }
 0x19e   : >> { %vm912_vm12 = vcmp.eq.s32.totalorder %v10425_v12, %v880_v40  ;;  %vm896_vm13 = vcmp.eq.s32.totalorder %v10425_v12, %v864_v43 }
 0x19f   : >> { %v517_v36 = vpop.permute.xlu1 %516  ;;  %v513_v41 = vpop.permute.xlu0 %512  ;;  %v5506_v37 = vsel %vm896_vm13, 1.0, %v10291_v38  ;;  %v5522_v34 = vsel %vm912_vm12, 1.0, %v10291_v38 }
 0x1a0   : >> { %vm770_vm14 = vcmp.eq.s32.totalorder %v10425_v12, %v517_v36  ;;  %v866_v7 = vadd.s32 1, %v517_v36  ;;  %vm769_vm15 = vcmp.eq.s32.totalorder %v10425_v12, %v513_v41  ;;  %v865_v40 = vadd.s32 1, %v513_v41 }
 0x1a1   : >> { %765 = vbcast.lane.b32.xlu1 %v6952_v42, 376  ;;  %761 = vbcast.lane.b32.xlu0 %v6952_v42, 368  ;;  %v7034_v32 = vsub.f32 %v5506_v37, %v5474_v33  ;;  %v7037_v43 = vsub.f32 %v5522_v34, %v7018_v29  ;;  %v5476_v4 = vsel %vm770_vm14, 1.0, %v10454_v11  ;;  %v5475_v36 = vsel %vm769_vm15, 1.0, %v10454_v11 }
 0x1a2   : >> { %vm898_vm0 = vcmp.eq.s32.totalorder %v10425_v12, %v866_v7  ;;  %vm897_vm1 = vcmp.eq.s32.totalorder %v10425_v12, %v865_v40  ;;  %v10455_v34 = vsub.s32 1, %v6938_v31 }
 0x1a3   : >> { %v584_v41 = vpop.permute.xlu1 %583  ;;  %v580_v42 = vpop.permute.xlu0 %579  ;;  %v5508_v30 = vsel %vm898_vm0, 1.0, %v10454_v11  ;;  %v5507_v38 = vsel %vm897_vm1, 1.0, %v10454_v11 }
 0x1a4   : >> { %vm786_vm2 = vcmp.eq.s32.totalorder %v10425_v12, %v584_v41  ;;  %v882_v25 = vadd.s32 1, %v584_v41  ;;  %vm785_vm3 = vcmp.eq.s32.totalorder %v10425_v12, %v580_v42  ;;  %v881_v7 = vadd.s32 1, %v580_v42 }
 0x1a5   : >> { %v7055_v2 = vsub.f32 %v5508_v30, %v5476_v4  ;;  %v7057_v40 = vsub.f32 %v5507_v38, %v5475_v36  ;;  %1543 = vbcast.lane.b32.xlu0 %v7015_v28, 256  ;;  %1547 = vbcast.lane.b32.xlu1 %v7015_v28, 264  ;;  %v7064_v37 = vrot.slane %v7000_v35, %v10455_v34  ;;  %v5492_v56 = vsel %vm786_vm2, 1.0, %v10454_v11 }
 0x1a6   : >> { %vm914_vm4 = vcmp.eq.s32.totalorder %v10425_v12, %v882_v25  ;;  %vm913_vm5 = vcmp.eq.s32.totalorder %v10425_v12, %v881_v7  ;;  %v5491_v41 = vsel %vm785_vm3, 1.0, %v10454_v11 }
 0x1a7   : >> { %v643_v42 = vpop.permute.xlu1 %642  ;;  %v639_v38 = vpop.permute.xlu0 %638  ;;  %v5524_v57 = vsel %vm914_vm4, 1.0, %v10454_v11  ;;  %v5523_v54 = vsel %vm913_vm5, 1.0, %v10454_v11 }
 0x1a8   : >> { %v1024_v34 = vmul.f32 %v7034_v32, %v643_v42  ;;  %v1023_v55 = vmul.f32 %v7027_v3, %v639_v38  ;;  %v7076_v52 = vsub.f32 %v5524_v57, %v5492_v56  ;;  %v7078_v25 = vsub.f32 %v5523_v54, %v5491_v41 }
 0x1a9   : >> { %1610 = vbcast.lane.b32.xlu0 %v7064_v37, 256  ;;  %1614 = vbcast.lane.b32.xlu1 %v7064_v37, 264 }
 0x1aa   : >> { %v1055_v7 = vadd.f32 %v5473_v46, %v1023_v55  ;;  %v1056_v53 = vadd.f32 %v5474_v33, %v1024_v34 }
 0x1ab   : >> { %v710_v1 = vpop.permute.xlu1 %709  ;;  %v706_v0 = vpop.permute.xlu0 %705 }
 0x1ac   : >> { %v1040_v42 = vmul.f32 %v7037_v43, %v710_v1  ;;  %v1039_v38 = vmul.f32 %v7040_v39, %v706_v0  ;;  %v1087_v57 = vpack.c.bf16 %v1056_v53, %v1055_v7 }
 0x1ad   : >> { %1551 = vbcast.lane.b32.xlu0 %v7015_v28, 272  ;;  %1618 = vbcast.lane.b32.xlu1 %v7064_v37, 272 }
 0x1ae   : >> { %5706 = vmatprep.mubr.msk.bf16.mxu0 %vm10374_vm6, %v1087_v57  ;;  %v1071_v54 = vadd.f32 %v7007_v45, %v1039_v38  ;;  %v1072_v55 = vadd.f32 %v7018_v29, %v1040_v42 }
 0x1af   : >> { %v651_v46 = vpop.permute.xlu1 %650  ;;  %v647_v33 = vpop.permute.xlu0 %646 }
 0x1b0   : >> { %v1026_v34 = vmul.f32 %v7055_v2, %v651_v46  ;;  %v1025_v30 = vmul.f32 %v7057_v40, %v647_v33  ;;  %v1103_v1 = vpack.c.bf16 %v1072_v55, %v1071_v54  ;;  %v495_v46 = vcvt.s32.f32 %v7000_v35 }
 0x1b1   : >> { %1555 = vbcast.lane.b32.xlu0 %v7015_v28, 280  ;;  %1622 = vbcast.lane.b32.xlu1 %v7064_v37, 280 }
 0x1b2   : >> { %v1058_v53 = vadd.f32 %v5476_v4, %v1026_v34  ;;  %v1057_v0 = vadd.f32 %v5475_v36, %v1025_v30  ;;  %5740 = vmatprep.mubr.msk.bf16.mxu1 %vm10374_vm6, %v1103_v1 }
 0x1b3   : >> { %v718_v7 = vpop.permute.xlu1 %717  ;;  %v714_v57 = vpop.permute.xlu0 %713 }
 0x1b4   : >> { %v1088_v45 = vpack.c.bf16 %v1058_v53, %v1057_v0  ;;  %v1042_v29 = vmul.f32 %v7076_v52, %v718_v7  ;;  %v1041_v42 = vmul.f32 %v7078_v25, %v714_v57  ;;  %v496_v0 = vsub.f32 %v6985_v44, %v495_v46 }
 0x1b5   : >> { %1559 = vbcast.lane.b32.xlu0 %v7015_v28, 288  ;;  %1626 = vbcast.lane.b32.xlu1 %v7064_v37, 288  ;;  %v10457_v46 = vsub.s32 1, %v6938_v31 }
 0x1b6   : >> { %v1074_v38 = vadd.f32 %v5492_v56, %v1042_v29  ;;  %v1073_v54 = vadd.f32 %v5491_v41, %v1041_v42  ;;  %5707 = vmatmul.mubr.msk.bf16.vlgmr.msra.gmra.mrb[0].mxu0 %vm10374_vm6, %v1088_v45 }
 0x1b7   : >> { %v525_v55 = vpop.permute.xlu1 %524  ;;  %v521_v4 = vpop.permute.xlu0 %520  ;;  %v7161_v63 = vrot.slane %v496_v0, %v10457_v46 }
 0x1b8   : >> { %v1104_v36 = vpack.c.bf16 %v1074_v38, %v1073_v54  ;;  %v868_v30 = vadd.s32 1, %v525_v55  ;;  %vm772_vm7 = vcmp.eq.s32.totalorder %v10425_v12, %v525_v55  ;;  %v867_v33 = vadd.s32 1, %v521_v4 }
 0x1b9   : >> { %1563 = vbcast.lane.b32.xlu0 %v7015_v28, 296  ;;  %1630 = vbcast.lane.b32.xlu1 %v7064_v37, 296  ;;  %vm771_vm9 = vcmp.eq.s32.totalorder %v10425_v12, %v521_v4  ;;  %v7111_v35 = vsel %vm772_vm7, 1.0, %v10454_v11 }
 0x1ba   : >> { %vm900_vm8 = vcmp.eq.s32.totalorder %v10425_v12, %v868_v30  ;;  %5741 = vmatmul.mubr.msk.bf16.vlgmr.msra.gmra.mrb[0].mxu1 %vm10374_vm6, %v1104_v36  ;;  %vm899_vm10 = vcmp.eq.s32.totalorder %v10425_v12, %v867_v33  ;;  %v5477_v7 = vsel %vm771_vm9, 1.0, %v10454_v11 }
 0x1bb   : >> { %v592_v56 = vpop.permute.xlu1 %591  ;;  %v588_v41 = vpop.permute.xlu0 %587  ;;  %v5510_v34 = vsel %vm900_vm8, 1.0, %v10454_v11  ;;  %v5509_v45 = vsel %vm899_vm10, 1.0, %v10454_v11 }
 0x1bc   : >> { %v884_v1 = vadd.s32 1, %v592_v56  ;;  %v883_v53 = vadd.s32 1, %v588_v41  ;;  %vm788_vm11 = vcmp.eq.s32.totalorder %v10425_v12, %v592_v56  ;;  %v7117_v57 = vsub.f32 %v5510_v34, %v7111_v35 }
 0x1bd   : >> { %1567 = vbcast.lane.b32.xlu0 %v7015_v28, 304  ;;  %1634 = vbcast.lane.b32.xlu1 %v7064_v37, 304  ;;  %vm787_vm13 = vcmp.eq.s32.totalorder %v10425_v12, %v588_v41  ;;  %v7125_v44 = vsub.f32 %v5509_v45, %v5477_v7  ;;  %v5494_v55 = vsel %vm788_vm11, 1.0, %v10454_v11  ;;  %v10456_v56 = vsub.s32 0, %v6938_v31 }
 0x1be   : >> { %vm916_vm12 = vcmp.eq.s32.totalorder %v10425_v12, %v884_v1  ;;  %vm915_vm14 = vcmp.eq.s32.totalorder %v10425_v12, %v883_v53  ;;  %v5493_v30 = vsel %vm787_vm13, 1.0, %v10454_v11 }
 0x1bf   : >> { %v533_v29 = vpop.permute.xlu1 %532  ;;  %v529_v42 = vpop.permute.xlu0 %528  ;;  %v5526_v38 = vsel %vm916_vm12, 1.0, %v10454_v11  ;;  %v5525_v54 = vsel %vm915_vm14, 1.0, %v10454_v11  ;;  %v7140_v41 = vrot.slane %v496_v0, %v10456_v56 }
 0x1c0   : >> { %vm774_vm15 = vcmp.eq.s32.totalorder %v10425_v12, %v533_v29  ;;  %v870_v4 = vadd.s32 1, %v533_v29  ;;  %v869_v36 = vadd.s32 1, %v529_v42  ;;  %v7134_v33 = vsub.f32 %v5526_v38, %v5494_v55 }
 0x1c1   : >> { %1571 = vbcast.lane.b32.xlu0 %v7015_v28, 312  ;;  %1638 = vbcast.lane.b32.xlu1 %v7064_v37, 312  ;;  %vm773_vm1 = vcmp.eq.s32.totalorder %v10425_v12, %v529_v42  ;;  %v7145_v34 = vsub.f32 %v5525_v54, %v5493_v30  ;;  %v5480_v1 = vsel %vm774_vm15, 1.0, %v10454_v11 }
 0x1c2   : >> { %vm902_vm0 = vcmp.eq.s32.totalorder %v10425_v12, %v870_v4  ;;  %vm901_vm2 = vcmp.eq.s32.totalorder %v10425_v12, %v869_v36  ;;  %v5479_v42 = vsel %vm773_vm1, 1.0, %v10454_v11 }
 0x1c3   : >> { %v600_v53 = vpop.permute.xlu1 %599  ;;  %v596_v45 = vpop.permute.xlu0 %595  ;;  %v5512_v29 = vsel %vm902_vm0, 1.0, %v10454_v11  ;;  %v5511_v38 = vsel %vm901_vm2, 1.0, %v10454_v11 }
 0x1c4   : >> { %vm790_vm3 = vcmp.eq.s32.totalorder %v10425_v12, %v600_v53  ;;  %v886_v56 = vadd.s32 1, %v600_v53  ;;  %vm789_vm4 = vcmp.eq.s32.totalorder %v10425_v12, %v596_v45  ;;  %v885_v4 = vadd.s32 1, %v596_v45 }
 0x1c5   : >> { %v7155_v36 = vsub.f32 %v5512_v29, %v5480_v1  ;;  %1677 = vbcast.lane.b32.xlu0 %v7140_v41, 256  ;;  %1681 = vbcast.lane.b32.xlu1 %v7140_v41, 264  ;;  %v7165_v53 = vsub.f32 %v5511_v38, %v5479_v42  ;;  %v5496_v45 = vsel %vm790_vm3, 1.0, %v10454_v11  ;;  %v5495_v54 = vsel %vm789_vm4, 1.0, %v10454_v11 }
 0x1c6   : >> { %vm918_vm5 = vcmp.eq.s32.totalorder %v10425_v12, %v886_v56  ;;  %vm917_vm7 = vcmp.eq.s32.totalorder %v10425_v12, %v885_v4 }
 0x1c7   : >> { %v659_v29 = vpop.permute.xlu1 %658  ;;  %v655_v47 = vpop.permute.xlu0 %654  ;;  %v5528_v27 = vsel %vm918_vm5, 1.0, %v10454_v11  ;;  %v5527_v24 = vsel %vm917_vm7, 1.0, %v10454_v11 }
 0x1c8   : >> { %v1028_v51 = vmul.f32 %v7117_v57, %v659_v29  ;;  %v1027_v0 = vmul.f32 %v7125_v44, %v655_v47  ;;  %v7175_v56 = vsub.f32 %v5528_v27, %v5496_v45  ;;  %v7177_v38 = vsub.f32 %v5527_v24, %v5495_v54 }
 0x1c9   : >> { %1744 = vbcast.lane.b32.xlu0 %v7161_v63, 256  ;;  %1748 = vbcast.lane.b32.xlu1 %v7161_v63, 264 }
 0x1ca   : >> { %v1060_v4 = vadd.f32 %v7111_v35, %v1028_v51  ;;  %v1059_v50 = vadd.f32 %v5477_v7, %v1027_v0 }
 0x1cb   : >> { %v726_v49 = vpop.permute.xlu1 %725  ;;  %v722_v58 = vpop.permute.xlu0 %721 }
 0x1cc   : >> { %v1089_v47 = vpack.c.bf16 %v1060_v4, %v1059_v50  ;;  %v1044_v59 = vmul.f32 %v7134_v33, %v726_v49  ;;  %v1043_v27 = vmul.f32 %v7145_v34, %v722_v58 }
 0x1cd   : >> { %1575 = vbcast.lane.b32.xlu0 %v7015_v28, 320  ;;  %1642 = vbcast.lane.b32.xlu1 %v7064_v37, 320 }
 0x1ce   : >> { %v1076_v24 = vadd.f32 %v5494_v55, %v1044_v59  ;;  %v1075_v46 = vadd.f32 %v5493_v30, %v1043_v27  ;;  %5710 = vmatprep.mubr.msk.bf16.mxu0 %vm10374_vm6, %v1089_v47 }
 0x1cf   : >> { %v667_v51 = vpop.permute.xlu1 %666  ;;  %v663_v35 = vpop.permute.xlu0 %662 }
 0x1d0   : >> { %v1105_v7 = vpack.c.bf16 %v1076_v24, %v1075_v46  ;;  %v1030_v0 = vmul.f32 %v7155_v36, %v667_v51  ;;  %v1029_v29 = vmul.f32 %v7165_v53, %v663_v35 }
 0x1d1   : >> { %1685 = vbcast.lane.b32.xlu0 %v7140_v41, 272  ;;  %1752 = vbcast.lane.b32.xlu1 %v7161_v63, 272 }
 0x1d2   : >> { %v1062_v49 = vadd.f32 %v5480_v1, %v1030_v0  ;;  %v1061_v50 = vadd.f32 %v5479_v42, %v1029_v29  ;;  %5744 = vmatprep.mubr.msk.bf16.mxu1 %vm10374_vm6, %v1105_v7 }
 0x1d3   : >> { %v734_v58 = vpop.permute.xlu1 %733  ;;  %v730_v59 = vpop.permute.xlu0 %729 }
 0x1d4   : >> { %v1090_v55 = vpack.c.bf16 %v1062_v49, %v1061_v50  ;;  %v1046_v30 = vmul.f32 %v7175_v56, %v734_v58  ;;  %v1045_v4 = vmul.f32 %v7177_v38, %v730_v59 }
 0x1d5   : >> { %1579 = vbcast.lane.b32.xlu0 %v7015_v28, 328  ;;  %1646 = vbcast.lane.b32.xlu1 %v7064_v37, 328 }
 0x1d6   : >> { %v1078_v46 = vadd.f32 %v5496_v45, %v1046_v30  ;;  %v1077_v47 = vadd.f32 %v5495_v54, %v1045_v4  ;;  %5711 = vmatmul.mubr.msk.bf16.gmra.mrb[4].mxu0 %vm10374_vm6, %v1090_v55 }
 0x1d7   : >> { %v541_v27 = vpop.permute.xlu1 %540  ;;  %v537_v1 = vpop.permute.xlu0 %536 }
 0x1d8   : >> { %v1106_v42 = vpack.c.bf16 %v1078_v46, %v1077_v47  ;;  %v872_v51 = vadd.s32 1, %v541_v27  ;;  %v871_v35 = vadd.s32 1, %v537_v1  ;;  %vm776_vm10 = vcmp.eq.s32.totalorder %v10425_v12, %v541_v27 }
 0x1d9   : >> { %1689 = vbcast.lane.b32.xlu0 %v7140_v41, 280  ;;  %1756 = vbcast.lane.b32.xlu1 %v7161_v63, 280  ;;  %vm775_vm11 = vcmp.eq.s32.totalorder %v10425_v12, %v537_v1  ;;  %v5482_v4 = vsel %vm776_vm10, 1.0, %v10454_v11 }
 0x1da   : >> { %5745 = vmatmul.mubr.msk.bf16.gmra.mrb[4].mxu1 %vm10374_vm6, %v1106_v42  ;;  %vm904_vm8 = vcmp.eq.s32.totalorder %v10425_v12, %v872_v51  ;;  %vm903_vm9 = vcmp.eq.s32.totalorder %v10425_v12, %v871_v35  ;;  %v5481_v46 = vsel %vm775_vm11, 1.0, %v10454_v11 }
 0x1db   : >> { %v608_v29 = vpop.permute.xlu1 %607  ;;  %v604_v24 = vpop.permute.xlu0 %603  ;;  %v5514_v59 = vsel %vm904_vm8, 1.0, %v10454_v11  ;;  %v5513_v55 = vsel %vm903_vm9, 1.0, %v10454_v11 }
 0x1dc   : >> { %v888_v7 = vadd.s32 1, %v608_v29  ;;  %v887_v0 = vadd.s32 1, %v604_v24  ;;  %vm792_vm14 = vcmp.eq.s32.totalorder %v10425_v12, %v608_v29  ;;  %vm791_vm15 = vcmp.eq.s32.totalorder %v10425_v12, %v604_v24 }
 0x1dd   : >> { %1583 = vbcast.lane.b32.xlu0 %v7015_v28, 336  ;;  %1650 = vbcast.lane.b32.xlu1 %v7064_v37, 336  ;;  %v7224_v47 = vsub.f32 %v5514_v59, %v5482_v4  ;;  %v7226_v27 = vsub.f32 %v5513_v55, %v5481_v46  ;;  %v5498_v59 = vsel %vm792_vm14, 1.0, %v10454_v11  ;;  %v5497_v55 = vsel %vm791_vm15, 1.0, %v10454_v11 }
 0x1de   : >> { %vm920_vm12 = vcmp.eq.s32.totalorder %v10425_v12, %v888_v7  ;;  %vm919_vm13 = vcmp.eq.s32.totalorder %v10425_v12, %v887_v0 }
 0x1df   : >> { %v549_v54 = vpop.permute.xlu1 %548  ;;  %v545_v45 = vpop.permute.xlu0 %544  ;;  %v5530_v35 = vsel %vm920_vm12, 1.0, %v10454_v11  ;;  %v5529_v7 = vsel %vm919_vm13, 1.0, %v10454_v11 }
 0x1e0   : >> { %v874_v49 = vadd.s32 1, %v549_v54  ;;  %v873_v30 = vadd.s32 1, %v545_v45  ;;  %vm778_vm2 = vcmp.eq.s32.totalorder %v10425_v12, %v549_v54  ;;  %vm777_vm3 = vcmp.eq.s32.totalorder %v10425_v12, %v545_v45 }
 0x1e1   : >> { %1693 = vbcast.lane.b32.xlu0 %v7140_v41, 288  ;;  %1760 = vbcast.lane.b32.xlu1 %v7161_v63, 288  ;;  %v7242_v22 = vsub.f32 %v5530_v35, %v5498_v59  ;;  %v7244_v21 = vsub.f32 %v5529_v7, %v5497_v55  ;;  %v5484_v7 = vsel %vm778_vm2, 1.0, %v10454_v11 }
 0x1e2   : >> { %vm906_vm0 = vcmp.eq.s32.totalorder %v10425_v12, %v874_v49  ;;  %vm905_vm1 = vcmp.eq.s32.totalorder %v10425_v12, %v873_v30  ;;  %v5483_v49 = vsel %vm777_vm3, 1.0, %v10454_v11 }
 0x1e3   : >> { %v7210_v50 = vpop.permute.xlu1 %615  ;;  %v7212_v58 = vpop.permute.xlu0 %611  ;;  %v5516_v20 = vsel %vm906_vm0, 1.0, %v10454_v11  ;;  %v5515_v19 = vsel %vm905_vm1, 1.0, %v10454_v11 }
 0x1e4   : >> { %v890_v1 = vadd.s32 1, %v7210_v50  ;;  %v889_v29 = vadd.s32 1, %v7212_v58  ;;  %vm794_vm7 = vcmp.eq.s32.totalorder %v10425_v12, %v7210_v50  ;;  %vm793_vm8 = vcmp.eq.s32.totalorder %v10425_v12, %v7212_v58 }
 0x1e5   : >> { %1587 = vbcast.lane.b32.xlu0 %v7015_v28, 344  ;;  %1654 = vbcast.lane.b32.xlu1 %v7064_v37, 344  ;;  %v7269_v54 = vsub.f32 %v5516_v20, %v5484_v7  ;;  %v7271_v30 = vsub.f32 %v5515_v19, %v5483_v49  ;;  %v5500_v19 = vsel %vm794_vm7, 1.0, %v10454_v11  ;;  %v5499_v20 = vsel %vm793_vm8, 1.0, %v10454_v11 }
 0x1e6   : >> { %vm922_vm4 = vcmp.eq.s32.totalorder %v10425_v12, %v890_v1  ;;  %vm921_vm5 = vcmp.eq.s32.totalorder %v10425_v12, %v889_v29 }
 0x1e7   : >> { %v675_v42 = vpop.permute.xlu1 %674  ;;  %v671_v51 = vpop.permute.xlu0 %670 }
 0x1e8   : >> { %v1032_v24 = vmul.f32 %v7224_v47, %v675_v42  ;;  %v1031_v0 = vmul.f32 %v7226_v27, %v671_v51 }
 0x1e9   : >> { %1697 = vbcast.lane.b32.xlu0 %v7140_v41, 296  ;;  %1764 = vbcast.lane.b32.xlu1 %v7161_v63, 296 }
 0x1ea   : >> { %v1064_v48 = vadd.f32 %v5482_v4, %v1032_v24  ;;  %v1063_v23 = vadd.f32 %v5481_v46, %v1031_v0  ;;  %v5532_v0 = vsel %vm922_vm4, 1.0, %v10454_v11 }
 0x1eb   : >> { %v742_v42 = vpop.permute.xlu1 %741  ;;  %v738_v51 = vpop.permute.xlu0 %737 }
 0x1ec   : >> { %v1091_v4 = vpack.c.bf16 %v1064_v48, %v1063_v23  ;;  %v1048_v46 = vmul.f32 %v7242_v22, %v742_v42  ;;  %v1047_v35 = vmul.f32 %v7244_v21, %v738_v51  ;;  %v5531_v42 = vsel %vm921_vm5, 1.0, %v10454_v11 }
 0x1ed   : >> { %1591 = vbcast.lane.b32.xlu0 %v7015_v28, 352  ;;  %1658 = vbcast.lane.b32.xlu1 %v7064_v37, 352 }
 0x1ee   : >> { %v1080_v23 = vadd.f32 %v5498_v59, %v1048_v46  ;;  %v1079_v48 = vadd.f32 %v5497_v55, %v1047_v35  ;;  %5714 = vmatprep.mubr.msk.bf16.mxu0 %vm10374_vm6, %v1091_v4  ;;  %v7292_v4 = vsub.f32 %v5532_v0, %v5500_v19  ;;  %v7294_v46 = vsub.f32 %v5531_v42, %v5499_v20 }
 0x1ef   : >> { %v683_v45 = vpop.permute.xlu1 %682  ;;  %v679_v24 = vpop.permute.xlu0 %678 }
 0x1f0   : >> { %v1107_v51 = vpack.c.bf16 %v1080_v23, %v1079_v48  ;;  %v1034_v59 = vmul.f32 %v7269_v54, %v683_v45  ;;  %v1033_v55 = vmul.f32 %v7271_v30, %v679_v24 }
 0x1f1   : >> { %1701 = vbcast.lane.b32.xlu0 %v7140_v41, 304  ;;  %1768 = vbcast.lane.b32.xlu1 %v7161_v63, 304 }
 0x1f2   : >> { %v1066_v1 = vadd.f32 %v5484_v7, %v1034_v59  ;;  %v1065_v29 = vadd.f32 %v5483_v49, %v1033_v55  ;;  %5748 = vmatprep.mubr.msk.bf16.mxu1 %vm10374_vm6, %v1107_v51 }
 0x1f3   : >> { %v750_v35 = vpop.permute.xlu1 %749  ;;  %v746_v50 = vpop.permute.xlu0 %745 }
 0x1f4   : >> { %v1092_v23 = vpack.c.bf16 %v1066_v1, %v1065_v29  ;;  %v1050_v48 = vmul.f32 %v7292_v4, %v750_v35  ;;  %v1049_v58 = vmul.f32 %v7294_v46, %v746_v50 }
 0x1f5   : >> { %1595 = vbcast.lane.b32.xlu0 %v7015_v28, 360  ;;  %1662 = vbcast.lane.b32.xlu1 %v7064_v37, 360 }
 0x1f6   : >> { %v1082_v45 = vadd.f32 %v5500_v19, %v1050_v48  ;;  %v1081_v7 = vadd.f32 %v5499_v20, %v1049_v58  ;;  %5715 = vmatmul.mubr.msk.bf16.gmra.mrb[8].mxu0 %vm10374_vm6, %v1092_v23 }
 0x1f7   : >> { %v557_v49 = vpop.permute.xlu1 %556  ;;  %v553_v24 = vpop.permute.xlu0 %552 }
 0x1f8   : >> { %v1108_v0 = vpack.c.bf16 %v1082_v45, %v1081_v7  ;;  %v876_v59 = vadd.s32 1, %v557_v49  ;;  %v875_v55 = vadd.s32 1, %v553_v24  ;;  %vm780_vm11 = vcmp.eq.s32.totalorder %v10425_v12, %v557_v49 }
 0x1f9   : >> { %1705 = vbcast.lane.b32.xlu0 %v7140_v41, 312  ;;  %1772 = vbcast.lane.b32.xlu1 %v7161_v63, 312  ;;  %vm779_vm12 = vcmp.eq.s32.totalorder %v10425_v12, %v553_v24  ;;  %v5486_v7 = vsel %vm780_vm11, 1.0, %v10454_v11 }
 0x1fa   : >> { %5749 = vmatmul.mubr.msk.bf16.gmra.mrb[8].mxu1 %vm10374_vm6, %v1108_v0  ;;  %vm908_vm9 = vcmp.eq.s32.totalorder %v10425_v12, %v876_v59  ;;  %vm907_vm10 = vcmp.eq.s32.totalorder %v10425_v12, %v875_v55  ;;  %v5485_v49 = vsel %vm779_vm12, 1.0, %v10454_v11 }
 0x1fb   : >> { %v624_v42 = vpop.permute.xlu1 %623  ;;  %v620_v51 = vpop.permute.xlu0 %619  ;;  %v5518_v48 = vsel %vm908_vm9, 1.0, %v10454_v11  ;;  %v5517_v58 = vsel %vm907_vm10, 1.0, %v10454_v11 }
 0x1fc   : >> { %v892_v1 = vadd.s32 1, %v624_v42  ;;  %v891_v29 = vadd.s32 1, %v620_v51  ;;  %vm796_vm15 = vcmp.eq.s32.totalorder %v10425_v12, %v624_v42  ;;  %vm795_vm0 = vcmp.eq.s32.totalorder %v10425_v12, %v620_v51 }
 0x1fd   : >> { %1666 = vbcast.lane.b32.xlu1 %v7064_v37, 368  ;;  %1599 = vbcast.lane.b32.xlu0 %v7015_v28, 368  ;;  %v7326_v24 = vsub.f32 %v5518_v48, %v5486_v7  ;;  %v7328_v0 = vsub.f32 %v5517_v58, %v5485_v49  ;;  %v5502_v48 = vsel %vm796_vm15, 1.0, %v10454_v11  ;;  %v5501_v58 = vsel %vm795_vm0, 1.0, %v10454_v11 }
 0x1fe   : >> { %vm924_vm13 = vcmp.eq.s32.totalorder %v10425_v12, %v892_v1  ;;  %vm923_vm14 = vcmp.eq.s32.totalorder %v10425_v12, %v891_v29 }
 0x1ff   : >> { %v565_v19 = vpop.permute.xlu1 %564  ;;  %v561_v20 = vpop.permute.xlu0 %560  ;;  %v5534_v29 = vsel %vm924_vm13, 1.0, %v10454_v11 }
 0x200   : >> { %v878_v35 = vadd.s32 1, %v565_v19  ;;  %v877_v45 = vadd.s32 1, %v561_v20  ;;  %vm782_vm3 = vcmp.eq.s32.totalorder %v10425_v12, %v565_v19  ;;  %vm781_vm4 = vcmp.eq.s32.totalorder %v10425_v12, %v561_v20 }
 0x201   : >> { %1776 = vbcast.lane.b32.xlu1 %v7161_v63, 320  ;;  %1709 = vbcast.lane.b32.xlu0 %v7140_v41, 320  ;;  %v7344_v16 = vsub.f32 %v5534_v29, %v5502_v48 }
 0x202   : >> { %vm910_vm1 = vcmp.eq.s32.totalorder %v10425_v12, %v878_v35  ;;  %vm909_vm2 = vcmp.eq.s32.totalorder %v10425_v12, %v877_v45  ;;  %v5487_v35 = vsel %vm781_vm4, 1.0, %v10454_v11 }
 0x203   : >> { %v7312_v50 = vpop.permute.xlu1 %631  ;;  %v7314_v23 = vpop.permute.xlu0 %627  ;;  %v5520_v14 = vsel %vm910_vm1, 1.0, %v10454_v11  ;;  %v5519_v13 = vsel %vm909_vm2, 1.0, %v10454_v11 }
 0x204   : >> { %v894_v59 = vadd.s32 1, %v7312_v50  ;;  %vm798_vm8 = vcmp.eq.s32.totalorder %v10425_v12, %v7312_v50  ;;  %vm797_vm9 = vcmp.eq.s32.totalorder %v10425_v12, %v7314_v23  ;;  %v7373_v45 = vsub.f32 %v5519_v13, %v5487_v35 }
 0x205   : >> { %1670 = vbcast.lane.b32.xlu1 %v7064_v37, 376  ;;  %1603 = vbcast.lane.b32.xlu0 %v7015_v28, 376  ;;  %v5533_v37 = vsel %vm923_vm14, 1.0, %v10454_v11  ;;  %v893_v28 = vadd.s32 1, %v7314_v23  ;;  %v5504_v13 = vsel %vm798_vm8, 1.0, %v10454_v11 }
 0x206   : >> { %v7346_v15 = vsub.f32 %v5533_v37, %v5501_v58  ;;  %vm926_vm5 = vcmp.eq.s32.totalorder %v10425_v12, %v894_v59  ;;  %v5488_v37 = vsel %vm782_vm3, 1.0, %v10454_v11 }
 0x207   : >> { %v691_v55 = vpop.permute.xlu1 %690  ;;  %v687_v1 = vpop.permute.xlu0 %686  ;;  %vm925_vm7 = vcmp.eq.s32.totalorder %v10425_v12, %v893_v28  ;;  %v7371_v19 = vsub.f32 %v5520_v14, %v5488_v37  ;;  %v5503_v14 = vsel %vm797_vm9, 1.0, %v10454_v11 }
 0x208   : >> { %v1036_v42 = vmul.f32 %v7326_v24, %v691_v55  ;;  %v1035_v51 = vmul.f32 %v7328_v0, %v687_v1 }
 0x209   : >> { %1780 = vbcast.lane.b32.xlu1 %v7161_v63, 328  ;;  %1713 = vbcast.lane.b32.xlu0 %v7140_v41, 328 }
 0x20a   : >> { %v1068_v18 = vadd.f32 %v5486_v7, %v1036_v42  ;;  %v1067_v17 = vadd.f32 %v5485_v49, %v1035_v51  ;;  %v5536_v51 = vsel %vm926_vm5, 1.0, %v10454_v11 }
 0x20b   : >> { %v758_v55 = vpop.permute.xlu1 %757  ;;  %v754_v1 = vpop.permute.xlu0 %753 }
 0x20c   : >> { %v1093_v7 = vpack.c.bf16 %v1068_v18, %v1067_v17  ;;  %v1052_v49 = vmul.f32 %v7344_v16, %v758_v55  ;;  %v1051_v29 = vmul.f32 %v7346_v15, %v754_v1  ;;  %v5535_v55 = vsel %vm925_vm7, 1.0, %v10454_v11 }
 0x20d   : >> { %1717 = vbcast.lane.b32.xlu0 %v7140_v41, 336  ;;  %1784 = vbcast.lane.b32.xlu1 %v7161_v63, 336 }
 0x20e   : >> { %v1084_v17 = vadd.f32 %v5502_v48, %v1052_v49  ;;  %v1083_v18 = vadd.f32 %v5501_v58, %v1051_v29  ;;  %5718 = vmatprep.mubr.msk.bf16.mxu0 %vm10374_vm6, %v1093_v7  ;;  %v1022_v7 = vsub.f32 %v5536_v51, %v5504_v13  ;;  %v1021_v49 = vsub.f32 %v5535_v55, %v5503_v14 }
 0x20f   : >> { %v699_v20 = vpop.permute.xlu1 %698  ;;  %v695_v42 = vpop.permute.xlu0 %694  ;;  %v10459_v55 = vpack.c.bf16 %v7037_v43, %v7040_v39  ;;  %v10462_v43 = vpack.c.bf16 %v7076_v52, %v7078_v25  ;;  %v1115_v25 = vpack.c.bf16 %v7242_v22, %v7244_v21  ;;  %v1116_v22 = vpack.c.bf16 %v7292_v4, %v7294_v46 }
 0x210   : >> { %v1109_v1 = vpack.c.bf16 %v1084_v17, %v1083_v18  ;;  %v1038_v48 = vmul.f32 %v7371_v19, %v699_v20  ;;  %v1037_v58 = vmul.f32 %v7373_v45, %v695_v42 }
 0x211   : >> { %1721 = vbcast.lane.b32.xlu0 %v7140_v41, 344  ;;  %1788 = vbcast.lane.b32.xlu1 %v7161_v63, 344 }
 0x212   : >> { %v1070_v59 = vadd.f32 %v5488_v37, %v1038_v48  ;;  %v1069_v28 = vadd.f32 %v5487_v35, %v1037_v58  ;;  %5752 = vmatprep.mubr.msk.bf16.mxu1 %vm10374_vm6, %v1109_v1  ;;  %v10458_v37 = vpack.c.bf16 %v7034_v32, %v7027_v3  ;;  %v10460_v3 = vpack.c.bf16 %v7055_v2, %v7057_v40 }
 0x213   : >> { %v766_v29 = vpop.permute.xlu1 %765  ;;  %v762_v17 = vpop.permute.xlu0 %761  ;;  %v10461_v32 = vpack.c.bf16 %v7117_v57, %v7125_v44  ;;  %v10463_v2 = vpack.c.bf16 %v7134_v33, %v7145_v34  ;;  %v1099_v40 = vpack.c.bf16 %v7224_v47, %v7226_v27  ;;  %v10464_v57 = vpack.c.bf16 %v7155_v36, %v7165_v53 }
 0x214   : >> { %v1094_v18 = vpack.c.bf16 %v1070_v59, %v1069_v28  ;;  %v1054_v50 = vmul.f32 %v1022_v7, %v766_v29  ;;  %v1053_v20 = vmul.f32 %v1021_v49, %v762_v17  ;;  %v10465_v44 = vpack.c.bf16 %v7175_v56, %v7177_v38 }
 0x215   : >> { %1792 = vbcast.lane.b32.xlu1 %v7161_v63, 352  ;;  %1725 = vbcast.lane.b32.xlu0 %v7140_v41, 352  ;;  %v1101_v36 = vpack.c.bf16 %v7326_v24, %v7328_v0  ;;  %v1117_v53 = vpack.c.bf16 %v7344_v16, %v7346_v15  ;;  %v1102_v47 = vpack.c.bf16 %v7371_v19, %v7373_v45 }
 0x216   : >> { %v1086_v23 = vadd.f32 %v5504_v13, %v1054_v50  ;;  %v1085_v42 = vadd.f32 %v5503_v14, %v1053_v20  ;;  %5719 = vmatmul.mubr.msk.bf16.gmra.mrb[12].mxu0 %vm10374_vm6, %v1094_v18 }
 0x217   : >> { %5722 = vmatprep.mubr.msk.bf16.mxu0 %vm10374_vm6, %v10458_v37  ;;  %v7401_v35 = vpop.permute.xlu0 %1543 }
 0x218   : >> { %v1110_v51 = vpack.c.bf16 %v1086_v23, %v1085_v42  ;;  %vm1806_vm0 = vcmp.eq.s32.totalorder %v10425_v12, %v7401_v35 }
 0x219   : >> { %1796 = vbcast.lane.b32.xlu1 %v7161_v63, 360  ;;  %1729 = vbcast.lane.b32.xlu0 %v7140_v41, 360 }
 0x21a   : >> { %5753 = vmatmul.mubr.msk.bf16.gmra.mrb[12].mxu1 %vm10374_vm6, %v1110_v51 }
 0x21b   : >> { %5756 = vmatprep.mubr.msk.bf16.mxu1 %vm10374_vm6, %v10459_v55  ;;  %v7410_v1 = vpop.permute.xlu0 %1610 }
 0x21c   : >> { %vm1822_vm2 = vcmp.eq.s32.totalorder %v10425_v12, %v7410_v1 }
 0x21d   : >> { %1800 = vbcast.lane.b32.xlu1 %v7161_v63, 368  ;;  %1733 = vbcast.lane.b32.xlu0 %v7140_v41, 368 }
 0x21e   : >> { %5723 = vmatmul.mubr.msk.bf16.gmra.mrb[16].mxu0 %vm10374_vm6, %v10460_v3 }
 0x21f   : >> { %5726 = vmatprep.mubr.msk.bf16.mxu0 %vm10374_vm6, %v10461_v32  ;;  %v7422_v48 = vpop.permute.xlu0 %1551 }
 0x220   : >> { %vm1808_vm14 = vcmp.eq.s32.totalorder %v10425_v12, %v7422_v48 }
 0x221   : >> { %1804 = vbcast.lane.b32.xlu1 %v7161_v63, 376  ;;  %1737 = vbcast.lane.b32.xlu0 %v7140_v41, 376  ;;  %v7440_v63 = vpop.permute.xlu1 %1547  ;;  %v1100_v41 = vpack.c.bf16 %v7269_v54, %v7271_v30  ;;  %v1118_v54 = vpack.c.bf16 %v1022_v7, %v1021_v49 }
 0x222   : >> { %5757 = vmatmul.mubr.msk.bf16.gmra.mrb[16].mxu1 %vm10374_vm6, %v10462_v43  ;;  %vm1807_vm9 = vcmp.eq.s32.totalorder %v10425_v12, %v7440_v63 }
 0x223   : >> { %5760 = vmatprep.mubr.msk.bf16.mxu1 %vm10374_vm6, %v10463_v2  ;;  %v1556_v39 = vpop.permute.xlu0 %1555  ;;  %v5570_v6 = vsel %vm1807_vm9, 1.0, %v10454_v11 }
 0x224   : >> { %v1905_v16 = vadd.s32 1, %v1556_v39  ;;  %vm1809_vm10 = vcmp.eq.s32.totalorder %v10425_v12, %v1556_v39 }
 0x225   : >> { %v7456_v34 = vpop.permute.xlu1 %1614  ;;  %v5572_v19 = vsel %vm1809_vm10, 1.0, %v10454_v11 }
 0x226   : >> { %5727 = vmatmul.mubr.msk.bf16.gmra.mrb[20].mxu0 %vm10374_vm6, %v10464_v57  ;;  %vm1937_vm11 = vcmp.eq.s32.totalorder %v10425_v12, %v1905_v16  ;;  %vm1823_vm4 = vcmp.eq.s32.totalorder %v10425_v12, %v7456_v34 }
 0x227   : >> { %5730 = vmatprep.mubr.msk.bf16.mxu0 %vm10374_vm6, %v1099_v40  ;;  %v7443_v52 = vpop.permute.xlu0 %1559  ;;  %v5604_v45 = vsel %vm1937_vm11, 1.0, %v10454_v11 }
 0x228   : >> { %v7494_v13 = vsub.f32 %v5604_v45, %v5572_v19 }
 0x229   : >> { %v7469_v56 = vpop.permute.xlu1 %1618 }
 0x22a   : >> { %5761 = vmatmul.mubr.msk.bf16.gmra.mrb[20].mxu1 %vm10374_vm6, %v10465_v44  ;;  %vm1824_vm7 = vcmp.eq.s32.totalorder %v10425_v12, %v7469_v56 }
 0x22b   : >> { %5764 = vmatprep.mubr.msk.bf16.mxu1 %vm10374_vm6, %v1115_v25  ;;  %v7452_v33 = vpop.permute.xlu0 %1563 }
 0x22d   : >> { %v7477_v30 = vpop.permute.xlu1 %1622 }
 0x22e   : >> { %5731 = vmatmul.mubr.msk.bf16.gmra.mrb[24].mxu0 %vm10374_vm6, %v1100_v41  ;;  %v1904_v41 = vadd.s32 1, %v7422_v48  ;;  %vm1825_vm11 = vcmp.eq.s32.totalorder %v10425_v12, %v7477_v30 }
 0x22f   : >> { %5734 = vmatprep.mubr.msk.bf16.mxu0 %vm10374_vm6, %v1101_v36  ;;  %v7462_v21 = vpop.permute.xlu0 %1567 }
 0x230   : >> { %vm1936_vm15 = vcmp.eq.s32.totalorder %v10425_v12, %v1904_v41 }
 0x231   : >> { %v7482_v4 = vpop.permute.xlu1 %1626  ;;  %v5603_v16 = vsel %vm1936_vm15, 1.0, %v10454_v11  ;;  %vm1810_vm15 = vcmp.eq.s32.totalorder %v10425_v12, %v7443_v52 }
 0x232   : >> { %5765 = vmatmul.mubr.msk.bf16.gmra.mrb[24].mxu1 %vm10374_vm6, %v1116_v22  ;;  %v1902_v22 = vadd.s32 1, %v7401_v35 }
 0x233   : >> { %5768 = vmatprep.mubr.msk.bf16.mxu1 %vm10374_vm6, %v1117_v53  ;;  %v1572_v38 = vpop.permute.xlu0 %1571  ;;  %v1918_v53 = vadd.s32 1, %v7410_v1 }
 0x234   : >> { %v1909_v42 = vadd.s32 1, %v1572_v38  ;;  %vm1813_vm12 = vcmp.eq.s32.totalorder %v10425_v12, %v1572_v38  ;;  %vm1934_vm1 = vcmp.eq.s32.totalorder %v10425_v12, %v1902_v22 }
 0x235   : >> { %v7488_v0 = vpop.permute.xlu1 %1630  ;;  %v5576_v3 = vsel %vm1813_vm12, 1.0, %v10454_v11  ;;  %v5601_v48 = vsel %vm1934_vm1, 1.0, %v10454_v11  ;;  %vm1950_vm3 = vcmp.eq.s32.totalorder %v10425_v12, %v1918_v53  ;;  %vm1811_vm1 = vcmp.eq.s32.totalorder %v10425_v12, %v7452_v33 }
 0x236   : >> { %5735 = vmatmul.mubr.msk.bf16.gmra.mrb[28].mxu0 %vm10374_vm6, %v1102_v47  ;;  %vm1941_vm13 = vcmp.eq.s32.totalorder %v10425_v12, %v1909_v42  ;;  %v1919_v47 = vadd.s32 1, %v7456_v34  ;;  %v1920_v42 = vadd.s32 1, %v7469_v56 }
 0x237   : >> { %v7475_v27 = vpop.permute.xlu0 %1677  ;;  %v5608_v32 = vsel %vm1941_vm13, 1.0, %v10454_v11  ;;  %vm1812_vm13 = vcmp.eq.s32.totalorder %v10425_v12, %v7462_v21 }
 0x238   : >> { %v7527_v39 = vsub.f32 %v5608_v32, %v5576_v3  ;;  %vm1951_vm5 = vcmp.eq.s32.totalorder %v10425_v12, %v1919_v47  ;;  %v5586_v32 = vsel %vm1823_vm4, 1.0, %v10454_v11  ;;  %vm1952_vm8 = vcmp.eq.s32.totalorder %v10425_v12, %v1920_v42 }
 0x239   : >> { %v7496_v14 = vpop.permute.xlu1 %1634  ;;  %v5618_v1 = vsel %vm1951_vm5, 1.0, %v10454_v11  ;;  %v1903_v47 = vadd.s32 1, %v7440_v63  ;;  %vm1826_vm5 = vcmp.eq.s32.totalorder %v10425_v12, %v7482_v4 }
 0x23a   : >> { %5769 = vmatmul.mubr.msk.bf16.gmra.mrb[28].mxu1 %vm10374_vm6, %v1118_v54  ;;  %v5571_v54 = vsel %vm1808_vm14, 1.0, %v10454_v11  ;;  %v7569_v34 = vsub.f32 %v5618_v1, %v5586_v32 }
 0x23b   : >> { %v7480_v15 = vpop.permute.xlu0 %1744  ;;  %v2032_v35 = vsub.f32 %v5603_v16, %v5571_v54  ;;  %v7577_v16 = vsel %vm1824_vm7, 1.0, %v10454_v11  ;;  %vm1935_vm10 = vcmp.eq.s32.totalorder %v10425_v12, %v1903_v47  ;;  %v7632_v47 = vsel %vm1825_vm11, 1.0, %v10454_v11 }
 0x23d   : >> { %v7503_v29 = vpop.permute.xlu1 %1638 }
 0x23f   : >> { %v7484_v46 = vpop.permute.xlu0 %1575 }
 0x241   : >> { %v7507_v18 = vpop.permute.xlu1 %1681 }
 0x243   : >> { %v1686_v24 = vpop.permute.xlu0 %1685 }
 0x245   : >> { %v1749_v23 = vpop.permute.xlu1 %1748 }
 0x246   : >> { %v2079_v56 = vmul.f32 %v7569_v34, %v1749_v23 }
 0x247   : >> { %v7492_v58 = vpop.permute.xlu0 %1579 }
 0x248   : >> { %v7607_v9 = vadd.f32 %v5586_v32, %v2079_v56 }
 0x249   : >> { %v7517_v51 = vpop.permute.xlu1 %1642 }
 0x24b   : >> { %v1690_v59 = vpop.permute.xlu0 %1689 }
 0x24c   : >> { %v2065_v28 = vmul.f32 %v7494_v13, %v1690_v59 }
 0x24d   : >> { %v7525_v2 = vpop.permute.xlu1 %1752 }
 0x24e   : >> { %v7499_v7 = vadd.f32 %v5572_v19, %v2065_v28  ;;  %v5569_v19 = vsel %vm1806_vm0, 1.0, %v10454_v11  ;;  %v5585_v28 = vsel %vm1822_vm2, 1.0, %v10454_v11 }
 0x24f   : >> { %v7501_v49 = vpop.permute.xlu0 %1583  ;;  %v2030_v45 = vsub.f32 %v5601_v48, %v5569_v19 }
 0x251   : >> { %v7530_v25 = vpop.permute.xlu1 %1646 }
 0x253   : >> { %v7505_v17 = vpop.permute.xlu0 %1693 }
 0x255   : >> { %v7535_v36 = vpop.permute.xlu1 %1756 }
 0x257   : >> { %v7509_v50 = vpop.permute.xlu0 %1587 }
 0x259   : >> { %v7545_v38 = vpop.permute.xlu1 %1650 }
 0x25b   : >> { %v7511_v20 = vpop.permute.xlu0 %1697 }
 0x25d   : >> { %v7558_v59 = vpop.permute.xlu1 %1760 }
 0x25f   : >> { %v7513_v37 = vpop.permute.xlu0 %1591 }
 0x261   : >> { %v7573_v53 = vpop.permute.xlu1 %1654 }
 0x263   : >> { %v7519_v55 = vpop.permute.xlu0 %1701 }
 0x265   : >> { %v7603_v62 = vpop.permute.xlu1 %1764 }
 0x267   : >> { %v7523_v43 = vpop.permute.xlu0 %1595 }
 0x26b   : >> { %v1706_v40 = vpop.permute.xlu0 %1705 }
 0x26c   : >> { %v2069_v57 = vmul.f32 %v7527_v39, %v1706_v40  ;;  %v2064_v40 = vmul.f32 %v2032_v35, %v1686_v24 }
 0x26e   : >> { %v7532_v44 = vadd.f32 %v5576_v3, %v2069_v57  ;;  %v5617_v3 = vsel %vm1950_vm3, 1.0, %v10454_v11  ;;  %v2062_v57 = vmul.f32 %v2030_v45, %v7475_v27  ;;  %v7571_v22 = vadd.f32 %v5571_v54, %v2064_v40 }
 0x26f   : >> { %v2046_v41 = vsub.f32 %v5617_v3, %v5585_v28  ;;  %v5619_v27 = vsel %vm1952_vm8, 1.0, %v10454_v11  ;;  %v1921_v40 = vadd.s32 1, %v7477_v30  ;;  %v7629_v30 = vpop.permute.xlu1 %1658  ;;  %vm1829_vm3 = vcmp.eq.s32.totalorder %v10425_v12, %v7503_v29 }
 0x270   : >> { %v7581_v48 = vadd.f32 %v5569_v19, %v2062_v57  ;;  %vm1827_vm8 = vcmp.eq.s32.totalorder %v10425_v12, %v7488_v0 }
 0x271   : >> { %v2078_v24 = vmul.f32 %v2046_v41, %v7480_v15  ;;  %v7592_v15 = vsub.f32 %v5619_v27, %v7577_v16  ;;  %vm1953_vm12 = vcmp.eq.s32.totalorder %v10425_v12, %v1921_v40  ;;  %v1908_v40 = vadd.s32 1, %v7462_v21 }
 0x273   : >> { %vm1940_vm14 = vcmp.eq.s32.totalorder %v10425_v12, %v1908_v40 }
 0x289   : >> { %v5708_v42 = vpop.f32.mrb[0].mxu0 }
 0x28a   : >> { %v7585_v3 = vmul.f32 %v5708_v42, %v7571_v22  ;;  %v2256_v54 = vmul.f32 %v5708_v42, %v2032_v35  ;;  %v1202_v1 = vpop.f32.mrb[1].mxu0  ;;  %v7601_v42 = vadd.f32 %v5585_v28, %v2078_v24  ;;  %v5602_v28 = vsel %vm1935_vm10, 1.0, %v10454_v11 }
 0x28b   : >> { %v5709_v19 = vpop.f32.mrb[2].mxu0  ;;  %v2126_v57 = vmul.f32 %v7581_v48, %v1202_v1  ;;  %v2254_v24 = vmul.f32 %v2030_v45, %v1202_v1  ;;  %v2031_v45 = vsub.f32 %v5602_v28, %v5570_v6  ;;  %v5620_v1 = vsel %vm1953_vm12, 1.0, %v10454_v11 }
 0x28c   : >> { %10466 = vst [vmem:[#allocation53_spill] sm:$0xff] %v7585_v3  ;;  %v7596_v23 = vmul.f32 %v5709_v19, %v7499_v7  ;;  %v7598_v10 = vpop.f32.mrb[3].mxu0  ;;  %v2292_v35 = vsel %vm10374_vm6, %v2256_v54, 0.0  ;;  %v2257_v60 = vmul.f32 %v5709_v19, %v7494_v13  ;;  %v7652_v19 = vpop.permute.xlu1 %1768  ;;  %vm1828_vm10 = vcmp.eq.s32.totalorder %v10425_v12, %v7496_v14 }
 0x28d   : >> { %v7605_v26 = vpop.f32.mrb[0].mxu1  ;;  %2293 = vadd.xlane.f32.xlu1 %v2292_v35  ;;  %v2158_v63 = vsel %vm10374_vm6, %v2126_v57, 0.0  ;;  %v2286_v57 = vsel %vm10374_vm6, %v2254_v24, 0.0  ;;  %v2063_v28 = vmul.f32 %v2031_v45, %v7507_v18  ;;  %10471 = vst [vmem:[#allocation58_spill] sm:$0xff] %v7652_v19  ;;  %v1907_v24 = vadd.s32 1, %v7452_v33 }
 0x28e   : >> { %10467 = vst [vmem:[#allocation54_spill] sm:$0xff] %v7596_v23  ;;  %10468 = vst [vmem:[#allocation55_spill] sm:$0xff] %v7605_v26  ;;  %v2272_v27 = vmul.f32 %v7605_v26, %v7592_v15  ;;  %v1411_v8 = vpop.f32.mrb[1].mxu1  ;;  %v1925_v18 = vadd.s32 1, %v7503_v29  ;;  %v7716_v31 = vsel %vm1828_vm10, 1.0, %v10454_v11  ;;  %vm1814_vm12 = vcmp.eq.s32.totalorder %v10425_v12, %v7484_v46 }
 0x28f   : >> { %v7621_v32 = vpop.f32.mrb[2].mxu1  ;;  %v2142_v56 = vmul.f32 %v7601_v42, %v1411_v8  ;;  %vm1939_vm2 = vcmp.eq.s32.totalorder %v10425_v12, %v1907_v24  ;;  %10473 = vst [vmem:[#allocation60_spill] sm:$0xff] %v7716_v31 }
 0x290   : >> { %10469 = vst [vmem:[#allocation56_spill] sm:$0xff] %v7621_v32  ;;  %v1414_v54 = vpop.f32.mrb[3].mxu1  ;;  %v2340_v35 = vsel %vm10374_vm6, %v2272_v27, 0.0  ;;  %v2270_v27 = vmul.f32 %v2046_v41, %v1411_v8  ;;  %v2255_v8 = vmul.f32 %v2031_v45, %v7598_v10  ;;  %v5607_v45 = vsel %vm1940_vm14, 1.0, %v10454_v11 }
 0x291   : >> { %v7627_v5 = vmul.f32 %v7607_v9, %v1414_v54  ;;  %2341 = vadd.xlane.f32.xlu0 %v2340_v35  ;;  %2159 = vadd.xlane.f32.xlu1 %v2158_v63  ;;  %v2206_v61 = vsel %vm10374_vm6, %v2142_v56, 0.0  ;;  %v1906_v35 = vadd.s32 1, %v7443_v52  ;;  %v7641_v63 = vsub.f32 %v5620_v1, %v7632_v47 }
 0x292   : >> { %v2334_v41 = vsel %vm10374_vm6, %v2270_v27, 0.0  ;;  %v1922_v56 = vadd.s32 1, %v7482_v4  ;;  %v7669_v1 = vadd.f32 %v5570_v6, %v2063_v28  ;;  %v2271_v52 = vmul.f32 %v7569_v34, %v1414_v54  ;;  %v7681_v34 = vpop.permute.xlu1 %1662 }
 0x293   : >> { %10470 = vst [vmem:[#allocation57_spill] sm:$0xff] %v7627_v5  ;;  %v2273_v13 = vmul.f32 %v7621_v32, %v7641_v63  ;;  %vm1938_vm0 = vcmp.eq.s32.totalorder %v10425_v12, %v1906_v35  ;;  %v5573_v35 = vsel %vm1810_vm15, 1.0, %v10454_v11  ;;  %vm1957_vm4 = vcmp.eq.s32.totalorder %v10425_v12, %v1925_v18  ;;  %v7703_v18 = vpop.permute.xlu0 %1599 }
 0x294   : >> { %10472 = vst [vmem:[#allocation59_spill] sm:$0xff] %v7669_v1  ;;  %v5605_v21 = vsel %vm1938_vm0, 1.0, %v10454_v11  ;;  %vm1954_vm7 = vcmp.eq.s32.totalorder %v10425_v12, %v1922_v56  ;;  %v5574_v54 = vsel %vm1811_vm1, 1.0, %v10454_v11  ;;  %v2127_v29 = vmul.f32 %v7669_v1, %v7598_v10 }
 0x295   : >> { %2287 = vadd.xlane.f32.xlu0 %v2286_v57  ;;  %2207 = vadd.xlane.f32.xlu1 %v2206_v61  ;;  %v2295_v61 = vsel %vm10374_vm6, %v2257_v60, 0.0  ;;  %v5575_v60 = vsel %vm1812_vm13, 1.0, %v10454_v11  ;;  %v2343_v27 = vsel %vm10374_vm6, %v2273_v13, 0.0  ;;  %v2289_v57 = vsel %vm10374_vm6, %v2255_v8, 0.0 }
 0x296   : >> { %v2036_v6 = vsub.f32 %v5607_v45, %v5575_v60  ;;  %v2034_v40 = vsub.f32 %v5605_v21, %v5573_v35  ;;  %v5606_v28 = vsel %vm1939_vm2, 1.0, %v10454_v11  ;;  %v2337_v8 = vsel %vm10374_vm6, %v2271_v52, 0.0 }
 0x297   : >> { %v1924_v4 = vadd.s32 1, %v7496_v14  ;;  %v5592_v13 = vsel %vm1829_vm3, 1.0, %v10454_v11  ;;  %v5624_v33 = vsel %vm1957_vm4, 1.0, %v10454_v11  ;;  %v2035_v24 = vsub.f32 %v5606_v28, %v5574_v54 }
 0x298   : >> { %v2068_v10 = vmul.f32 %v2036_v6, %v7519_v55  ;;  %v5590_v56 = vsel %vm1827_vm8, 1.0, %v10454_v11  ;;  %v2161_v52 = vsel %vm10374_vm6, %v2127_v29, 0.0  ;;  %vm1816_vm14 = vcmp.eq.s32.totalorder %v10425_v12, %v7501_v49 }
 0x299   : >> { %2335 = vadd.xlane.f32.xlu0 %v2334_v41  ;;  %2296 = vadd.xlane.f32.xlu1 %v2295_v61  ;;  %v1923_v41 = vadd.s32 1, %v7488_v0  ;;  %v5589_v61 = vsel %vm1826_vm5, 1.0, %v10454_v11  ;;  %v5621_v0 = vsel %vm1954_vm7, 1.0, %v10454_v11  ;;  %vm1956_vm11 = vcmp.eq.s32.totalorder %v10425_v12, %v1924_v4 }
 0x29a   : >> { %v2050_v21 = vsub.f32 %v5621_v0, %v5589_v61  ;;  %v7712_v55 = vadd.f32 %v5575_v60, %v2068_v10  ;;  %v2067_v28 = vmul.f32 %v2035_v24, %v7511_v20  ;;  %v5623_v29 = vsel %vm1956_vm11, 1.0, %v10454_v11 }
 0x29b   : >> { %vm1955_vm9 = vcmp.eq.s32.totalorder %v10425_v12, %v1923_v41  ;;  %v2066_v41 = vmul.f32 %v2034_v40, %v7505_v17  ;;  %v7724_v17 = vpop.permute.xlu0 %1709  ;;  %vm1817_vm0 = vcmp.eq.s32.totalorder %v10425_v12, %v7509_v50  ;;  %vm1815_vm2 = vcmp.eq.s32.totalorder %v10425_v12, %v7492_v58 }
 0x29c   : >> { %v5622_v45 = vsel %vm1955_vm9, 1.0, %v10454_v11  ;;  %v2082_v14 = vmul.f32 %v2050_v21, %v7558_v59  ;;  %v7736_v59 = vadd.f32 %v5574_v54, %v2067_v28  ;;  %vm1832_vm4 = vcmp.eq.s32.totalorder %v10425_v12, %v7545_v38 }
 0x29d   : >> { %2344 = vadd.xlane.f32.xlu0 %v2343_v27  ;;  %2290 = vadd.xlane.f32.xlu1 %v2289_v57  ;;  %v2053_v27 = vsub.f32 %v5624_v33, %v5592_v13  ;;  %v1773_v57 = vpop.permute.xlu1 %1772  ;;  %v7722_v23 = vadd.f32 %v5573_v35, %v2066_v41  ;;  %vm1833_vm7 = vcmp.eq.s32.totalorder %v10425_v12, %v7573_v53 }
 0x29e   : >> { %vm1830_vm9 = vcmp.eq.s32.totalorder %v10425_v12, %v7517_v51  ;;  %vm1831_vm11 = vcmp.eq.s32.totalorder %v10425_v12, %v7530_v25 }
 0x29f   : >> { %v2085_v33 = vmul.f32 %v2053_v27, %v1773_v57 }
 0x2a1   : >> { %2338 = vadd.xlane.f32.xlu0 %v2337_v8  ;;  %v2051_v8 = vsub.f32 %v5622_v45, %v5590_v56  ;;  %v7719_v32 = vpop.permute.xlu1 %1666  ;;  %v7731_v45 = vsub.f32 %v5623_v29, %v7716_v31 }
 0x2a3   : >> { %v2083_v10 = vmul.f32 %v2051_v8, %v7603_v62  ;;  %10475 = vst [vmem:[#allocation62_spill] sm:$0xff] %v7731_v45 }
 0x2a5   : >> { %2162 = vadd.xlane.f32.xlu0 %v2161_v52  ;;  %v7753_v28 = vpop.permute.xlu1 %1776 }
 0x2a9   : >> { %v5712_v4 = vpop.f32.mrb[4].mxu0 }
 0x2aa   : >> { %v7727_v60 = vmul.f32 %v5712_v4, %v7712_v55  ;;  %v2260_v20 = vmul.f32 %v5712_v4, %v2036_v6  ;;  %v1218_v0 = vpop.f32.mrb[5].mxu0  ;;  %v7742_v6 = vadd.f32 %v5592_v13, %v2085_v33  ;;  %v7749_v4 = vadd.f32 %v5589_v61, %v2082_v14 }
 0x2ab   : >> { %v7734_v52 = vmul.f32 %v7722_v23, %v1218_v0  ;;  %v5713_v57 = vpop.f32.mrb[6].mxu0  ;;  %v2258_v35 = vmul.f32 %v2034_v40, %v1218_v0  ;;  %v7759_v33 = vadd.f32 %v5590_v56, %v2083_v10  ;;  %v1912_v56 = vadd.s32 1, %v7501_v49 }
 0x2ac   : >> { %10474 = vst [vmem:[#allocation61_spill] sm:$0xff] %v7727_v60  ;;  %v7739_v41 = vmul.f32 %v5713_v57, %v7532_v44  ;;  %v1221_v5 = vpop.f32.mrb[7].mxu0  ;;  %v2304_v60 = vsel %vm10374_vm6, %v2260_v20, 0.0  ;;  %v2261_v0 = vmul.f32 %v5713_v57, %v7527_v39  ;;  %v1910_v39 = vadd.s32 1, %v7484_v46 }
 0x2ad   : >> { %10476 = vst [vmem:[#allocation63_spill] sm:$0xff] %v7734_v52  ;;  %v7745_v62 = vmul.f32 %v7736_v59, %v1221_v5  ;;  %v7747_v29 = vpop.f32.mrb[4].mxu1  ;;  %2305 = vadd.xlane.f32.xlu1 %v2304_v60  ;;  %10481 = vst [vmem:[#allocation68_spill] sm:$0xff] %v7759_v33  ;;  %v2259_v10 = vmul.f32 %v2035_v24, %v1221_v5  ;;  %v1911_v5 = vadd.s32 1, %v7492_v58  ;;  %v1926_v46 = vadd.s32 1, %v7517_v51 }
 0x2ae   : >> { %10477 = vst [vmem:[#allocation64_spill] sm:$0xff] %v7739_v41  ;;  %10479 = vst [vmem:[#allocation66_spill] sm:$0xff] %v7747_v29  ;;  %v2276_v54 = vmul.f32 %v7747_v29, %v7731_v45  ;;  %v1427_v40 = vpop.f32.mrb[5].mxu1  ;;  %v7761_v41 = vpop.permute.xlu0 %1603  ;;  %v2298_v29 = vsel %vm10374_vm6, %v2258_v35, 0.0  ;;  %vm1942_vm13 = vcmp.eq.s32.totalorder %v10425_v12, %v1910_v39  ;;  %vm1944_vm15 = vcmp.eq.s32.totalorder %v10425_v12, %v1912_v56 }
 0x2af   : >> { %10478 = vst [vmem:[#allocation65_spill] sm:$0xff] %v7745_v62  ;;  %v7757_v20 = vmul.f32 %v7749_v4, %v1427_v40  ;;  %v5747_v13 = vpop.f32.mrb[6].mxu1  ;;  %v2274_v62 = vmul.f32 %v2050_v21, %v1427_v40  ;;  %v2307_v40 = vsel %vm10374_vm6, %v2261_v0, 0.0  ;;  %v1929_v49 = vadd.s32 1, %v7573_v53 }
 0x2b0   : >> { %v7764_v61 = vmul.f32 %v5747_v13, %v7742_v6  ;;  %v1430_v14 = vpop.f32.mrb[7].mxu1  ;;  %v2352_v60 = vsel %vm10374_vm6, %v2276_v54, 0.0  ;;  %v2277_v57 = vmul.f32 %v5747_v13, %v2053_v27  ;;  %v7775_v54 = vpop.permute.xlu1 %1670  ;;  %v5577_v0 = vsel %vm1814_vm12, 1.0, %v10454_v11 }
 0x2b1   : >> { %10480 = vst [vmem:[#allocation67_spill] sm:$0xff] %v7757_v20  ;;  %v7769_v52 = vmul.f32 %v7759_v33, %v1430_v14  ;;  %2353 = vadd.xlane.f32.xlu0 %v2352_v60  ;;  %2299 = vadd.xlane.f32.xlu1 %v2298_v29  ;;  %v2346_v21 = vsel %vm10374_vm6, %v2274_v62, 0.0  ;;  %v2275_v24 = vmul.f32 %v2051_v8, %v1430_v14  ;;  %v2301_v62 = vsel %vm10374_vm6, %v2259_v10, 0.0 }
 0x2b2   : >> { %10482 = vst [vmem:[#allocation69_spill] sm:$0xff] %v7764_v61  ;;  %v7777_v35 = vpop.permute.xlu0 %1713  ;;  %v1913_v61 = vadd.s32 1, %v7509_v50  ;;  %v2355_v27 = vsel %vm10374_vm6, %v2277_v57, 0.0  ;;  %v1928_v29 = vadd.s32 1, %v7545_v38  ;;  %v5579_v8 = vsel %vm1816_vm14, 1.0, %v10454_v11 }
 0x2b3   : >> { %10483 = vst [vmem:[#allocation70_spill] sm:$0xff] %v7769_v52  ;;  %v5609_v13 = vsel %vm1942_vm13, 1.0, %v10454_v11  ;;  %v5611_v60 = vsel %vm1944_vm15, 1.0, %v10454_v11  ;;  %vm1943_vm3 = vcmp.eq.s32.totalorder %v10425_v12, %v1911_v5  ;;  %v1927_v50 = vadd.s32 1, %v7530_v25 }
 0x2b4   : >> { %vm1945_vm1 = vcmp.eq.s32.totalorder %v10425_v12, %v1913_v61  ;;  %v1781_v14 = vpop.permute.xlu1 %1780  ;;  %v2349_v10 = vsel %vm10374_vm6, %v2275_v24, 0.0  ;;  %vm1960_vm5 = vcmp.eq.s32.totalorder %v10425_v12, %v1928_v29  ;;  %v5580_v39 = vsel %vm1817_vm0, 1.0, %v10454_v11 }
 0x2b5   : >> { %2347 = vadd.xlane.f32.xlu0 %v2346_v21  ;;  %2308 = vadd.xlane.f32.xlu1 %v2307_v40  ;;  %v5612_v57 = vsel %vm1945_vm1, 1.0, %v10454_v11  ;;  %vm1961_vm8 = vcmp.eq.s32.totalorder %v10425_v12, %v1929_v49  ;;  %v2040_v58 = vsub.f32 %v5611_v60, %v5579_v8  ;;  %vm1958_vm10 = vcmp.eq.s32.totalorder %v10425_v12, %v1926_v46 }
 0x2b6   : >> { %v1718_v56 = vpop.permute.xlu0 %1717  ;;  %v5578_v38 = vsel %vm1815_vm2, 1.0, %v10454_v11  ;;  %v2038_v21 = vsub.f32 %v5609_v13, %v5577_v0  ;;  %v5595_v24 = vsel %vm1832_vm4, 1.0, %v10454_v11  ;;  %v5610_v61 = vsel %vm1943_vm3, 1.0, %v10454_v11 }
 0x2b7   : >> { %v5627_v53 = vsel %vm1960_vm5, 1.0, %v10454_v11  ;;  %vm1959_vm12 = vcmp.eq.s32.totalorder %v10425_v12, %v1927_v50  ;;  %v5596_v51 = vsel %vm1833_vm7, 1.0, %v10454_v11  ;;  %v5628_v29 = vsel %vm1961_vm8, 1.0, %v10454_v11 }
 0x2b8   : >> { %v1785_v40 = vpop.permute.xlu1 %1784  ;;  %v5593_v46 = vsel %vm1830_vm9, 1.0, %v10454_v11  ;;  %v5625_v49 = vsel %vm1958_vm10, 1.0, %v10454_v11  ;;  %v2072_v13 = vmul.f32 %v2040_v58, %v1718_v56  ;;  %v2039_v5 = vsub.f32 %v5610_v61, %v5578_v38 }
 0x2b9   : >> { %2356 = vadd.xlane.f32.xlu0 %v2355_v27  ;;  %2302 = vadd.xlane.f32.xlu1 %v2301_v62  ;;  %v2041_v27 = vsub.f32 %v5612_v57, %v5580_v39  ;;  %v2056_v60 = vsub.f32 %v5627_v53, %v5595_v24  ;;  %v5626_v57 = vsel %vm1959_vm12, 1.0, %v10454_v11  ;;  %v2057_v25 = vsub.f32 %v5628_v29, %v5596_v51 }
 0x2ba   : >> { %v1722_v62 = vpop.permute.xlu0 %1721  ;;  %v2054_v20 = vsub.f32 %v5625_v49, %v5593_v46  ;;  %v2070_v50 = vmul.f32 %v2038_v21, %v7724_v17  ;;  %v7835_v3 = vadd.f32 %v5579_v8, %v2072_v13  ;;  %v2071_v45 = vmul.f32 %v2039_v5, %v7777_v35 }
 0x2bb   : >> { %v2073_v52 = vmul.f32 %v2041_v27, %v1722_v62  ;;  %v2088_v19 = vmul.f32 %v2056_v60, %v1785_v40  ;;  %vm1818_vm13 = vcmp.eq.s32.totalorder %v10425_v12, %v7513_v37  ;;  %vm1820_vm15 = vcmp.eq.s32.totalorder %v10425_v12, %v7703_v18 }
 0x2bc   : >> { %v1789_v26 = vpop.permute.xlu1 %1788  ;;  %v2086_v61 = vmul.f32 %v2054_v20, %v7753_v28  ;;  %v7841_v33 = vadd.f32 %v5577_v0, %v2070_v50  ;;  %v7849_v35 = vadd.f32 %v5578_v38, %v2071_v45  ;;  %vm1821_vm1 = vcmp.eq.s32.totalorder %v10425_v12, %v7761_v41 }
 0x2bd   : >> { %2350 = vadd.xlane.f32.xlu0 %v2349_v10  ;;  %v5594_v10 = vsel %vm1831_vm11, 1.0, %v10454_v11  ;;  %v2089_v1 = vmul.f32 %v2057_v25, %v1789_v26  ;;  %v7838_v56 = vadd.f32 %v5580_v39, %v2073_v52  ;;  %v7851_v26 = vadd.f32 %v5595_v24, %v2088_v19 }
 0x2be   : >> { %v2055_v31 = vsub.f32 %v5626_v57, %v5594_v10  ;;  %v7862_v57 = vadd.f32 %v5593_v46, %v2086_v61  ;;  %vm1819_vm3 = vcmp.eq.s32.totalorder %v10425_v12, %v7523_v43  ;;  %vm1836_vm5 = vcmp.eq.s32.totalorder %v10425_v12, %v7719_v32 }
 0x2bf   : >> { %v7857_v40 = vadd.f32 %v5596_v51, %v2089_v1  ;;  %vm1837_vm8 = vcmp.eq.s32.totalorder %v10425_v12, %v7775_v54  ;;  %vm1834_vm10 = vcmp.eq.s32.totalorder %v10425_v12, %v7629_v30  ;;  %vm1835_vm12 = vcmp.eq.s32.totalorder %v10425_v12, %v7681_v34 }
 0x2c0   : >> { %v2087_v49 = vmul.f32 %v2055_v31, %v1781_v14 }
 0x2c9   : >> { %v5716_v53 = vpop.f32.mrb[8].mxu0 }
 0x2ca   : >> { %v7844_v62 = vmul.f32 %v5716_v53, %v7835_v3  ;;  %v2264_v29 = vmul.f32 %v5716_v53, %v2040_v58  ;;  %v1234_v17 = vpop.f32.mrb[9].mxu0  ;;  %v7870_v53 = vadd.f32 %v5594_v10, %v2087_v49  ;;  %v1916_v10 = vadd.s32 1, %v7703_v18 }
 0x2cb   : >> { %v7847_v8 = vmul.f32 %v7841_v33, %v1234_v17  ;;  %v5717_v13 = vpop.f32.mrb[10].mxu0  ;;  %v2262_v52 = vmul.f32 %v2038_v21, %v1234_v17  ;;  %v5583_v18 = vsel %vm1820_vm15, 1.0, %v10454_v11  ;;  %vm2846_vm15 = vcmask 195712  }
 0x2cc   : >> { %10484 = vst [vmem:[#allocation71_spill] sm:$0xff] %v7844_v62  ;;  %v7854_v28 = vmul.f32 %v5717_v13, %v7838_v56  ;;  %v1237_v0 = vpop.f32.mrb[11].mxu0  ;;  %v2316_v39 = vsel %vm10374_vm6, %v2264_v29, 0.0  ;;  %v2265_v21 = vmul.f32 %v5717_v13, %v2041_v27  ;;  %v7880_v27 = vpop.permute.xlu0 %1725  ;;  %vm1948_vm0 = vcmp.eq.s32.totalorder %v10425_v12, %v1916_v10 }
 0x2cd   : >> { %v7860_v58 = vmul.f32 %v7849_v35, %v1237_v0  ;;  %v5750_v14 = vpop.f32.mrb[8].mxu1  ;;  %2317 = vadd.xlane.f32.xlu1 %v2316_v39  ;;  %v2310_v61 = vsel %vm10374_vm6, %v2262_v52, 0.0 }
 0x2ce   : >> { %10485 = vst [vmem:[#allocation72_spill] sm:$0xff] %v7854_v28  ;;  %v7865_v45 = vmul.f32 %v5750_v14, %v7851_v26  ;;  %v2280_v19 = vmul.f32 %v5750_v14, %v2056_v60  ;;  %v1443_v38 = vpop.f32.mrb[9].mxu1  ;;  %v1914_v60 = vadd.s32 1, %v7513_v37  ;;  %v2319_v39 = vsel %vm10374_vm6, %v2265_v21, 0.0 }
 0x2cf   : >> { %10486 = vst [vmem:[#allocation73_spill] sm:$0xff] %v7860_v58  ;;  %v7868_v24 = vmul.f32 %v7862_v57, %v1443_v38  ;;  %v5751_v50 = vpop.f32.mrb[10].mxu1  ;;  %v2278_v1 = vmul.f32 %v2054_v20, %v1443_v38  ;;  %v2263_v20 = vmul.f32 %v2039_v5, %v1237_v0  ;;  %v1917_v14 = vadd.s32 1, %v7761_v41  ;;  %v1793_v5 = vpop.permute.xlu1 %1792 }
 0x2d0   : >> { %10487 = vst [vmem:[#allocation74_spill] sm:$0xff] %v7865_v45  ;;  %v7873_v51 = vmul.f32 %v5751_v50, %v7857_v40  ;;  %v1446_v29 = vpop.f32.mrb[11].mxu1  ;;  %v2364_v46 = vsel %vm10374_vm6, %v2280_v19, 0.0  ;;  %v2281_v49 = vmul.f32 %v5751_v50, %v2057_v25  ;;  %v7886_v52 = vpop.permute.xlu0 %1729  ;;  %vm1946_vm14 = vcmp.eq.s32.totalorder %v10425_v12, %v1914_v60 }
 0x2d1   : >> { %10488 = vst [vmem:[#allocation75_spill] sm:$0xff] %v7868_v24  ;;  %v7878_v17 = vmul.f32 %v7870_v53, %v1446_v29  ;;  %2365 = vadd.xlane.f32.xlu0 %v2364_v46  ;;  %2311 = vadd.xlane.f32.xlu1 %v2310_v61  ;;  %v2358_v13 = vsel %vm10374_vm6, %v2278_v1, 0.0  ;;  %v1915_v19 = vadd.s32 1, %v7523_v43  ;;  %v2279_v25 = vmul.f32 %v2055_v31, %v1446_v29 }
 0x2d2   : >> { %10489 = vst [vmem:[#allocation76_spill] sm:$0xff] %v7873_v51  ;;  %v2367_v0 = vsel %vm10374_vm6, %v2281_v49, 0.0  ;;  %v2313_v38 = vsel %vm10374_vm6, %v2263_v20, 0.0  ;;  %v1932_v21 = vadd.s32 1, %v7719_v32  ;;  %v1930_v50 = vadd.s32 1, %v7629_v30 }
 0x2d3   : >> { %10490 = vst [vmem:[#allocation77_spill] sm:$0xff] %v7878_v17  ;;  %v1933_v1 = vadd.s32 1, %v7775_v54  ;;  %vm1949_vm2 = vcmp.eq.s32.totalorder %v10425_v12, %v1917_v14  ;;  %v5581_v31 = vsel %vm1818_vm13, 1.0, %v10454_v11  ;;  %v5613_v29 = vsel %vm1946_vm14, 1.0, %v10454_v11  ;;  %v1797_v46 = vpop.permute.xlu1 %1796 }
 0x2d4   : >> { %v5615_v61 = vsel %vm1948_vm0, 1.0, %v10454_v11  ;;  %v1734_v10 = vpop.permute.xlu0 %1733  ;;  %vm1947_vm4 = vcmp.eq.s32.totalorder %v10425_v12, %v1915_v19  ;;  %v1931_v41 = vadd.s32 1, %v7681_v34  ;;  %v2361_v37 = vsel %vm10374_vm6, %v2279_v25, 0.0 }
 0x2d5   : >> { %2359 = vadd.xlane.f32.xlu0 %v2358_v13  ;;  %2320 = vadd.xlane.f32.xlu1 %v2319_v39  ;;  %vm1964_vm7 = vcmp.eq.s32.totalorder %v10425_v12, %v1932_v21  ;;  %v5584_v60 = vsel %vm1821_vm1, 1.0, %v10454_v11  ;;  %v5616_v20 = vsel %vm1949_vm2, 1.0, %v10454_v11  ;;  %vm1965_vm9 = vcmp.eq.s32.totalorder %v10425_v12, %v1933_v1 }
 0x2d6   : >> { %v2044_v43 = vsub.f32 %v5615_v61, %v5583_v18  ;;  %vm1962_vm11 = vcmp.eq.s32.totalorder %v10425_v12, %v1930_v50  ;;  %v5582_v32 = vsel %vm1819_vm3, 1.0, %v10454_v11  ;;  %v2042_v49 = vsub.f32 %v5613_v29, %v5581_v31 }
 0x2d7   : >> { %v1801_v13 = vpop.permute.xlu1 %1800  ;;  %v5599_v39 = vsel %vm1836_vm5, 1.0, %v10454_v11  ;;  %v5614_v14 = vsel %vm1947_vm4, 1.0, %v10454_v11  ;;  %v5631_v54 = vsel %vm1964_vm7, 1.0, %v10454_v11  ;;  %v2045_v25 = vsub.f32 %v5616_v20, %v5584_v60 }
 0x2d8   : >> { %vm1963_vm13 = vcmp.eq.s32.totalorder %v10425_v12, %v1931_v41  ;;  %v5600_v30 = vsel %vm1837_vm8, 1.0, %v10454_v11  ;;  %v5597_v21 = vsel %vm1834_vm10, 1.0, %v10454_v11  ;;  %v5629_v50 = vsel %vm1962_vm11, 1.0, %v10454_v11 }
 0x2d9   : >> { %2368 = vadd.xlane.f32.xlu0 %v2367_v0  ;;  %2314 = vadd.xlane.f32.xlu1 %v2313_v38  ;;  %v1738_v0 = vpop.permute.xlu0 %1737  ;;  %v5632_v38 = vsel %vm1965_vm9, 1.0, %v10454_v11  ;;  %v2076_v1 = vmul.f32 %v2044_v43, %v1734_v10  ;;  %v2043_v19 = vsub.f32 %v5614_v14, %v5582_v32  ;;  %v2060_v29 = vsub.f32 %v5631_v54, %v5599_v39 }
 0x2da   : >> { %v5598_v61 = vsel %vm1835_vm12, 1.0, %v10454_v11  ;;  %v2077_v20 = vmul.f32 %v2045_v25, %v1738_v0  ;;  %v2061_v34 = vsub.f32 %v5632_v38, %v5600_v30  ;;  %v2058_v51 = vsub.f32 %v5629_v50, %v5597_v21 }
 0x2db   : >> { %v2074_v41 = vmul.f32 %v2042_v49, %v7880_v27  ;;  %v1805_v12 = vpop.permute.xlu1 %1804  ;;  %v7945_v45 = vadd.f32 %v5583_v18, %v2076_v1  ;;  %v2075_v17 = vmul.f32 %v2043_v19, %v7886_v52  ;;  %v2092_v62 = vmul.f32 %v2060_v29, %v1801_v13 }
 0x2dc   : >> { %v2093_v24 = vmul.f32 %v2061_v34, %v1805_v12  ;;  %v7948_v10 = vadd.f32 %v5584_v60, %v2077_v20  ;;  %v2090_v14 = vmul.f32 %v2058_v51, %v1793_v5  ;;  %vm2839_vm14 = vcmask 130112  }
 0x2dd   : >> { %2362 = vadd.xlane.f32.xlu0 %v2361_v37  ;;  %v5630_v37 = vsel %vm1963_vm13, 1.0, %v10454_v11  ;;  %v7950_v58 = vadd.f32 %v5581_v31, %v2074_v41  ;;  %v7960_v52 = vadd.f32 %v5599_v39, %v2092_v62  ;;  %vm2853_vm0 = vcmask 261312  }
 0x2de   : >> { %v2059_v28 = vsub.f32 %v5630_v37, %v5598_v61  ;;  %v7958_v37 = vadd.f32 %v5582_v32, %v2075_v17  ;;  %v7966_v13 = vadd.f32 %v5600_v30, %v2093_v24  ;;  %v7971_v20 = vadd.f32 %v5597_v21, %v2090_v14 }
 0x2df   : >> { %vm2860_vm1 = vcmask 326912   ;;  %vm2867_vm2 = vcmask 392512   ;;  %vm2874_vm3 = vcmask 458112   ;;  %vm2881_vm4 = vcmask 523712  }
 0x2e0   : >> { %v2091_v27 = vmul.f32 %v2059_v28, %v1797_v46  ;;  %vm2888_vm5 = vcmask 589312   ;;  %vm2895_vm7 = vcmask 654912   ;;  %vm2902_vm8 = vcmask 720512  }
 0x2e1   : >> { %vm2909_vm9 = vcmask 786112   ;;  %vm2916_vm10 = vcmask 851712   ;;  %vm2923_vm11 = vcmask 917312   ;;  %vm2930_vm12 = vcmask 982912  }
 0x2e2   : >> { %vm2937_vm13 = vcmask 1048512  }
 0x2e9   : >> { %v5720_v54 = vpop.f32.mrb[12].mxu0 }
 0x2ea   : >> { %v7953_v0 = vmul.f32 %v5720_v54, %v7945_v45  ;;  %v2268_v38 = vmul.f32 %v5720_v54, %v2044_v43  ;;  %v1250_v50 = vpop.f32.mrb[13].mxu0  ;;  %v7979_v54 = vadd.f32 %v5598_v61, %v2091_v27 }
 0x2eb   : >> { %v7956_v18 = vmul.f32 %v7950_v58, %v1250_v50  ;;  %v5721_v1 = vpop.f32.mrb[14].mxu0  ;;  %v2266_v12 = vmul.f32 %v2042_v49, %v1250_v50 }
 0x2ec   : >> { %v7963_v5 = vmul.f32 %v5721_v1, %v7948_v10  ;;  %v1253_v31 = vpop.f32.mrb[15].mxu0  ;;  %v2328_v60 = vsel %vm10374_vm6, %v2268_v38, 0.0  ;;  %v2269_v49 = vmul.f32 %v5721_v1, %v2045_v25 }
 0x2ed   : >> { %v7969_v43 = vmul.f32 %v7958_v37, %v1253_v31  ;;  %v5754_v46 = vpop.f32.mrb[12].mxu1  ;;  %2329 = vadd.xlane.f32.xlu1 %v2328_v60  ;;  %v2322_v14 = vsel %vm10374_vm6, %v2266_v12, 0.0  ;;  %v2267_v61 = vmul.f32 %v2043_v19, %v1253_v31 }
 0x2ee   : >> { %v7974_v17 = vmul.f32 %v5754_v46, %v7960_v52  ;;  %v2284_v62 = vmul.f32 %v5754_v46, %v2060_v29  ;;  %v1459_v32 = vpop.f32.mrb[13].mxu1  ;;  %v2331_v12 = vsel %vm10374_vm6, %v2269_v49, 0.0  ;;  %v2081_v49 = vmul.f32 %v7641_v63, %v7535_v36 }
 0x2ef   : >> { %v7977_v39 = vmul.f32 %v7971_v20, %v1459_v32  ;;  %v5755_v41 = vpop.f32.mrb[14].mxu1  ;;  %v2282_v24 = vmul.f32 %v2058_v51, %v1459_v32 }
 0x2f0   : >> { %v7982_v30 = vmul.f32 %v5755_v41, %v7966_v13  ;;  %v1462_v38 = vpop.f32.mrb[15].mxu1  ;;  %v2376_v21 = vsel %vm10374_vm6, %v2284_v62, 0.0  ;;  %v2285_v51 = vmul.f32 %v5755_v41, %v2061_v34 }
 0x2f1   : >> { %v7987_v50 = vmul.f32 %v7979_v54, %v1462_v38  ;;  %v5724_v29 = vpop.f32.mrb[16].mxu0  ;;  %2377 = vadd.xlane.f32.xlu0 %v2376_v21  ;;  %2323 = vadd.xlane.f32.xlu1 %v2322_v14  ;;  %v2370_v62 = vsel %vm10374_vm6, %v2282_v24, 0.0  ;;  %v2080_v21 = vmul.f32 %v7592_v15, %v7525_v2 }
 0x2f2   : >> { %v2384_v25 = vmul.f32 %v5724_v29, %v7571_v22  ;;  %v1266_v1 = vpop.f32.mrb[17].mxu0  ;;  %v2283_v29 = vmul.f32 %v2059_v28, %v1462_v38  ;;  %v2379_v34 = vsel %vm10374_vm6, %v2285_v51, 0.0 }
 0x2f3   : >> { %v5725_v27 = vpop.f32.mrb[18].mxu0  ;;  %v8005_v24 = vadd.f32 %v7577_v16, %v2080_v21  ;;  %v2382_v28 = vmul.f32 %v7581_v48, %v1266_v1  ;;  %v8024_v48 = vadd.f32 %v7632_v47, %v2081_v49 }
 0x2f4   : >> { %v7991_v60 = vmul.f32 %v5725_v27, %v7499_v7  ;;  %v1269_v46 = vpop.f32.mrb[19].mxu0  ;;  %v2325_v7 = vsel %vm10374_vm6, %v2267_v61, 0.0  ;;  %v2373_v36 = vsel %vm10374_vm6, %v2283_v29, 0.0  ;;  %v2420_v16 = vsel %vm10374_vm6, %v2384_v25, 0.0  ;;  %v10491_v29 = vld [vmem:[#allocation68_spill] sm:$0xff] }
 0x2f5   : >> { %v5758_v32 = vpop.f32.mrb[16].mxu1  ;;  %2371 = vadd.xlane.f32.xlu0 %v2370_v62  ;;  %2332 = vadd.xlane.f32.xlu1 %v2331_v12  ;;  %v2414_v62 = vsel %vm10374_vm6, %v2382_v28, 0.0 }
 0x2f6   : >> { %v1475_v14 = vpop.f32.mrb[17].mxu1  ;;  %v2400_v61 = vmul.f32 %v5758_v32, %v8005_v24 }
 0x2f7   : >> { %v5759_v22 = vpop.f32.mrb[18].mxu1  ;;  %v2398_v12 = vmul.f32 %v7601_v42, %v1475_v14  ;;  %v10492_v42 = vld [vmem:[#allocation59_spill] sm:$0xff] }
 0x2f8   : >> { %v1478_v19 = vpop.f32.mrb[19].mxu1  ;;  %v2401_v25 = vmul.f32 %v5759_v22, %v8024_v48  ;;  %v2468_v21 = vsel %vm10374_vm6, %v2400_v61, 0.0  ;;  %v2383_v14 = vmul.f32 %v10492_v42, %v1269_v46  ;;  %v10494_v61 = vld [vmem:[#allocation62_spill] sm:$0xff] }
 0x2f9   : >> { %v8000_v31 = vmul.f32 %v7607_v9, %v1478_v19  ;;  %v5728_v41 = vpop.f32.mrb[20].mxu0  ;;  %2380 = vadd.xlane.f32.xlu0 %v2379_v34  ;;  %2326 = vadd.xlane.f32.xlu1 %v2325_v7 }
 0x2fa   : >> { %v8008_v2 = vmul.f32 %v5728_v41, %v7712_v55  ;;  %v1282_v15 = vpop.f32.mrb[21].mxu0  ;;  %v2471_v49 = vsel %vm10374_vm6, %v2401_v25, 0.0  ;;  %v10495_v25 = vld [vmem:[#allocation60_spill] sm:$0xff] }
 0x2fb   : >> { %v8012_v38 = vmul.f32 %v7722_v23, %v1282_v15  ;;  %v5729_v9 = vpop.f32.mrb[22].mxu0  ;;  %v2462_v15 = vsel %vm10374_vm6, %v2398_v12, 0.0 }
 0x2fc   : >> { %v8016_v27 = vmul.f32 %v5729_v9, %v7532_v44  ;;  %v1285_v51 = vpop.f32.mrb[23].mxu0 }
 0x2fd   : >> { %v8021_v63 = vmul.f32 %v7736_v59, %v1285_v51  ;;  %v5762_v55 = vpop.f32.mrb[20].mxu1  ;;  %2374 = vadd.xlane.f32.xlu0 %v2373_v36  ;;  %2421 = vadd.xlane.f32.xlu1 %v2420_v16 }
 0x2fe   : >> { %v1491_v23 = vpop.f32.mrb[21].mxu1 }
 0x2ff   : >> { %v8027_v1 = vmul.f32 %v7749_v4, %v1491_v23  ;;  %v5763_v44 = vpop.f32.mrb[22].mxu1 }
 0x300   : >> { %v2405_v59 = vmul.f32 %v5763_v44, %v7742_v6  ;;  %v1494_v32 = vpop.f32.mrb[23].mxu1  ;;  %v2417_v44 = vsel %vm10374_vm6, %v2383_v14, 0.0 }
 0x301   : >> { %v8035_v19 = vmul.f32 %v10491_v29, %v1494_v32  ;;  %v5732_v47 = vpop.f32.mrb[24].mxu0  ;;  %2469 = vadd.xlane.f32.xlu0 %v2468_v21  ;;  %2415 = vadd.xlane.f32.xlu1 %v2414_v62 }
 0x302   : >> { %v2392_v4 = vmul.f32 %v5732_v47, %v7835_v3  ;;  %v1298_v34 = vpop.f32.mrb[25].mxu0  ;;  %v10493_v3 = vld [vmem:[#allocation58_spill] sm:$0xff] }
 0x303   : >> { %v2390_v7 = vmul.f32 %v7841_v33, %v1298_v34  ;;  %v5733_v41 = vpop.f32.mrb[26].mxu0  ;;  %v2084_v33 = vmul.f32 %v10494_v61, %v10493_v3 }
 0x304   : >> { %v8041_v22 = vmul.f32 %v5733_v41, %v7838_v56  ;;  %v1301_v6 = vpop.f32.mrb[27].mxu0 }
 0x305   : >> { %v8046_v28 = vmul.f32 %v7849_v35, %v1301_v6  ;;  %v5766_v9 = vpop.f32.mrb[24].mxu1  ;;  %2472 = vadd.xlane.f32.xlu0 %v2471_v49  ;;  %2463 = vadd.xlane.f32.xlu1 %v2462_v15  ;;  %v2423_v35 = vsel %vm10374_vm6, %v7991_v60, 0.0  ;;  %v8058_v32 = vadd.f32 %v10495_v25, %v2084_v33  ;;  %v2432_v60 = vsel %vm10374_vm6, %v8008_v2, 0.0  ;;  %v10498_v25 = vld [vmem:[#allocation55_spill] sm:$0xff] }
 0x306   : >> { %v2408_v51 = vmul.f32 %v5766_v9, %v7851_v26  ;;  %v1507_v46 = vpop.f32.mrb[25].mxu1 }
 0x307   : >> { %v2406_v56 = vmul.f32 %v7862_v57, %v1507_v46  ;;  %v5767_v36 = vpop.f32.mrb[26].mxu1  ;;  %v2404_v29 = vmul.f32 %v5762_v55, %v8058_v32 }
 0x308   : >> { %v2409_v16 = vmul.f32 %v5767_v36, %v7857_v40  ;;  %v1510_v23 = vpop.f32.mrb[27].mxu1 }
 0x309   : >> { %v2407_v62 = vmul.f32 %v7870_v53, %v1510_v23  ;;  %v5736_v12 = vpop.f32.mrb[28].mxu0  ;;  %2418 = vadd.xlane.f32.xlu0 %v2417_v44  ;;  %2424 = vadd.xlane.f32.xlu1 %v2423_v35  ;;  %v2465_v53 = vsel %vm10374_vm6, %v8000_v31, 0.0  ;;  %v2480_v49 = vsel %vm10374_vm6, %v2404_v29, 0.0  ;;  %v2426_v31 = vsel %vm10374_vm6, %v8012_v38, 0.0  ;;  %v10496_v44 = vld [vmem:[#allocation53_spill] sm:$0xff] }
 0x30a   : >> { %v2396_v26 = vmul.f32 %v5736_v12, %v7945_v45  ;;  %v1314_v57 = vpop.f32.mrb[29].mxu0  ;;  %v2444_v38 = vsel %vm10374_vm6, %v2392_v4, 0.0  ;;  %v2495_v15 = vsel %vm10374_vm6, %v2409_v16, 0.0  ;;  %v2164_v35 = vsel %vm10374_vm6, %v10496_v44, 0.0  ;;  %v10517_v44 = vld [vmem:[#allocation77_spill] sm:$0xff] }
 0x30b   : >> { %v2394_v21 = vmul.f32 %v7950_v58, %v1314_v57  ;;  %v5737_v40 = vpop.f32.mrb[30].mxu0  ;;  %v2489_v4 = vsel %vm10374_vm6, %v2407_v62, 0.0  ;;  %v6531_v12 = vmov 2   ;;  %v10499_v57 = vld [vmem:[#allocation57_spill] sm:$0xff] }
 0x30c   : >> { %v2397_v47 = vmul.f32 %v5737_v40, %v7948_v10  ;;  %v1317_v34 = vpop.f32.mrb[31].mxu0  ;;  %6164 = vset.pattern.permute.xlu0 %v6531_v12  ;;  %v10500_v40 = vld [vmem:[#allocation54_spill] sm:$0xff]  ;;  %v10518_v12 = vld [vmem:[#allocation72_spill] sm:$0xff] }
 0x30d   : >> { %v2395_v41 = vmul.f32 %v7958_v37, %v1317_v34  ;;  %v5770_v42 = vpop.f32.mrb[28].mxu1  ;;  %2466 = vadd.xlane.f32.xlu0 %v2465_v53  ;;  %2433 = vadd.xlane.f32.xlu1 %v2432_v60  ;;  %v2474_v37 = vsel %vm10374_vm6, %v8027_v1, 0.0  ;;  %v2492_v1 = vsel %vm10374_vm6, %v2408_v51, 0.0  ;;  %v2167_v29 = vsel %vm10374_vm6, %v10500_v40, 0.0  ;;  %v10501_v34 = vld [vmem:[#allocation56_spill] sm:$0xff] }
 0x30e   : >> { %v2412_v45 = vmul.f32 %v5770_v42, %v7960_v52  ;;  %v1523_v58 = vpop.f32.mrb[29].mxu1  ;;  %v2435_v52 = vsel %vm10374_vm6, %v8016_v27, 0.0  ;;  %v2438_v27 = vsel %vm10374_vm6, %v2390_v7, 0.0  ;;  %v2456_v7 = vsel %vm10374_vm6, %v2396_v26, 0.0  ;;  %v10502_v42 = vld [vmem:[#allocation63_spill] sm:$0xff] }
 0x30f   : >> { %v2410_v14 = vmul.f32 %v7971_v20, %v1523_v58  ;;  %v5771_v55 = vpop.f32.mrb[30].mxu1  ;;  %v2429_v20 = vsel %vm10374_vm6, %v8021_v63, 0.0  ;;  %v2447_v63 = vsel %vm10374_vm6, %v8041_v22, 0.0  ;;  %v2450_v22 = vsel %vm10374_vm6, %v2394_v21, 0.0 }
 0x310   : >> { %v2413_v10 = vmul.f32 %v5771_v55, %v7966_v13  ;;  %v1526_v6 = vpop.f32.mrb[31].mxu1  ;;  %v2483_v13 = vsel %vm10374_vm6, %v2405_v59, 0.0  ;;  %v2486_v59 = vsel %vm10374_vm6, %v2406_v56, 0.0  ;;  %v2504_v3 = vsel %vm10374_vm6, %v2412_v45, 0.0 }
 0x311   : >> { %v2411_v2 = vmul.f32 %v7979_v54, %v1526_v6  ;;  %2481 = vadd.xlane.f32.xlu0 %v2480_v49  ;;  %2427 = vadd.xlane.f32.xlu1 %v2426_v31  ;;  %v2477_v54 = vsel %vm10374_vm6, %v8035_v19, 0.0  ;;  %v2441_v19 = vsel %vm10374_vm6, %v8046_v28, 0.0  ;;  %v2498_v28 = vsel %vm10374_vm6, %v2410_v14, 0.0  ;;  %v10503_v14 = vld [vmem:[#allocation65_spill] sm:$0xff] }
 0x312   : >> { %v2459_v33 = vsel %vm10374_vm6, %v2397_v47, 0.0  ;;  %v2507_v56 = vsel %vm10374_vm6, %v2413_v10, 0.0  ;;  %v2453_v36 = vsel %vm10374_vm6, %v2395_v41, 0.0  ;;  %v2144_v26 = vmul.f32 %v10498_v25, %v8005_v24  ;;  %v10505_v49 = vld [vmem:[#allocation61_spill] sm:$0xff] }
 0x313   : >> { %v2501_v23 = vsel %vm10374_vm6, %v2411_v2, 0.0  ;;  %v2209_v21 = vsel %vm10374_vm6, %v10499_v57, 0.0  ;;  %v2145_v53 = vmul.f32 %v10501_v34, %v8024_v48  ;;  %v2170_v24 = vsel %vm10374_vm6, %v10502_v42, 0.0  ;;  %v10504_v48 = vld [vmem:[#allocation67_spill] sm:$0xff] }
 0x314   : >> { %v2212_v41 = vsel %vm10374_vm6, %v2144_v26, 0.0  ;;  %v2173_v55 = vsel %vm10374_vm6, %v10503_v14, 0.0  ;;  %v2218_v6 = vsel %vm10374_vm6, %v10504_v48, 0.0  ;;  %v2176_v31 = vsel %vm10374_vm6, %v10505_v49, 0.0  ;;  %v10529_v49 = vld [vmem:[#allocation15_spill] sm:$0xff] }
 0x315   : >> { %2475 = vadd.xlane.f32.xlu0 %v2474_v37  ;;  %2436 = vadd.xlane.f32.xlu1 %v2435_v52  ;;  %v2215_v58 = vsel %vm10374_vm6, %v2145_v53, 0.0  ;;  %v10506_v52 = vld [vmem:[#allocation66_spill] sm:$0xff]  ;;  %v2191_v25 = vsel %vm10374_vm6, %v10518_v12, 0.0  ;;  %v10523_v53 = vld [vmem:[#allocation76_spill] sm:$0xff]  ;;  %v2197_v42 = vsel %vm10374_vm6, %v7969_v43, 0.0  ;;  %v2245_v48 = vsel %vm10374_vm6, %v7987_v50, 0.0 }
 0x316   : >> { %v2203_v43 = vsel %vm10374_vm6, %v7963_v5, 0.0  ;;  %v2251_v5 = vsel %vm10374_vm6, %v7982_v30, 0.0 }
 0x319   : >> { %2484 = vadd.xlane.f32.xlu0 %v2483_v13  ;;  %2430 = vadd.xlane.f32.xlu1 %v2429_v20  ;;  %v2148_v13 = vmul.f32 %v10506_v52, %v8058_v32  ;;  %v10507_v20 = vld [vmem:[#allocation70_spill] sm:$0xff]  ;;  %v2841_v52 = vadd.s32 4294967280, %v10529_v49 }
 0x31a   : >> { %v8100_v61 = vpop.xlane.xlu1 %2293 }
 0x31d   : >> { %2478 = vadd.xlane.f32.xlu0 %v2477_v54  ;;  %2445 = vadd.xlane.f32.xlu1 %v2444_v38  ;;  %v2221_v54 = vsel %vm10374_vm6, %v10507_v20, 0.0  ;;  %v10508_v38 = vld [vmem:[#allocation64_spill] sm:$0xff] }
 0x31e   : >> { %v8096_v9 = vpop.xlane.xlu0 %2341  ;;  %v8106_v46 = vpop.xlane.xlu1 %2159 }
 0x321   : >> { %2493 = vadd.xlane.f32.xlu0 %v2492_v1  ;;  %2439 = vadd.xlane.f32.xlu1 %v2438_v27  ;;  %v2179_v1 = vsel %vm10374_vm6, %v10508_v38, 0.0 }
 0x322   : >> { %v8104_v51 = vpop.xlane.xlu0 %2287  ;;  %v8115_v62 = vpop.xlane.xlu1 %2207 }
 0x323   : >> { %10497 = vst [vmem:[#allocation68_spill] sm:$0xff] %v8115_v62  ;;  %v2925_v62 = vadd.s32 4294967184, %v10529_v49 }
 0x325   : >> { %2487 = vadd.xlane.f32.xlu0 %v2486_v59  ;;  %2448 = vadd.xlane.f32.xlu1 %v2447_v63  ;;  %v2224_v63 = vsel %vm10374_vm6, %v2148_v13, 0.0  ;;  %v10530_v13 = vld [vmem:[#allocation52_spill] sm:$0xff] }
 0x326   : >> { %v8110_v16 = vpop.xlane.xlu0 %2335  ;;  %v8127_v60 = vpop.xlane.xlu1 %2296  ;;  %v8218_v50 = vsub.s32 %v10529_v49, %v10530_v13 }
 0x328   : >> { %10531 = vst [vmem:[#allocation61_spill] sm:$0xff] %v8218_v50  ;;  %v2833_v30 = vrot.slane %v8106_v46, %v8218_v50  ;;  %v8255_v46 = vmul.f32 %v8104_v51, %v8104_v51 }
 0x329   : >> { %2496 = vadd.xlane.f32.xlu0 %v2495_v15  ;;  %2442 = vadd.xlane.f32.xlu1 %v2441_v19  ;;  %v2182_v15 = vsel %vm10374_vm6, %v7847_v8, 0.0  ;;  %v10510_v19 = vld [vmem:[#allocation69_spill] sm:$0xff] }
 0x32a   : >> { %v8123_v47 = vpop.xlane.xlu0 %2344  ;;  %v8137_v10 = vpop.xlane.xlu1 %2290 }
 0x32d   : >> { %2490 = vadd.xlane.f32.xlu0 %v2489_v4  ;;  %2457 = vadd.xlane.f32.xlu1 %v2456_v7  ;;  %v2227_v4 = vsel %vm10374_vm6, %v10510_v19, 0.0  ;;  %v10511_v7 = vld [vmem:[#allocation73_spill] sm:$0xff]  ;;  %v10534_v19 = vld [vmem:[#allocation39_spill] sm:$0xff] }
 0x32e   : >> { %v8132_v45 = vpop.xlane.xlu0 %2338 }
 0x331   : >> { %2505 = vadd.xlane.f32.xlu0 %v2504_v3  ;;  %2451 = vadd.xlane.f32.xlu1 %v2450_v22  ;;  %v2185_v3 = vsel %vm10374_vm6, %v10511_v7, 0.0  ;;  %v10535_v7 = vld [vmem:[#allocation36_spill] sm:$0xff] }
 0x332   : >> { %v8143_v2 = vpop.xlane.xlu0 %2162 }
 0x335   : >> { %2499 = vadd.xlane.f32.xlu0 %v2498_v28  ;;  %2460 = vadd.xlane.f32.xlu1 %v2459_v33  ;;  %v10513_v28 = vld [vmem:[#allocation75_spill] sm:$0xff] }
 0x336   : >> { %v2230_v33 = vsel %vm10374_vm6, %v10513_v28, 0.0  ;;  %v8248_v28 = vmul.f32 %v8096_v9, %v8096_v9 }
 0x339   : >> { %2508 = vadd.xlane.f32.xlu0 %v2507_v56  ;;  %2454 = vadd.xlane.f32.xlu1 %v2453_v36  ;;  %v10514_v56 = vld [vmem:[#allocation71_spill] sm:$0xff] }
 0x33a   : >> { %v8145_v37 = vpop.xlane.xlu1 %2305  ;;  %v2188_v8 = vsel %vm10374_vm6, %v10514_v56, 0.0  ;;  %v2862_v56 = vadd.s32 4294967256, %v10529_v49 }
 0x33c   : >> { %v8349_v11 = vsub.s32 %v2862_v56, %v10530_v13  ;;  %v10555_v56 = vld [vmem:[#allocation12_spill] sm:$0xff] }
 0x33d   : >> { %2502 = vadd.xlane.f32.xlu0 %v2501_v23  ;;  %2165 = vadd.xlane.f32.xlu1 %v2164_v35  ;;  %v2233_v35 = vsel %vm10374_vm6, %v10517_v44, 0.0  ;;  %v8260_v44 = vmul.f32 %v8127_v60, %v8127_v60 }
 0x33e   : >> { %v8153_v27 = vpop.xlane.xlu0 %2353  ;;  %v8155_v59 = vpop.xlane.xlu1 %2299  ;;  %10546 = vst [vmem:[#allocation76_spill] sm:$0xff] %v8349_v11 }
 0x341   : >> { %2210 = vadd.xlane.f32.xlu0 %v2209_v21  ;;  %2168 = vadd.xlane.f32.xlu1 %v2167_v29  ;;  %v10521_v21 = vld [vmem:[#allocation74_spill] sm:$0xff]  ;;  %v2194_v29 = vsel %vm10374_vm6, %v7956_v18, 0.0  ;;  %v2200_v18 = vsel %vm10374_vm6, %v7953_v0, 0.0 }
 0x342   : >> { %v8160_v32 = vpop.xlane.xlu0 %2347  ;;  %v8166_v22 = vpop.xlane.xlu1 %2308  ;;  %v2236_v40 = vsel %vm10374_vm6, %v10521_v21, 0.0  ;;  %v2855_v21 = vadd.s32 4294967264, %v10529_v49 }
 0x343   : >> { %10509 = vst [vmem:[#allocation59_spill] sm:$0xff] %v8160_v32  ;;  %10512 = vst [vmem:[#allocation58_spill] sm:$0xff] %v8166_v22 }
 0x345   : >> { %2213 = vadd.xlane.f32.xlu0 %v2212_v41  ;;  %2171 = vadd.xlane.f32.xlu1 %v2170_v24  ;;  %v2239_v41 = vsel %vm10374_vm6, %v10523_v53, 0.0 }
 0x346   : >> { %v8172_v36 = vpop.xlane.xlu0 %2356  ;;  %v8174_v23 = vpop.xlane.xlu1 %2302 }
 0x347   : >> { %10515 = vst [vmem:[#allocation62_spill] sm:$0xff] %v8172_v36  ;;  %10516 = vst [vmem:[#allocation60_spill] sm:$0xff] %v8174_v23 }
 0x349   : >> { %2216 = vadd.xlane.f32.xlu0 %v2215_v58  ;;  %2174 = vadd.xlane.f32.xlu1 %v2173_v55  ;;  %v2242_v58 = vsel %vm10374_vm6, %v7977_v39, 0.0  ;;  %v2248_v39 = vsel %vm10374_vm6, %v7974_v17, 0.0  ;;  %v8228_v17 = vmul.f32 %v8100_v61, %v8100_v61 }
 0x34a   : >> { %v8180_v26 = vpop.xlane.xlu0 %2350 }
 0x34b   : >> { %10519 = vst [vmem:[#allocation53_spill] sm:$0xff] %v8180_v26 }
 0x34d   : >> { %2219 = vadd.xlane.f32.xlu0 %v2218_v6  ;;  %2177 = vadd.xlane.f32.xlu1 %v2176_v31  ;;  %v2834_v31 = vadd.s32 4294967288, %v10529_v49 }
 0x351   : >> { %2222 = vadd.xlane.f32.xlu0 %v2221_v54  ;;  %2180 = vadd.xlane.f32.xlu1 %v2179_v1  ;;  %v8232_v1 = vsub.s32 %v2834_v31, %v10530_v13  ;;  %v10538_v31 = vld [vmem:[#allocation8_spill] sm:$0xff] }
 0x353   : >> { %v2838_v53 = vrot.slane %v8143_v2, %v8232_v1  ;;  %v8292_v2 = vmul.f32 %v8132_v45, %v8132_v45 }
 0x355   : >> { %2225 = vadd.xlane.f32.xlu0 %v2224_v63  ;;  %2183 = vadd.xlane.f32.xlu1 %v2182_v15  ;;  %v8235_v63 = vsub.s32 %v2841_v52, %v10530_v13  ;;  %v2848_v15 = vadd.s32 4294967272, %v10529_v49  ;;  %v10539_v52 = vld [vmem:[#allocation9_spill] sm:$0xff] }
 0x359   : >> { %2228 = vadd.xlane.f32.xlu0 %v2227_v4  ;;  %2186 = vadd.xlane.f32.xlu1 %v2185_v3  ;;  %v3872_v4 = vmul.f32 %v10534_v19, %v10534_v19  ;;  %v8244_v3 = vmul.f32 %v10535_v7, %v10535_v7  ;;  %v2904_v7 = vadd.s32 4294967208, %v10529_v49  ;;  %v8364_v19 = vmul.f32 %v8180_v26, %v8180_v26 }
 0x35a   : >> { %v8182_v57 = vpop.xlane.xlu1 %2317 }
 0x35b   : >> { %10520 = vst [vmem:[#allocation55_spill] sm:$0xff] %v8182_v57  ;;  %10548 = vst [vmem:[#allocation78_spill] sm:$0xff] %v8364_v19  ;;  %v10554_v19 = vld [vmem:[#allocation11_spill] sm:$0xff] }
 0x35c   : >> { %v5814_v26 = vpack.c.bf16 %v10555_v56, %v10554_v19  ;;  %v2932_v56 = vadd.s32 4294967176, %v10529_v49 }
 0x35d   : >> { %2231 = vadd.xlane.f32.xlu0 %v2230_v33  ;;  %2189 = vadd.xlane.f32.xlu1 %v2188_v8  ;;  %v2883_v33 = vadd.s32 4294967232, %v10529_v49  ;;  %v8354_v8 = vmul.f32 %v8174_v23, %v8174_v23  ;;  %v8378_v23 = vsub.s32 %v2904_v7, %v10530_v13  ;;  %v8394_v7 = vsub.s32 %v2925_v62, %v10530_v13 }
 0x35e   : >> { %v8188_v34 = vpop.xlane.xlu0 %2365  ;;  %v8194_v24 = vpop.xlane.xlu1 %2311 }
 0x35f   : >> { %10522 = vst [vmem:[#allocation57_spill] sm:$0xff] %v8188_v34  ;;  %10524 = vst [vmem:[#allocation54_spill] sm:$0xff] %v8194_v24  ;;  %v8403_v19 = vmul.f32 %v8188_v34, %v8188_v34  ;;  %v2918_v34 = vadd.s32 4294967192, %v10529_v49 }
 0x360   : >> { %10547 = vst [vmem:[#allocation52_spill] sm:$0xff] %v8354_v8  ;;  %10552 = vst [vmem:[#allocation82_spill] sm:$0xff] %v8378_v23 }
 0x361   : >> { %2234 = vadd.xlane.f32.xlu0 %v2233_v35  ;;  %2192 = vadd.xlane.f32.xlu1 %v2191_v25  ;;  %v2869_v25 = vadd.s32 4294967248, %v10529_v49  ;;  %10556 = vst [vmem:[#allocation84_spill] sm:$0xff] %v8394_v7 }
 0x362   : >> { %v8200_v14 = vpop.xlane.xlu0 %2359  ;;  %v8202_v55 = vpop.xlane.xlu1 %2320 }
 0x363   : >> { %10525 = vst [vmem:[#allocation56_spill] sm:$0xff] %v8200_v14  ;;  %10526 = vst [vmem:[#allocation63_spill] sm:$0xff] %v8202_v55  ;;  %v8409_v62 = vmul.f32 %v8202_v55, %v8202_v55 }
 0x365   : >> { %2237 = vadd.xlane.f32.xlu0 %v2236_v40  ;;  %2195 = vadd.xlane.f32.xlu1 %v2194_v29  ;;  %v8271_v29 = vmul.f32 %v8110_v16, %v8110_v16 }
 0x366   : >> { %v8208_v6 = vpop.xlane.xlu0 %2368  ;;  %v8212_v0 = vpop.xlane.xlu1 %2314 }
 0x367   : >> { %10527 = vst [vmem:[#allocation65_spill] sm:$0xff] %v8208_v6  ;;  %10528 = vst [vmem:[#allocation67_spill] sm:$0xff] %v8212_v0 }
 0x369   : >> { %2240 = vadd.xlane.f32.xlu0 %v2239_v41  ;;  %2198 = vadd.xlane.f32.xlu1 %v2197_v42  ;;  %v2876_v41 = vadd.s32 4294967240, %v10529_v49  ;;  %v8309_v42 = vsel %vm2839_vm14, %v2838_v53, %v2833_v30  ;;  %v8345_v53 = vmul.f32 %v8160_v32, %v8160_v32  ;;  %v8371_v32 = vsub.s32 %v2883_v33, %v10530_v13 }
 0x36a   : >> { %v8222_v20 = vpop.xlane.xlu0 %2362  ;;  %10542 = vst [vmem:[#allocation71_spill] sm:$0xff] %v8309_v42 }
 0x36b   : >> { %10532 = vst [vmem:[#allocation66_spill] sm:$0xff] %v8222_v20  ;;  %10550 = vst [vmem:[#allocation80_spill] sm:$0xff] %v8371_v32  ;;  %v8447_v55 = vmul.f32 %v8222_v20, %v8222_v20 }
 0x36d   : >> { %2243 = vadd.xlane.f32.xlu0 %v2242_v58  ;;  %2201 = vadd.xlane.f32.xlu1 %v2200_v18  ;;  %v8279_v58 = vmul.f32 %v8137_v10, %v8137_v10  ;;  %10561 = vst [vmem:[#allocation89_spill] sm:$0xff] %v8447_v55 }
 0x371   : >> { %2246 = vadd.xlane.f32.xlu0 %v2245_v48  ;;  %2204 = vadd.xlane.f32.xlu1 %v2203_v43  ;;  %v8283_v48 = vsub.s32 %v2848_v15, %v10530_v13  ;;  %v8287_v43 = vmul.f32 %v8123_v47, %v8123_v47  ;;  %v8303_v15 = vsub.s32 %v2869_v25, %v10530_v13 }
 0x372   : >> { %v8322_v25 = vmul.f32 %v8155_v59, %v8155_v59 }
 0x375   : >> { %2249 = vadd.xlane.f32.xlu0 %v2248_v39  ;;  %v8306_v39 = vsub.s32 %v2855_v21, %v10530_v13  ;;  %v8327_v21 = vmul.f32 %v8153_v27, %v8153_v27 }
 0x379   : >> { %2252 = vadd.xlane.f32.xlu0 %v2251_v5  ;;  %v5810_v5 = vpack.c.bf16 %v10539_v52, %v10538_v31  ;;  %v8313_v31 = vmul.f32 %v8145_v37, %v8145_v37  ;;  %v8316_v52 = vsub.s32 %v2876_v41, %v10530_v13  ;;  %v2897_v41 = vadd.s32 4294967216, %v10529_v49 }
 0x37a   : >> { %v8224_v54 = vpop.xlane.xlu1 %2329 }
 0x37b   : >> { %10533 = vst [vmem:[#allocation70_spill] sm:$0xff] %v8224_v54  ;;  %10543 = vst [vmem:[#allocation77_spill] sm:$0xff] %v8316_v52  ;;  %5811 = vmatprep.subr.bf16.mxu0 %v5810_v5  ;;  %5842 = vmatprep.subr.bf16.mxu1 %v5810_v5  ;;  %v8359_v52 = vmul.f32 %v8172_v36, %v8172_v36  ;;  %v8368_v11 = vsub.s32 %v2897_v41, %v10530_v13  ;;  %v2911_v36 = vadd.s32 4294967200, %v10529_v49 }
 0x37c   : >> { %5813 = vmatpush3.bf16.msra.mxu0 %v5810_v5  ;;  %5850 = vmatpush3.bf16.msra.mxu1 %v5810_v5  ;;  %v2890_v5 = vadd.s32 4294967224, %v10529_v49  ;;  %v8388_v41 = vmul.f32 %v8182_v57, %v8182_v57  ;;  %v8439_v49 = vmul.f32 %v8208_v6, %v8208_v6 }
 0x37d   : >> { %10549 = vst [vmem:[#allocation79_spill] sm:$0xff] %v8368_v11  ;;  %5815 = vmatprep.subr.bf16.mxu0 %v5814_v26  ;;  %5843 = vmatprep.subr.bf16.mxu1 %v5814_v26  ;;  %v8423_v33 = vsub.s32 %v2911_v36, %v10530_v13  ;;  %v8454_v36 = vmul.f32 %v8224_v54, %v8224_v54 }
 0x37e   : >> { %v8262_v35 = vpop.xlane.xlu1 %2323  ;;  %v8264_v12 = vpop.xlane.xlu0 %2377  ;;  %10559 = vst [vmem:[#allocation87_spill] sm:$0xff] %v8439_v49  ;;  %v10581_v49 = vsub.f32 0.0, %v8132_v45 }
 0x37f   : >> { %10536 = vst [vmem:[#allocation64_spill] sm:$0xff] %v8262_v35  ;;  %10537 = vst [vmem:[#allocation69_spill] sm:$0xff] %v8264_v12  ;;  %v8474_v54 = vmul.f32 %v8264_v12, %v8264_v12 }
 0x380   : >> { %5817 = vmatpush3.bf16.msra.mxu0 %v5814_v26  ;;  %5851 = vmatpush3.bf16.msra.mxu1 %v5814_v26  ;;  %10557 = vst [vmem:[#allocation85_spill] sm:$0xff] %v8423_v33  ;;  %10562 = vst [vmem:[#allocation90_spill] sm:$0xff] %v8454_v36  ;;  %v8466_v33 = vsub.s32 %v2918_v34, %v10530_v13 }
 0x381   : >> { %10566 = vst [vmem:[#allocation93_spill] sm:$0xff] %v8474_v54 }
 0x382   : >> { %v8297_v40 = vpop.xlane.xlu1 %2332  ;;  %v8299_v18 = vpop.xlane.xlu0 %2371  ;;  %3874 = vrot.lane.b32.xlu1 %v3872_v4, %s10381_s26  ;;  %v8334_v4 = vmul.f32 %v8166_v22, %v8166_v22  ;;  %v8381_v22 = vsub.s32 %v2890_v5, %v10530_v13  ;;  %v8398_v5 = vmul.f32 %v8194_v24, %v8194_v24  ;;  %10564 = vst [vmem:[#allocation92_spill] sm:$0xff] %v8466_v33  ;;  %s6548_s26 = smov 127  }
 0x383   : >> { %10540 = vst [vmem:[#allocation73_spill] sm:$0xff] %v8297_v40  ;;  %10541 = vst [vmem:[#allocation75_spill] sm:$0xff] %v8299_v18 }
 0x384   : >> { %10553 = vst [vmem:[#allocation83_spill] sm:$0xff] %v8381_v22  ;;  %v8415_v22 = vmul.f32 %v8200_v14, %v8200_v14 }
 0x386   : >> { %v8337_v38 = vpop.xlane.xlu1 %2326  ;;  %v8339_v30 = vpop.xlane.xlu0 %2380 }
 0x387   : >> { %10544 = vst [vmem:[#allocation72_spill] sm:$0xff] %v8337_v38  ;;  %10545 = vst [vmem:[#allocation74_spill] sm:$0xff] %v8339_v30 }
 0x38a   : >> { %v8373_v8 = vpop.xlane.xlu1 %2421  ;;  %v8375_v42 = vpop.xlane.xlu0 %2374 }
 0x38b   : >> { %10551 = vst [vmem:[#allocation81_spill] sm:$0xff] %v8375_v42  ;;  %v2544_v11 = vmul.f32 %v8373_v8, %v8373_v8 }
 0x38d   : >> { %v2576_v23 = vadd.f32 %v2544_v11, %v8228_v17  ;;  %v8428_v11 = vmul.f32 %v8212_v0, %v8212_v0 }
 0x38e   : >> { %v8418_v24 = vpop.xlane.xlu1 %2415  ;;  %v8420_v57 = vpop.xlane.xlu0 %2469 }
 0x38f   : >> { %10558 = vst [vmem:[#allocation86_spill] sm:$0xff] %v8428_v11  ;;  %v2608_v26 = vadd.f32 1.0, %v2576_v23  ;;  %v2542_v17 = vmul.f32 %v8418_v24, %v8418_v24  ;;  %v2560_v7 = vmul.f32 %v8420_v57, %v8420_v57  ;;  %3880 = vrot.lane.b32.xlu0 %v8244_v3, %s6533_s10  ;;  %v8443_v23 = vsub.s32 %v2932_v56, %v10530_v13 }
 0x390   : >> { %v8459_v56 = vmul.f32 %v8262_v35, %v8262_v35 }
 0x391   : >> { %10560 = vst [vmem:[#allocation88_spill] sm:$0xff] %v8443_v23  ;;  %v2574_v14 = vadd.f32 %v2542_v17, %v8255_v46  ;;  %v2592_v3 = vadd.f32 %v2560_v7, %v8248_v28  ;;  %6174 = vrsqrt.f32 %v2608_v26  ;;  %v10565_v17 = vld [vmem:[#allocation49_spill] sm:$0xff] }
 0x392   : >> { %10563 = vst [vmem:[#allocation91_spill] sm:$0xff] %v8459_v56  ;;  %v8461_v32 = vpop.xlane.xlu1 %2463  ;;  %v8463_v6 = vpop.xlane.xlu0 %2472 }
 0x393   : >> { %v2606_v46 = vadd.f32 1.0, %v2574_v14  ;;  %v2624_v28 = vadd.f32 1.0, %v2592_v3  ;;  %v2558_v7 = vmul.f32 %v8461_v32, %v8461_v32  ;;  %3717 = vperm.xlu0 %6164, %v10565_v17   ;;  %v2561_v34 = vmul.f32 %v8463_v6, %v8463_v6 }
 0x394   : >> { %v8481_v14 = vmul.f32 %v8297_v40, %v8297_v40  ;;  %v8487_v3 = vmul.f32 %v8299_v18, %v8299_v18  ;;  %v2736_v18 = vsub.f32 0.0, %v8373_v8  ;;  %v8514_v40 = vmul.f32 %v8375_v42, %v8375_v42 }
 0x395   : >> { %6176 = vrsqrt.f32 %v2606_v46  ;;  %v2590_v26 = vadd.f32 %v2558_v7, %v8271_v29  ;;  %v2593_v0 = vadd.f32 %v2561_v34, %v8287_v43  ;;  %v8501_v46 = vmul.f32 %v8337_v38, %v8337_v38 }
 0x396   : >> { %10567 = vst [vmem:[#allocation94_spill] sm:$0xff] %v8481_v14  ;;  %10568 = vst [vmem:[#allocation95_spill] sm:$0xff] %v8487_v3  ;;  %6178 = vrsqrt.f32 %v2624_v28  ;;  %v8490_v23 = vpop.xlane.xlu1 %2424  ;;  %v8492_v17 = vpop.xlane.xlu0 %2418  ;;  %v8506_v43 = vmul.f32 %v8339_v30, %v8339_v30  ;;  %v2752_v8 = vsub.f32 0.0, %v8420_v57 }
 0x397   : >> { %v2622_v35 = vadd.f32 1.0, %v2590_v26  ;;  %v2545_v13 = vmul.f32 %v8490_v23, %v8490_v23  ;;  %v2543_v29 = vmul.f32 %v8492_v17, %v8492_v17  ;;  %10569 = vst [vmem:[#allocation96_spill] sm:$0xff] %v8501_v46  ;;  %v2625_v7 = vadd.f32 1.0, %v2593_v0  ;;  %10571 = vst [vmem:[#allocation98_spill] sm:$0xff] %v8514_v40 }
 0x398   : >> { %10570 = vst [vmem:[#allocation97_spill] sm:$0xff] %v8506_v43  ;;  %v2750_v0 = vsub.f32 0.0, %v8461_v32  ;;  %v10575_v40 = vsub.f32 0.0, %v8104_v51 }
 0x399   : >> { %6180 = vrsqrt.f32 %v2622_v35  ;;  %v2577_v34 = vadd.f32 %v2545_v13, %v8260_v44  ;;  %v2575_v26 = vadd.f32 %v2543_v29, %v8279_v58  ;;  %v2734_v58 = vsub.f32 0.0, %v8418_v24  ;;  %v10572_v29 = vld [vmem:[#allocation42_spill] sm:$0xff] }
 0x39a   : >> { %6182 = vrsqrt.f32 %v2625_v7  ;;  %v8516_v28 = vpop.xlane.xlu1 %2433  ;;  %v8518_v38 = vpop.xlane.xlu0 %2466  ;;  %v8529_v7 = vmul.f32 %v10572_v29, %v10572_v29 }
 0x39b   : >> { %v2609_v35 = vadd.f32 1.0, %v2577_v34  ;;  %v2607_v33 = vadd.f32 1.0, %v2575_v26  ;;  %v2548_v44 = vmul.f32 %v8516_v28, %v8516_v28  ;;  %v2559_v13 = vmul.f32 %v8518_v38, %v8518_v38  ;;  %v8531_v12 = vpop.eup %6174 }
 0x39c   : >> { %10573 = vst [vmem:[#allocation99_spill] sm:$0xff] %v8529_v7  ;;  %v2753_v34 = vsub.f32 0.0, %v8463_v6  ;;  %v2751_v51 = vsub.f32 0.0, %v8518_v38 }
 0x39d   : >> { %v2580_v26 = vadd.f32 %v2548_v44, %v8313_v31  ;;  %6184 = vrsqrt.f32 %v2607_v33  ;;  %v2591_v24 = vadd.f32 %v2559_v13, %v8292_v2  ;;  %v10574_v31 = vsub.f32 0.0, %v8100_v61 }
 0x39e   : >> { %v8537_v30 = vpop.xlane.xlu1 %2427  ;;  %v8539_v57 = vpop.xlane.xlu0 %2481  ;;  %6186 = vrsqrt.f32 %v2609_v35  ;;  %v8555_v33 = vmul.f32 %v8531_v12, %v2736_v18  ;;  %v2737_v44 = vsub.f32 0.0, %v8490_v23  ;;  %v2735_v13 = vsub.f32 0.0, %v8492_v17 }
 0x39f   : >> { %v8541_v42 = vpop.eup %6176  ;;  %v2612_v29 = vadd.f32 1.0, %v2580_v26  ;;  %v2546_v7 = vmul.f32 %v8537_v30, %v8537_v30  ;;  %v2564_v32 = vmul.f32 %v8539_v57, %v8539_v57  ;;  %v8552_v2 = vmul.f32 %v8531_v12, %v10574_v31 }
 0x3a0   : >> { %v8547_v6 = vpop.eup %6178  ;;  %v2623_v35 = vadd.f32 1.0, %v2591_v24  ;;  %v8565_v61 = vmul.f32 %v8541_v42, %v10575_v40  ;;  %v2766_v17 = vmul.f32 %v8541_v42, %v2734_v58 }
 0x3a1   : >> { %6188 = vrsqrt.f32 %v2612_v29  ;;  %v2578_v18 = vadd.f32 %v2546_v7, %v8322_v25  ;;  %v10576_v29 = vsub.f32 0.0, %v8096_v9  ;;  %v2596_v40 = vadd.f32 %v2564_v32, %v8327_v21 }
 0x3a2   : >> { %6190 = vrsqrt.f32 %v2623_v35  ;;  %v8568_v31 = vpop.xlane.xlu1 %2436  ;;  %v8570_v23 = vpop.xlane.xlu0 %2475  ;;  %v8589_v26 = vmul.f32 %v8547_v6, %v2752_v8  ;;  %v3472_v9 = vrot.slane %v8541_v42, %v8218_v50  ;;  %v10577_v25 = vsub.f32 0.0, %v8110_v16 }
 0x3a3   : >> { %v8572_v24 = vpop.eup %6180  ;;  %v8578_v20 = vmul.f32 %v8547_v6, %v10576_v29  ;;  %v2610_v58 = vadd.f32 1.0, %v2578_v18  ;;  %v2628_v32 = vadd.f32 1.0, %v2596_v40  ;;  %v3084_v29 = vrot.slane %v8565_v61, %v8218_v50 }
 0x3a4   : >> { %v8582_v35 = vpop.eup %6182  ;;  %v8601_v7 = vmul.f32 %v8572_v24, %v10577_v25  ;;  %v8604_v8 = vmul.f32 %v8572_v24, %v2750_v0  ;;  %v3278_v38 = vrot.slane %v2766_v17, %v8218_v50  ;;  %v10578_v61 = vsub.f32 0.0, %v8123_v47 }
 0x3a5   : >> { %6192 = vrsqrt.f32 %v2610_v58  ;;  %v8619_v25 = vmul.f32 %v8582_v35, %v2753_v34  ;;  %v3551_v21 = vrot.slane %v8572_v24, %v8218_v50  ;;  %v2549_v40 = vmul.f32 %v8568_v31, %v8568_v31 }
 0x3a6   : >> { %v8606_v42 = vpop.xlane.xlu1 %2430  ;;  %v8608_v18 = vpop.xlane.xlu0 %2484  ;;  %v8616_v16 = vmul.f32 %v8582_v35, %v10578_v61  ;;  %v10579_v47 = vsub.f32 0.0, %v8137_v10  ;;  %6194 = vrsqrt.f32 %v2628_v32  ;;  %v3163_v58 = vrot.slane %v8601_v7, %v8218_v50 }
 0x3a7   : >> { %v6185_v0 = vpop.eup %6184  ;;  %v3357_v24 = vrot.slane %v8604_v8, %v8218_v50  ;;  %v2562_v3 = vmul.f32 %v8570_v23, %v8570_v23  ;;  %v10580_v17 = vsub.f32 0.0, %v8127_v60  ;;  %v2581_v56 = vadd.f32 %v2549_v40, %v8334_v4 }
 0x3a8   : >> { %v6187_v43 = vpop.eup %6186  ;;  %v2703_v61 = vmul.f32 %v6185_v0, %v10579_v47  ;;  %v2767_v46 = vmul.f32 %v6185_v0, %v2735_v13  ;;  %v3476_v34 = vrot.slane %v6185_v0, %v8232_v1  ;;  %v2741_v55 = vsub.f32 0.0, %v8568_v31 }
 0x3a9   : >> { %v2705_v50 = vmul.f32 %v6187_v43, %v10580_v17  ;;  %v2769_v54 = vmul.f32 %v6187_v43, %v2737_v44  ;;  %v3486_v36 = vrot.slane %v6187_v43, %v8283_v48  ;;  %v10582_v60 = vsub.f32 0.0, %v8145_v37 }
 0x3aa   : >> { %v8639_v14 = vpop.xlane.xlu1 %2445  ;;  %v8641_v10 = vpop.xlane.xlu0 %2478  ;;  %v3088_v8 = vrot.slane %v2703_v61, %v8232_v1  ;;  %v3282_v0 = vrot.slane %v2767_v46, %v8232_v1  ;;  %v3477_v32 = vsel %vm2839_vm14, %v3476_v34, %v3472_v9  ;;  %v2594_v4 = vadd.f32 %v2562_v3, %v8345_v53 }
 0x3ab   : >> { %v8643_v13 = vpop.eup %6188  ;;  %v10584_v9 = vsub.f32 0.0, %v8516_v28  ;;  %v3292_v53 = vrot.slane %v2769_v54, %v8283_v48  ;;  %v2613_v3 = vadd.f32 1.0, %v2581_v56  ;;  %v2754_v17 = vsub.f32 0.0, %v8570_v23 }
 0x3ac   : >> { %v6191_v47 = vpop.eup %6190  ;;  %v3089_v61 = vsel %vm2839_vm14, %v3088_v8, %v3084_v29  ;;  %v3283_v46 = vsel %vm2839_vm14, %v3282_v0, %v3278_v38  ;;  %v8664_v44 = vmul.f32 %v8643_v13, %v10582_v60  ;;  %v3098_v29 = vrot.slane %v2705_v50, %v8283_v48 }
 0x3ad   : >> { %v2719_v7 = vmul.f32 %v6191_v47, %v10581_v49  ;;  %v2783_v11 = vmul.f32 %v6191_v47, %v2751_v51  ;;  %v8674_v45 = vmul.f32 %v8643_v13, %v10584_v9  ;;  %v3555_v37 = vrot.slane %v6191_v47, %v8232_v1 }
 0x3ae   : >> { %10583 = vst [vmem:[#allocation100_spill] sm:$0xff] %v8664_v44  ;;  %v8667_v40 = vpop.xlane.xlu1 %2439  ;;  %v8669_v43 = vpop.xlane.xlu0 %2493  ;;  %v10585_v28 = vrot.slane %v8552_v2, %v8235_v63  ;;  %v10587_v8 = vrot.slane %v8531_v12, %v8235_v63  ;;  %v10588_v54 = vsub.f32 0.0, %v8155_v59  ;;  %6196 = vrsqrt.f32 %v2613_v3 }
 0x3af   : >> { %v3167_v49 = vrot.slane %v2719_v7, %v8232_v1  ;;  %v3361_v51 = vrot.slane %v2783_v11, %v8232_v1  ;;  %v6193_v38 = vpop.eup %6192  ;;  %v10586_v7 = vrot.slane %v8555_v33, %v8235_v63  ;;  %v3556_v2 = vsel %vm2839_vm14, %v3555_v37, %v3551_v21 }
 0x3b0   : >> { %v3094_v34 = vsel %vm2846_vm15, %v10585_v28, %v3089_v61  ;;  %v3482_v50 = vsel %vm2846_vm15, %v10587_v8, %v3477_v32  ;;  %v2706_v56 = vmul.f32 %v6193_v38, %v10588_v54  ;;  %v2626_v61 = vadd.f32 1.0, %v2594_v4 }
 0x3b1   : >> { %v3288_v11 = vsel %vm2846_vm15, %v10586_v7, %v3283_v46  ;;  %v3168_v0 = vsel %vm2839_vm14, %v3167_v49, %v3163_v58  ;;  %v3362_v47 = vsel %vm2839_vm14, %v3361_v51, %v3357_v24  ;;  %v8703_v46 = vpop.eup %6194  ;;  %v3307_v59 = vrot.slane %v8674_v45, %v8303_v15 }
 0x3b2   : >> { %v8699_v60 = vpop.xlane.xlu1 %2448  ;;  %v8701_v33 = vpop.xlane.xlu0 %2487  ;;  %v3501_v58 = vrot.slane %v8643_v13, %v8303_v15  ;;  %v10589_v24 = vsub.f32 0.0, %v8537_v30  ;;  %v3099_v21 = vsel %vm2853_vm0, %v3098_v29, %v3094_v34  ;;  %v3293_v4 = vsel %vm2853_vm0, %v3292_v53, %v3288_v11 }
 0x3b3   : >> { %v3487_v9 = vsel %vm2853_vm0, %v3486_v36, %v3482_v50  ;;  %v10590_v49 = vrot.slane %v8578_v20, %v8235_v63  ;;  %v10591_v37 = vrot.slane %v8589_v26, %v8235_v63  ;;  %v10592_v30 = vrot.slane %v8547_v6, %v8235_v63  ;;  %v10615_v50 = vld [vmem:[#allocation62_spill] sm:$0xff] }
 0x3b4   : >> { %v2770_v32 = vmul.f32 %v6193_v38, %v10589_v24  ;;  %v3103_v53 = vrot.slane %v2706_v56, %v8306_v39  ;;  %v3491_v36 = vrot.slane %v6193_v38, %v8306_v39  ;;  %v10593_v3 = vsub.f32 0.0, %v8153_v27 }
 0x3b5   : >> { %v3173_v51 = vsel %vm2846_vm15, %v10590_v49, %v3168_v0  ;;  %v3367_v28 = vsel %vm2846_vm15, %v10591_v37, %v3362_v47  ;;  %v3561_v29 = vsel %vm2846_vm15, %v10592_v30, %v3556_v2  ;;  %6198 = vrsqrt.f32 %v2626_v61  ;;  %v10597_v0 = vld [vmem:[#allocation52_spill] sm:$0xff]  ;;  %v10600_v37 = vld [vmem:[#allocation78_spill] sm:$0xff] }
 0x3b6   : >> { %v8733_v20 = vmul.f32 %v8703_v46, %v10593_v3  ;;  %v2547_v26 = vmul.f32 %v8606_v42, %v8606_v42  ;;  %v8737_v34 = vpop.xlane.xlu1 %2442  ;;  %v8739_v7 = vpop.xlane.xlu0 %2496  ;;  %v3297_v6 = vrot.slane %v2770_v32, %v8306_v39  ;;  %v10595_v11 = vsub.f32 0.0, %v8539_v57 }
 0x3b7   : >> { %v2565_v27 = vmul.f32 %v8608_v18, %v8608_v18  ;;  %v2552_v38 = vmul.f32 %v8639_v14, %v8639_v14  ;;  %v10596_v54 = vrot.slane %v8616_v16, %v8283_v48  ;;  %v2563_v47 = vmul.f32 %v8641_v10, %v8641_v10 }
 0x3b8   : >> { %10594 = vst [vmem:[#allocation101_spill] sm:$0xff] %v8733_v20  ;;  %v8745_v8 = vmul.f32 %v8703_v46, %v10595_v11  ;;  %v2579_v57 = vadd.f32 %v2547_v26, %v10597_v0  ;;  %v10598_v2 = vrot.slane %v8619_v25, %v8283_v48  ;;  %v2550_v16 = vmul.f32 %v8667_v40, %v8667_v40  ;;  %v8798_v0 = vpop.eup %6196 }
 0x3b9   : >> { %v8757_v56 = vsel %vm2853_vm0, %v10596_v54, %v3173_v51  ;;  %v2597_v24 = vadd.f32 %v2565_v27, %v8359_v52  ;;  %v2584_v32 = vadd.f32 %v2552_v38, %v8388_v41  ;;  %v8773_v49 = vsel %vm2860_vm1, %v3103_v53, %v3099_v21 }
 0x3ba   : >> { %v8766_v61 = vsel %vm2853_vm0, %v10598_v2, %v3367_v28  ;;  %10599 = vst [vmem:[#allocation52_spill] sm:$0xff] %v8773_v49  ;;  %v2611_v51 = vadd.f32 1.0, %v2579_v57  ;;  %v2595_v30 = vadd.f32 %v2563_v47, %v10600_v37  ;;  %v2568_v3 = vmul.f32 %v8669_v43, %v8669_v43  ;;  %v8778_v25 = vpop.xlane.xlu1 %2457  ;;  %v8780_v28 = vpop.xlane.xlu0 %2490  ;;  %v10653_v49 = vld [vmem:[#allocation97_spill] sm:$0xff] }
 0x3bb   : >> { %v8783_v52 = vsel %vm2860_vm1, %v3491_v36, %v3487_v9  ;;  %v2629_v53 = vadd.f32 1.0, %v2597_v24  ;;  %v2616_v26 = vadd.f32 1.0, %v2584_v32  ;;  %v2582_v27 = vadd.f32 %v2550_v16, %v8398_v5  ;;  %v10602_v16 = vld [vmem:[#allocation58_spill] sm:$0xff] }
 0x3bc   : >> { %6200 = vrsqrt.f32 %v2611_v51  ;;  %v2627_v11 = vadd.f32 1.0, %v2595_v30  ;;  %v8791_v38 = vsel %vm2860_vm1, %v3297_v6, %v3293_v4  ;;  %v10601_v54 = vrot.slane %v8582_v35, %v8283_v48 }
 0x3bd   : >> { %6202 = vrsqrt.f32 %v2629_v53  ;;  %v2600_v36 = vadd.f32 %v2568_v3, %v8403_v19  ;;  %v2739_v57 = vsub.f32 0.0, %v8606_v42  ;;  %v2614_v47 = vadd.f32 1.0, %v2582_v27  ;;  %v10605_v3 = vld [vmem:[#allocation59_spill] sm:$0xff] }
 0x3be   : >> { %v3566_v9 = vsel %vm2853_vm0, %v10601_v54, %v3561_v29  ;;  %6204 = vrsqrt.f32 %v2616_v26  ;;  %v2553_v5 = vmul.f32 %v8699_v60, %v8699_v60  ;;  %v8803_v2 = vpop.xlane.xlu1 %2451  ;;  %v8805_v4 = vpop.xlane.xlu0 %2505  ;;  %v2757_v35 = vsub.f32 0.0, %v8608_v18  ;;  %v10607_v54 = vld [vmem:[#allocation86_spill] sm:$0xff]  ;;  %v10618_v18 = vld [vmem:[#allocation53_spill] sm:$0xff] }
 0x3bf   : >> { %6206 = vrsqrt.f32 %v2627_v11  ;;  %v2632_v29 = vadd.f32 1.0, %v2600_v36  ;;  %v2566_v19 = vmul.f32 %v8701_v33, %v8701_v33  ;;  %v6199_v6 = vpop.eup %6198  ;;  %v2744_v24 = vsub.f32 0.0, %v8639_v14 }
 0x3c0   : >> { %6208 = vrsqrt.f32 %v2614_v47  ;;  %v2585_v42 = vadd.f32 %v2553_v5, %v8409_v62  ;;  %v2551_v32 = vmul.f32 %v8737_v34, %v8737_v34  ;;  %v10603_v51 = vsub.f32 0.0, %v10602_v16 }
 0x3c1   : >> { %v8822_v30 = vmul.f32 %v8798_v0, %v2741_v55  ;;  %v10606_v53 = vsub.f32 0.0, %v10605_v3  ;;  %v2786_v11 = vmul.f32 %v6199_v6, %v2754_v17  ;;  %v2598_v27 = vadd.f32 %v2566_v19, %v8415_v22  ;;  %v10608_v19 = vld [vmem:[#allocation87_spill] sm:$0xff] }
 0x3c2   : >> { %v8817_v37 = vmul.f32 %v8798_v0, %v10603_v51  ;;  %v2617_v62 = vadd.f32 1.0, %v2585_v42  ;;  %v2583_v36 = vadd.f32 %v2551_v32, %v10607_v54  ;;  %v2569_v47 = vmul.f32 %v8739_v7, %v8739_v7  ;;  %v8832_v5 = vpop.xlane.xlu1 %2460  ;;  %v8834_v31 = vpop.xlane.xlu0 %2499  ;;  %v10609_v32 = vld [vmem:[#allocation77_spill] sm:$0xff] }
 0x3c3   : >> { %v2722_v26 = vmul.f32 %v6199_v6, %v10606_v53  ;;  %v3570_v55 = vrot.slane %v6199_v6, %v8306_v39  ;;  %v2755_v16 = vsub.f32 0.0, %v8641_v10  ;;  %v2742_v23 = vsub.f32 0.0, %v8667_v40 }
 0x3c4   : >> { %10604 = vst [vmem:[#allocation78_spill] sm:$0xff] %v8817_v37  ;;  %6210 = vrsqrt.f32 %v2632_v29  ;;  %v2630_v17 = vadd.f32 1.0, %v2598_v27  ;;  %v2615_v22 = vadd.f32 1.0, %v2583_v36  ;;  %v2601_v42 = vadd.f32 %v2569_v47, %v10608_v19  ;;  %v10648_v37 = vld [vmem:[#allocation93_spill] sm:$0xff] }
 0x3c5   : >> { %6212 = vrsqrt.f32 %v2617_v62  ;;  %v3182_v3 = vrot.slane %v2722_v26, %v8306_v39  ;;  %v3376_v53 = vrot.slane %v2786_v11, %v8306_v39  ;;  %v3312_v40 = vrot.slane %v8822_v30, %v10609_v32  ;;  %v10610_v30 = vld [vmem:[#allocation76_spill] sm:$0xff] }
 0x3c6   : >> { %v6201_v54 = vpop.eup %6200  ;;  %v2745_v29 = vsub.f32 0.0, %v8699_v60  ;;  %6214 = vrsqrt.f32 %v2630_v17  ;;  %v8850_v62 = vpop.xlane.xlu1 %2454  ;;  %v3571_v41 = vsel %vm2860_vm1, %v3570_v55, %v3566_v9  ;;  %v2633_v60 = vadd.f32 1.0, %v2601_v42  ;;  %v10612_v55 = vld [vmem:[#allocation60_spill] sm:$0xff] }
 0x3c7   : >> { %v8852_v27 = vpop.xlane.xlu0 %2508  ;;  %v8854_v36 = vpop.eup %6202  ;;  %v2771_v26 = vmul.f32 %v6201_v54, %v2739_v57  ;;  %6216 = vrsqrt.f32 %v2615_v22  ;;  %v3496_v10 = vrot.slane %v6201_v54, %v10610_v30  ;;  %v8865_v51 = vsel %vm2860_vm1, %v3182_v3, %v8757_v56 }
 0x3c8   : >> { %v8858_v19 = vpop.eup %6204  ;;  %10611 = vst [vmem:[#allocation58_spill] sm:$0xff] %v8865_v51  ;;  %v3377_v57 = vsel %vm2860_vm1, %v3376_v53, %v8766_v61  ;;  %v2556_v11 = vmul.f32 %v8778_v25, %v8778_v25  ;;  %v10613_v47 = vsub.f32 0.0, %v10612_v55  ;;  %v2567_v56 = vmul.f32 %v8780_v28, %v8780_v28 }
 0x3c9   : >> { %v6207_v12 = vpop.eup %6206  ;;  %v3302_v22 = vrot.slane %v2771_v26, %v10610_v30  ;;  %v10616_v21 = vsub.f32 0.0, %v10615_v50  ;;  %v3497_v17 = vsel %vm2867_vm2, %v3496_v10, %v8783_v52  ;;  %v8901_v3 = vmul.f32 %v8858_v19, %v2744_v24  ;;  %v10628_v24 = vld [vmem:[#allocation79_spill] sm:$0xff] }
 0x3ca   : >> { %v8872_v9 = vpop.eup %6208  ;;  %v8876_v42 = vmul.f32 %v6201_v54, %v10613_v47  ;;  %v8882_v61 = vpop.xlane.xlu1 %2165  ;;  %v2789_v47 = vmul.f32 %v8854_v36, %v2757_v35  ;;  %v2787_v55 = vmul.f32 %v6207_v12, %v2755_v16  ;;  %6218 = vrsqrt.f32 %v2633_v60  ;;  %v10621_v60 = vld [vmem:[#allocation55_spill] sm:$0xff] }
 0x3cb   : >> { %v8884_v53 = vpop.xlane.xlu0 %2502  ;;  %v3303_v26 = vsel %vm2867_vm2, %v3302_v22, %v8791_v38  ;;  %v8891_v54 = vmul.f32 %v8854_v36, %v10616_v21  ;;  %v3575_v38 = vrot.slane %v6207_v12, %v10610_v30  ;;  %v10619_v22 = vsub.f32 0.0, %v10618_v18 }
 0x3cc   : >> { %10614 = vst [vmem:[#allocation59_spill] sm:$0xff] %v8876_v42  ;;  %v3381_v16 = vrot.slane %v2787_v55, %v10610_v30  ;;  %v2774_v52 = vmul.f32 %v8872_v9, %v2742_v23  ;;  %v3308_v10 = vsel %vm2874_vm3, %v3307_v59, %v3303_v26  ;;  %v10622_v21 = vsub.f32 0.0, %v10621_v60  ;;  %v10635_v59 = vld [vmem:[#allocation82_spill] sm:$0xff] }
 0x3cd   : >> { %10617 = vst [vmem:[#allocation86_spill] sm:$0xff] %v8891_v54  ;;  %v8910_v35 = vmul.f32 %v6207_v12, %v10619_v22  ;;  %v10624_v12 = vld [vmem:[#allocation54_spill] sm:$0xff]  ;;  %v8940_v45 = vsel %vm2874_vm3, %v3501_v58, %v3497_v17  ;;  %v3576_v58 = vsel %vm2867_vm2, %v3575_v38, %v3571_v41  ;;  %v10630_v13 = vrot.slane %v8745_v8, %v8303_v15 }
 0x3ce   : >> { %v8904_v50 = vpop.eup %6210  ;;  %v8925_v18 = vmul.f32 %v8858_v19, %v10622_v21  ;;  %v10625_v22 = vsub.f32 0.0, %v10624_v12  ;;  %v8932_v23 = vpop.xlane.xlu1 %2168  ;;  %v3382_v26 = vsel %vm2867_vm2, %v3381_v16, %v3377_v57  ;;  %v10627_v21 = vld [vmem:[#allocation80_spill] sm:$0xff]  ;;  %v3313_v57 = vsel %vm2881_vm4, %v3312_v40, %v3308_v10  ;;  %v10631_v40 = vld [vmem:[#allocation57_spill] sm:$0xff] }
 0x3cf   : >> { %10620 = vst [vmem:[#allocation87_spill] sm:$0xff] %v8910_v35  ;;  %v8914_v14 = vpop.eup %6212  ;;  %v8934_v6 = vpop.xlane.xlu0 %2210  ;;  %v3317_v60 = vrot.slane %v2774_v52, %v10627_v21  ;;  %v10629_v16 = vsub.f32 0.0, %v8669_v43  ;;  %v3387_v41 = vsel %vm2874_vm3, %v10630_v13, %v3382_v26  ;;  %v10632_v10 = vsub.f32 0.0, %v10631_v40  ;;  %v10641_v35 = vld [vmem:[#allocation89_spill] sm:$0xff] }
 0x3d0   : >> { %10623 = vst [vmem:[#allocation77_spill] sm:$0xff] %v8925_v18  ;;  %v8930_v55 = vmul.f32 %v8872_v9, %v10625_v22  ;;  %v8946_v12 = vpop.eup %6214  ;;  %v3391_v22 = vrot.slane %v2789_v47, %v10609_v32  ;;  %v8965_v47 = vmul.f32 %v8914_v14, %v2745_v29  ;;  %v10634_v8 = vrot.slane %v8703_v46, %v8303_v15 }
 0x3d1   : >> { %v8954_v17 = vpop.eup %6216  ;;  %v8962_v52 = vmul.f32 %v8904_v50, %v10629_v16  ;;  %v8978_v43 = vmul.f32 %v8904_v50, %v10632_v10  ;;  %v3318_v13 = vsel %vm2888_vm5, %v3317_v60, %v3313_v57  ;;  %v10636_v10 = vld [vmem:[#allocation56_spill] sm:$0xff]  ;;  %v10639_v54 = vsub.f32 0.0, %v8737_v34 }
 0x3d2   : >> { %10626 = vst [vmem:[#allocation76_spill] sm:$0xff] %v8930_v55  ;;  %v8980_v16 = vpop.xlane.xlu1 %2171  ;;  %v8988_v26 = vsel %vm2874_vm3, %v10634_v8, %v3576_v58  ;;  %v10637_v20 = vsub.f32 0.0, %v10636_v10  ;;  %v10640_v58 = vld [vmem:[#allocation90_spill] sm:$0xff]  ;;  %v2599_v60 = vadd.f32 %v2567_v56, %v10641_v35  ;;  %v3332_v38 = vrot.slane %v8965_v47, %v10635_v59  ;;  %v10647_v55 = vld [vmem:[#allocation83_spill] sm:$0xff] }
 0x3d3   : >> { %10633 = vst [vmem:[#allocation60_spill] sm:$0xff] %v8978_v43  ;;  %v8982_v29 = vpop.xlane.xlu0 %2213  ;;  %v2775_v46 = vmul.f32 %v8954_v17, %v10639_v54  ;;  %v2588_v8 = vadd.f32 %v2556_v11, %v10640_v58  ;;  %v3392_v40 = vsel %vm2881_vm4, %v3391_v22, %v3387_v41  ;;  %v10642_v34 = vsub.f32 0.0, %v8701_v33  ;;  %v10643_v41 = vld [vmem:[#allocation67_spill] sm:$0xff] }
 0x3d4   : >> { %v8998_v43 = vmul.f32 %v8946_v12, %v10637_v20  ;;  %v2554_v20 = vmul.f32 %v8803_v2, %v8803_v2  ;;  %v9012_v10 = vpop.eup %6218  ;;  %v2631_v56 = vadd.f32 1.0, %v2599_v60  ;;  %v2572_v35 = vmul.f32 %v8805_v4, %v8805_v4  ;;  %v10646_v33 = vld [vmem:[#allocation91_spill] sm:$0xff] }
 0x3d5   : >> { %v2790_v54 = vmul.f32 %v8946_v12, %v10642_v34  ;;  %v2620_v11 = vadd.f32 1.0, %v2588_v8  ;;  %v10644_v57 = vsub.f32 0.0, %v10643_v41  ;;  %v2557_v8 = vmul.f32 %v8832_v5, %v8832_v5 }
 0x3d6   : >> { %10638 = vst [vmem:[#allocation62_spill] sm:$0xff] %v8998_v43  ;;  %v9019_v58 = vpop.xlane.xlu1 %2174  ;;  %v2586_v34 = vadd.f32 %v2554_v20, %v10646_v33  ;;  %v3322_v18 = vrot.slane %v2775_v46, %v10647_v55  ;;  %v2604_v44 = vadd.f32 %v2572_v35, %v10648_v37  ;;  %v10649_v22 = vsub.f32 0.0, %v8739_v7  ;;  %v10650_v20 = vld [vmem:[#allocation94_spill] sm:$0xff] }
 0x3d7   : >> { %v9021_v47 = vpop.xlane.xlu0 %2216  ;;  %v9028_v51 = vmul.f32 %v8954_v17, %v10644_v57  ;;  %6220 = vrsqrt.f32 %v2620_v11  ;;  %v2589_v33 = vadd.f32 %v2557_v8, %v10650_v20  ;;  %v2570_v46 = vmul.f32 %v8834_v31, %v8834_v31  ;;  %v10652_v20 = vld [vmem:[#allocation96_spill] sm:$0xff] }
 0x3d8   : >> { %v9040_v41 = vmul.f32 %v9012_v10, %v10649_v22  ;;  %6222 = vrsqrt.f32 %v2631_v56  ;;  %v2618_v57 = vadd.f32 1.0, %v2586_v34  ;;  %v2636_v42 = vadd.f32 1.0, %v2604_v44  ;;  %v10651_v44 = vld [vmem:[#allocation95_spill] sm:$0xff] }
 0x3d9   : >> { %10645 = vst [vmem:[#allocation53_spill] sm:$0xff] %v9028_v51  ;;  %v2555_v37 = vmul.f32 %v8850_v62, %v8850_v62  ;;  %v3396_v56 = vrot.slane %v2790_v54, %v10627_v21  ;;  %v2621_v35 = vadd.f32 1.0, %v2589_v33  ;;  %v2573_v22 = vmul.f32 %v8852_v27, %v8852_v27 }
 0x3da   : >> { %v9049_v11 = vpop.xlane.xlu1 %2177  ;;  %6224 = vrsqrt.f32 %v2618_v57  ;;  %v3323_v34 = vsel %vm2895_vm7, %v3322_v18, %v3318_v13  ;;  %v2602_v8 = vadd.f32 %v2570_v46, %v10651_v44  ;;  %v2571_v57 = vmul.f32 %v8884_v53, %v8884_v53 }
 0x3db   : >> { %v9051_v7 = vpop.xlane.xlu0 %2219  ;;  %6226 = vrsqrt.f32 %v2636_v42  ;;  %v2587_v60 = vadd.f32 %v2555_v37, %v10652_v20  ;;  %v2605_v54 = vadd.f32 %v2573_v22, %v10653_v49  ;;  %v2746_v33 = vsub.f32 0.0, %v8803_v2  ;;  %v10655_v22 = vld [vmem:[#allocation98_spill] sm:$0xff] }
 0x3dc   : >> { %6228 = vrsqrt.f32 %v2621_v35  ;;  %v2634_v18 = vadd.f32 1.0, %v2602_v8  ;;  %v3397_v37 = vsel %vm2888_vm5, %v3396_v56, %v3392_v40  ;;  %v10654_v44 = vrot.slane %v8901_v3, %v10628_v24 }
 0x3dd   : >> { %v2619_v42 = vadd.f32 1.0, %v2587_v60  ;;  %v2637_v49 = vadd.f32 1.0, %v2605_v54  ;;  %v2603_v43 = vadd.f32 %v2571_v57, %v10655_v22  ;;  %v2764_v51 = vsub.f32 0.0, %v8805_v4 }
 0x3de   : >> { %v9067_v13 = vpop.xlane.xlu1 %2180  ;;  %v3328_v20 = vsel %vm2902_vm8, %v10654_v44, %v3323_v34  ;;  %v2749_v2 = vsub.f32 0.0, %v8832_v5  ;;  %6230 = vrsqrt.f32 %v2634_v18  ;;  %v2845_v60 = vrot.slane %v8882_v61, %v8235_v63 }
 0x3df   : >> { %v9069_v46 = vpop.xlane.xlu0 %2222  ;;  %6232 = vrsqrt.f32 %v2619_v42  ;;  %v2635_v35 = vadd.f32 1.0, %v2603_v43  ;;  %v2852_v40 = vrot.slane %v8932_v23, %v8283_v48  ;;  %v2946_v3 = vrot.slane %v8934_v6, %v8232_v1 }
 0x3e0   : >> { %v3333_v34 = vsel %vm2909_vm9, %v3332_v38, %v3328_v20  ;;  %v2762_v4 = vsub.f32 0.0, %v8834_v31  ;;  %v2747_v5 = vsub.f32 0.0, %v8850_v62  ;;  %6234 = vrsqrt.f32 %v2637_v49  ;;  %v10657_v62 = vld [vmem:[#allocation71_spill] sm:$0xff] }
 0x3e1   : >> { %v9085_v56 = vpop.eup %6220  ;;  %v2765_v43 = vsub.f32 0.0, %v8852_v27  ;;  %6236 = vrsqrt.f32 %v2635_v35  ;;  %v2859_v23 = vrot.slane %v8980_v16, %v8306_v39  ;;  %v2951_v1 = vrot.slane %v8982_v29, %v8235_v63  ;;  %v10660_v29 = vld [vmem:[#allocation61_spill] sm:$0xff] }
 0x3e2   : >> { %v2184_v8 = vpop.xlane.xlu1 %2183  ;;  %v9090_v61 = vpop.eup %6222  ;;  %v10656_v6 = vsub.f32 0.0, %v8780_v28  ;;  %v2847_v38 = vsel %vm2846_vm15, %v2845_v60, %v10657_v62  ;;  %v2763_v57 = vsub.f32 0.0, %v8884_v53  ;;  %v2866_v18 = vrot.slane %v9019_v58, %v10610_v30  ;;  %v10659_v28 = vld [vmem:[#allocation68_spill] sm:$0xff] }
 0x3e3   : >> { %v2226_v54 = vpop.xlane.xlu0 %2225  ;;  %v10658_v16 = vsub.f32 0.0, %v8778_v25  ;;  %v2854_v63 = vsel %vm2853_vm0, %v2852_v40, %v2847_v38  ;;  %v10661_v20 = vrot.slane %v10659_v28, %v10660_v29  ;;  %v2956_v53 = vrot.slane %v9021_v47, %v8283_v48  ;;  %v10665_v29 = vld [vmem:[#allocation84_spill] sm:$0xff] }
 0x3e4   : >> { %v2791_v31 = vmul.f32 %v9090_v61, %v10656_v6  ;;  %v9105_v42 = vpop.eup %6224  ;;  %v2873_v25 = vrot.slane %v9049_v11, %v8303_v15  ;;  %v2961_v35 = vrot.slane %v9051_v7, %v8306_v39  ;;  %v2861_v62 = vsel %vm2860_vm1, %v2859_v23, %v2854_v63 }
 0x3e5   : >> { %v9110_v44 = vmul.f32 %v9085_v56, %v10658_v16  ;;  %v2947_v49 = vsel %vm2839_vm14, %v2946_v3, %v10661_v20  ;;  %v9119_v22 = vpop.eup %6226  ;;  %v2778_v60 = vmul.f32 %v9105_v42, %v2746_v33  ;;  %v2880_v48 = vrot.slane %v9067_v13, %v10609_v32  ;;  %v10662_v33 = vld [vmem:[#allocation66_spill] sm:$0xff]  ;;  %v10664_v13 = vld [vmem:[#allocation85_spill] sm:$0xff] }
 0x3e6   : >> { %v3401_v58 = vrot.slane %v2791_v31, %v10647_v55  ;;  %v2187_v40 = vpop.xlane.xlu1 %2186  ;;  %v2952_v3 = vsel %vm2846_vm15, %v2951_v1, %v2947_v49  ;;  %v2966_v47 = vrot.slane %v9069_v46, %v10610_v30  ;;  %v9133_v31 = vpop.eup %6228  ;;  %v10663_v38 = vsub.f32 0.0, %v10662_v33 }
 0x3e7   : >> { %v2229_v6 = vpop.xlane.xlu0 %2228  ;;  %v9141_v39 = vmul.f32 %v9119_v22, %v2764_v51  ;;  %v2868_v7 = vsel %vm2867_vm2, %v2866_v18, %v2861_v62  ;;  %v2887_v23 = vrot.slane %v2184_v8, %v10627_v21  ;;  %v3337_v16 = vrot.slane %v2778_v60, %v10664_v13 }
 0x3e8   : >> { %v9138_v11 = vmul.f32 %v9090_v61, %v10663_v38  ;;  %v3402_v1 = vsel %vm2895_vm7, %v3401_v58, %v3397_v37  ;;  %v2957_v46 = vsel %vm2853_vm0, %v2956_v53, %v2952_v3  ;;  %v2971_v63 = vrot.slane %v2226_v54, %v8303_v15  ;;  %v9149_v28 = vpop.eup %6230 }
 0x3e9   : >> { %v3347_v20 = vrot.slane %v9110_v44, %v10665_v29  ;;  %v3595_v51 = vrot.slane %v9090_v61, %v10647_v55  ;;  %v2875_v18 = vsel %vm2874_vm3, %v2873_v25, %v2868_v7  ;;  %v2962_v8 = vsel %vm2860_vm1, %v2961_v35, %v2957_v46  ;;  %v9157_v58 = vpop.eup %6232  ;;  %v10667_v7 = vld [vmem:[#allocation92_spill] sm:$0xff] }
 0x3ea   : >> { %v2190_v37 = vpop.xlane.xlu1 %2189  ;;  %v9160_v53 = vmul.f32 %v9133_v31, %v2749_v2  ;;  %v2794_v54 = vmul.f32 %v9149_v28, %v2762_v4  ;;  %v2882_v60 = vsel %vm2881_vm4, %v2880_v48, %v2875_v18  ;;  %v2967_v44 = vsel %vm2867_vm2, %v2966_v47, %v2962_v8  ;;  %v9165_v62 = vpop.eup %6234  ;;  %v10670_v8 = vld [vmem:[#allocation88_spill] sm:$0xff] }
 0x3eb   : >> { %v2232_v49 = vpop.xlane.xlu0 %2231  ;;  %v10666_v25 = vrot.slane %v8962_v52, %v10628_v24  ;;  %v3426_v3 = vrot.slane %v9141_v39, %v10665_v29  ;;  %v2779_v2 = vmul.f32 %v9157_v58, %v2747_v5  ;;  %v2889_v33 = vsel %vm2888_vm5, %v2887_v23, %v2882_v60  ;;  %v9175_v4 = vpop.eup %6236 }
 0x3ec   : >> { %v3338_v48 = vsel %vm2916_vm10, %v3337_v16, %v3333_v34  ;;  %v2972_v47 = vsel %vm2874_vm3, %v2971_v63, %v2967_v44  ;;  %v2894_v38 = vrot.slane %v2187_v40, %v10647_v55  ;;  %v2976_v52 = vrot.slane %v2229_v6, %v10609_v32 }
 0x3ed   : >> { %v3407_v35 = vsel %vm2902_vm8, %v10666_v25, %v3402_v1  ;;  %v3342_v1 = vrot.slane %v2779_v2, %v10667_v7  ;;  %v2795_v46 = vmul.f32 %v9175_v4, %v2763_v57  ;;  %v2901_v39 = vrot.slane %v2190_v37, %v10628_v24 }
 0x3ee   : >> { %v2193_v18 = vpop.xlane.xlu1 %2192  ;;  %v10668_v23 = vrot.slane %v8798_v0, %v10609_v32  ;;  %v3416_v16 = vrot.slane %v2794_v54, %v10664_v13  ;;  %v2797_v40 = vmul.f32 %v9165_v62, %v2765_v43  ;;  %v2981_v6 = vrot.slane %v2232_v49, %v10627_v21 }
 0x3ef   : >> { %v2235_v5 = vpop.xlane.xlu0 %2234  ;;  %v10669_v57 = vrot.slane %v8872_v9, %v10627_v21  ;;  %v3352_v37 = vrot.slane %v9160_v53, %v10670_v8  ;;  %v3421_v0 = vrot.slane %v2795_v46, %v10667_v7  ;;  %v3531_v27 = vrot.slane %v9105_v42, %v10664_v13 }
 0x3f0   : >> { %v3507_v34 = vsel %vm2881_vm4, %v10668_v23, %v8940_v45  ;;  %v10671_v45 = vrot.slane %v8954_v17, %v10647_v55  ;;  %v2896_v43 = vsel %vm2895_vm7, %v2894_v38, %v2889_v33  ;;  %v2908_v49 = vrot.slane %v2193_v18, %v10635_v59 }
 0x3f1   : >> { %v3512_v63 = vsel %vm2888_vm5, %v10669_v57, %v3507_v34  ;;  %v10672_v9 = vrot.slane %v8858_v19, %v10628_v24  ;;  %v3536_v53 = vrot.slane %v9157_v58, %v10667_v7  ;;  %v10673_v17 = vrot.slane %v9040_v41, %v10635_v59 }
 0x3f2   : >> { %v3517_v54 = vsel %vm2895_vm7, %v10671_v45, %v3512_v63  ;;  %v3343_v25 = vsel %vm2923_vm11, %v3342_v1, %v3338_v48  ;;  %v2977_v2 = vsel %vm2881_vm4, %v2976_v52, %v2972_v47  ;;  %v2903_v33 = vsel %vm2902_vm8, %v2901_v39, %v2896_v43  ;;  %v2196_v38 = vpop.xlane.xlu1 %2195 }
 0x3f3   : >> { %v3522_v60 = vsel %vm2902_vm8, %v10672_v9, %v3517_v54  ;;  %v3412_v44 = vsel %vm2909_vm9, %v10673_v17, %v3407_v35  ;;  %v2238_v46 = vpop.xlane.xlu0 %2237  ;;  %v3431_v18 = vrot.slane %v2797_v40, %v10670_v8  ;;  %v2982_v23 = vsel %vm2888_vm5, %v2981_v6, %v2977_v2  ;;  %v10678_v9 = vld [vmem:[#allocation13_spill] sm:$0xff]  ;;  %v10682_v2 = vld [vmem:[#allocation18_spill] sm:$0xff] }
 0x3f4   : >> { %v3417_v19 = vsel %vm2916_vm10, %v3416_v16, %v3412_v44  ;;  %v10674_v34 = vrot.slane %v8914_v14, %v10635_v59  ;;  %v2986_v48 = vrot.slane %v2235_v5, %v10647_v55  ;;  %v10675_v52 = vrot.slane %v8854_v36, %v10609_v32 }
 0x3f5   : >> { %v3422_v35 = vsel %vm2923_vm11, %v3421_v0, %v3417_v19  ;;  %v3348_v39 = vsel %vm2930_vm12, %v3347_v20, %v3343_v25  ;;  %v2910_v16 = vsel %vm2909_vm9, %v2908_v49, %v2903_v33  ;;  %v10676_v6 = vrot.slane %v8946_v12, %v10627_v21  ;;  %v10681_v25 = vld [vmem:[#allocation17_spill] sm:$0xff] }
 0x3f6   : >> { %v3527_v41 = vsel %vm2909_vm9, %v10674_v34, %v3522_v60  ;;  %v3586_v1 = vsel %vm2881_vm4, %v10675_v52, %v8988_v26  ;;  %v2915_v5 = vrot.slane %v2196_v38, %v10664_v13  ;;  %v2199_v63 = vpop.xlane.xlu1 %2198  ;;  %v3541_v36 = vrot.slane %v9085_v56, %v10665_v29  ;;  %v10679_v60 = vld [vmem:[#allocation16_spill] sm:$0xff] }
 0x3f7   : >> { %v3532_v47 = vsel %vm2916_vm10, %v3531_v27, %v3527_v41  ;;  %v3591_v57 = vsel %vm2888_vm5, %v10676_v6, %v3586_v1  ;;  %v2241_v0 = vpop.xlane.xlu0 %2240  ;;  %v3610_v20 = vrot.slane %v9149_v28, %v10664_v13  ;;  %v3427_v45 = vsel %vm2930_vm12, %v3426_v3, %v3422_v35  ;;  %v10683_v1 = vld [vmem:[#allocation19_spill] sm:$0xff] }
 0x3f8   : >> { %v3537_v40 = vsel %vm2923_vm11, %v3536_v53, %v3532_v47  ;;  %v3596_v26 = vsel %vm2895_vm7, %v3595_v51, %v3591_v57  ;;  %v2991_v12 = vrot.slane %v2238_v46, %v10628_v24  ;;  %v10677_v54 = vrot.slane %v8904_v50, %v10628_v24 }
 0x3f9   : >> { %v3615_v43 = vrot.slane %v9175_v4, %v10667_v7  ;;  %v9262_v49 = vsel %vm2937_vm13, %v3352_v37, %v3348_v39  ;;  %v2987_v61 = vsel %vm2895_vm7, %v2986_v48, %v2982_v23  ;;  %v3542_v51 = vsel %vm2930_vm12, %v3541_v36, %v3537_v40  ;;  %v10684_v39 = vld [vmem:[#allocation20_spill] sm:$0xff]  ;;  %v10685_v36 = vld [vmem:[#allocation21_spill] sm:$0xff] }
 0x3fa   : >> { %v3601_v27 = vsel %vm2902_vm8, %v10677_v54, %v3596_v26  ;;  %v5818_v3 = vpack.c.bf16 %v10679_v60, %v10678_v9  ;;  %v2922_v53 = vrot.slane %v2199_v63, %v10667_v7  ;;  %v2996_v17 = vrot.slane %v2241_v0, %v10635_v59  ;;  %v2202_v46 = vpop.xlane.xlu1 %2201  ;;  %v10686_v26 = vld [vmem:[#allocation22_spill] sm:$0xff]  ;;  %v10691_v60 = vld [vmem:[#allocation63_spill] sm:$0xff] }
 0x3fb   : >> { %v10680_v50 = vrot.slane %v9012_v10, %v10635_v59  ;;  %v5822_v37 = vpack.c.bf16 %v10682_v2, %v10681_v25  ;;  %v9277_v33 = vsel %vm2937_vm13, %v3431_v18, %v3427_v45  ;;  %v2917_v38 = vsel %vm2916_vm10, %v2915_v5, %v2910_v16  ;;  %v2244_v19 = vpop.xlane.xlu0 %2243  ;;  %v10687_v45 = vld [vmem:[#allocation23_spill] sm:$0xff]  ;;  %v10695_v25 = vld [vmem:[#allocation72_spill] sm:$0xff] }
 0x3fc   : >> { %v3546_v23 = vrot.slane %v9133_v31, %v10670_v8  ;;  %5819 = vmatprep.subr.bf16.mxu0 %v5818_v3  ;;  %v2992_v41 = vsel %vm2902_vm8, %v2991_v12, %v2987_v61  ;;  %v2929_v35 = vrot.slane %v2202_v46, %v10665_v29  ;;  %v3001_v48 = vrot.slane %v2244_v19, %v10664_v13  ;;  %v10688_v12 = vld [vmem:[#allocation24_spill] sm:$0xff]  ;;  %v10697_v46 = vld [vmem:[#allocation70_spill] sm:$0xff] }
 0x3fd   : >> { %v3606_v44 = vsel %vm2909_vm9, %v10680_v50, %v3601_v27  ;;  %5821 = vmatpush3.bf16.msra.mxu0 %v5818_v3  ;;  %v3620_v52 = vrot.slane %v9119_v22, %v10665_v29  ;;  %v5826_v16 = vpack.c.bf16 %v10684_v39, %v10683_v1  ;;  %5844 = vmatprep.subr.bf16.mxu1 %v5818_v3  ;;  %v10689_v27 = vld [vmem:[#allocation25_spill] sm:$0xff]  ;;  %v10696_v2 = vsub.f32 0.0, %v10695_v25 }
 0x3fe   : >> { %v3611_v34 = vsel %vm2916_vm10, %v3610_v20, %v3606_v44  ;;  %v9288_v18 = vsel %vm2937_vm13, %v3546_v23, %v3542_v51  ;;  %5823 = vmatprep.subr.bf16.mxu0 %v5822_v37  ;;  %v2924_v40 = vsel %vm2923_vm11, %v2922_v53, %v2917_v38  ;;  %v2997_v6 = vsel %vm2909_vm9, %v2996_v17, %v2992_v41  ;;  %v9298_v5 = vpop.xlane.xlu1 %2204  ;;  %v10693_v17 = vld [vmem:[#allocation64_spill] sm:$0xff]  ;;  %v10700_v41 = vld [vmem:[#allocation73_spill] sm:$0xff] }
 0x3ff   : >> { %v3616_v47 = vsel %vm2923_vm11, %v3615_v43, %v3611_v34  ;;  %v3625_v57 = vrot.slane %v9165_v62, %v10670_v8  ;;  %5852 = vmatpush3.bf16.msra.mxu1 %v5818_v3  ;;  %v9300_v63 = vpop.xlane.xlu0 %2246  ;;  %v9307_v20 = vpack.c.bf16 %v10686_v26, %v10685_v36  ;;  %v9311_v54 = vpack.c.bf16 %v10688_v12, %v10687_v45  ;;  %v10690_v43 = vld [vmem:[#allocation26_spill] sm:$0xff]  ;;  %v10699_v34 = vld [vmem:[#allocation33_spill] sm:$0xff] }
 0x400   : >> { %v9303_v0 = vsel %vm2930_vm12, %v3620_v52, %v3616_v47  ;;  %v9315_v61 = vpack.c.bf16 %v10690_v43, %v10689_v27  ;;  %5845 = vmatprep.subr.bf16.mxu1 %v5822_v37  ;;  %v9318_v51 = vsel %vm2930_vm12, %v2929_v35, %v2924_v40  ;;  %v3002_v9 = vsel %vm2916_vm10, %v3001_v48, %v2997_v6  ;;  %v10703_v47 = vld [vmem:[#allocation65_spill] sm:$0xff]  ;;  %v10705_v40 = vld [vmem:[#allocation52_spill] sm:$0xff] }
 0x401   : >> { %5825 = vmatpush3.bf16.msra.mxu0 %v5822_v37  ;;  %v10692_v3 = vsub.f32 0.0, %v10691_v60  ;;  %v10694_v50 = vsub.f32 0.0, %v10693_v17  ;;  %v9330_v38 = vmul.f32 %v9157_v58, %v10696_v2  ;;  %v10698_v19 = vsub.f32 0.0, %v10697_v46  ;;  %v10708_v45 = vld [vmem:[#allocation53_spill] sm:$0xff]  ;;  %v10716_v46 = vld [vmem:[#allocation78_spill] sm:$0xff] }
 0x402   : >> { %5827 = vmatprep.subr.bf16.mxu0 %v5826_v16  ;;  %vm3022_vm14 = vcmp.ge.f32.partialorder %v10699_v34, -0.8  ;;  %v10701_v35 = vsub.f32 0.0, %v10700_v41  ;;  %vm3023_vm15 = vcmp.le.f32.partialorder %v10699_v34, 0.8  ;;  %v3875_v58 = vpop.permute.xlu1 %3874  ;;  %v10704_v52 = vsub.f32 0.0, %v10703_v47 }
 0x403   : >> { %v2713_v53 = vmul.f32 %v8914_v14, %v10692_v3  ;;  %v2714_v44 = vmul.f32 %v9105_v42, %v10694_v50  ;;  %v9335_v23 = vmul.f32 %v9085_v56, %v10698_v19  ;;  %v10702_v42 = vld [vmem:[#allocation32_spill] sm:$0xff]  ;;  %5853 = vmatpush3.bf16.msra.mxu1 %v5822_v37  ;;  %v2250_v48 = vpop.xlane.xlu0 %2249  ;;  %v6534_v56 = vmov 0   ;;  %v10740_v2 = vld [vmem:[#allocation62_spill] sm:$0xff] }
 0x404   : >> { %v9341_v14 = vmul.f32 %v9133_v31, %v10701_v35  ;;  %vm3025_vm0 = vcmp.ge.f32.partialorder %v10702_v42, -0.8  ;;  %v9348_v1 = vmul.f32 %v9012_v10, %v10704_v52  ;;  %vm3030_vm1 = vcmp.le.f32.partialorder %v10702_v42, 0.8  ;;  %v10706_v31 = vld [vmem:[#allocation59_spill] sm:$0xff]  ;;  %5846 = vmatprep.subr.bf16.mxu1 %v5826_v16  ;;  %v10711_v3 = vld [vmem:[#allocation100_spill] sm:$0xff] }
 0x405   : >> { %v3026_v39 = vsel %vm3025_vm0, 1, %v6534_v56  ;;  %v10707_v6 = vrot.slane %v10706_v31, %v10610_v30  ;;  %v2936_v37 = vrot.slane %v9298_v5, %v10670_v8  ;;  %5829 = vmatpush3.bf16.msra.mxu0 %v5826_v16  ;;  %v3031_v10 = vsel %vm3030_vm1, 1, %v6534_v56  ;;  %vm9370_vm0 = vmand %vm3022_vm14, %vm3023_vm15  ;;  %v10718_v35 = vld [vmem:[#allocation77_spill] sm:$0xff] }
 0x406   : >> { %v3027_v26 = vrot.slane %v3026_v39, 2  ;;  %v3128_v12 = vrot.slane %v10708_v45, %v10647_v55  ;;  %v3006_v27 = vrot.slane %v9300_v63, %v10667_v7  ;;  %v3011_v43 = vrot.slane %v2250_v48, %v10665_v29  ;;  %5831 = vmatprep.subr.bf16.mxu0 %v9307_v20  ;;  %v10713_v63 = vld [vmem:[#allocation99_spill] sm:$0xff]  ;;  %v10721_v39 = vld [vmem:[#allocation76_spill] sm:$0xff] }
 0x407   : >> { %v3109_v36 = vsel %vm2867_vm2, %v10707_v6, %v10705_v40  ;;  %v3032_v60 = vrot.slane %v3031_v10, 2  ;;  %v10712_v17 = vrot.slane %v10711_v3, %v8303_v15  ;;  %vm3018_vm1 = vcmask 1045509   ;;  %5854 = vmatpush3.bf16.msra.mxu1 %v5826_v16  ;;  %v2253_v47 = vpop.xlane.xlu0 %2252  ;;  %v10723_v10 = vld [vmem:[#allocation58_spill] sm:$0xff] }
 0x408   : >> { %v3877_v25 = vadd.f32 %v3875_v58, %v10713_v63  ;;  %vm9379_vm6 = vcmp.ne.s32.totalorder %v3027_v26, 0  ;;  %v10717_v19 = vrot.slane %v10716_v46, %v10609_v32  ;;  %v3133_v48 = vrot.slane %v10718_v35, %v10628_v24  ;;  %5847 = vmatprep.subr.bf16.mxu1 %v9307_v20  ;;  %v10728_v63 = vld [vmem:[#allocation101_spill] sm:$0xff] }
 0x409   : >> { %v3114_v50 = vsel %vm2874_vm3, %v10712_v17, %v3109_v36  ;;  %vm9389_vm14 = vcmp.ne.s32.totalorder %v3032_v60, 0  ;;  %v10722_v58 = vrot.slane %v10721_v39, %v10627_v21  ;;  %v3138_v31 = vrot.slane %v2713_v53, %v10635_v59  ;;  %5833 = vmatpush3.bf16.msra.mxu0 %v9307_v20  ;;  %vm3029_vm15 = vmand %vm9370_vm0, %vm9379_vm6  ;;  %v10724_v53 = vld [vmem:[#allocation87_spill] sm:$0xff] }
 0x40a   : >> { %v3119_v41 = vsel %vm2881_vm4, %v10717_v19, %v3114_v50  ;;  %v3143_v6 = vrot.slane %v2714_v44, %v10664_v13  ;;  %v3016_v36 = vrot.slane %v2253_v47, %v10670_v8  ;;  %v3148_v26 = vrot.slane %v9330_v38, %v10667_v7  ;;  %5835 = vmatprep.subr.bf16.mxu0 %v9311_v54  ;;  %v10726_v60 = vld [vmem:[#allocation75_spill] sm:$0xff]  ;;  %v10730_v19 = vld [vmem:[#allocation81_spill] sm:$0xff] }
 0x40b   : >> { %v3124_v40 = vsel %vm2888_vm5, %v10722_v58, %v3119_v41  ;;  %v10725_v44 = vrot.slane %v10724_v53, %v10610_v30  ;;  %v10727_v3 = vsub.f32 0.0, %v10726_v60  ;;  %v3207_v38 = vrot.slane %v9138_v11, %v10647_v55  ;;  %v10732_v47 = vld [vmem:[#allocation69_spill] sm:$0xff]  ;;  %5855 = vmatpush3.bf16.msra.mxu1 %v9307_v20  ;;  %v3881_v58 = vpop.permute.xlu0 %3880 }
 0x40c   : >> { %v3129_v16 = vsel %vm2895_vm7, %v3128_v12, %v3124_v40  ;;  %v10729_v12 = vrot.slane %v10728_v63, %v8303_v15  ;;  %v3007_v30 = vsel %vm2923_vm11, %v3006_v27, %v3002_v9  ;;  %v10731_v41 = vsub.f32 0.0, %v10730_v19  ;;  %v10734_v40 = vld [vmem:[#allocation74_spill] sm:$0xff]  ;;  %5848 = vmatprep.subr.bf16.mxu1 %v9311_v54 }
 0x40d   : >> { %v3188_v45 = vsel %vm2867_vm2, %v10725_v44, %v10723_v10  ;;  %v2730_v17 = vmul.f32 %v9149_v28, %v10727_v3  ;;  %v3134_v50 = vsel %vm2902_vm8, %v3133_v48, %v3129_v16  ;;  %v10733_v39 = vsub.f32 0.0, %v10732_v47  ;;  %vm9445_vm2 = vmand %vm3029_vm15, %vm9389_vm14  ;;  %5837 = vmatpush3.bf16.msra.mxu0 %v9311_v54  ;;  %v10745_v63 = vld [vmem:[#allocation30_spill] sm:$0xff] }
 0x40e   : >> { %v3193_v46 = vsel %vm2874_vm3, %v10729_v12, %v3188_v45  ;;  %v2731_v35 = vmul.f32 %v9175_v4, %v10731_v41  ;;  %v3139_v48 = vsel %vm2909_vm9, %v3138_v31, %v3134_v50  ;;  %v3012_v15 = vsel %vm2930_vm12, %v3011_v43, %v3007_v30  ;;  %v10738_v4 = vld [vmem:[#allocation86_spill] sm:$0xff]  ;;  %5839 = vmatprep.subr.bf16.mxu0 %v9315_v61  ;;  %v10743_v45 = vld [vmem:[#allocation31_spill] sm:$0xff] }
 0x40f   : >> { %v2732_v28 = vmul.f32 %v9119_v22, %v10733_v39  ;;  %v10735_v16 = vsub.f32 0.0, %v10734_v40  ;;  %v3144_v11 = vsel %vm2916_vm10, %v3143_v6, %v3139_v48  ;;  %v10739_v20 = vrot.slane %v10738_v4, %v10609_v32  ;;  %5856 = vmatpush3.bf16.msra.mxu1 %v9311_v54  ;;  %v10746_v39 = vld [vmem:[#allocation28_spill] sm:$0xff] }
 0x410   : >> { %v3017_v27 = vsel %vm2937_vm13, %v3016_v36, %v3012_v15  ;;  %v9456_v43 = vadd.f32 %v3881_v58, %v3877_v25  ;;  %v3149_v5 = vsel %vm2923_vm11, %v3148_v26, %v3144_v11  ;;  %v10741_v52 = vrot.slane %v10740_v2, %v10627_v21  ;;  %v10742_v36 = vld [vmem:[#allocation60_spill] sm:$0xff]  ;;  %5849 = vmatprep.subr.bf16.mxu1 %v9315_v61 }
 0x411   : >> { %v2733_v55 = vmul.f32 %v9165_v62, %v10735_v16  ;;  %v3198_v9 = vsel %vm2881_vm4, %v10739_v20, %v3193_v46  ;;  %v3153_v32 = vrot.slane %v9335_v23, %v10665_v29  ;;  %v3212_v25 = vrot.slane %v10742_v36, %v10628_v24  ;;  %5841 = vmatpush3.bf16.msra.mxu0 %v9315_v61 }
 0x412   : >> { %v3203_v31 = vsel %vm2888_vm5, %v10741_v52, %v3198_v9  ;;  %v3222_v10 = vrot.slane %v2730_v17, %v10664_v13  ;;  %v2938_v26 = vsel %vm2937_vm13, %v2936_v37, %v9318_v51  ;;  %6238 = vrsqrt.f32 %v9456_v43  ;;  %v10744_v17 = vld [vmem:[#allocation29_spill] sm:$0xff] }
 0x413   : >> { %v3208_v6 = vsel %vm2895_vm7, %v3207_v38, %v3203_v31  ;;  %v3036_v21 = vsel %vm9445_vm2, 1, %v6534_v56  ;;  %v3217_v53 = vrot.slane %v9348_v1, %v10635_v59  ;;  %v3019_v23 = vsel %vm3018_vm1, %v3017_v27, %v2938_v26  ;;  %5857 = vmatpush3.bf16.msra.mxu1 %v9315_v61 }
 0x414   : >> { %v3154_v24 = vsel %vm2930_vm12, %v3153_v32, %v3149_v5  ;;  %v3213_v13 = vsel %vm2902_vm8, %v3212_v25, %v3208_v6  ;;  %v3227_v44 = vrot.slane %v2731_v35, %v10667_v7  ;;  %v9490_v51 = vsel %vm2937_vm13, %v3625_v57, %v9303_v0 }
 0x415   : >> { %v3158_v59 = vrot.slane %v9341_v14, %v10670_v8  ;;  %v3218_v54 = vsel %vm2909_vm9, %v3217_v53, %v3213_v13  ;;  %vm3239_vm6 = vcmask 1041409   ;;  %v3037_v1 = vrot.slane %v3036_v21, 4 }
 0x416   : >> { %v3223_v7 = vsel %vm2916_vm10, %v3222_v10, %v3218_v54  ;;  %v3232_v37 = vrot.slane %v2732_v28, %v10665_v29  ;;  %v3433_v62 = vsel %vm3239_vm6, %v9277_v33, %v9262_v49  ;;  %v3021_v57 = vsub.f32 %v10743_v45, %v3019_v23 }
 0x417   : >> { %v3159_v0 = vsel %vm2937_vm13, %v3158_v59, %v3154_v24  ;;  %v3228_v60 = vsel %vm2923_vm11, %v3227_v44, %v3223_v7  ;;  %v3237_v14 = vrot.slane %v2733_v55, %v10670_v8  ;;  %v3435_v50 = vmul.f32 %v10744_v17, %v3433_v62 }
 0x418   : >> { %v3233_v3 = vsel %vm2930_vm12, %v3232_v37, %v3228_v60  ;;  %v3752_v29 = vrot.slane %v10745_v63, 2  ;;  %vm3773_vm3 = vcmask 1041408   ;;  %vm3775_vm4 = vcmask 1043456  }
 0x419   : >> { %v3238_v12 = vsel %vm2937_vm13, %v3237_v14, %v3233_v3  ;;  %v3774_v46 = vsel %vm3773_vm3, %v10699_v34, %v10702_v42  ;;  %vm3777_vm5 = vcmask 1045504   ;;  %v3627_v8 = vsel %vm3239_vm6, %v9490_v51, %v9288_v18 }
 0x41a   : >> { %v3240_v38 = vsel %vm3239_vm6, %v3238_v12, %v3159_v0  ;;  %v3776_v61 = vsel %vm3775_vm4, %v3774_v46, %v10743_v45  ;;  %vm3035_vm7 = vcmp.le.f32.partialorder %v3021_v57, 0.0  ;;  %vm3038_vm8 = vcmp.ne.s32.totalorder %v3037_v1, 0 }
 0x41b   : >> { %v3242_v30 = vmul.f32 %v10745_v63, %v3240_v38  ;;  %v3778_v19 = vsel %vm3777_vm5, %v3776_v61, %v3752_v29  ;;  %v6535_v41 = vmov 1   ;;  %v3629_v28 = vmul.f32 %v10746_v39, %v3627_v8  ;;  %vm3039_vm10 = vmand %vm3035_vm7, %vm3038_vm8  ;;  %v10750_v29 = vld [vmem:[#allocation50_spill] sm:$0xff] }
 0x41c   : >> { %5804 = vmatprep.mubr.f32.mxu0 %v3778_v19  ;;  %6165 = vset.pattern.permute.xlu1 %v6535_v41  ;;  %v6239_v35 = vpop.eup %6238  ;;  %vm3886_vm9 = vcmp.eq.f32.partialorder %v9456_v43, inf  ;;  %v3889_v15 = vand.u32 2147483648, %v9456_v43  ;;  %vm3888_vm11 = vcmp.eq.f32.partialorder %v9456_v43, 0.0  ;;  %v3631_v16 = vmul.f32 100.0, %v3021_v57  ;;  %v10752_v19 = vld [vmem:[#allocation51_spill] sm:$0xff] }
 0x41d   : >> { %v3436_v47 = vadd.f32 %v3435_v50, %v3242_v30  ;;  %v3885_v48 = vmul.f32 %v6239_v35, %v9456_v43  ;;  %v10747_v9 = vmov 0.0   ;;  %v3642_v13 = vsel %vm3018_vm1, %v9277_v33, %v9262_v49 }
 0x41e   : >> { %v5633_v27 = vsel %vm3039_vm10, 1.0, %v10747_v9  ;;  %v3645_v44 = vsel %vm3018_vm1, %v9490_v51, %v9288_v18  ;;  %v3639_v59 = vsel %vm3018_vm1, %v3238_v12, %v3159_v0  ;;  %v3755_v30 = vrot.slane %v10746_v39, 6 }
 0x41f   : >> { %v3630_v58 = vadd.f32 %v3629_v28, %v3436_v47  ;;  %v3887_v40 = vsel %vm3886_vm9, %v9456_v43, %v3885_v48  ;;  %v10748_v43 = vld [vmem:[#allocation27_spill] sm:$0xff] }
 0x420   : >> { %v3890_v55 = vsel %vm3888_vm11, %v3889_v15, %v3887_v40  ;;  %v9538_v6 = vmul.f32 %v10748_v43, %v5633_v27  ;;  %v3779_v15 = vsel %vm3773_vm3, %v10744_v17, %v3755_v30 }
 0x421   : >> { %v3632_v22 = vmul.f32 20.0, %v3630_v58  ;;  %v3660_v11 = vmul.f32 %v3630_v58, %v3240_v38  ;;  %v3662_v4 = vmul.f32 %v3630_v58, %v3433_v62  ;;  %v3891_v20 = vadd.f32 1e-06, %v3890_v55 }
 0x422   : >> { %v3664_v5 = vmul.f32 %v3630_v58, %v3627_v8  ;;  %v10751_v8 = vld [vmem:[#allocation42_spill] sm:$0xff]  ;;  %v3780_v55 = vsel %vm3775_vm4, %v3779_v15, %v9538_v6 }
 0x423   : >> { %v3634_v2 = vrot.slane %v3632_v22, 4  ;;  %v9529_v52 = vsub.f32 %v10745_v63, %v3660_v11  ;;  %v9532_v31 = vsub.f32 %v10744_v17, %v3662_v4  ;;  %6240 = vrcp.f32 %v3891_v20 }
 0x424   : >> { %v9535_v32 = vsub.f32 %v10746_v39, %v3664_v5 }
 0x425   : >> { %v3636_v36 = vadd.f32 %v3634_v2, %v3631_v16  ;;  %v3666_v25 = vmul.f32 %v9529_v52, %v9529_v52  ;;  %v3667_v10 = vmul.f32 %v9532_v31, %v9532_v31  ;;  %v3682_v39 = vrot.slane %v9529_v52, 4 }
 0x426   : >> { %v3669_v53 = vmul.f32 %v9535_v32, %v9535_v32  ;;  %v3690_v16 = vrot.slane %v9532_v31, 4  ;;  %v3695_v22 = vrot.slane %v9535_v32, 4 }
 0x427   : >> { %v3637_v26 = vsub.f32 0.0, %v3636_v36  ;;  %v3668_v21 = vadd.f32 %v3667_v10, %v3666_v25 }
 0x429   : >> { %v3638_v23 = vmul.f32 %v3637_v26, %v9538_v6  ;;  %v3670_v24 = vadd.f32 %v3669_v53, %v3668_v21 }
 0x42b   : >> { %v9554_v54 = vmul.f32 %v3645_v44, %v3638_v23  ;;  %6242 = vrsqrt.f32 %v3670_v24  ;;  %v3641_v1 = vmul.f32 %v3639_v59, %v3638_v23  ;;  %v3644_v7 = vmul.f32 %v3642_v13, %v3638_v23  ;;  %v10754_v44 = vld [vmem:[#allocation39_spill] sm:$0xff] }
 0x42c   : >> { %vm3673_vm12 = vcmp.eq.f32.partialorder %v3670_v24, inf  ;;  %v3676_v63 = vand.u32 2147483648, %v3670_v24  ;;  %vm3675_vm13 = vcmp.eq.f32.partialorder %v3670_v24, 0.0 }
 0x42d   : >> { %v3648_v37 = vmul.f32 %v3641_v1, %v3641_v1  ;;  %v3649_v62 = vmul.f32 %v3644_v7, %v3644_v7  ;;  %v5082_v57 = vrot.slane %v3641_v1, 4  ;;  %v6241_v60 = vpop.eup %6240  ;;  %v5085_v49 = vrot.slane %v3644_v7, 2 }
 0x42e   : >> { %3895 = vrot.lane.b32.xlu1 %v6241_v60, %s6536_s18  ;;  %v3651_v33 = vmul.f32 %v9554_v54, %v9554_v54  ;;  %v3893_v61 = vmul.f32 %v10751_v8, %v6241_v60 }
 0x42f   : >> { %v3650_v18 = vadd.f32 %v3649_v62, %v3648_v37  ;;  %v5087_v51 = vsel %vm3773_vm3, %v5082_v57, %v5085_v49  ;;  %v3718_v62 = vpop.permute.xlu0 %3717 }
 0x430   : >> { %v5088_v14 = vsel %vm3775_vm4, %v5087_v51, %v9554_v54  ;;  %v3904_v47 = vrot.slane %v3893_v61, 2  ;;  %v3719_v57 = vrot.slane %v3718_v62, 4 }
 0x431   : >> { %v3652_v0 = vadd.f32 %v3651_v33, %v3650_v18  ;;  %5090 = vst [vmem:[%s5089_s23] sm:$0x3f] %v5088_v14  ;;  %s5099_s23 = scalar_lea.vmem %s10753_s1, %s9557_s19  ;;  %s6543_s1 = smov 120  }
 0x432   : >> { %3899 = vrot.lane.b32.xlu1 %v6241_v60, %s6537_s14  ;;  %s10379_s14 = smov 119   ;;  %v9610_v60 = vsub.f32 %v10743_v45, %v3719_v57 }
 0x433   : >> { %6244 = vrsqrt.f32 %v3652_v0  ;;  %vm3655_vm0 = vcmp.eq.f32.partialorder %v3652_v0, inf  ;;  %v3658_v28 = vand.u32 2147483648, %v3652_v0  ;;  %vm3657_vm1 = vcmp.eq.f32.partialorder %v3652_v0, 0.0 }
 0x435   : >> { %v6243_v3 = vpop.eup %6242 }
 0x436   : >> { %v3672_v50 = vmul.f32 %v6243_v3, %v3670_v24  ;;  %3710 = vperm.xlu1 %6165, %v10750_v29  }
 0x438   : >> { %v3674_v12 = vsel %vm3673_vm12, %v3670_v24, %v3672_v50 }
 0x439   : >> { %v3677_v46 = vsel %vm3675_vm13, %v3676_v63, %v3674_v12 }
 0x43a   : >> { %v3678_v38 = vadd.f32 1e-06, %v3677_v46  ;;  %6166 = vset.pattern.permute.xlu1 %v6534_v56 }
 0x43b   : >> { %3704 = vperm.xlu1 %6166, %v10752_v19  }
 0x43c   : >> { %6246 = vrcp.f32 %v3678_v38 }
 0x43d   : >> { %v6245_v41 = vpop.eup %6244 }
 0x43e   : >> { %v3654_v35 = vmul.f32 %v6245_v41, %v3652_v0 }
 0x43f   : >> { %3905 = vrot.lane.b32.xlu1 %v3904_v47, %s10379_s14  ;;  %s6547_s14 = smov 118  }
 0x440   : >> { %v3656_v48 = vsel %vm3655_vm0, %v3652_v0, %v3654_v35 }
 0x441   : >> { %v3659_v58 = vsel %vm3657_vm1, %v3658_v28, %v3656_v48 }
 0x442   : >> { %v3680_v56 = vmul.f32 -0.5, %v3659_v58  ;;  %v3758_v40 = vrot.slane %v3659_v58, 6 }
 0x444   : >> { %v3781_v11 = vsel %vm3777_vm5, %v3780_v55, %v3758_v40  ;;  %v3684_v4 = vmul.f32 %v3682_v39, %v3680_v56  ;;  %v3692_v17 = vmul.f32 %v3690_v16, %v3680_v56  ;;  %v3697_v20 = vmul.f32 %v3695_v22, %v3680_v56 }
 0x445   : >> { %5805 = vmatmul.mubr.f32.vlgmr.msra.gmra.mrb[32].mxu0 %v3781_v11  ;;  %v3996_v11 = vrot.slane %v10750_v29, 6 }
 0x446   : >> { %v6247_v9 = vpop.eup %6246 }
 0x447   : >> { %v3686_v27 = vrot.slane %v6247_v9, 4 }
 0x449   : >> { %v3688_v5 = vmul.f32 %v3686_v27, %v3684_v4  ;;  %v3693_v2 = vmul.f32 %v3692_v17, %v3686_v27  ;;  %v3698_v52 = vmul.f32 %v3697_v20, %v3686_v27 }
 0x44b   : >> { %v3699_v36 = vadd.f32 %v3688_v5, %v3641_v1  ;;  %v3700_v31 = vadd.f32 %v3693_v2, %v3644_v7  ;;  %v5092_v25 = vrot.slane %v3688_v5, 4  ;;  %v5095_v10 = vrot.slane %v3693_v2, 2  ;;  %v10755_v1 = vld [vmem:[#allocation36_spill] sm:$0xff] }
 0x44c   : >> { %v3701_v6 = vadd.f32 %v3698_v52, %v9554_v54 }
 0x44d   : >> { %v3760_v32 = vrot.slane %v3699_v36, 4  ;;  %v3762_v26 = vrot.slane %v3700_v31, 2  ;;  %v5097_v21 = vsel %vm3773_vm3, %v5092_v25, %v5095_v10  ;;  %v3726_v33 = vmul.f32 %v9610_v60, %v3700_v31 }
 0x44e   : >> { %v5098_v23 = vsel %vm3775_vm4, %v5097_v21, %v3698_v52  ;;  %v3723_v0 = vrot.slane %v3701_v6, 2  ;;  %v3744_v14 = vrot.slane %v3699_v36, 2  ;;  %v3732_v38 = vrot.slane %v3701_v6, 4 }
 0x44f   : >> { %v3782_v53 = vsel %vm3773_vm3, %v3760_v32, %v3762_v26  ;;  %5100 = vst [vmem:[%s5099_s23] sm:$0x3f] %v5098_v23  ;;  %s6542_s23 = smov 114   ;;  %v3728_v12 = vrot.slane %v3726_v33, 2  ;;  %v3740_v61 = vrot.slane %v3700_v31, 4  ;;  %v3731_v48 = vmul.f32 %v9610_v60, %v3699_v36 }
 0x450   : >> { %v3783_v24 = vsel %vm3775_vm4, %v3782_v53, %v3701_v6 }
 0x4a0   : >> { %v3896_v13 = vpop.permute.xlu1 %3895 }
 0x4a1   : >> { %v9597_v59 = vmul.f32 %v10754_v44, %v3896_v13 }
 0x4a3   : >> { %3910 = vrot.lane.b32.xlu0 %v9597_v59, %s10377_s12  ;;  %3932 = vrot.lane.b32.xlu1 %v9597_v59, %s6540_s21  ;;  %s6545_s21 = smov 2   ;;  %v3982_v23 = vrot.slane %v9597_v59, 2 }
 0x4a4   : >> { %v3900_v54 = vpop.permute.xlu1 %3899 }
 0x4a5   : >> { %v9603_v7 = vmul.f32 %v10755_v1, %v3900_v54 }
 0x4a7   : >> { %v3919_v37 = vrot.slane %v9603_v7, 6 }
 0x4a9   : >> { %3920 = vrot.lane.b32.xlu0 %v3919_v37, %s10375_s22  ;;  %3940 = vrot.lane.b32.xlu1 %v3919_v37, %s6542_s23  ;;  %s10383_s23 = sshll.u32 %s6518_s24, 1  ;;  %s6546_s22 = smov 1  }
 0x4aa   : >> { %s479_s12 = scalar_lea.vmem %s6773_s13, %s10383_s23  ;;  %s6552_s23 = smov 4  }
 0x4ab   : >> { %v480_v37 = vld [vmem:[%s479_s12] sm:$0x3]  ;;  %s6549_s12 = smov 115  }
 0x4ad   : >> { %3928 = vrot.lane.b32.xlu0 %v3904_v47, %s6543_s1 }
 0x4b1   : >> { %3978 = vrot.lane.b32.xlu0 %v3904_v47, %s6544_s17 }
 0x4b5   : >> { %v3711_v49 = vpop.permute.xlu1 %3710 }
 0x4b6   : >> { %v3712_v18 = vrot.slane %v3711_v49, 6 }
 0x4b8   : >> { %v9614_v51 = vsub.f32 %v10702_v42, %v3712_v18 }
 0x4ba   : >> { %v3725_v3 = vmul.f32 %v3723_v0, %v9614_v51  ;;  %v3746_v50 = vmul.f32 %v3744_v14, %v9614_v51  ;;  %v3705_v63 = vpop.permute.xlu1 %3704 }
 0x4bb   : >> { %v9619_v46 = vsub.f32 %v10699_v34, %v3705_v63  ;;  %v10756_v63 = vld [vmem:[#allocation49_spill] sm:$0xff] }
 0x4bc   : >> { %v3748_v30 = vrot.slane %v3746_v50, 2  ;;  %v3730_v41 = vsub.f32 %v3725_v3, %v3728_v12  ;;  %v3987_v50 = vrot.slane %v9603_v7, 2  ;;  %v4001_v12 = vrot.slane %v10756_v63, 4 }
 0x4bd   : >> { %v3734_v35 = vmul.f32 %v3732_v38, %v9619_v46  ;;  %v3742_v47 = vmul.f32 %v3740_v61, %v9619_v46 }
 0x4be   : >> { %v3765_v28 = vrot.slane %v3730_v41, 4  ;;  %v3906_v22 = vpop.permute.xlu1 %3905 }
 0x4bf   : >> { %v3736_v15 = vrot.slane %v3734_v35, 4  ;;  %v3750_v58 = vsub.f32 %v3742_v47, %v3748_v30 }
 0x4c0   : >> { %v3784_v56 = vsel %vm3777_vm5, %v3783_v24, %v3765_v28 }
 0x4c1   : >> { %5807 = vmatprep.mubr.f32.mxu1 %v3784_v56  ;;  %v3738_v40 = vsub.f32 %v3731_v48, %v3736_v15  ;;  %v3771_v16 = vrot.slane %v3750_v58, 6 }
 0x4c3   : >> { %v3768_v39 = vrot.slane %v3738_v40, 4 }
 0x4c5   : >> { %v3785_v55 = vsel %vm3773_vm3, %v3768_v39, %v3771_v16 }
 0x4c6   : >> { %5808 = vmatmul.mubr.f32.vlgmr.msra.gmra.mrb[32].mxu1 %v3785_v55 }
 0x515   : >> { %v3911_v4 = vpop.permute.xlu0 %3910  ;;  %v3933_v20 = vpop.permute.xlu1 %3932 }
 0x518   : >> { %v5806_v17 = vpop.f32.mrb[32].mxu0 }
 0x519   : >> { %v9627_v9 = vpop.f32.mrb[33].mxu0  ;;  %v3959_v27 = vrot.slane %v5806_v17, 6  ;;  %v3913_v5 = vmul.f32 %v5806_v17, %v3911_v4  ;;  %v3935_v10 = vmul.f32 %v5806_v17, %v3933_v20 }
 0x51a   : >> { %v9630_v2 = vsub.f32 %v9627_v9, %v3996_v11  ;;  %v3908_v52 = vmul.f32 %v3906_v22, %v9627_v9 }
 0x51b   : >> { %3960 = vrot.lane.b32.xlu1 %v3959_v27, %s6545_s21  ;;  %v3915_v36 = vrot.slane %v3913_v5, 2  ;;  %v3941_v31 = vpop.permute.xlu1 %3940  ;;  %v3921_v25 = vpop.permute.xlu0 %3920  ;;  %v3937_v24 = vrot.slane %v3935_v10, 2 }
 0x51c   : >> { %v3923_v32 = vmul.f32 %v5806_v17, %v3921_v25  ;;  %v3943_v26 = vmul.f32 %v5806_v17, %v3941_v31 }
 0x51d   : >> { %v3917_v6 = vadd.f32 %v3915_v36, %v3908_v52 }
 0x51e   : >> { %v3925_v21 = vrot.slane %v3923_v32, 4  ;;  %v3945_v62 = vrot.slane %v3943_v26, 4 }
 0x51f   : >> { %3974 = vrot.lane.b32.xlu1 %v3959_v27, %s6546_s22  ;;  %v3929_v53 = vpop.permute.xlu0 %3928 }
 0x520   : >> { %v3927_v13 = vadd.f32 %v3925_v21, %v3917_v6  ;;  %v3931_v54 = vmul.f32 %v3929_v53, %v9627_v9 }
 0x522   : >> { %v3949_v57 = vrot.slane %v3927_v13, 6  ;;  %v3939_v49 = vadd.f32 %v3937_v24, %v3931_v54 }
 0x523   : >> { %3983 = vrot.lane.b32.xlu1 %v3982_v23, %s6547_s14  ;;  %s6550_s14 = smov 126   ;;  %v3979_v61 = vpop.permute.xlu0 %3978 }
 0x524   : >> { %v3951_v33 = vsub.f32 %v480_v37, %v3949_v57  ;;  %v3947_v18 = vadd.f32 %v3945_v62, %v3939_v49 }
 0x526   : >> { %v3953_v0 = vrot.slane %v3951_v33, 2  ;;  %v3965_v14 = vrot.slane %v3947_v18, 6 }
 0x527   : >> { %3997 = vrot.lane.b32.xlu1 %v3996_v11, %s6548_s26 }
 0x528   : >> { %3954 = vrot.lane.b32.xlu0 %v3953_v0, %s6545_s21  ;;  %v3967_v59 = vsub.f32 %v480_v37, %v3965_v14 }
 0x52a   : >> { %v3969_v3 = vrot.slane %v3967_v59, 2 }
 0x52b   : >> { %4006 = vrot.lane.b32.xlu1 %v10752_v19, %s6546_s22 }
 0x52c   : >> { %3970 = vrot.lane.b32.xlu0 %v3969_v3, %s6546_s22 }
 0x530   : >> { %3988 = vrot.lane.b32.xlu0 %v3987_v50, %s6549_s12  ;;  %s6551_s12 = smov 5  }
 0x534   : >> { %4002 = vrot.lane.b32.xlu0 %v4001_v12, %s6550_s14 }
 0x538   : >> { %4012 = vrot.lane.b32.xlu0 %v4001_v12, %s6548_s26 }
 0x58d   : >> { %v3961_v38 = vpop.permute.xlu1 %3960 }
 0x591   : >> { %v3975_v30 = vpop.permute.xlu1 %3974 }
 0x595   : >> { %v3984_v7 = vpop.permute.xlu1 %3983 }
 0x599   : >> { %v9650_v41 = vpop.f32.mrb[32].mxu1  ;;  %v3998_v49 = vpop.permute.xlu1 %3997 }
 0x59a   : >> { %v3955_v35 = vpop.permute.xlu0 %3954  ;;  %v9652_v47 = vpop.f32.mrb[33].mxu1 }
 0x59b   : >> { %v3957_v28 = vmul.f32 %v5806_v17, %v3955_v35  ;;  %v4179_v52 = vadd.f32 -98.1, %v9652_v47 }
 0x59d   : >> { %v3963_v48 = vmul.f32 %v3961_v38, %v3957_v28  ;;  %v4007_v18 = vpop.permute.xlu1 %4006  ;;  %v4000_v38 = vsub.f32 %v9627_v9, %v3998_v49 }
 0x59e   : >> { %v3971_v15 = vpop.permute.xlu0 %3970 }
 0x59f   : >> { %v9654_v58 = vmul.f32 %v3984_v7, %v3963_v48  ;;  %v3973_v56 = vmul.f32 %v5806_v17, %v3971_v15  ;;  %v9656_v40 = vmul.f32 %v3979_v61, %v3963_v48 }
 0x5a1   : >> { %v4172_v39 = vrot.slane %v9654_v58, 4  ;;  %v3977_v16 = vmul.f32 %v3975_v30, %v3973_v56  ;;  %v4023_v55 = vrot.slane %v9654_v58, 2  ;;  %v4107_v5 = vrot.slane %v9656_v40, 4 }
 0x5a2   : >> { %v3989_v22 = vpop.permute.xlu0 %3988  ;;  %v4061_v24 = vrot.slane %v9656_v40, 2  ;;  %v4102_v54 = vrot.slane %v9654_v58, 6  ;;  %v10762_v58 = vld [vmem:[#allocation41_spill] sm:$0xff] }
 0x5a3   : >> { %v4174_v11 = vadd.f32 %v4172_v39, %v9652_v47  ;;  %v9661_v4 = vmul.f32 %v3984_v7, %v3977_v16  ;;  %4024 = vrot.lane.b32.xlu1 %v4023_v55, %s6550_s14  ;;  %v9664_v20 = vmul.f32 %v3989_v22, %v3963_v48  ;;  %v9666_v27 = vmul.f32 %v3989_v22, %v3977_v16 }
 0x5a4   : >> { %v9686_v53 = vmul.f32 %v3979_v61, %v3977_v16  ;;  %v3995_v61 = vsub.f32 %v9627_v9, %v10752_v19 }
 0x5a5   : >> { %v4175_v17 = vrot.slane %v9661_v4, 4  ;;  %v4180_v36 = vrot.slane %v9664_v20, 2  ;;  %v4066_v31 = vrot.slane %v9664_v20, 6  ;;  %v4183_v6 = vrot.slane %v9666_v27, 2 }
 0x5a6   : >> { %v4045_v32 = vrot.slane %v9661_v4, 2  ;;  %v4017_v21 = vrot.slane %v9664_v20, 4  ;;  %v10384_v23 = vrot.slane %v9666_v27, 6  ;;  %v4127_v13 = vrot.slane %v9686_v53, 4  ;;  %v4003_v33 = vpop.permute.xlu0 %4002  ;;  %v10764_v20 = vld [vmem:[#allocation40_spill] sm:$0xff] }
 0x5a7   : >> { %v9673_v25 = vadd.f32 %v4175_v17, %v4174_v11  ;;  %4108 = vrot.lane.b32.xlu1 %v4107_v5, %s6550_s14  ;;  %v4182_v10 = vadd.f32 %v4180_v36, %v4179_v52  ;;  %4067 = vrot.lane.b32.xlu0 %v4066_v31, %s6550_s14  ;;  %v4082_v37 = vrot.slane %v9686_v53, 2  ;;  %v4039_v62 = vrot.slane %v9666_v27, 4 }
 0x5a8   : >> { %v10386_v57 = vrot.slane %v9661_v4, 6  ;;  %v4005_v59 = vsub.f32 %v9627_v9, %v4003_v33  ;;  %v4009_v17 = vsub.f32 %v9627_v9, %v4007_v18 }
 0x5a9   : >> { %v9681_v26 = vadd.f32 %v4183_v6, %v4182_v10 }
 0x5aa   : >> { %v4013_v14 = vpop.permute.xlu0 %4012 }
 0x5ab   : >> { %4046 = vrot.lane.b32.xlu1 %v4045_v32, %s6548_s26  ;;  %4018 = vrot.lane.b32.xlu0 %v4017_v21, %s6550_s14  ;;  %v4015_v5 = vsub.f32 %v9627_v9, %v4013_v14 }
 0x5af   : >> { %4088 = vrot.lane.b32.xlu1 %v10384_v23, %s6548_s26  ;;  %4062 = vrot.lane.b32.xlu0 %v4061_v24, %s6550_s14 }
 0x5b3   : >> { %4128 = vrot.lane.b32.xlu1 %v4127_v13, %s6548_s26  ;;  %4103 = vrot.lane.b32.xlu0 %v4102_v54, %s6550_s14 }
 0x5b7   : >> { %4083 = vrot.lane.b32.xlu1 %v4082_v37, %s6548_s26  ;;  %4040 = vrot.lane.b32.xlu0 %v4039_v62, %s6548_s26 }
 0x5bb   : >> { %4123 = vrot.lane.b32.xlu0 %v10386_v57, %s6548_s26 }
 0x615   : >> { %v4025_v0 = vpop.permute.xlu1 %4024 }
 0x616   : >> { %v4027_v12 = vmul.f32 %v4025_v0, %v4005_v59 }
 0x618   : >> { %v4029_v28 = vrot.slane %v4027_v12, 2 }
 0x619   : >> { %v4109_v3 = vpop.permute.xlu1 %4108  ;;  %v4068_v50 = vpop.permute.xlu0 %4067 }
 0x61a   : >> { %v4070_v48 = vmul.f32 %v4068_v50, %v3995_v61  ;;  %v4111_v16 = vmul.f32 %v4109_v3, %v4000_v38 }
 0x61c   : >> { %v4072_v55 = vrot.slane %v4070_v48, 4  ;;  %v4113_v32 = vrot.slane %v4111_v16, 2 }
 0x61d   : >> { %v4047_v30 = vpop.permute.xlu1 %4046  ;;  %v4019_v35 = vpop.permute.xlu0 %4018 }
 0x61e   : >> { %v4021_v7 = vmul.f32 %v4019_v35, %v4000_v38  ;;  %v4049_v21 = vmul.f32 %v4047_v30, %v4015_v5 }
 0x620   : >> { %v4031_v15 = vsub.f32 %v4021_v7, %v4029_v28  ;;  %v4051_v18 = vrot.slane %v4049_v21, 2 }
 0x621   : >> { %v4089_v56 = vpop.permute.xlu1 %4088  ;;  %v4063_v39 = vpop.permute.xlu0 %4062 }
 0x622   : >> { %v4033_v22 = vrot.slane %v4031_v15, 4  ;;  %v4065_v11 = vmul.f32 %v4063_v39, %v4005_v59  ;;  %v4091_v10 = vmul.f32 %v4089_v56, %v4009_v17 }
 0x624   : >> { %v4074_v52 = vsub.f32 %v4065_v11, %v4072_v55  ;;  %4034 = vrot.lane.b32.xlu1 %v4033_v22, %s6536_s18  ;;  %v4093_v49 = vrot.slane %v4091_v10, 4 }
 0x625   : >> { %v4129_v36 = vpop.permute.xlu1 %4128  ;;  %v4104_v6 = vpop.permute.xlu0 %4103 }
 0x626   : >> { %v4076_v24 = vrot.slane %v4074_v52, 4  ;;  %v4106_v13 = vmul.f32 %v4104_v6, %v3995_v61  ;;  %v4131_v9 = vmul.f32 %v4129_v36, %v9630_v2 }
 0x628   : >> { %v4115_v37 = vsub.f32 %v4106_v13, %v4113_v32  ;;  %4077 = vrot.lane.b32.xlu0 %v4076_v24, %s6536_s18  ;;  %v4133_v61 = vrot.slane %v4131_v9, 2 }
 0x629   : >> { %v4084_v62 = vpop.permute.xlu1 %4083  ;;  %v4041_v0 = vpop.permute.xlu0 %4040 }
 0x62a   : >> { %v4086_v33 = vmul.f32 %v4084_v62, %v4015_v5  ;;  %v4117_v14 = vrot.slane %v4115_v37, 6  ;;  %v4043_v59 = vmul.f32 %v4041_v0, %v9630_v2 }
 0x62c   : >> { %v4095_v3 = vsub.f32 %v4086_v33, %v4093_v49  ;;  %v4053_v50 = vsub.f32 %v4043_v59, %v4051_v18  ;;  %4118 = vrot.lane.b32.xlu1 %v4117_v14, %s6536_s18 }
 0x62d   : >> { %v4124_v38 = vpop.permute.xlu0 %4123 }
 0x62e   : >> { %v4097_v12 = vrot.slane %v4095_v3, 4  ;;  %v4055_v30 = vrot.slane %v4053_v50, 4  ;;  %v4126_v35 = vmul.f32 %v4124_v38, %v4009_v17 }
 0x630   : >> { %v4135_v28 = vsub.f32 %v4126_v35, %v4133_v61  ;;  %4098 = vrot.lane.b32.xlu1 %v4097_v12, %s6545_s21  ;;  %4056 = vrot.lane.b32.xlu0 %v4055_v30, %s6545_s21 }
 0x632   : >> { %v4137_v48 = vrot.slane %v4135_v28, 6 }
 0x634   : >> { %4138 = vrot.lane.b32.xlu0 %v4137_v48, %s6545_s21 }
 0x696   : >> { %v4035_v7 = vpop.permute.xlu1 %4034 }
 0x697   : >> { %v4037_v56 = vadd.f32 %v4035_v7, %v9652_v47 }
 0x69a   : >> { %v4078_v15 = vpop.permute.xlu0 %4077 }
 0x69b   : >> { %v4080_v39 = vadd.f32 %v9650_v41, %v4078_v15 }
 0x69e   : >> { %v4119_v2 = vpop.permute.xlu1 %4118 }
 0x69f   : >> { %v4121_v17 = vadd.f32 %v9650_v41, %v4119_v2 }
 0x6a2   : >> { %v4099_v16 = vpop.permute.xlu1 %4098  ;;  %v4057_v55 = vpop.permute.xlu0 %4056 }
 0x6a3   : >> { %v4101_v22 = vadd.f32 %v4099_v16, %v4080_v39  ;;  %v4059_v11 = vadd.f32 %v4057_v55, %v4037_v56 }
 0x6a5   : >> { %v4143_v5 = vmul.f32 0.0, %v4101_v22  ;;  %v4155_v52 = vrot.slane %v4101_v22, 2  ;;  %v4153_v36 = vmul.f32 0.0, %v4059_v11  ;;  %v4142_v32 = vmul.f32 2.0, %v4059_v11 }
 0x6a6   : >> { %v4139_v10 = vpop.permute.xlu0 %4138 }
 0x6a7   : >> { %v4145_v6 = vrot.slane %v4143_v5, 2  ;;  %v4157_v21 = vadd.f32 %v4155_v52, %v4153_v36  ;;  %v4141_v24 = vadd.f32 %v4139_v10, %v4121_v17 }
 0x6a9   : >> { %v4147_v13 = vadd.f32 %v4145_v6, %v4142_v32  ;;  %v4159_v37 = vadd.f32 %v4153_v36, %v4145_v6  ;;  %v4148_v62 = vmul.f32 0.0, %v4141_v24  ;;  %v4160_v49 = vmul.f32 0.6666667, %v4141_v24 }
 0x6ab   : >> { %v4150_v33 = vrot.slane %v4148_v62, 4  ;;  %v4162_v0 = vrot.slane %v4160_v49, 4 }
 0x6ad   : >> { %v4152_v18 = vadd.f32 %v4150_v33, %v4147_v13  ;;  %v4158_v9 = vadd.f32 %v4157_v21, %v4150_v33  ;;  %v4164_v14 = vadd.f32 %v4162_v0, %v4159_v37 }
 0x6af   : >> { %v4415_v59 = vmul.f32 0.01, %v4152_v18  ;;  %v4436_v3 = vmul.f32 0.01, %v4158_v9  ;;  %v4457_v41 = vmul.f32 0.01, %v4164_v14 }
 0x6b1   : >> { %v4416_v50 = vmul.f32 0.5, %v4415_v59  ;;  %v4437_v12 = vmul.f32 0.5, %v4436_v3  ;;  %v4458_v38 = vmul.f32 0.5, %v4457_v41 }
 0x6b3   : >> { %v4417_v61 = vadd.f32 %v4416_v50, %v4152_v18  ;;  %v4438_v30 = vadd.f32 %v4437_v12, %v4158_v9  ;;  %v4459_v35 = vadd.f32 %v4458_v38, %v4164_v14 }
 0x6b5   : >> { %v4418_v28 = vmul.f32 0.01, %v4417_v61  ;;  %v4439_v48 = vmul.f32 0.01, %v4438_v30  ;;  %v4460_v7 = vmul.f32 0.01, %v4459_v35 }
 0x6b7   : >> { %v4419_v15 = vmul.f32 0.5, %v4418_v28  ;;  %v4440_v2 = vmul.f32 0.5, %v4439_v48  ;;  %v4461_v56 = vmul.f32 0.5, %v4460_v7  ;;  %v4466_v39 = vmul.f32 2.0, %v4460_v7 }
 0x6b8   : >> { %v4445_v16 = vmul.f32 2.0, %v4439_v48  ;;  %v4424_v17 = vmul.f32 2.0, %v4418_v28 }
 0x6b9   : >> { %v4420_v55 = vadd.f32 %v4419_v15, %v4152_v18  ;;  %v4441_v22 = vadd.f32 %v4440_v2, %v4158_v9  ;;  %v4462_v11 = vadd.f32 %v4461_v56, %v4164_v14  ;;  %v4467_v10 = vadd.f32 %v4466_v39, %v4457_v41  ;;  %v10757_v15 = vld [vmem:[#allocation43_spill] sm:$0xff]  ;;  %v10759_v56 = vld [vmem:[#allocation44_spill] sm:$0xff] }
 0x6ba   : >> { %v4446_v6 = vadd.f32 %v4445_v16, %v4436_v3  ;;  %v4425_v62 = vadd.f32 %v4424_v17, %v4415_v59  ;;  %v10761_v17 = vld [vmem:[#allocation45_spill] sm:$0xff] }
 0x6bb   : >> { %v4463_v5 = vmul.f32 0.01, %v4462_v11  ;;  %v4442_v52 = vmul.f32 0.01, %v4441_v22  ;;  %v4421_v36 = vmul.f32 0.01, %v4420_v55 }
 0x6bd   : >> { %v4464_v32 = vadd.f32 %v4463_v5, %v4164_v14  ;;  %v4468_v21 = vmul.f32 2.0, %v4463_v5  ;;  %v4443_v24 = vadd.f32 %v4442_v52, %v4158_v9  ;;  %v4447_v13 = vmul.f32 2.0, %v4442_v52 }
 0x6be   : >> { %v4422_v37 = vadd.f32 %v4421_v36, %v4152_v18  ;;  %v4426_v49 = vmul.f32 2.0, %v4421_v36 }
 0x6bf   : >> { %v4465_v33 = vmul.f32 0.01, %v4464_v32  ;;  %v4469_v0 = vadd.f32 %v4468_v21, %v4467_v10  ;;  %v4444_v50 = vmul.f32 0.01, %v4443_v24  ;;  %v4448_v12 = vadd.f32 %v4447_v13, %v4446_v6 }
 0x6c0   : >> { %v4423_v38 = vmul.f32 0.01, %v4422_v37  ;;  %v4427_v61 = vadd.f32 %v4426_v49, %v4425_v62 }
 0x6c1   : >> { %v4470_v30 = vadd.f32 %v4469_v0, %v4465_v33  ;;  %v4449_v35 = vadd.f32 %v4448_v12, %v4444_v50 }
 0x6c2   : >> { %v4428_v28 = vadd.f32 %v4427_v61, %v4423_v38 }
 0x6c3   : >> { %v4471_v48 = vmul.f32 0.16666667, %v4470_v30  ;;  %v4450_v7 = vmul.f32 0.16666667, %v4449_v35 }
 0x6c4   : >> { %v4429_v14 = vmul.f32 0.16666667, %v4428_v28 }
 0x6c5   : >> { %v4473_v41 = vrot.slane %v4471_v48, 6  ;;  %v4452_v3 = vrot.slane %v4450_v7, 6 }
 0x6c6   : >> { %v4431_v18 = vrot.slane %v4429_v14, 6 }
 0x6c7   : >> { %4474 = vrot.lane.b32.xlu0 %v4473_v41, %s6551_s12  ;;  %4453 = vrot.lane.b32.xlu1 %v4452_v3, %s6552_s23  ;;  %v6553_v3 = vmov 683565275  }
 0x6cb   : >> { %4432 = vrot.lane.b32.xlu1 %v4431_v18, %s6536_s18  ;;  %v6554_v18 = vmov 2475754826  }
 0x739   : >> { %v4475_v9 = vpop.permute.xlu0 %4474  ;;  %v4454_v59 = vpop.permute.xlu1 %4453 }
 0x73a   : >> { %v9729_v2 = vadd.f32 %v10757_v15, %v4475_v9   ;;  %v9732_v0 = vadd.f32 %v10759_v56, %v4454_v59  }
 0x73c   : >> { %v10758_v39 = vmov %v9729_v2  ;;  %v10760_v16 = vmov %v9732_v0  ;;  %v6555_v2 = vmov 2131351028  }
 0x73d   : >> { %v4485_v55 = vmul.f32 %v10758_v39, %v10758_v39  ;;  %v4479_v22 = vmul.f32 %v10760_v16, %v10760_v16  ;;  %v4433_v11 = vpop.permute.xlu1 %4432 }
 0x73e   : >> { %v9741_v5 = vadd.f32 %v10761_v17, %v4433_v11   ;;  %v6556_v11 = vmov 2102212464  }
 0x73f   : >> { %4481 = vrot.lane.b32.xlu0 %v4479_v22, %s6548_s26  ;;  %4487 = vrot.lane.b32.xlu1 %v4485_v55, %s6550_s14 }
 0x740   : >> { %v4478_v52 = vmul.f32 %v9741_v5, %v9741_v5 }
 0x7b1   : >> { %v4482_v36 = vpop.permute.xlu0 %4481  ;;  %v4488_v6 = vpop.permute.xlu1 %4487 }
 0x7b2   : >> { %v4484_v10 = vadd.f32 %v4482_v36, %v4478_v52 }
 0x7b4   : >> { %v4490_v32 = vadd.f32 %v4488_v6, %v4484_v10  ;;  %v6557_v10 = vmov 920167782  }
 0x7b6   : >> { %6248 = vrsqrt.f32 %v4490_v32  ;;  %vm4493_vm14 = vcmp.eq.f32.partialorder %v4490_v32, inf  ;;  %v4496_v13 = vand.u32 2147483648, %v4490_v32  ;;  %vm4495_vm15 = vcmp.eq.f32.partialorder %v4490_v32, 0.0 }
 0x7c0   : >> { %v6249_v21 = vpop.eup %6248 }
 0x7c1   : >> { %v4492_v24 = vmul.f32 %v6249_v21, %v4490_v32  ;;  %v6558_v21 = vmov 1326507024  }
 0x7c3   : >> { %v4494_v37 = vsel %vm4493_vm14, %v4490_v32, %v4492_v24 }
 0x7c4   : >> { %v4497_v62 = vsel %vm4495_vm15, %v4496_v13, %v4494_v37 }
 0x7c5   : >> { %v9745_v49 = vmul.f32 0.01, %v4497_v62  ;;  %v4499_v33 = vadd.f32 1e-06, %v4497_v62 }
 0x7c7   : >> { %6250 = vrcp.f32 %v4499_v33  ;;  %v4514_v0 = vand.u32 2139095040, %v9745_v49  ;;  %v4511_v61 = vand.u32 2147483647, %v9745_v49  ;;  %vm4513_vm12 = vcmp.lt.s32.totalorder %v9745_v49, 0 }
 0x7c8   : >> { %vm4603_vm15 = vweird.f32 %v9745_v49 }
 0x7c9   : >> { %v4515_v50 = vshrl.u32 %v4514_v0, 23  ;;  %v4518_v48 = vand.u32 8388607, %v4511_v61  ;;  %vm4512_vm13 = vcmp.le.f32.partialorder %v4511_v61, 0.7853982 }
 0x7cb   : >> { %v5635_v12 = vadd.s32 4294967169, %v4515_v50  ;;  %v4519_v13 = vor.u32 8388608, %v4518_v48 }
 0x7cd   : >> { %v4521_v38 = vadd.s32 1, %v5635_v12 }
 0x7cf   : >> { %vm4522_vm2 = vcmp.gt.s32.totalorder %v4521_v38, 0 }
 0x7d0   : >> { %v4523_v30 = vsel %vm4522_vm2, %v4521_v38, 0 }
 0x7d1   : >> { %v9749_v35 = vpop.eup %6250  ;;  %v4525_v28 = vand.u32 31, %v4523_v30  ;;  %v4524_v41 = vshrl.u32 %v4523_v30, 5 }
 0x7d2   : >> { %4507 = vrot.lane.b32.xlu1 %v9749_v35, %s6545_s21  ;;  %4503 = vrot.lane.b32.xlu0 %v9749_v35, %s6546_s22 }
 0x7d3   : >> { %v4526_v7 = vsub.s32 32, %v4525_v28  ;;  %v4528_v14 = vshll.u32 %v6553_v3, %v4525_v28  ;;  %v4531_v9 = vshll.u32 %v6554_v18, %v4525_v28  ;;  %v4534_v22 = vshll.u32 %v6555_v2, %v4525_v28 }
 0x7d4   : >> { %v4537_v36 = vshll.u32 %v6556_v11, %v4525_v28  ;;  %v4540_v32 = vshll.u32 %v6557_v10, %v4525_v28  ;;  %vm4543_vm6 = vcmp.lt.s32.totalorder %v4524_v41, 1  ;;  %vm4546_vm7 = vcmp.lt.s32.totalorder %v4524_v41, 4 }
 0x7d5   : >> { %v4529_v59 = vshrl.u32 %v6554_v18, %v4526_v7  ;;  %v4532_v55 = vshrl.u32 %v6555_v2, %v4526_v7  ;;  %v4535_v52 = vshrl.u32 %v6556_v11, %v4526_v7  ;;  %v4538_v6 = vshrl.u32 %v6557_v10, %v4526_v7 }
 0x7d6   : >> { %v4541_v24 = vshrl.u32 %v6558_v21, %v4526_v7  ;;  %v4527_v18 = vshrl.u32 %v6553_v3, %v4526_v7  ;;  %vm4545_vm8 = vcmp.lt.s32.totalorder %v4524_v41, 3  ;;  %vm4544_vm9 = vcmp.lt.s32.totalorder %v4524_v41, 2 }
 0x7d7   : >> { %v4530_v37 = vor.u32 %v4529_v59, %v4528_v14  ;;  %v4533_v62 = vor.u32 %v4532_v55, %v4531_v9  ;;  %v4536_v33 = vor.u32 %v4535_v52, %v4534_v22  ;;  %v4539_v0 = vor.u32 %v4538_v6, %v4537_v36 }
 0x7d8   : >> { %v4542_v50 = vor.u32 %v4541_v24, %v4540_v32  ;;  %v4559_v10 = vshll.u32 %v4519_v13, 8 }
 0x7d9   : >> { %v4548_v12 = vsel %vm4546_vm7, %v4536_v33, 2102212464  ;;  %v4551_v38 = vsel %vm4543_vm6, %v4530_v37, %v4533_v62  ;;  %v4555_v30 = vsel %vm4543_vm6, %v4533_v62, %v4536_v33  ;;  %v4552_v2 = vsel %vm4546_vm7, %v4539_v0, 920167782 }
 0x7da   : >> { %v4556_v11 = vsel %vm4546_vm7, %v4542_v50, 1326507024  ;;  %v4553_v23 = vsel %vm4545_vm8, %v4536_v33, %v4552_v2  ;;  %v4547_v21 = vsel %vm4543_vm6, %v4527_v18, %v4530_v37  ;;  %v4549_v48 = vsel %vm4545_vm8, %v4533_v62, %v4548_v12 }
 0x7db   : >> { %v4557_v28 = vsel %vm4545_vm8, %v4539_v0, %v4556_v11  ;;  %v4554_v14 = vsel %vm4544_vm9, %v4551_v38, %v4553_v23  ;;  %v4550_v36 = vsel %vm4544_vm9, %v4547_v21, %v4549_v48  ;;  %vm5008_vm8 = vcmask 7168  }
 0x7dc   : >> { %v4558_v9 = vsel %vm4544_vm9, %v4555_v30, %v4557_v28  ;;  %v9760_v22 = vmul.u32.u64.low %v4559_v10, %v4554_v14  ;;  %v9761_v52 = vmul.u32.u64.high %v4559_v10, %v4554_v14, %v9760_v22  ;;  %v4566_v3 = vmul.u32 %v4559_v10, %v4550_v36 }
 0x7dd   : >> { %v9757_v59 = vmul.u32.u64.low %v4559_v10, %v4558_v9  ;;  %v9758_v55 = vmul.u32.u64.high %v4559_v10, %v4558_v9, %v9757_v59  ;;  %vm5010_vm9 = vcmask 15360  }
 0x7de   : >> { %v4569_v7 = vadd.s32 1, %v9761_v52 }
 0x7df   : >> { %vm4568_vm10 = vc.u32 %v9758_v55, %v9760_v22  ;;  %v4567_v18 = vadd.s32 %v9760_v22, %v9758_v55 }
 0x7e0   : >> { %v4570_v41 = vsel %vm4568_vm10, %v4569_v7, %v9761_v52  ;;  %vm5012_vm10 = vcmask 23552  }
 0x7e1   : >> { %v4571_v6 = vadd.s32 %v4570_v41, %v4566_v3 }
 0x7e3   : >> { %v4572_v32 = vadd.s32 536870912, %v4571_v6 }
 0x7e5   : >> { %v4573_v24 = vshrl.u32 %v4572_v32, 30 }
 0x7e7   : >> { %v4574_v13 = vshll.u32 %v4573_v24, 30  ;;  %v4597_v55 = vsub.s32 4, %v4573_v24 }
 0x7e9   : >> { %v4575_v23 = vsub.s32 %v4571_v6, %v4574_v13  ;;  %v4598_v22 = vsel %vm4513_vm12, %v4597_v55, %v4573_v24 }
 0x7ea   : >> { %v4600_v3 = vsel %vm4512_vm13, 0, %v4598_v22  ;;  %v4186_v22 = vmul.f32 0.1, %v9681_v26 }
 0x7eb   : >> { %v4577_v37 = vsub.s32 0, %v4575_v23  ;;  %v4708_v6 = vand.u32 3, %v4600_v3 }
 0x7ed   : >> { %v5636_v62 = vmin.u32 %v4577_v37, %v4575_v23  ;;  %vm4710_vm0 = vcmp.eq.s32.totalorder %v4708_v6, 0  ;;  %vm4713_vm1 = vcmp.eq.s32.totalorder %v4708_v6, 2  ;;  %vm4709_vm14 = vcmp.lt.s32.totalorder %v4708_v6, 2 }
 0x7ef   : >> { %v4579_v33 = vclz %v5636_v62 }
 0x7f1   : >> { %v5637_v0 = vadd.s32 4294967294, %v4579_v33 }
 0x7f3   : >> { %vm5638_vm11 = vcmp.lt.s32.totalorder %v5637_v0, 0 }
 0x7f4   : >> { %v4582_v50 = vsel %vm5638_vm11, 0, %v5637_v0  ;;  %vm5014_vm11 = vcmask 31744  }
 0x7f5   : >> { %v4587_v12 = vsub.s32 4294967266, %v4582_v50  ;;  %v4583_v30 = vsub.s32 32, %v4582_v50  ;;  %v4584_v28 = vshll.u32 %v4575_v23, %v4582_v50  ;;  %v4604_v23 = vadd.s32 3, %v4600_v3 }
 0x7f7   : >> { %v4588_v38 = vadd.s32 127, %v4587_v12  ;;  %v4585_v11 = vshrl.u32 %v4567_v18, %v4583_v30  ;;  %v4605_v61 = vand.u32 3, %v4604_v23 }
 0x7f9   : >> { %v4589_v2 = vshll.u32 %v4588_v38, 23  ;;  %v4586_v21 = vor.u32 %v4585_v11, %v4584_v28  ;;  %vm4607_vm2 = vcmp.eq.s32.totalorder %v4605_v61, 0  ;;  %vm4610_vm6 = vcmp.eq.s32.totalorder %v4605_v61, 2 }
 0x7fa   : >> { %vm4606_vm7 = vcmp.lt.s32.totalorder %v4605_v61, 2  ;;  %v6559_v28 = vmov 7  }
 0x7fb   : >> { %v4590_v10 = vor.u32 4788187, %v4589_v2  ;;  %v4593_v14 = vcvt.s32.f32 %v4586_v21  ;;  %6167 = vset.pattern.permute.xlu1 %v6559_v28 }
 0x7fd   : >> { %v4591_v48 = vand.u32 2147483647, %v4590_v10 }
 0x7ff   : >> { %v4594_v9 = vmul.f32 %v4593_v14, %v4591_v48  ;;  %v4168_v14 = vrot.slane %v9686_v53, 6 }
 0x801   : >> { %v4595_v59 = vxor.u32 2147483648, %v4594_v9 }
 0x803   : >> { %v4596_v52 = vsel %vm4513_vm12, %v4595_v59, %v4594_v9  ;;  %vm5016_vm12 = vcmask 39936  }
 0x804   : >> { %v4599_v36 = vsel %vm4512_vm13, %v9745_v49, %v4596_v52  ;;  %v10385_v49 = vrot.slane %v9656_v40, 6  ;;  %v4178_v52 = vmul.f32 0.1, %v9673_v25  ;;  %vm5018_vm13 = vcmask 48128  }
 0x805   : >> { %6252 = vcosq.f32 %v4599_v36 }
 0x806   : >> { %6254 = vsinq.f32 %v4599_v36  ;;  %v4167_v9 = vadd.f32 %v10385_v49, %v9652_v47  ;;  %v4259_v55 = vmul.f32 0.01, %v4178_v52 }
 0x808   : >> { %v4170_v59 = vadd.f32 %v4168_v14, %v4167_v9  ;;  %v4260_v3 = vmul.f32 0.5, %v4259_v55 }
 0x80a   : >> { %v4171_v36 = vmul.f32 0.1, %v4170_v59 }
 0x80f   : >> { %v6253_v7 = vpop.eup %6252 }
 0x810   : >> { %v6255_v41 = vpop.eup %6254  ;;  %v4611_v13 = vxor.u32 2147483648, %v6253_v7 }
 0x811   : >> { %v4608_v32 = vxor.u32 2147483648, %v6255_v41 }
 0x812   : >> { %v4715_v62 = vsel %vm4713_vm1, %v4611_v13, %v6255_v41  ;;  %v4612_v18 = vsel %vm4610_vm6, %v4611_v13, %v6255_v41  ;;  %v4280_v41 = vmul.f32 0.01, %v4186_v22  ;;  %vm5024_vm1 = vcmask 72704  }
 0x813   : >> { %v4712_v37 = vsel %vm4710_vm0, %v6253_v7, %v4608_v32  ;;  %v4609_v30 = vsel %vm4607_vm2, %v6253_v7, %v4608_v32  ;;  %v4238_v7 = vmul.f32 0.01, %v4171_v36  ;;  %v4261_v32 = vadd.f32 %v4260_v3, %v4178_v52 }
 0x814   : >> { %v4716_v33 = vsel %vm4709_vm14, %v4712_v37, %v4715_v62  ;;  %v4613_v11 = vsel %vm4606_vm7, %v4609_v30, %v4612_v18  ;;  %v4281_v13 = vmul.f32 0.5, %v4280_v41  ;;  %vm5020_vm0 = vcmask 56320  }
 0x815   : >> { %v4717_v38 = vsel %vm4603_vm15, nan, %v4716_v33  ;;  %v9796_v21 = vsel %vm4603_vm15, nan, %v4613_v11  ;;  %v4239_v6 = vmul.f32 0.5, %v4238_v7  ;;  %v4262_v37 = vmul.f32 0.01, %v4261_v32 }
 0x816   : >> { %v9784_v2 = vsub.f32 1.0, %v4717_v38  ;;  %v4282_v62 = vadd.f32 %v4281_v13, %v4186_v22  ;;  %vm5026_vm14 = vcmask 80896   ;;  %vm5028_vm15 = vcmask 89088  }
 0x817   : >> { %v4240_v23 = vadd.f32 %v4239_v6, %v4171_v36  ;;  %v4263_v47 = vmul.f32 0.5, %v4262_v37  ;;  %v4268_v11 = vmul.f32 2.0, %v4262_v37  ;;  %vm5030_vm2 = vcmask 97280  }
 0x818   : >> { %v4283_v61 = vmul.f32 0.01, %v4282_v62  ;;  %v9821_v62 = vmul.f32 %v9749_v35, %v9741_v5  ;;  %vm5032_vm6 = vcmask 105472   ;;  %vm5034_vm7 = vcmask 113664  }
 0x819   : >> { %v4241_v33 = vmul.f32 0.01, %v4240_v23  ;;  %v4269_v3 = vadd.f32 %v4268_v11, %v4259_v55 }
 0x81a   : >> { %v4284_v38 = vmul.f32 0.5, %v4283_v61  ;;  %v4289_v57 = vmul.f32 2.0, %v4283_v61 }
 0x81b   : >> { %v4247_v49 = vmul.f32 2.0, %v4241_v33 }
 0x81c   : >> { %v4285_v18 = vadd.f32 %v4284_v38, %v4186_v22 }
 0x81d   : >> { %v4248_v37 = vadd.f32 %v4247_v49, %v4238_v7 }
 0x81e   : >> { %v4286_v59 = vmul.f32 0.01, %v4285_v18 }
 0x844   : >> { %v4508_v0 = vpop.permute.xlu1 %4507  ;;  %v4504_v50 = vpop.permute.xlu0 %4503 }
 0x845   : >> { %v9772_v12 = vmul.f32 %v4508_v0, %v10758_v39  ;;  %v9775_v24 = vmul.f32 %v4504_v50, %v10760_v16  ;;  %v4242_v0 = vmul.f32 0.5, %v4241_v33  ;;  %v4264_v50 = vadd.f32 %v4263_v47, %v4178_v52 }
 0x846   : >> { %v4287_v47 = vadd.f32 %v4286_v59, %v4186_v22  ;;  %v4290_v33 = vadd.f32 %v4289_v57, %v4280_v41 }
 0x847   : >> { %4754 = vrot.lane.b32.xlu1 %v9772_v12, %s6550_s14  ;;  %4739 = vrot.lane.b32.xlu0 %v9775_v24, %s6548_s26  ;;  %v9792_v10 = vmul.f32 %v9772_v12, %v9772_v12  ;;  %v9804_v48 = vmul.f32 %v9775_v24, %v9775_v24  ;;  %v4243_v25 = vadd.f32 %v4242_v0, %v4171_v36  ;;  %v4265_v30 = vmul.f32 0.01, %v4264_v50 }
 0x848   : >> { %v4291_v0 = vmul.f32 2.0, %v4286_v59  ;;  %v4288_v11 = vmul.f32 0.01, %v4287_v47  ;;  %v4766_v59 = vmul.f32 %v9821_v62, %v9821_v62  ;;  %v6560_v47 = vmov 8  }
 0x849   : >> { %v4244_v26 = vmul.f32 0.01, %v4243_v25  ;;  %v4266_v28 = vadd.f32 %v4265_v30, %v4178_v52  ;;  %v4270_v9 = vmul.f32 2.0, %v4265_v30  ;;  %6168 = vset.pattern.permute.xlu0 %v6560_v47 }
 0x84a   : >> { %v4292_v35 = vadd.f32 %v4291_v0, %v4290_v33 }
 0x84b   : >> { %4775 = vrot.lane.b32.xlu0 %v9772_v12, %s6548_s26  ;;  %4727 = vrot.lane.b32.xlu1 %v9784_v2, %s6546_s22  ;;  %v4245_v6 = vadd.f32 %v4244_v26, %v4171_v36  ;;  %v4249_v32 = vmul.f32 2.0, %v4244_v26  ;;  %v4267_v13 = vmul.f32 0.01, %v4266_v28  ;;  %v4271_v23 = vadd.f32 %v4270_v9, %v4269_v3 }
 0x84c   : >> { %v4293_v41 = vadd.f32 %v4292_v35, %v4288_v11  ;;  %v4773_v11 = vsub.f32 0.0, %v9821_v62 }
 0x84d   : >> { %v4246_v55 = vmul.f32 0.01, %v4245_v6  ;;  %v4250_v61 = vadd.f32 %v4249_v32, %v4248_v37  ;;  %v4272_v36 = vadd.f32 %v4271_v23, %v4267_v13 }
 0x84e   : >> { %v4294_v13 = vmul.f32 0.16666667, %v4293_v41 }
 0x84f   : >> { %4767 = vrot.lane.b32.xlu0 %v9792_v10, %s6550_s14  ;;  %4734 = vrot.lane.b32.xlu1 %v9796_v21, %s6545_s21  ;;  %v4251_v28 = vadd.f32 %v4250_v61, %v4246_v55  ;;  %v4273_v57 = vmul.f32 0.16666667, %v4272_v36 }
 0x851   : >> { %v4253_v6 = vmul.f32 0.16666667, %v4251_v28  ;;  %v4275_v32 = vrot.slane %v4273_v57, 2  ;;  %v4788_v57 = vmul.f32 %v9796_v21, %v9821_v62 }
 0x853   : >> { %4791 = vrot.lane.b32.xlu0 %v9804_v48, %s6548_s26  ;;  %4749 = vrot.lane.b32.xlu1 %v9796_v21, %s6546_s22 }
 0x8b9   : >> { %v4755_v50 = vpop.permute.xlu1 %4754  ;;  %v4740_v38 = vpop.permute.xlu0 %4739 }
 0x8ba   : >> { %v4757_v52 = vmul.f32 %v4755_v50, %v9821_v62  ;;  %v4742_v25 = vmul.f32 %v4740_v38, %v9821_v62  ;;  %v4296_v38 = vrot.slane %v4294_v13, 4 }
 0x8bc   : >> { %v4758_v30 = vmul.f32 %v4757_v52, %v9784_v2  ;;  %v4743_v18 = vmul.f32 %v4742_v25, %v9784_v2 }
 0x8bd   : >> { %v4776_v26 = vpop.permute.xlu0 %4775  ;;  %v4728_v49 = vpop.permute.xlu1 %4727 }
 0x8be   : >> { %v4778_v22 = vmul.f32 %v4776_v26, %v9775_v24  ;;  %4745 = vrot.lane.b32.xlu0 %v4743_v18, %s6545_s21  ;;  %4760 = vrot.lane.b32.xlu1 %v4758_v30, %s6546_s22  ;;  %v4785_v30 = vsub.f32 0.0, %v9775_v24 }
 0x8c0   : >> { %v4779_v7 = vmul.f32 %v4778_v22, %v4728_v49 }
 0x8c1   : >> { %v4768_v9 = vpop.permute.xlu0 %4767  ;;  %v4735_v25 = vpop.permute.xlu1 %4734 }
 0x8c2   : >> { %4781 = vrot.lane.b32.xlu0 %v4779_v7, %s6548_s26  ;;  %4722 = vrot.lane.b32.xlu1 %v9792_v10, %s6548_s26  ;;  %v4770_v3 = vadd.f32 %v4768_v9, %v4766_v59  ;;  %v4764_v55 = vmul.f32 %v4735_v25, %v9772_v12 }
 0x8c4   : >> { %v4771_v0 = vmul.f32 %v4770_v3, %v9784_v2 }
 0x8c5   : >> { %v4792_v23 = vpop.permute.xlu0 %4791  ;;  %v4750_v33 = vpop.permute.xlu1 %4749 }
 0x8c6   : >> { %4255 = vrot.lane.b32.xlu0 %v4253_v6, %s6546_s22  ;;  %4276 = vrot.lane.b32.xlu1 %v4275_v32, %s6545_s21  ;;  %v4794_v50 = vadd.f32 %v4792_v23, %v4766_v59  ;;  %v4772_v10 = vsub.f32 1.0, %v4771_v0  ;;  %v4752_v6 = vmul.f32 %v4750_v33, %v9775_v24  ;;  %v10763_v24 = vld [vmem:[#allocation38_spill] sm:$0xff]  ;;  %v10765_v23 = vld [vmem:[#allocation37_spill] sm:$0xff]  ;;  %v10766_v0 = vld [vmem:[#allocation35_spill] sm:$0xff] }
 0x8c8   : >> { %v4795_v37 = vmul.f32 %v4794_v50, %v9784_v2  ;;  %v4774_v2 = vmul.f32 %v4773_v11, %v9796_v21  ;;  %v6562_v21 = vmov 6   ;;  %v10771_v11 = vld [vmem:[#allocation47_spill] sm:$0xff] }
 0x8ca   : >> { %4297 = vrot.lane.b32.xlu0 %v4296_v38, %s6536_s18  ;;  %4189 = vperm.xlu1 %6167, %v10759_v56   ;;  %v4796_v52 = vsub.f32 1.0, %v4795_v37  ;;  %v4786_v56 = vmul.f32 %v4785_v30, %v4750_v33  ;;  %v10767_v38 = vld [vmem:[#allocation34_spill] sm:$0xff]  ;;  %v10769_v33 = vld [vmem:[#allocation48_spill] sm:$0xff] }
 0x8ce   : >> { %4828 = vrot.lane.b32.xlu1 %v4772_v10, %s6533_s10 }
 0x8d2   : >> { %4863 = vrot.lane.b32.xlu1 %v4796_v52, %s6533_s10 }
 0x930   : >> { %v4746_v61 = vpop.permute.xlu0 %4745  ;;  %v4761_v36 = vpop.permute.xlu1 %4760 }
 0x931   : >> { %v4765_v18 = vadd.f32 %v4764_v55, %v4746_v61  ;;  %v4787_v22 = vadd.f32 %v4786_v56, %v4761_v36 }
 0x933   : >> { %4803 = vrot.lane.b32.xlu0 %v4765_v18, %s6543_s1  ;;  %s6561_s1 = smov 8  }
 0x934   : >> { %v4782_v35 = vpop.permute.xlu0 %4781  ;;  %v4723_v26 = vpop.permute.xlu1 %4722 }
 0x935   : >> { %v4784_v7 = vadd.f32 %v4782_v35, %v4774_v2  ;;  %v4725_v28 = vadd.f32 %v4723_v26, %v9804_v48  ;;  %v4789_v9 = vadd.f32 %v4788_v57, %v4782_v35  ;;  %v4732_v48 = vsub.f32 0.0, %v9772_v12 }
 0x936   : >> { %v4763_v12 = vadd.f32 %v4761_v36, %v4752_v6 }
 0x937   : >> { %v4730_v41 = vmul.f32 %v4728_v49, %v4725_v28  ;;  %4813 = vrot.lane.b32.xlu0 %v4787_v22, %s6544_s17  ;;  %4853 = vrot.lane.b32.xlu1 %v4784_v7, %s6533_s10  ;;  %v4737_v62 = vmul.f32 %v4735_v25, %v4732_v48  ;;  %v10768_v25 = vld [vmem:[#allocation46_spill] sm:$0xff] }
 0x938   : >> { %v4277_v3 = vpop.permute.xlu1 %4276  ;;  %v4256_v37 = vpop.permute.xlu0 %4255 }
 0x939   : >> { %v4731_v59 = vsub.f32 1.0, %v4730_v41  ;;  %v4748_v49 = vadd.f32 %v4746_v61, %v4737_v62  ;;  %v9894_v55 = vadd.f32 %v10769_v33, %v4256_v37   ;;  %v9901_v56 = vadd.f32 %v10771_v11, %v4277_v3  }
 0x93b   : >> { %4838 = vrot.lane.b32.xlu0 %v4789_v9, %s6533_s10  ;;  %4798 = vrot.lane.b32.xlu1 %v4731_v59, %s6545_s21  ;;  %s6565_s10 = smov 9   ;;  %v10770_v36 = vmov %v9894_v55  ;;  %v10772_v35 = vmov %v9901_v56 }
 0x93c   : >> { %v4298_v52 = vpop.permute.xlu0 %4297  ;;  %v9898_v18 = vmul.f32 0.01, %v10770_v36  ;;  %v9907_v41 = vmul.f32 0.01, %v10772_v35 }
 0x93d   : >> { %v9891_v2 = vadd.f32 %v10768_v25, %v4298_v52  }
 0x93e   : >> { %v4302_v57 = vmul.f32 0.5, %v9898_v18 }
 0x93f   : >> { %4198 = vperm.xlu0 %6168, %v10757_v15   ;;  %4872 = vrot.lane.b32.xlu1 %v4731_v59, %s6551_s12  ;;  %v6563_v15 = vmov 4   ;;  %v4341_v61 = vmul.f32 0.01, %v9891_v2 }
 0x940   : >> { %6170 = vset.pattern.permute.xlu1 %v6563_v15  ;;  %v4303_v62 = vadd.f32 %v4302_v57, %v10770_v36  ;;  %v4322_v15 = vmul.f32 0.5, %v9907_v41 }
 0x941   : >> { %v4342_v22 = vmul.f32 0.5, %v4341_v61 }
 0x943   : >> { %4920 = vrot.lane.b32.xlu0 %v4731_v59, %s6561_s1  ;;  %5039 = vrot.lane.b32.xlu1 %v10760_v16, %s6544_s17 }
 0x944   : >> { %6169 = vset.pattern.permute.xlu0 %v6562_v21  ;;  %v4343_v21 = vadd.f32 %v4342_v22, %v9891_v2 }
 0x946   : >> { %v4344_v6 = vmul.f32 0.01, %v4343_v21 }
 0x947   : >> { %5043 = vrot.lane.b32.xlu0 %v10758_v39, %s6544_s17  ;;  %5052 = vrot.lane.b32.xlu1 %v4168_v14, %s6536_s18  ;;  %s6564_s17 = smov 7   ;;  %s6566_s18 = smov 12  }
 0x948   : >> { %v4350_v56 = vmul.f32 2.0, %v4344_v6 }
 0x949   : >> { %v9870_v32 = vpop.permute.xlu1 %4189 }
 0x94a   : >> { %v4351_v21 = vadd.f32 %v4350_v56, %v4341_v61 }
 0x94b   : >> { %5046 = vrot.lane.b32.xlu0 %v4102_v54, %s6546_s22  ;;  %4823 = vrot.lane.b32.xlu1 %v4748_v49, %s6546_s22  ;;  %s6567_s22 = smov 15  }
 0x94d   : >> { %v4829_v53 = vpop.permute.xlu1 %4828 }
 0x94e   : >> { %v4831_v54 = vmul.f32 %v10762_v58, %v4829_v53  ;;  %v4892_v14 = vmul.f32 %v10763_v24, %v4829_v53  ;;  %v4940_v50 = vmul.f32 %v10766_v0, %v4829_v53  ;;  %v4323_v53 = vadd.f32 %v4322_v15, %v10772_v35 }
 0x94f   : >> { %5049 = vrot.lane.b32.xlu0 %v4066_v31, %s6545_s21  ;;  %4848 = vrot.lane.b32.xlu1 %v4763_v12, %s6545_s21  ;;  %s10775_s21 = smov 125  }
 0x951   : >> { %v4864_v13 = vpop.permute.xlu1 %4863 }
 0x952   : >> { %v4866_v31 = vmul.f32 %v10764_v20, %v4864_v13  ;;  %v4914_v47 = vmul.f32 %v10765_v23, %v4864_v13  ;;  %v4962_v10 = vmul.f32 %v10767_v38, %v4864_v13  ;;  %v4324_v13 = vmul.f32 0.01, %v4323_v53 }
 0x953   : >> { %4888 = vrot.lane.b32.xlu0 %v4748_v49, %s6552_s23  ;;  %4904 = vrot.lane.b32.xlu1 %v4763_v12, %s6551_s12 }
 0x954   : >> { %v4325_v52 = vmul.f32 0.5, %v4324_v13 }
 0x957   : >> { %4952 = vrot.lane.b32.xlu0 %v4763_v12, %s6561_s1  ;;  %4936 = vrot.lane.b32.xlu1 %v4748_v49, %s6564_s17  ;;  %v4304_v12 = vmul.f32 0.01, %v4303_v62  ;;  %s10782_s1 = smov 113  }
 0x95b   : >> { %4833 = vrot.lane.b32.xlu0 %v4831_v54, %s6565_s10  ;;  %4894 = vrot.lane.b32.xlu1 %v4892_v14, %s6566_s18  ;;  %v4345_v14 = vmul.f32 0.5, %v4344_v6 }
 0x95f   : >> { %4868 = vrot.lane.b32.xlu0 %v4866_v31, %s6565_s10  ;;  %4916 = vrot.lane.b32.xlu1 %v4914_v47, %s6566_s18  ;;  %v4305_v47 = vmul.f32 0.5, %v4304_v12 }
 0x961   : >> { %v4306_v37 = vadd.f32 %v4305_v47, %v10770_v36  ;;  %v6568_v47 = vmov 3  }
 0x963   : >> { %4942 = vrot.lane.b32.xlu0 %v4940_v50, %s6567_s22  ;;  %4964 = vrot.lane.b32.xlu1 %v4962_v10, %s6567_s22  ;;  %v4346_v50 = vadd.f32 %v4345_v14, %v9891_v2 }
 0x965   : >> { %v4347_v55 = vmul.f32 0.01, %v4346_v50 }
 0x9a5   : >> { %v4804_v30 = vpop.permute.xlu0 %4803 }
 0x9a6   : >> { %v4806_v26 = vmul.f32 %v10762_v58, %v4804_v30  ;;  %v4876_v49 = vmul.f32 %v10763_v24, %v4804_v30 }
 0x9a8   : >> { %4808 = vrot.lane.b32.xlu0 %v4806_v26, %s6565_s10 }
 0x9a9   : >> { %v4814_v7 = vpop.permute.xlu0 %4813  ;;  %v4854_v28 = vpop.permute.xlu1 %4853 }
 0x9aa   : >> { %v4816_v9 = vmul.f32 %v10764_v20, %v4814_v7  ;;  %v4856_v59 = vmul.f32 %v10762_v58, %v4854_v28  ;;  %v4882_v58 = vmul.f32 %v10765_v23, %v4814_v7  ;;  %v4908_v54 = vmul.f32 %v10763_v24, %v4854_v28 }
 0x9ab   : >> { %v4930_v10 = vmul.f32 %v10767_v38, %v4814_v7  ;;  %v4956_v24 = vmul.f32 %v10766_v0, %v4854_v28  ;;  %v4307_v7 = vmul.f32 0.01, %v4306_v37 }
 0x9ac   : >> { %4818 = vrot.lane.b32.xlu0 %v4816_v9, %s6565_s10  ;;  %4858 = vrot.lane.b32.xlu1 %v4856_v59, %s6565_s10  ;;  %v4348_v9 = vadd.f32 %v4347_v55, %v9891_v2  ;;  %v4352_v59 = vmul.f32 2.0, %v4347_v55 }
 0x9ad   : >> { %v4839_v48 = vpop.permute.xlu0 %4838  ;;  %v4308_v6 = vadd.f32 %v4307_v7, %v10770_v36  ;;  %v4312_v53 = vmul.f32 2.0, %v4307_v7 }
 0x9ae   : >> { %v4841_v3 = vmul.f32 %v10764_v20, %v4839_v48  ;;  %v4924_v20 = vmul.f32 %v10766_v0, %v4804_v30  ;;  %v4898_v31 = vmul.f32 %v10765_v23, %v4839_v48  ;;  %v4193_v23 = vrot.slane %v9610_v60, 4 }
 0x9af   : >> { %v4202_v30 = vrot.slane %v9614_v51, 2  ;;  %v4946_v26 = vmul.f32 %v10767_v38, %v4839_v48  ;;  %v4326_v0 = vadd.f32 %v4325_v52, %v10772_v35  ;;  %v10773_v38 = vrot.slane %v9661_v4, 6 }
 0x9b0   : >> { %4878 = vrot.lane.b32.xlu0 %v4876_v49, %s6566_s18  ;;  %4843 = vrot.lane.b32.xlu1 %v4841_v3, %s6565_s10  ;;  %v9944_v28 = vmul.f32 %v4193_v23, %v9870_v32  ;;  %v4310_v48 = vmul.f32 2.0, %v4304_v12  ;;  %v4349_v49 = vmul.f32 0.01, %v4348_v9  ;;  %v4353_v3 = vadd.f32 %v4352_v59, %v4351_v21 }
 0x9b1   : >> { %v4327_v15 = vmul.f32 0.01, %v4326_v0  ;;  %v4309_v14 = vmul.f32 0.01, %v4308_v6 }
 0x9b2   : >> { %v4311_v4 = vadd.f32 %v4310_v48, %v9898_v18  ;;  %v4354_v12 = vadd.f32 %v4353_v3, %v4349_v49  ;;  %v6569_v18 = vmov 5  }
 0x9b3   : >> { %v4328_v61 = vadd.f32 %v4327_v15, %v10772_v35 }
 0x9b4   : >> { %4910 = vrot.lane.b32.xlu0 %v4908_v54, %s6566_s18  ;;  %4884 = vrot.lane.b32.xlu1 %v4882_v58, %s6566_s18  ;;  %v10774_v58 = vrot.slane %v9666_v27, 6  ;;  %v4330_v54 = vmul.f32 2.0, %v4324_v13  ;;  %v4355_v50 = vmul.f32 0.16666667, %v4354_v12 }
 0x9b8   : >> { %4900 = vrot.lane.b32.xlu0 %v4898_v31, %s6566_s18  ;;  %4926 = vrot.lane.b32.xlu1 %v4924_v20, %s6567_s22  ;;  %v4313_v20 = vadd.f32 %v4312_v53, %v4311_v4  ;;  %v4332_v31 = vmul.f32 2.0, %v4327_v15 }
 0x9ba   : >> { %v4314_v27 = vadd.f32 %v4313_v20, %v4309_v14 }
 0x9bc   : >> { %4958 = vrot.lane.b32.xlu0 %v4956_v24, %s6567_s22  ;;  %4932 = vrot.lane.b32.xlu1 %v4930_v10, %s6567_s22  ;;  %v4329_v10 = vmul.f32 0.01, %v4328_v61  ;;  %v4315_v13 = vmul.f32 0.16666667, %v4314_v27 }
 0x9be   : >> { %v9938_v22 = vpop.permute.xlu0 %4198 }
 0x9bf   : >> { %v9949_v57 = vmul.f32 %v4202_v30, %v9938_v22 }
 0x9c0   : >> { %5055 = vrot.lane.b32.xlu0 %v10773_v38, %s6552_s23  ;;  %4948 = vrot.lane.b32.xlu1 %v4946_v26, %s6567_s22  ;;  %s6570_s23 = smov 16   ;;  %s10789_s22 = scalar_lea.vmem [#allocation4], %s6686_s25 }
 0x9c2   : >> { %v9976_v52 = vpop.permute.xlu0 %4920 }
 0x9c4   : >> { %4216 = vperm.xlu0 %6169, %v10761_v17   ;;  %5058 = vrot.lane.b32.xlu1 %v10774_v58, %s6551_s12  ;;  %v4331_v17 = vadd.f32 %v4330_v54, %v9907_v41  ;;  %s10777_s12 = smov 119  }
 0x9c6   : >> { %v4333_v24 = vadd.f32 %v4332_v31, %v4331_v17  ;;  %v5044_v56 = vpop.permute.xlu0 %5043 }
 0x9c8   : >> { %6172 = vset.pattern.permute.xlu0 %v6568_v47  ;;  %4223 = vperm.xlu1 %6170, %v10771_v11   ;;  %v4334_v37 = vadd.f32 %v4333_v24, %v4329_v10  ;;  %v9974_v11 = vpop.permute.xlu1 %4798 }
 0x9c9   : >> { %4208 = vperm.xlu0 %6172, %v10769_v33  }
 0x9ca   : >> { %v4335_v33 = vmul.f32 0.16666667, %v4334_v37 }
 0x9cc   : >> { %6171 = vset.pattern.permute.xlu1 %v6569_v18  ;;  %v4873_v41 = vpop.permute.xlu1 %4872 }
 0x9cd   : >> { %4357 = vrot.lane.b32.xlu0 %v4355_v50, %s10775_s21  ;;  %4233 = vperm.xlu1 %6171, %v10768_v25   ;;  %v5047_v25 = vpop.permute.xlu0 %5046 }
 0x9ce   : >> { %6173 = vset.pattern.permute.xlu0 %v6569_v18 }
 0x9d0   : >> { %v5040_v55 = vpop.permute.xlu1 %5039 }
 0x9d1   : >> { %5005 = vrot.lane.b32.xlu0 %v9741_v5, %s6565_s10  ;;  %4317 = vrot.lane.b32.xlu1 %v4315_v13, %s10775_s21  ;;  %v5050_v0 = vpop.permute.xlu0 %5049  ;;  %v5061_v24 = vsel %vm5008_vm8, %v5040_v55, %v5044_v56  ;;  %s10785_s10 = scalar_lea.vmem %s10284_s6, %s6753_s20 }
 0x9d2   : >> { %s5079_s18 = scalar_lea.vmem %s10785_s10, %s9557_s19  ;;  %s10788_s19 = sshll.u32 %s6518_s24, 1 }
 0x9d3   : >> { %s453_s24 = sadd.s32 1, %s6518_s24  }
 0x9d4   : >> { %v5053_v26 = vpop.permute.xlu1 %5052  ;;  %p10123_p12 = scmp.ge.s32.totalorder %s453_s24, 8  }
 0x9d5   : >> { %4337 = vrot.lane.b32.xlu1 %v4335_v33, %s10775_s21  ;;  %v4889_v59 = vpop.permute.xlu0 %4888  ;;  %v10776_v33 = vrot.slane %v9656_v40, 6  ;;  %s6575_s17 = smov (%p10123_p12), 14   ;;  %s5649_s24 = sshll.u32 (%p10123_p12), %s6646_s9, 8 }
 0x9d6   : >> { %v4891_v62 = vmul.f32 %v10754_v44, %v4889_v59  ;;  %s10809_s20 = scalar_lea.vmem (%p10123_p12), [#allocation4], %s6686_s25 }
 0x9d7   : > { %s5222_s13 = sshll.u32 (%p10123_p12), %s10809_s20, 4  ;;  %s10213_s13 = int_to_ptr.vmem [resolvable:$true] %s5222_s13 }
 0x9d8   : >> { %v4824_v7 = vpop.permute.xlu1 %4823  ;;  %s6256_s25 = scalar_lea.vmem (%p10123_p12), %s10213_s13, 256 }
 0x9d9   : >> { %v9978_v21 = vpop.permute.xlu0 %4952  ;;  %v4826_v12 = vmul.f32 %v10751_v8, %v4824_v7  ;;  %v5062_v7 = vsel %vm5010_vm9, %v5061_v24, %v10776_v33  ;;  %p6257_p13 = scmp.ne.s32.totalorder (%p10123_p12), %s10213_s13, %s6256_s25 }
 0x9db   : > { %p6258_p0 = pnand (%p10123_p12), %p6257_p13, %p6663_p5 }
 0x9dc   : >> { %v4849_v9 = vpop.permute.xlu1 %4848 }
 0x9dd   : >> { %v4834_v15 = vpop.permute.xlu0 %4833  ;;  %p6259_p1 = pneg (%p10123_p12), %p6258_p0 }
 0x9de   : >> { %v4836_v14 = vadd.f32 %v4834_v15, %v4826_v12  ;;  %v5063_v15 = vsel %vm5012_vm10, %v5062_v7, %v5047_v25  ;;  %v4875_v25 = vmul.f32 %v10754_v44, %v4873_v41 }
 0x9e0   : >> { %v4905_v38 = vpop.permute.xlu1 %4904 }
 0x9e1   : >> { %v4869_v3 = vpop.permute.xlu0 %4868 }
 0x9e4   : >> { %v4937_v48 = vpop.permute.xlu1 %4936 }
 0x9e5   : >> { %v4943_v53 = vpop.permute.xlu0 %4942  ;;  %v4939_v37 = vmul.f32 %v10755_v1, %v4937_v48 }
 0x9e7   : >> { %v4945_v12 = vadd.f32 %v4943_v53, %v4939_v37  ;;  %v4907_v37 = vmul.f32 %v10754_v44, %v4905_v38 }
 0x9e8   : >> { %v4895_v49 = vpop.permute.xlu1 %4894 }
 0x9ec   : >> { %v4917_v6 = vpop.permute.xlu1 %4916 }
 0x9f0   : >> { %v9980_v58 = vpop.permute.xlu1 %4964 }
 0xa1a   : >> { %v4809_v4 = vpop.permute.xlu0 %4808 }
 0xa1e   : >> { %v4819_v54 = vpop.permute.xlu0 %4818  ;;  %v4859_v61 = vpop.permute.xlu1 %4858 }
 0xa22   : >> { %v4879_v20 = vpop.permute.xlu0 %4878  ;;  %v4844_v31 = vpop.permute.xlu1 %4843 }
 0xa23   : >> { %v4846_v47 = vadd.f32 %v4844_v31, %v4836_v14  ;;  %v5064_v14 = vsel %vm5014_vm11, %v5063_v15, %v5050_v0  ;;  %v4897_v0 = vadd.f32 %v4895_v49, %v4891_v62  ;;  %v4881_v33 = vadd.f32 %v4879_v20, %v4875_v25 }
 0xa24   : >> { %v5065_v48 = vsel %vm5016_vm12, %v5064_v14, %v5053_v26  ;;  %v4801_v26 = vmul.f32 %v10751_v8, %v9974_v11  ;;  %v4923_v11 = vmul.f32 %v10755_v1, %v9976_v52 }
 0xa25   : >> { %4973 = vrot.lane.b32.xlu0 %v4846_v47, %s6550_s14 }
 0xa26   : >> { %v4911_v17 = vpop.permute.xlu0 %4910  ;;  %v4885_v50 = vpop.permute.xlu1 %4884  ;;  %v4811_v41 = vadd.f32 %v4809_v4, %v4801_v26 }
 0xa27   : >> { %v4913_v7 = vadd.f32 %v4911_v17, %v4907_v37  ;;  %v10001_v15 = vadd.f32 %v4885_v50, %v4881_v33  }
 0xa28   : >> { %v10007_v62 = vadd.f32 %v4819_v54, %v4811_v41  }
 0xa29   : >> { %v4919_v49 = vadd.f32 %v4917_v6, %v4913_v7 }
 0xa2a   : >> { %v4901_v27 = vpop.permute.xlu0 %4900  ;;  %v4927_v10 = vpop.permute.xlu1 %4926  ;;  %v10778_v44 = vmov %v10007_v62  ;;  %v4955_v62 = vmul.f32 %v10755_v1, %v9978_v21  ;;  %v10781_v1 = vsub.f32 %v9944_v28, %v9949_v57 }
 0xa2b   : >> { %v4903_v59 = vadd.f32 %v4901_v27, %v4897_v0  ;;  %v4929_v6 = vadd.f32 %v4927_v10, %v4923_v11 }
 0xa2e   : >> { %v4959_v18 = vpop.permute.xlu0 %4958  ;;  %v4933_v13 = vpop.permute.xlu1 %4932 }
 0xa2f   : >> { %v4961_v52 = vadd.f32 %v4959_v18, %v4955_v62  ;;  %v10026_v60 = vadd.f32 %v4933_v13, %v4929_v6  }
 0xa32   : >> { %v4949_v31 = vpop.permute.xlu1 %4948  ;;  %v5056_v55 = vpop.permute.xlu0 %5055 }
 0xa33   : >> { %v4951_v56 = vadd.f32 %v4949_v31, %v4945_v12  ;;  %v5066_v40 = vsel %vm5018_vm13, %v5065_v48, %v5056_v55  ;;  %v4851_v12 = vmul.f32 %v10751_v8, %v4849_v9  ;;  %v4229_v8 = vmul.f32 %v9870_v32, %v9619_v46 }
 0xa34   : >> { %v4213_v9 = vmul.f32 %v9938_v22, %v9619_v46  ;;  %v10780_v32 = vmov %v10026_v60 }
 0xa35   : >> { %4997 = vrot.lane.b32.xlu0 %v4951_v56, %s6550_s14  ;;  %v4861_v38 = vadd.f32 %v4859_v61, %v4851_v12 }
 0xa36   : >> { %v5059_v24 = vpop.permute.xlu1 %5058 }
 0xa37   : >> { %v5067_v53 = vsel %vm5020_vm0, %v5066_v40, %v5059_v24  ;;  %v4871_v20 = vadd.f32 %v4869_v3, %v4861_v38 }
 0xa38   : >> { %5069 = vrot.lane.b32.xlu1 %v5067_v53, %s6570_s23 }
 0xa39   : >> { %5101 = vrot.lane.b32.xlu0 %v4846_v47, %s10777_s12 }
 0xa3c   : >> { %4985 = vrot.lane.b32.xlu1 %v4903_v59, %s6550_s14  ;;  %s10779_s14 = smov 116  }
 0xa3d   : >> { %4981 = vrot.lane.b32.xlu0 %v10001_v15, %s10775_s21 }
 0xa40   : >> { %4969 = vrot.lane.b32.xlu1 %v10778_v44, %s10775_s21 }
 0xa41   : >> { %4989 = vrot.lane.b32.xlu0 %v4919_v49, %s6548_s26 }
 0xa43   : >> { %v4217_v4 = vpop.permute.xlu0 %4216 }
 0xa44   : >> { %v4219_v54 = vmul.f32 %v4217_v4, %v4193_v23  ;;  %v4228_v61 = vmul.f32 %v4217_v4, %v4202_v30  ;;  %4977 = vrot.lane.b32.xlu1 %v4871_v20, %s6548_s26  ;;  %v4967_v23 = vadd.f32 %v9980_v58, %v4961_v52 }
 0xa45   : >> { %5107 = vrot.lane.b32.xlu0 %v4903_v59, %s10779_s14 }
 0xa46   : >> { %v4220_v3 = vsub.f32 %v4213_v9, %v4219_v54  ;;  %v4230_v46 = vsub.f32 %v4228_v61, %v4229_v8 }
 0xa47   : >> { %v4224_v22 = vpop.permute.xlu1 %4223 }
 0xa48   : >> { %v4226_v47 = vadd.f32 %v4224_v22, %v4220_v3  ;;  %v4209_v17 = vpop.permute.xlu0 %4208  ;;  %4993 = vrot.lane.b32.xlu1 %v10780_v32, %s10775_s21  ;;  %s5073_s21 = scalar_lea.vmem %s10789_s22, %s10788_s19 [#allocation4]  ;;  %s10211_s19 = scalar_lea.hbm (%p10123_p12), %s10283_s5, %s5649_s24 }
 0xa49   : >> { %v4211_v51 = vadd.f32 %v4209_v17, %v10781_v1  ;;  %5113 = vrot.lane.b32.xlu0 %v4951_v56, %s10782_s1  ;;  %s10810_s22 = sand.u32 (%p10123_p12), 1, %s6410_s28  }
 0xa4a   : >> { %v10036_v30 = vmul.f32 %v10748_v43, %v4226_v47   ;;  %s10217_s9 = scalar_lea.sflag (%p10123_p12), [#allocation5], %s10810_s22 }
 0xa4b   : >> { %v10039_v50 = vmul.f32 %v10748_v43, %v4211_v51  }
 0xa4c   : >> { %v4377_v60 = vmul.f32 0.01, %v10036_v30  ;;  %5001 = vrot.lane.b32.xlu1 %v4967_v23, %s6548_s26  ;;  %v4234_v27 = vpop.permute.xlu1 %4233  ;;  %s6574_s26 = smov (%p10123_p12), 13  }
 0xa4d   : >> { %v10783_v21 = vmov %v10039_v50  ;;  %v4236_v18 = vadd.f32 %v4234_v27, %v4230_v46 }
 0xa4e   : >> { %v4361_v10 = vmul.f32 0.01, %v10783_v21  ;;  %v4378_v28 = vmul.f32 0.5, %v4377_v60 }
 0xa4f   : >> { %v10045_v51 = vmul.f32 %v10748_v43, %v4236_v18  }
 0xa50   : >> { %v4362_v57 = vmul.f32 0.5, %v4361_v10  ;;  %v4379_v58 = vadd.f32 %v4378_v28, %v10036_v30  ;;  %5104 = vrot.lane.b32.xlu1 %v4871_v20, %s10777_s12  ;;  %s6571_s12 = smov (%p10123_p12), 1  }
 0xa51   : >> { %v10784_v13 = vmov %v10045_v51 }
 0xa52   : >> { %v4363_v14 = vadd.f32 %v4362_v57, %v10783_v21  ;;  %v4396_v50 = vmul.f32 0.01, %v10784_v13  ;;  %v4380_v31 = vmul.f32 0.01, %v4379_v58  ;;  %v4318_v57 = vpop.permute.xlu1 %4317 }
 0xa54   : >> { %v4364_v55 = vmul.f32 0.01, %v4363_v14  ;;  %v4397_v56 = vmul.f32 0.5, %v4396_v50  ;;  %v4381_v48 = vmul.f32 0.5, %v4380_v31  ;;  %5110 = vrot.lane.b32.xlu1 %v4919_v49, %s10779_s14  ;;  %v4386_v53 = vmul.f32 2.0, %v4380_v31  ;;  %s6572_s14 = smov (%p10123_p12), 11  }
 0xa56   : >> { %v4365_v40 = vmul.f32 0.5, %v4364_v55  ;;  %v4398_v24 = vadd.f32 %v4397_v56, %v10784_v13  ;;  %v4382_v25 = vadd.f32 %v4381_v48, %v10036_v30  ;;  %v4370_v0 = vmul.f32 2.0, %v4364_v55 }
 0xa57   : >> { %v4387_v41 = vadd.f32 %v4386_v53, %v4377_v60 }
 0xa58   : >> { %v4366_v37 = vadd.f32 %v4365_v40, %v10783_v21  ;;  %v4399_v33 = vmul.f32 0.01, %v4398_v24  ;;  %v4383_v26 = vmul.f32 0.01, %v4382_v25  ;;  %5116 = vrot.lane.b32.xlu1 %v4967_v23, %s10782_s1  ;;  %v4371_v49 = vadd.f32 %v4370_v0, %v4361_v10  ;;  %s6573_s1 = smov (%p10123_p12), 10  }
 0xa5a   : >> { %v4367_v59 = vmul.f32 0.01, %v4366_v37  ;;  %v4400_v7 = vmul.f32 0.5, %v4399_v33  ;;  %v4384_v12 = vadd.f32 %v4383_v26, %v10036_v30  ;;  %v4388_v38 = vmul.f32 2.0, %v4383_v26 }
 0xa5b   : >> { %v4405_v9 = vmul.f32 2.0, %v4399_v33 }
 0xa5c   : >> { %v4368_v11 = vadd.f32 %v4367_v59, %v10783_v21  ;;  %v4372_v20 = vmul.f32 2.0, %v4367_v59  ;;  %v4401_v8 = vadd.f32 %v4400_v7, %v10784_v13  ;;  %v4385_v4 = vmul.f32 0.01, %v4384_v12 }
 0xa5d   : >> { %v4389_v62 = vadd.f32 %v4388_v38, %v4387_v41  ;;  %v4406_v22 = vadd.f32 %v4405_v9, %v4396_v50  ;;  %v4338_v50 = vpop.permute.xlu1 %4337 }
 0xa5e   : >> { %v4369_v6 = vmul.f32 0.01, %v4368_v11  ;;  %v4373_v54 = vadd.f32 %v4372_v20, %v4371_v49  ;;  %v4402_v61 = vmul.f32 0.01, %v4401_v8 }
 0xa5f   : >> { %v4390_v52 = vadd.f32 %v4389_v62, %v4385_v4 }
 0xa60   : >> { %v4374_v3 = vadd.f32 %v4373_v54, %v4369_v6  ;;  %v4403_v46 = vadd.f32 %v4402_v61, %v10784_v13  ;;  %v4407_v47 = vmul.f32 2.0, %v4402_v61 }
 0xa61   : >> { %v4391_v17 = vmul.f32 0.16666667, %v4390_v52 }
 0xa62   : >> { %v4375_v1 = vmul.f32 0.16666667, %v4374_v3  ;;  %v4404_v51 = vmul.f32 0.01, %v4403_v46  ;;  %v4408_v23 = vadd.f32 %v4407_v47, %v4406_v22  ;;  %v10084_v47 = vadd.f32 %v10752_v19, %v4318_v57  }
 0xa63   : >> { %v4393_v60 = vrot.slane %v4391_v17, 6 }
 0xa64   : >> { %v10061_v48 = vadd.f32 %v10699_v34, %v4375_v1   ;;  %v4409_v27 = vadd.f32 %v4408_v23, %v4404_v51  ;;  %v10792_v51 = vmov %v10784_v13  ;;  %v10806_v1 = vmov %v9741_v5 }
 0xa65   : >> { %v10064_v59 = vadd.f32 %v10702_v42, %v4393_v60   ;;  %v4358_v42 = vpop.permute.xlu0 %4357  ;;  %v10797_v60 = vmov %v10780_v32 }
 0xa66   : >> { %v4410_v10 = vmul.f32 0.16666667, %v4409_v27  ;;  %v10081_v27 = vadd.f32 %v10750_v29, %v4338_v50   ;;  %v10090_v26 = vadd.f32 %v10756_v63, %v4358_v42   ;;  %v10794_v50 = vmov %v10783_v21 }
 0xa67   : >> { %v5076_v18 = vsel %vm3773_vm3, %v10061_v48, %v10064_v59 }
 0xa68   : >> { %v4412_v28 = vrot.slane %v4410_v10, 4 }
 0xa69   : >> { %v5006_v14 = vpop.permute.xlu0 %5005 }
 0xa6a   : >> { %v4414_v58 = vadd.f32 %v10743_v45, %v4412_v28   ;;  %v5009_v45 = vsel %vm5008_vm8, %v10084_v47, %v10081_v27 }
 0xa6b   : >> { %v5011_v56 = vsel %vm5010_vm9, %v5009_v45, %v10090_v26  ;;  %vm5036_vm9 = vcmask 121856  }
 0xa6c   : >> { %v10077_v34 = vsel %vm3775_vm4, %v5076_v18, %v4414_v58  ;;  %v5013_v29 = vsel %vm5012_vm10, %v5011_v56, %v10770_v36  ;;  %vm5022_vm4 = vcmask 64512   ;;  %vm5074_vm10 = vcmask 189440  }
 0xa6d   : >> { %5080 = vst [vmem:[%s5079_s18] sm:$0x3f] %v10077_v34  ;;  %v5015_v0 = vsel %vm5014_vm11, %v5013_v29, %v10772_v35  ;;  %vm10790_vm11 = vcmask 130048  }
 0xa6e   : >> { %v10102_v37 = vsel %vm5016_vm12, %v5015_v0, %v9891_v2  ;;  %v10805_v0 = vmov %v10760_v16 }
 0xa97   : >> { %v4974_v31 = vpop.permute.xlu0 %4973 }
 0xaa7   : >> { %v4998_v55 = vpop.permute.xlu0 %4997 }
 0xaaa   : >> { %v5070_v40 = vpop.permute.xlu1 %5069 }
 0xaab   : >> { %v10094_v53 = vpop.permute.xlu0 %5101  }
 0xaac   : >> { %v10786_v24 = vmov %v10094_v53 }
 0xaae   : >> { %v4986_v25 = vpop.permute.xlu1 %4985 }
 0xaaf   : >> { %v4982_v19 = vpop.permute.xlu0 %4981 }
 0xab2   : >> { %v4970_v63 = vpop.permute.xlu1 %4969 }
 0xab3   : >> { %v5019_v33 = vsel %vm5018_vm13, %v10102_v37, %v4970_v63  ;;  %v4990_v7 = vpop.permute.xlu0 %4989  ;;  %v10804_v63 = vmov %v10758_v39 }
 0xab4   : >> { %v5021_v53 = vsel %vm5020_vm0, %v5019_v33, %v4974_v31 }
 0xab6   : >> { %v4978_v12 = vpop.permute.xlu1 %4977 }
 0xab7   : >> { %v5023_v41 = vsel %vm5022_vm4, %v5021_v53, %v4978_v12  ;;  %v5108_v38 = vpop.permute.xlu0 %5107   ;;  %v10802_v53 = vmov %v10786_v24 }
 0xab8   : >> { %v5025_v49 = vsel %vm5024_vm1, %v5023_v41, %v4982_v19 }
 0xab9   : >> { %v5027_v11 = vsel %vm5026_vm14, %v5025_v49, %v4986_v25  ;;  %v10793_v49 = vmov %v10036_v30  ;;  %v10808_v25 = vmov %v10770_v36  ;;  %v5179_v36 = vrot.slane (%p10123_p12), %v10783_v21, 2 }
 0xaba   : >> { %v5029_v20 = vsel %vm5028_vm15, %v5027_v11, %v4990_v7  ;;  %v4994_v8 = vpop.permute.xlu1 %4993 }
 0xabb   : >> { %v5031_v9 = vsel %vm5030_vm2, %v5029_v20, %v4994_v8  ;;  %v10112_v57 = vpop.permute.xlu0 %5113   ;;  %v5189_v43 = vsel (%p10123_p12), %vm3777_vm5, %v10077_v34, %v5179_v36 }
 0xabc   : >> { %v10787_v6 = vmov %v10112_v57  ;;  %v5033_v4 = vsel %vm5032_vm6, %v5031_v9, %v4998_v55  ;;  %5191 = vst [vmem:[#allocation3] sm:$0xff] (%p10123_p12), %v5189_v43 }
 0xabd   : >> { %v10796_v57 = vmov %v10787_v6 }
 0xabe   : >> { %v5002_v62 = vpop.permute.xlu1 %5001 }
 0xabf   : >> { %v5035_v54 = vsel %vm5034_vm7, %v5033_v4, %v5002_v62  ;;  %v10803_v62 = vmov %v10778_v44  ;;  %v10807_v4 = vmov %v10772_v35  ;;  %v5182_v35 = vrot.slane (%p10123_p12), %v10784_v13, 6 }
 0xac0   : >> { %v5037_v61 = vsel %vm5036_vm9, %v5035_v54, %v5006_v14 }
 0xac1   : >> { %v5072_v52 = vsel %vm10790_vm11, %v5037_v61, %v5070_v40  ;;  %v10800_v61 = vmov %v10001_v15  ;;  %v5190_v2 = vsel (%p10123_p12), %vm3773_vm3, %v10036_v30, %v5182_v35 }
 0xac2   : >> { %5075 = vst.msk [vmem:[%s5073_s21] sm:$0x3] %vm5074_vm10, %v5072_v52  ;;  %v5105_v3 = vpop.permute.xlu1 %5104   ;;  %v10799_v52 = vmov %v5108_v38  ;;  %5192 = vst [vmem:[#allocation3 + $0x8] sm:$0xf] (%p10123_p12), %v5190_v2  ;;  %s6576_s21 = smov (%p10123_p12), [#allocation4]  }
 0xac3   : >> { %v10801_v55 = vmov %v5105_v3  ;;  %5124 = vrot.lane.b32.xlu1 (%p10123_p12), %v5105_v3, %s6572_s14  ;;  %s6260_s23 = sshll.u32 (%p10123_p12), %s6576_s21, 4  ;;  %s6261_s23 = int_to_ptr.vmem [resolvable:$false] %s6260_s23 }
 0xac4   : > { %p6263_p2 = scmp.lt.s32.totalorder (%p10123_p12), %s10213_s13, %s6261_s23 }
 0xac5   : > { %452 = sbr.rel (!%p10123_p12) target bundleno = 279 (0x117), region = 127 }
 0xac6   : >> { %v5111_v46 = vpop.permute.xlu1 %5110  }
 0xac7   : >> { %v10798_v54 = vmov %v5111_v46  ;;  %5128 = vrot.lane.b32.xlu1 (%p10123_p12), %v5108_v38, %s6574_s26 }
 0xaca   : >> { %v5117_v22 = vpop.permute.xlu1 %5116  }
 0xacb   : >> { %v10795_v56 = vmov %v5117_v22  ;;  %5166 = vrot.lane.b32.xlu0 (%p10123_p12), %v5117_v22, %s6571_s12  ;;  %s6262_s12 = scalar_lea.vmem (%p10123_p12), %s6261_s23, 512 }
 0xacc   : > { %p6264_p3 = scmp.lt.s32.totalorder %s6262_s12, %s6256_s25 }
 0xace   : > { %p6265_p4 = por %p6264_p3, %p6263_p2 }
 0xacf   : > { %5120 = vrot.lane.b32.xlu0 %v10786_v24, %s6573_s1 }
 0xad0   : > { %p6266_p7 = pnand %p6265_p4, %p6259_p1 }
 0xad3   : > { %5132 = vrot.lane.b32.xlu0 %v5111_v46, %s6575_s17 }
 0xad4   : > { %6269 = shalt.err (!%p6266_p7)
}
 0xad5   : > { %s6270_s14 = scalar_lea.hbm %s10211_s19, 256  ;;  %s6274_s17 = scalar_lea.hbm %s10283_s5, 768 }
 0xad6   : > { %p6271_p8 = scmp.ne.s32.totalorder %s10211_s19, %s6270_s14  ;;  %p6275_p11 = scmp.lt.u32.totalorder %s10211_s19, %s10283_s5 }
 0xad7   : > { %p6276_p12 = scmp.lt.u32.totalorder %s6274_s17, %s6270_s14  ;;  %p6278_p0 = scmp.lt.u32.totalorder %s6270_s14, %s10211_s19 }
 0xad8   : > { %p6272_p9 = pnand %p6271_p8, %p6663_p5 }
 0xad9   : > { %p6277_p13 = por %p6276_p12, %p6275_p11 }
 0xada   : > { %p6273_p10 = pneg %p6272_p9 }
 0xadb   : > { %p6279_p1 = por %p6278_p0, %p6277_p13 }
 0xadd   : > { %p6280_p2 = pnand %p6279_p1, %p6273_p10 }
 0xadf   : > { %6283 = shalt.err (!%p6280_p2)
}
 0xae0   : > { %s6577_s10 = smov 32   ;;  %s6578_s18 = smov 2   ;;  %v5146_v13 = vsel %vm5018_vm13, %v10102_v37, %v9741_v5  ;;  %vm5176_vm3 = vcmask 140288   ;;  %vm10811_vm5 = vcmask 130048  }
 0xae1   : > { %5866 = dma.vmem_to_hbm [thread:$0]  (%p6663_p5), %s10213_s13, 256, %s10211_s19, %s10217_s9, %s6577_s10, %s6577_s10, %s6578_s18   ;;  %v5148_v58 = vsel %vm5020_vm0, %v5146_v13, %v10760_v16 }
 0xae2   : > { %s6579_s22 = smov 16   ;;  %v5150_v48 = vsel %vm5022_vm4, %v5148_v58, %v10758_v39 }
 0xae3   : > { %v5152_v26 = vsel %vm5024_vm1, %v5150_v48, %v10778_v44 }
 0xb35   : > { %v5125_v47 = vpop.permute.xlu1 %5124 }
 0xb39   : > { %v5129_v51 = vpop.permute.xlu1 %5128 }
 0xb3d   : > { %v5167_v30 = vpop.permute.xlu0 %5166 }
 0xb3e   : > { %v5169_v21 = vsel %vm5008_vm8, %v10787_v6, %v5167_v30 }
 0xb3f   : > { %5171 = vrot.lane.b32.xlu1 %v5169_v21, %s6579_s22 }
 0xb41   : > { %v5121_v59 = vpop.permute.xlu0 %5120 }
 0xb42   : > { %v5154_v17 = vsel %vm5026_vm14, %v5152_v26, %v5121_v59 }
 0xb43   : > { %v5156_v1 = vsel %vm5028_vm15, %v5154_v17, %v5125_v47 }
 0xb44   : > { %v5158_v23 = vsel %vm5030_vm2, %v5156_v1, %v10001_v15 }
 0xb45   : > { %v5160_v5 = vsel %vm5032_vm6, %v5158_v23, %v5129_v51  ;;  %v5133_v60 = vpop.permute.xlu0 %5132 }
 0xb46   : > { %v5162_v16 = vsel %vm5034_vm7, %v5160_v5, %v5133_v60 }
 0xb47   : > { %v5164_v39 = vsel %vm5036_vm9, %v5162_v16, %v10780_v32 }
 0xbb1   : > { %v5172_v44 = vpop.permute.xlu1 %5171 }
 0xbb2   : > { %v5175_v27 = vsel %vm10811_vm5, %v5164_v39, %v5172_v44 }
 0xbb3   : > { %5177 = vst.msk [vmem:[#allocation2] sm:$0x3] %vm5176_vm3, %v5175_v27 }
 0xbb4 PF: > { %p5872_p5 = scmp.ge.s32.totalorder %s6418_s30, 2  ;;  %s5249_s15 = sand.u32 1, %s6406_s27  }
 0xbb5   : > { %s5250_s13 = scalar_lea.sflag [#allocation5], %s5249_s15 }
 0xbb6   : > { %p5869_p3 = pnand %p5872_p5, %p6667_p6 }
 0xbb8   : > { %6401 = dma.done.wait (!%p5869_p3), %s5250_s13, 256  }
 0xbb9   : > { %6403 = vsyncadd (!%p5869_p3), %s5250_s13, 4294967040  ;;  %s10812_s19 = sld [smem:[#allocation7_spill]]  ;;  %p19_p4 = scmp.ge.s32.totalorder %s6650_s11, 5  }
 0xbba   : > { %s10813_s27 = smov %s6410_s28  ;;  %s10814_s28 = smov %s6414_s29 }
 0xbbb   : > { %s10816_s30 = smov %s6650_s11  ;;  %21 = sbr.rel (!%p19_p4) target bundleno = 5 (0x5), region = 138 }
 0xbbf   : > { %s10815_s29 = smov %s10812_s19 }
 0xbc2   :  { %5279 = vsyncpa [#allocation5], 1 }
 0xbc3   :  { %5281 = vsyncpa [#allocation5 + $0x1], 1 }

</bundles_post_ra>
